<compile_context>
chip_gen: v7x
topology: tpu7x:2x2x1
jax: 0.10.0
libtpu: 0.0.40
codegen_flags: <defaults>
</compile_context>

<pallas_src>
import math
import functools

import jax
import jax.numpy as jnp
from jax import lax
from jax.experimental import pallas as pl
from jax.experimental.pallas import tpu as pltpu


def _mhsa_kernel(x_ref, wqkv_ref, bqkv_ref, wp_ref, bp_ref, o_ref,
                 k_scr, v_scr, q_scr, y_scr, *,
                 n_head: int, batch_block: int, seq_len: int, q_tile: int):
    H, Bblk, T, Tq = n_head, batch_block, seq_len, q_tile
    C = x_ref.shape[1]
    D = C // H
    Mq = Bblk * Tq                      # query rows handled per grid step
    qi = pl.program_id(1)
    bf16 = jnp.bfloat16

    # ---- once per batch block: K / V projections for the full sequence -----
    @pl.when(qi == 0)
    def _():
        xb = x_ref[...]                                              # (Bblk*T, C) bf16
        k_scr[...] = (jnp.dot(xb, wqkv_ref[:, C:2 * C],
                              preferred_element_type=jnp.float32)
                      + bqkv_ref[:, C:2 * C]).astype(bf16)
        v_scr[...] = (jnp.dot(xb, wqkv_ref[:, 2 * C:3 * C],
                              preferred_element_type=jnp.float32)
                      + bqkv_ref[:, 2 * C:3 * C]).astype(bf16)

    # ---- per query tile: Q projection (1/sqrt(D) folded into Wq/bq) --------
    r0 = pl.multiple_of(qi * Mq, Mq)
    q_scr[...] = (jnp.dot(x_ref[pl.ds(r0, Mq), :], wqkv_ref[:, 0:C],
                          preferred_element_type=jnp.float32)
                  + bqkv_ref[:, 0:C]).astype(bf16)

    # ---- attention per (batch element, head); heads written into a lane-
    # ---- dense (Mq, C) slab so the output projection is one deep matmul ----
    for e in range(Bblk):
        for h in range(H):
            q_h = q_scr[e * Tq:(e + 1) * Tq, h * D:(h + 1) * D]      # (Tq, D) bf16
            k_h = k_scr[e * T:(e + 1) * T, h * D:(h + 1) * D]        # (T,  D) bf16
            v_h = v_scr[e * T:(e + 1) * T, h * D:(h + 1) * D]        # (T,  D) bf16

            # scores: contract head dims directly (MXU consumes transposed K)
            s = lax.dot_general(q_h, k_h, (((1,), (1,)), ((), ())),
                                preferred_element_type=jnp.float32)  # (Tq, T)
            s = s - jnp.max(s, axis=-1, keepdims=True)
            p = jnp.exp(s)                                           # f32 exp
            inv = pl.reciprocal(jnp.sum(p, axis=-1, keepdims=True),
                                approx=True)                         # (Tq, 1)
            y_h = jnp.dot(p.astype(bf16), v_h,
                          preferred_element_type=jnp.float32)        # (Tq, D)
            # normalise AFTER the PV matmul (Tq*D multiplies, not Tq*T)
            y_scr[e * Tq:(e + 1) * Tq, h * D:(h + 1) * D] = \
                (y_h * inv).astype(bf16)

    # ---- head merge folded into one deep output projection -----------------
    out = jnp.dot(y_scr[...], wp_ref[...],
                  preferred_element_type=jnp.float32) + bp_ref[...]
    o_ref[...] = out.astype(o_ref.dtype)


def _pick_batch_block(B, T, target_rows=256):
    """Largest divisor of B so that Bblk*T ~ target MXU rows (T must be 16-aligned)."""
    if T % 16 != 0:
        return 1
    divisors = [d for d in range(1, B + 1) if B % d == 0]
    cand = [d for d in divisors if d * T <= target_rows] or [1]
    bblk = max(cand)
    # keep >=2 batch blocks (v7x megacore) only if that still keeps MXU rows >= 128
    if B // bblk < 2:
        alt = [d for d in cand if B // d >= 2 and d * T >= 128]
        if alt:
            bblk = max(alt)
    return bblk


def _vmem_limit_bytes(batch_block, T, q_tile, C):
    rows_in = batch_block * T
    rows_out = batch_block * q_tile
    x_blk = rows_in * C * 2 * 2                   # bf16 input block, double-buffered
    out_blk = rows_out * C * 4 * 2                # f32 output block, double-buffered
    weights = (C * 3 * C) * 2 + (3 * C) * 4 + C * C * 2 + C * 4   # single-buffered
    scratch = (2 * rows_in + 2 * rows_out) * C * 2                # K,V,Q,Y bf16 slabs
    est = x_blk + out_blk + weights + scratch
    return int(min(max(2 * est, 16 * 1024 * 1024), 64 * 1024 * 1024))


def mhsa_pallas(x, params, n_head, q_tile=None, batch_block=None):
    """x: (B, T, C) float32. params: dict of Linear weights/biases (PyTorch layout)."""
    B, T, C = x.shape
    assert C % n_head == 0, "embed_dim must be divisible by n_head"
    D = C // n_head
    scale = 1.0 / math.sqrt(D)
    f32, bf16 = jnp.float32, jnp.bfloat16

    # ---- static tiling decisions -------------------------------------------
    if batch_block is None:
        batch_block = _pick_batch_block(B, T)
    assert B % batch_block == 0
    if batch_block > 1:
        q_tile = T                       # batching across batch -> single query tile
    elif q_tile is None:
        q_tile = 128 if (T > 128 and T % 128 == 0) else T
    assert T % q_tile == 0, "T must be divisible by the query tile"
    n_q = T // q_tile
    n_b = B // batch_block
    rows_in = batch_block * T
    rows_out = batch_block * q_tile
    assert rows_in % 8 == 0 or rows_in == B * T
    assert rows_out % 8 == 0 or rows_out == B * T

    # ---- weight prep (PyTorch Linear is (out, in); pre-transpose) ----------
    wq = jnp.asarray(params["wq"], f32).T * scale     # fold softmax scale into Q
    bq = jnp.asarray(params["bq"], f32) * scale
    wk = jnp.asarray(params["wk"], f32).T
    bk = jnp.asarray(params["bk"], f32)
    wv = jnp.asarray(params["wv"], f32).T
    bv = jnp.asarray(params["bv"], f32)
    wqkv = jnp.concatenate([wq, wk, wv], axis=1).astype(bf16)        # (C, 3C) bf16
    bqkv = jnp.concatenate([bq, bk, bv], axis=0).reshape(1, 3 * C)   # (1, 3C) f32
    wp = jnp.asarray(params["wp"], f32).T.astype(bf16)               # (C, C)  bf16
    bp = jnp.asarray(params["bp"], f32).reshape(1, C)                # (1, C)  f32

    x_flat = x.reshape(B * T, C).astype(bf16)

    kernel = functools.partial(_mhsa_kernel, n_head=n_head,
                               batch_block=batch_block, seq_len=T, q_tile=q_tile)
    vmem_limit = _vmem_limit_bytes(batch_block, T, q_tile, C)

    def build(single_buffer_weights):
        wmode = ({"pipeline_mode": pl.Buffered(1)}
                 if single_buffer_weights else {})
        return pl.pallas_call(
            kernel,
            out_shape=jax.ShapeDtypeStruct((B * T, C), jnp.float32),
            grid_spec=pltpu.PrefetchScalarGridSpec(
                num_scalar_prefetch=0,
                grid=(n_b, n_q),
                in_specs=[
                    pl.BlockSpec((rows_in, C), lambda b, q: (b, 0)),          # x
                    pl.BlockSpec((C, 3 * C), lambda b, q: (0, 0), **wmode),   # Wqkv
                    pl.BlockSpec((1, 3 * C), lambda b, q: (0, 0), **wmode),   # bqkv
                    pl.BlockSpec((C, C), lambda b, q: (0, 0), **wmode),       # Wproj
                    pl.BlockSpec((1, C), lambda b, q: (0, 0), **wmode),       # bproj
                ],
                out_specs=pl.BlockSpec((rows_out, C),
                                       lambda b, q: (b * n_q + q, 0)),
                scratch_shapes=[
                    pltpu.VMEM((rows_in, C), bf16),    # K (lane-dense, per batch block)
                    pltpu.VMEM((rows_in, C), bf16),    # V
                    pltpu.VMEM((rows_out, C), bf16),   # Q for the current tile (scaled)
                    pltpu.VMEM((rows_out, C), bf16),   # head-merged attention output
                ],
            ),
            compiler_params=pltpu.CompilerParams(
                # batch-block axis megacore-shardable; query-tile axis stays
                # "arbitrary" because K/V scratch is carried across it.
                dimension_semantics=("parallel", "arbitrary"),
                vmem_limit_bytes=vmem_limit,
            ),
        )

    try:
        out_flat = build(True)(x_flat, wqkv, bqkv, wp, bp)
    except Exception:
        # Fallback if pipeline_mode=pl.Buffered(1) is unsupported in this jax build.
        out_flat = build(False)(x_flat, wqkv, bqkv, wp, bp)
    return out_flat.reshape(B, T, C)


def mhsa_reference(x, params, n_head):
    """Pure-JAX f32 reference mirroring the PyTorch forward (eval mode)."""
    B, T, C = x.shape
    D = C // n_head

    def lin(x, w, b):
        return x @ w.T + b

    q = lin(x, params["wq"], params["bq"]).reshape(B, T, n_head, D).transpose(0, 2, 1, 3)
    k = lin(x, params["wk"], params["bk"]).reshape(B, T, n_head, D).transpose(0, 2, 1, 3)
    v = lin(x, params["wv"], params["bv"]).reshape(B, T, n_head, D).transpose(0, 2, 1, 3)
    att = (q @ k.transpose(0, 1, 3, 2)) * (1.0 / math.sqrt(D))
    att = jax.nn.softmax(att, axis=-1)
    y = att @ v
    y = y.transpose(0, 2, 1, 3).reshape(B, T, C)
    return lin(y, params["wp"], params["bp"])


if __name__ == "__main__":
    # Module defaults: embed_dim=512, block_size=16, n_head=8  (D = 64, C % 128 == 0).
    B, T, C, H = 2, 16, 512, 8

    key = jax.random.PRNGKey(0)
    keys = jax.random.split(key, 9)

    def linear_init(kw, kb, fan_in, fan_out):
        # deterministic PyTorch-style uniform init: U(-1/sqrt(fan_in), 1/sqrt(fan_in))
        bound = 1.0 / math.sqrt(fan_in)
        w = jax.random.uniform(kw, (fan_out, fan_in), jnp.float32, -bound, bound)
        b = jax.random.uniform(kb, (fan_out,), jnp.float32, -bound, bound)
        return w, b

    wq, bq = linear_init(keys[0], keys[1], C, C)
    wk, bk = linear_init(keys[2], keys[3], C, C)
    wv, bv = linear_init(keys[4], keys[5], C, C)
    wp, bp = linear_init(keys[6], keys[7], C, C)
    params = dict(wq=wq, bq=bq, wk=wk, bk=bk, wv=wv, bv=bv, wp=wp, bp=bp)

    x = jax.random.normal(keys[8], (B, T, C), jnp.float32)

    out = mhsa_pallas(x, params, n_head=H)
    out = jax.block_until_ready(out)

    ref = mhsa_reference(x, params, n_head=H)
    assert out.shape == (B, T, C)
    # bf16 MXU with f32 accumulation + approx-reciprocal softmax -> bf16-level tolerance.
    assert jnp.allclose(out, ref, atol=3e-2, rtol=3e-2), "mismatch vs reference"

    print("KERNEL_OK")
</pallas_src>

<mosaic_0001>
module attributes {stable_mosaic.version = 11 : i64} {
  func.func @_mhsa_kernel(%arg0: i32, %arg1: i32, %arg2: memref<32x512xbf16, #tpu.memory_space<vmem>>, %arg3: memref<512x1536xbf16, #tpu.memory_space<vmem>>, %arg4: memref<1x1536xf32, #tpu.memory_space<vmem>>, %arg5: memref<512x512xbf16, #tpu.memory_space<vmem>>, %arg6: memref<1x512xf32, #tpu.memory_space<vmem>>, %arg7: memref<32x512xf32, #tpu.memory_space<vmem>>, %arg8: memref<32x512xbf16, #tpu.memory_space<vmem>>, %arg9: memref<32x512xbf16, #tpu.memory_space<vmem>>, %arg10: memref<32x512xbf16, #tpu.memory_space<vmem>>, %arg11: memref<32x512xbf16, #tpu.memory_space<vmem>>) attributes {dimension_semantics = [#tpu.dimension_semantics<parallel>, #tpu.dimension_semantics<arbitrary>], iteration_bounds = array<i64: 1, 1>, scalar_prefetch = 0 : i64, scratch_operands = 4 : i64, tpu.core_type = #tpu.core_type<tc>, window_params = [{transform_indices = @transform_0, window_bounds = array<i64: 32, 512>}, {pipeline_mode = #tpu.pipeline_mode<synchronous>, transform_indices = @transform_1, window_bounds = array<i64: 512, 1536>}, {pipeline_mode = #tpu.pipeline_mode<synchronous>, transform_indices = @transform_2, window_bounds = array<i64: 1, 1536>}, {pipeline_mode = #tpu.pipeline_mode<synchronous>, transform_indices = @transform_3, window_bounds = array<i64: 512, 512>}, {pipeline_mode = #tpu.pipeline_mode<synchronous>, transform_indices = @transform_4, window_bounds = array<i64: 1, 512>}, {transform_indices = @transform_5, window_bounds = array<i64: 32, 512>}]} {
    %c0_i32 = arith.constant 0 : i32
    %0 = arith.cmpi eq, %arg1, %c0_i32 : i32
    %1 = arith.extui %0 : i1 to i32
    %c0_i32_0 = arith.constant 0 : i32
    %2 = arith.cmpi ne, %1, %c0_i32_0 : i32
    scf.if %2 {
      %c0_200 = arith.constant 0 : index
      %c0_201 = arith.constant 0 : index
      %309 = vector.load %arg2[%c0_200, %c0_201] : memref<32x512xbf16, #tpu.memory_space<vmem>>, vector<32x512xbf16>
      %c0_202 = arith.constant 0 : index
      %c512 = arith.constant 512 : index
      %310 = vector.load %arg3[%c0_202, %c512] : memref<512x1536xbf16, #tpu.memory_space<vmem>>, vector<512x512xbf16>
      %cst_203 = arith.constant dense<0.000000e+00> : vector<32x512xf32>
      %311 = tpu.matmul %309, %310, %cst_203 {dimension_numbers = #tpu.dot_dimension_numbers<[1], [0], [0], [1], [0, 0, 1, 1], [], []>} : vector<32x512xbf16>, vector<512x512xbf16>, vector<32x512xf32> -> vector<32x512xf32>
      %c0_204 = arith.constant 0 : index
      %c512_205 = arith.constant 512 : index
      %312 = vector.load %arg4[%c0_204, %c512_205] : memref<1x1536xf32, #tpu.memory_space<vmem>>, vector<1x512xf32>
      %313 = vector.broadcast %312 : vector<1x512xf32> to vector<32x512xf32>
      %314 = arith.addf %311, %313 : vector<32x512xf32>
      %315 = arith.truncf %314 : vector<32x512xf32> to vector<32x512xbf16>
      %c0_206 = arith.constant 0 : index
      %c0_207 = arith.constant 0 : index
      %316 = vector.load %arg8[%c0_206, %c0_207] : memref<32x512xbf16, #tpu.memory_space<vmem>>, vector<32x512xbf16>
      tpu.vector_store %arg8[%c0_206, %c0_207], %315 {strides = array<i32>} : memref<32x512xbf16, #tpu.memory_space<vmem>>, vector<32x512xbf16>,
      %c0_208 = arith.constant 0 : index
      %c1024 = arith.constant 1024 : index
      %317 = vector.load %arg3[%c0_208, %c1024] : memref<512x1536xbf16, #tpu.memory_space<vmem>>, vector<512x512xbf16>
      %cst_209 = arith.constant dense<0.000000e+00> : vector<32x512xf32>
      %318 = tpu.matmul %309, %317, %cst_209 {dimension_numbers = #tpu.dot_dimension_numbers<[1], [0], [0], [1], [0, 0, 1, 1], [], []>} : vector<32x512xbf16>, vector<512x512xbf16>, vector<32x512xf32> -> vector<32x512xf32>
      %c0_210 = arith.constant 0 : index
      %c1024_211 = arith.constant 1024 : index
      %319 = vector.load %arg4[%c0_210, %c1024_211] : memref<1x1536xf32, #tpu.memory_space<vmem>>, vector<1x512xf32>
      %320 = vector.broadcast %319 : vector<1x512xf32> to vector<32x512xf32>
      %321 = arith.addf %318, %320 : vector<32x512xf32>
      %322 = arith.truncf %321 : vector<32x512xf32> to vector<32x512xbf16>
      %c0_212 = arith.constant 0 : index
      %c0_213 = arith.constant 0 : index
      %323 = vector.load %arg9[%c0_212, %c0_213] : memref<32x512xbf16, #tpu.memory_space<vmem>>, vector<32x512xbf16>
      tpu.vector_store %arg9[%c0_212, %c0_213], %322 {strides = array<i32>} : memref<32x512xbf16, #tpu.memory_space<vmem>>, vector<32x512xbf16>,
    } else {
    }
    %c32_i32 = arith.constant 32 : i32
    %3 = arith.muli %arg1, %c32_i32 : i32
    %4 = tpu.assume_multiple %3, 32 : i32
    %5 = arith.index_cast %4 : i32 to index
    %c0 = arith.constant 0 : index
    %6 = vector.load %arg2[%5, %c0] : memref<32x512xbf16, #tpu.memory_space<vmem>>, vector<32x512xbf16>
    %c0_1 = arith.constant 0 : index
    %c0_2 = arith.constant 0 : index
    %7 = vector.load %arg3[%c0_1, %c0_2] : memref<512x1536xbf16, #tpu.memory_space<vmem>>, vector<512x512xbf16>
    %cst = arith.constant dense<0.000000e+00> : vector<32x512xf32>
    %8 = tpu.matmul %6, %7, %cst {dimension_numbers = #tpu.dot_dimension_numbers<[1], [0], [0], [1], [0, 0, 1, 1], [], []>} : vector<32x512xbf16>, vector<512x512xbf16>, vector<32x512xf32> -> vector<32x512xf32>
    %c0_3 = arith.constant 0 : index
    %c0_4 = arith.constant 0 : index
    %9 = vector.load %arg4[%c0_3, %c0_4] : memref<1x1536xf32, #tpu.memory_space<vmem>>, vector<1x512xf32>
    %10 = vector.broadcast %9 : vector<1x512xf32> to vector<32x512xf32>
    %11 = arith.addf %8, %10 : vector<32x512xf32>
    %12 = arith.truncf %11 : vector<32x512xf32> to vector<32x512xbf16>
    %c0_5 = arith.constant 0 : index
    %c0_6 = arith.constant 0 : index
    %13 = vector.load %arg10[%c0_5, %c0_6] : memref<32x512xbf16, #tpu.memory_space<vmem>>, vector<32x512xbf16>
    tpu.vector_store %arg10[%c0_5, %c0_6], %12 {strides = array<i32>} : memref<32x512xbf16, #tpu.memory_space<vmem>>, vector<32x512xbf16>,
    %c0_7 = arith.constant 0 : index
    %c0_8 = arith.constant 0 : index
    %14 = vector.load %arg10[%c0_7, %c0_8] : memref<32x512xbf16, #tpu.memory_space<vmem>>, vector<16x64xbf16>
    %c0_9 = arith.constant 0 : index
    %c0_10 = arith.constant 0 : index
    %15 = vector.load %arg8[%c0_9, %c0_10] : memref<32x512xbf16, #tpu.memory_space<vmem>>, vector<16x64xbf16>
    %c0_11 = arith.constant 0 : index
    %c0_12 = arith.constant 0 : index
    %16 = vector.load %arg9[%c0_11, %c0_12] : memref<32x512xbf16, #tpu.memory_space<vmem>>, vector<16x64xbf16>
    %cst_13 = arith.constant dense<0.000000e+00> : vector<16x16xf32>
    %17 = tpu.matmul %14, %15, %cst_13 {dimension_numbers = #tpu.dot_dimension_numbers<[1], [1], [0], [0], [0, 0, 1, 0], [], []>} : vector<16x64xbf16>, vector<16x64xbf16>, vector<16x16xf32> -> vector<16x16xf32>
    %cst_14 = arith.constant dense<0xFF800000> : vector<16xf32>
    %18 = vector.multi_reduction <maximumf>, %17, %cst_14 [1] : vector<16x16xf32> to vector<16xf32>
    %19 = vector.shape_cast %18 : vector<16xf32> to vector<16x1xf32>
    %20 = vector.broadcast %19 : vector<16x1xf32> to vector<16x16xf32>
    %21 = arith.subf %17, %20 : vector<16x16xf32>
    %22 = math.exp %21 : vector<16x16xf32>
    %cst_15 = arith.constant dense<0.000000e+00> : vector<16xf32>
    %23 = vector.multi_reduction <add>, %22, %cst_15 [1] : vector<16x16xf32> to vector<16xf32>
    %24 = vector.shape_cast %23 : vector<16xf32> to vector<16x1xf32>
    %25 = tpu.reciprocal %24 {approx = true} : vector<16x1xf32> -> vector<16x1xf32>
    %26 = arith.truncf %22 : vector<16x16xf32> to vector<16x16xbf16>
    %cst_16 = arith.constant dense<0.000000e+00> : vector<16x64xf32>
    %27 = tpu.matmul %26, %16, %cst_16 {dimension_numbers = #tpu.dot_dimension_numbers<[1], [0], [0], [1], [0, 0, 1, 1], [], []>} : vector<16x16xbf16>, vector<16x64xbf16>, vector<16x64xf32> -> vector<16x64xf32>
    %28 = vector.broadcast %25 : vector<16x1xf32> to vector<16x64xf32>
    %29 = arith.mulf %27, %28 : vector<16x64xf32>
    %30 = arith.truncf %29 : vector<16x64xf32> to vector<16x64xbf16>
    %c0_17 = arith.constant 0 : index
    %c0_18 = arith.constant 0 : index
    %31 = vector.load %arg11[%c0_17, %c0_18] : memref<32x512xbf16, #tpu.memory_space<vmem>>, vector<16x64xbf16>
    tpu.vector_store %arg11[%c0_17, %c0_18], %30 {strides = array<i32>} : memref<32x512xbf16, #tpu.memory_space<vmem>>, vector<16x64xbf16>,
    %c0_19 = arith.constant 0 : index
    %c64 = arith.constant 64 : index
    %32 = vector.load %arg10[%c0_19, %c64] : memref<32x512xbf16, #tpu.memory_space<vmem>>, vector<16x64xbf16>
    %c0_20 = arith.constant 0 : index
    %c64_21 = arith.constant 64 : index
    %33 = vector.load %arg8[%c0_20, %c64_21] : memref<32x512xbf16, #tpu.memory_space<vmem>>, vector<16x64xbf16>
    %c0_22 = arith.constant 0 : index
    %c64_23 = arith.constant 64 : index
    %34 = vector.load %arg9[%c0_22, %c64_23] : memref<32x512xbf16, #tpu.memory_space<vmem>>, vector<16x64xbf16>
    %cst_24 = arith.constant dense<0.000000e+00> : vector<16x16xf32>
    %35 = tpu.matmul %32, %33, %cst_24 {dimension_numbers = #tpu.dot_dimension_numbers<[1], [1], [0], [0], [0, 0, 1, 0], [], []>} : vector<16x64xbf16>, vector<16x64xbf16>, vector<16x16xf32> -> vector<16x16xf32>
    %cst_25 = arith.constant dense<0xFF800000> : vector<16xf32>
    %36 = vector.multi_reduction <maximumf>, %35, %cst_25 [1] : vector<16x16xf32> to vector<16xf32>
    %37 = vector.shape_cast %36 : vector<16xf32> to vector<16x1xf32>
    %38 = vector.broadcast %37 : vector<16x1xf32> to vector<16x16xf32>
    %39 = arith.subf %35, %38 : vector<16x16xf32>
    %40 = math.exp %39 : vector<16x16xf32>
    %cst_26 = arith.constant dense<0.000000e+00> : vector<16xf32>
    %41 = vector.multi_reduction <add>, %40, %cst_26 [1] : vector<16x16xf32> to vector<16xf32>
    %42 = vector.shape_cast %41 : vector<16xf32> to vector<16x1xf32>
    %43 = tpu.reciprocal %42 {approx = true} : vector<16x1xf32> -> vector<16x1xf32>
    %44 = arith.truncf %40 : vector<16x16xf32> to vector<16x16xbf16>
    %cst_27 = arith.constant dense<0.000000e+00> : vector<16x64xf32>
    %45 = tpu.matmul %44, %34, %cst_27 {dimension_numbers = #tpu.dot_dimension_numbers<[1], [0], [0], [1], [0, 0, 1, 1], [], []>} : vector<16x16xbf16>, vector<16x64xbf16>, vector<16x64xf32> -> vector<16x64xf32>
    %46 = vector.broadcast %43 : vector<16x1xf32> to vector<16x64xf32>
    %47 = arith.mulf %45, %46 : vector<16x64xf32>
    %48 = arith.truncf %47 : vector<16x64xf32> to vector<16x64xbf16>
    %c0_28 = arith.constant 0 : index
    %c64_29 = arith.constant 64 : index
    %49 = vector.load %arg11[%c0_28, %c64_29] : memref<32x512xbf16, #tpu.memory_space<vmem>>, vector<16x64xbf16>
    tpu.vector_store %arg11[%c0_28, %c64_29], %48 {strides = array<i32>} : memref<32x512xbf16, #tpu.memory_space<vmem>>, vector<16x64xbf16>,
    %c0_30 = arith.constant 0 : index
    %c128 = arith.constant 128 : index
    %50 = vector.load %arg10[%c0_30, %c128] : memref<32x512xbf16, #tpu.memory_space<vmem>>, vector<16x64xbf16>
    %c0_31 = arith.constant 0 : index
    %c128_32 = arith.constant 128 : index
    %51 = vector.load %arg8[%c0_31, %c128_32] : memref<32x512xbf16, #tpu.memory_space<vmem>>, vector<16x64xbf16>
    %c0_33 = arith.constant 0 : index
    %c128_34 = arith.constant 128 : index
    %52 = vector.load %arg9[%c0_33, %c128_34] : memref<32x512xbf16, #tpu.memory_space<vmem>>, vector<16x64xbf16>
    %cst_35 = arith.constant dense<0.000000e+00> : vector<16x16xf32>
    %53 = tpu.matmul %50, %51, %cst_35 {dimension_numbers = #tpu.dot_dimension_numbers<[1], [1], [0], [0], [0, 0, 1, 0], [], []>} : vector<16x64xbf16>, vector<16x64xbf16>, vector<16x16xf32> -> vector<16x16xf32>
    %cst_36 = arith.constant dense<0xFF800000> : vector<16xf32>
    %54 = vector.multi_reduction <maximumf>, %53, %cst_36 [1] : vector<16x16xf32> to vector<16xf32>
    %55 = vector.shape_cast %54 : vector<16xf32> to vector<16x1xf32>
    %56 = vector.broadcast %55 : vector<16x1xf32> to vector<16x16xf32>
    %57 = arith.subf %53, %56 : vector<16x16xf32>
    %58 = math.exp %57 : vector<16x16xf32>
    %cst_37 = arith.constant dense<0.000000e+00> : vector<16xf32>
    %59 = vector.multi_reduction <add>, %58, %cst_37 [1] : vector<16x16xf32> to vector<16xf32>
    %60 = vector.shape_cast %59 : vector<16xf32> to vector<16x1xf32>
    %61 = tpu.reciprocal %60 {approx = true} : vector<16x1xf32> -> vector<16x1xf32>
    %62 = arith.truncf %58 : vector<16x16xf32> to vector<16x16xbf16>
    %cst_38 = arith.constant dense<0.000000e+00> : vector<16x64xf32>
    %63 = tpu.matmul %62, %52, %cst_38 {dimension_numbers = #tpu.dot_dimension_numbers<[1], [0], [0], [1], [0, 0, 1, 1], [], []>} : vector<16x16xbf16>, vector<16x64xbf16>, vector<16x64xf32> -> vector<16x64xf32>
    %64 = vector.broadcast %61 : vector<16x1xf32> to vector<16x64xf32>
    %65 = arith.mulf %63, %64 : vector<16x64xf32>
    %66 = arith.truncf %65 : vector<16x64xf32> to vector<16x64xbf16>
    %c0_39 = arith.constant 0 : index
    %c128_40 = arith.constant 128 : index
    %67 = vector.load %arg11[%c0_39, %c128_40] : memref<32x512xbf16, #tpu.memory_space<vmem>>, vector<16x64xbf16>
    tpu.vector_store %arg11[%c0_39, %c128_40], %66 {strides = array<i32>} : memref<32x512xbf16, #tpu.memory_space<vmem>>, vector<16x64xbf16>,
    %c0_41 = arith.constant 0 : index
    %c192 = arith.constant 192 : index
    %68 = vector.load %arg10[%c0_41, %c192] : memref<32x512xbf16, #tpu.memory_space<vmem>>, vector<16x64xbf16>
    %c0_42 = arith.constant 0 : index
    %c192_43 = arith.constant 192 : index
    %69 = vector.load %arg8[%c0_42, %c192_43] : memref<32x512xbf16, #tpu.memory_space<vmem>>, vector<16x64xbf16>
    %c0_44 = arith.constant 0 : index
    %c192_45 = arith.constant 192 : index
    %70 = vector.load %arg9[%c0_44, %c192_45] : memref<32x512xbf16, #tpu.memory_space<vmem>>, vector<16x64xbf16>
    %cst_46 = arith.constant dense<0.000000e+00> : vector<16x16xf32>
    %71 = tpu.matmul %68, %69, %cst_46 {dimension_numbers = #tpu.dot_dimension_numbers<[1], [1], [0], [0], [0, 0, 1, 0], [], []>} : vector<16x64xbf16>, vector<16x64xbf16>, vector<16x16xf32> -> vector<16x16xf32>
    %cst_47 = arith.constant dense<0xFF800000> : vector<16xf32>
    %72 = vector.multi_reduction <maximumf>, %71, %cst_47 [1] : vector<16x16xf32> to vector<16xf32>
    %73 = vector.shape_cast %72 : vector<16xf32> to vector<16x1xf32>
    %74 = vector.broadcast %73 : vector<16x1xf32> to vector<16x16xf32>
    %75 = arith.subf %71, %74 : vector<16x16xf32>
    %76 = math.exp %75 : vector<16x16xf32>
    %cst_48 = arith.constant dense<0.000000e+00> : vector<16xf32>
    %77 = vector.multi_reduction <add>, %76, %cst_48 [1] : vector<16x16xf32> to vector<16xf32>
    %78 = vector.shape_cast %77 : vector<16xf32> to vector<16x1xf32>
    %79 = tpu.reciprocal %78 {approx = true} : vector<16x1xf32> -> vector<16x1xf32>
    %80 = arith.truncf %76 : vector<16x16xf32> to vector<16x16xbf16>
    %cst_49 = arith.constant dense<0.000000e+00> : vector<16x64xf32>
    %81 = tpu.matmul %80, %70, %cst_49 {dimension_numbers = #tpu.dot_dimension_numbers<[1], [0], [0], [1], [0, 0, 1, 1], [], []>} : vector<16x16xbf16>, vector<16x64xbf16>, vector<16x64xf32> -> vector<16x64xf32>
    %82 = vector.broadcast %79 : vector<16x1xf32> to vector<16x64xf32>
    %83 = arith.mulf %81, %82 : vector<16x64xf32>
    %84 = arith.truncf %83 : vector<16x64xf32> to vector<16x64xbf16>
    %c0_50 = arith.constant 0 : index
    %c192_51 = arith.constant 192 : index
    %85 = vector.load %arg11[%c0_50, %c192_51] : memref<32x512xbf16, #tpu.memory_space<vmem>>, vector<16x64xbf16>
    tpu.vector_store %arg11[%c0_50, %c192_51], %84 {strides = array<i32>} : memref<32x512xbf16, #tpu.memory_space<vmem>>, vector<16x64xbf16>,
    %c0_52 = arith.constant 0 : index
    %c256 = arith.constant 256 : index
    %86 = vector.load %arg10[%c0_52, %c256] : memref<32x512xbf16, #tpu.memory_space<vmem>>, vector<16x64xbf16>
    %c0_53 = arith.constant 0 : index
    %c256_54 = arith.constant 256 : index
    %87 = vector.load %arg8[%c0_53, %c256_54] : memref<32x512xbf16, #tpu.memory_space<vmem>>, vector<16x64xbf16>
    %c0_55 = arith.constant 0 : index
    %c256_56 = arith.constant 256 : index
    %88 = vector.load %arg9[%c0_55, %c256_56] : memref<32x512xbf16, #tpu.memory_space<vmem>>, vector<16x64xbf16>
    %cst_57 = arith.constant dense<0.000000e+00> : vector<16x16xf32>
    %89 = tpu.matmul %86, %87, %cst_57 {dimension_numbers = #tpu.dot_dimension_numbers<[1], [1], [0], [0], [0, 0, 1, 0], [], []>} : vector<16x64xbf16>, vector<16x64xbf16>, vector<16x16xf32> -> vector<16x16xf32>
    %cst_58 = arith.constant dense<0xFF800000> : vector<16xf32>
    %90 = vector.multi_reduction <maximumf>, %89, %cst_58 [1] : vector<16x16xf32> to vector<16xf32>
    %91 = vector.shape_cast %90 : vector<16xf32> to vector<16x1xf32>
    %92 = vector.broadcast %91 : vector<16x1xf32> to vector<16x16xf32>
    %93 = arith.subf %89, %92 : vector<16x16xf32>
    %94 = math.exp %93 : vector<16x16xf32>
    %cst_59 = arith.constant dense<0.000000e+00> : vector<16xf32>
    %95 = vector.multi_reduction <add>, %94, %cst_59 [1] : vector<16x16xf32> to vector<16xf32>
    %96 = vector.shape_cast %95 : vector<16xf32> to vector<16x1xf32>
    %97 = tpu.reciprocal %96 {approx = true} : vector<16x1xf32> -> vector<16x1xf32>
    %98 = arith.truncf %94 : vector<16x16xf32> to vector<16x16xbf16>
    %cst_60 = arith.constant dense<0.000000e+00> : vector<16x64xf32>
    %99 = tpu.matmul %98, %88, %cst_60 {dimension_numbers = #tpu.dot_dimension_numbers<[1], [0], [0], [1], [0, 0, 1, 1], [], []>} : vector<16x16xbf16>, vector<16x64xbf16>, vector<16x64xf32> -> vector<16x64xf32>
    %100 = vector.broadcast %97 : vector<16x1xf32> to vector<16x64xf32>
    %101 = arith.mulf %99, %100 : vector<16x64xf32>
    %102 = arith.truncf %101 : vector<16x64xf32> to vector<16x64xbf16>
    %c0_61 = arith.constant 0 : index
    %c256_62 = arith.constant 256 : index
    %103 = vector.load %arg11[%c0_61, %c256_62] : memref<32x512xbf16, #tpu.memory_space<vmem>>, vector<16x64xbf16>
    tpu.vector_store %arg11[%c0_61, %c256_62], %102 {strides = array<i32>} : memref<32x512xbf16, #tpu.memory_space<vmem>>, vector<16x64xbf16>,
    %c0_63 = arith.constant 0 : index
    %c320 = arith.constant 320 : index
    %104 = vector.load %arg10[%c0_63, %c320] : memref<32x512xbf16, #tpu.memory_space<vmem>>, vector<16x64xbf16>
    %c0_64 = arith.constant 0 : index
    %c320_65 = arith.constant 320 : index
    %105 = vector.load %arg8[%c0_64, %c320_65] : memref<32x512xbf16, #tpu.memory_space<vmem>>, vector<16x64xbf16>
    %c0_66 = arith.constant 0 : index
    %c320_67 = arith.constant 320 : index
    %106 = vector.load %arg9[%c0_66, %c320_67] : memref<32x512xbf16, #tpu.memory_space<vmem>>, vector<16x64xbf16>
    %cst_68 = arith.constant dense<0.000000e+00> : vector<16x16xf32>
    %107 = tpu.matmul %104, %105, %cst_68 {dimension_numbers = #tpu.dot_dimension_numbers<[1], [1], [0], [0], [0, 0, 1, 0], [], []>} : vector<16x64xbf16>, vector<16x64xbf16>, vector<16x16xf32> -> vector<16x16xf32>
    %cst_69 = arith.constant dense<0xFF800000> : vector<16xf32>
    %108 = vector.multi_reduction <maximumf>, %107, %cst_69 [1] : vector<16x16xf32> to vector<16xf32>
    %109 = vector.shape_cast %108 : vector<16xf32> to vector<16x1xf32>
    %110 = vector.broadcast %109 : vector<16x1xf32> to vector<16x16xf32>
    %111 = arith.subf %107, %110 : vector<16x16xf32>
    %112 = math.exp %111 : vector<16x16xf32>
    %cst_70 = arith.constant dense<0.000000e+00> : vector<16xf32>
    %113 = vector.multi_reduction <add>, %112, %cst_70 [1] : vector<16x16xf32> to vector<16xf32>
    %114 = vector.shape_cast %113 : vector<16xf32> to vector<16x1xf32>
    %115 = tpu.reciprocal %114 {approx = true} : vector<16x1xf32> -> vector<16x1xf32>
    %116 = arith.truncf %112 : vector<16x16xf32> to vector<16x16xbf16>
    %cst_71 = arith.constant dense<0.000000e+00> : vector<16x64xf32>
    %117 = tpu.matmul %116, %106, %cst_71 {dimension_numbers = #tpu.dot_dimension_numbers<[1], [0], [0], [1], [0, 0, 1, 1], [], []>} : vector<16x16xbf16>, vector<16x64xbf16>, vector<16x64xf32> -> vector<16x64xf32>
    %118 = vector.broadcast %115 : vector<16x1xf32> to vector<16x64xf32>
    %119 = arith.mulf %117, %118 : vector<16x64xf32>
    %120 = arith.truncf %119 : vector<16x64xf32> to vector<16x64xbf16>
    %c0_72 = arith.constant 0 : index
    %c320_73 = arith.constant 320 : index
    %121 = vector.load %arg11[%c0_72, %c320_73] : memref<32x512xbf16, #tpu.memory_space<vmem>>, vector<16x64xbf16>
    tpu.vector_store %arg11[%c0_72, %c320_73], %120 {strides = array<i32>} : memref<32x512xbf16, #tpu.memory_space<vmem>>, vector<16x64xbf16>,
    %c0_74 = arith.constant 0 : index
    %c384 = arith.constant 384 : index
    %122 = vector.load %arg10[%c0_74, %c384] : memref<32x512xbf16, #tpu.memory_space<vmem>>, vector<16x64xbf16>
    %c0_75 = arith.constant 0 : index
    %c384_76 = arith.constant 384 : index
    %123 = vector.load %arg8[%c0_75, %c384_76] : memref<32x512xbf16, #tpu.memory_space<vmem>>, vector<16x64xbf16>
    %c0_77 = arith.constant 0 : index
    %c384_78 = arith.constant 384 : index
    %124 = vector.load %arg9[%c0_77, %c384_78] : memref<32x512xbf16, #tpu.memory_space<vmem>>, vector<16x64xbf16>
    %cst_79 = arith.constant dense<0.000000e+00> : vector<16x16xf32>
    %125 = tpu.matmul %122, %123, %cst_79 {dimension_numbers = #tpu.dot_dimension_numbers<[1], [1], [0], [0], [0, 0, 1, 0], [], []>} : vector<16x64xbf16>, vector<16x64xbf16>, vector<16x16xf32> -> vector<16x16xf32>
    %cst_80 = arith.constant dense<0xFF800000> : vector<16xf32>
    %126 = vector.multi_reduction <maximumf>, %125, %cst_80 [1] : vector<16x16xf32> to vector<16xf32>
    %127 = vector.shape_cast %126 : vector<16xf32> to vector<16x1xf32>
    %128 = vector.broadcast %127 : vector<16x1xf32> to vector<16x16xf32>
    %129 = arith.subf %125, %128 : vector<16x16xf32>
    %130 = math.exp %129 : vector<16x16xf32>
    %cst_81 = arith.constant dense<0.000000e+00> : vector<16xf32>
    %131 = vector.multi_reduction <add>, %130, %cst_81 [1] : vector<16x16xf32> to vector<16xf32>
    %132 = vector.shape_cast %131 : vector<16xf32> to vector<16x1xf32>
    %133 = tpu.reciprocal %132 {approx = true} : vector<16x1xf32> -> vector<16x1xf32>
    %134 = arith.truncf %130 : vector<16x16xf32> to vector<16x16xbf16>
    %cst_82 = arith.constant dense<0.000000e+00> : vector<16x64xf32>
    %135 = tpu.matmul %134, %124, %cst_82 {dimension_numbers = #tpu.dot_dimension_numbers<[1], [0], [0], [1], [0, 0, 1, 1], [], []>} : vector<16x16xbf16>, vector<16x64xbf16>, vector<16x64xf32> -> vector<16x64xf32>
    %136 = vector.broadcast %133 : vector<16x1xf32> to vector<16x64xf32>
    %137 = arith.mulf %135, %136 : vector<16x64xf32>
    %138 = arith.truncf %137 : vector<16x64xf32> to vector<16x64xbf16>
    %c0_83 = arith.constant 0 : index
    %c384_84 = arith.constant 384 : index
    %139 = vector.load %arg11[%c0_83, %c384_84] : memref<32x512xbf16, #tpu.memory_space<vmem>>, vector<16x64xbf16>
    tpu.vector_store %arg11[%c0_83, %c384_84], %138 {strides = array<i32>} : memref<32x512xbf16, #tpu.memory_space<vmem>>, vector<16x64xbf16>,
    %c0_85 = arith.constant 0 : index
    %c448 = arith.constant 448 : index
    %140 = vector.load %arg10[%c0_85, %c448] : memref<32x512xbf16, #tpu.memory_space<vmem>>, vector<16x64xbf16>
    %c0_86 = arith.constant 0 : index
    %c448_87 = arith.constant 448 : index
    %141 = vector.load %arg8[%c0_86, %c448_87] : memref<32x512xbf16, #tpu.memory_space<vmem>>, vector<16x64xbf16>
    %c0_88 = arith.constant 0 : index
    %c448_89 = arith.constant 448 : index
    %142 = vector.load %arg9[%c0_88, %c448_89] : memref<32x512xbf16, #tpu.memory_space<vmem>>, vector<16x64xbf16>
    %cst_90 = arith.constant dense<0.000000e+00> : vector<16x16xf32>
    %143 = tpu.matmul %140, %141, %cst_90 {dimension_numbers = #tpu.dot_dimension_numbers<[1], [1], [0], [0], [0, 0, 1, 0], [], []>} : vector<16x64xbf16>, vector<16x64xbf16>, vector<16x16xf32> -> vector<16x16xf32>
    %cst_91 = arith.constant dense<0xFF800000> : vector<16xf32>
    %144 = vector.multi_reduction <maximumf>, %143, %cst_91 [1] : vector<16x16xf32> to vector<16xf32>
    %145 = vector.shape_cast %144 : vector<16xf32> to vector<16x1xf32>
    %146 = vector.broadcast %145 : vector<16x1xf32> to vector<16x16xf32>
    %147 = arith.subf %143, %146 : vector<16x16xf32>
    %148 = math.exp %147 : vector<16x16xf32>
    %cst_92 = arith.constant dense<0.000000e+00> : vector<16xf32>
    %149 = vector.multi_reduction <add>, %148, %cst_92 [1] : vector<16x16xf32> to vector<16xf32>
    %150 = vector.shape_cast %149 : vector<16xf32> to vector<16x1xf32>
    %151 = tpu.reciprocal %150 {approx = true} : vector<16x1xf32> -> vector<16x1xf32>
    %152 = arith.truncf %148 : vector<16x16xf32> to vector<16x16xbf16>
    %cst_93 = arith.constant dense<0.000000e+00> : vector<16x64xf32>
    %153 = tpu.matmul %152, %142, %cst_93 {dimension_numbers = #tpu.dot_dimension_numbers<[1], [0], [0], [1], [0, 0, 1, 1], [], []>} : vector<16x16xbf16>, vector<16x64xbf16>, vector<16x64xf32> -> vector<16x64xf32>
    %154 = vector.broadcast %151 : vector<16x1xf32> to vector<16x64xf32>
    %155 = arith.mulf %153, %154 : vector<16x64xf32>
    %156 = arith.truncf %155 : vector<16x64xf32> to vector<16x64xbf16>
    %c0_94 = arith.constant 0 : index
    %c448_95 = arith.constant 448 : index
    %157 = vector.load %arg11[%c0_94, %c448_95] : memref<32x512xbf16, #tpu.memory_space<vmem>>, vector<16x64xbf16>
    tpu.vector_store %arg11[%c0_94, %c448_95], %156 {strides = array<i32>} : memref<32x512xbf16, #tpu.memory_space<vmem>>, vector<16x64xbf16>,
    %c16 = arith.constant 16 : index
    %c0_96 = arith.constant 0 : index
    %158 = vector.load %arg10[%c16, %c0_96] : memref<32x512xbf16, #tpu.memory_space<vmem>>, vector<16x64xbf16>
    %c16_97 = arith.constant 16 : index
    %c0_98 = arith.constant 0 : index
    %159 = vector.load %arg8[%c16_97, %c0_98] : memref<32x512xbf16, #tpu.memory_space<vmem>>, vector<16x64xbf16>
    %c16_99 = arith.constant 16 : index
    %c0_100 = arith.constant 0 : index
    %160 = vector.load %arg9[%c16_99, %c0_100] : memref<32x512xbf16, #tpu.memory_space<vmem>>, vector<16x64xbf16>
    %cst_101 = arith.constant dense<0.000000e+00> : vector<16x16xf32>
    %161 = tpu.matmul %158, %159, %cst_101 {dimension_numbers = #tpu.dot_dimension_numbers<[1], [1], [0], [0], [0, 0, 1, 0], [], []>} : vector<16x64xbf16>, vector<16x64xbf16>, vector<16x16xf32> -> vector<16x16xf32>
    %cst_102 = arith.constant dense<0xFF800000> : vector<16xf32>
    %162 = vector.multi_reduction <maximumf>, %161, %cst_102 [1] : vector<16x16xf32> to vector<16xf32>
    %163 = vector.shape_cast %162 : vector<16xf32> to vector<16x1xf32>
    %164 = vector.broadcast %163 : vector<16x1xf32> to vector<16x16xf32>
    %165 = arith.subf %161, %164 : vector<16x16xf32>
    %166 = math.exp %165 : vector<16x16xf32>
    %cst_103 = arith.constant dense<0.000000e+00> : vector<16xf32>
    %167 = vector.multi_reduction <add>, %166, %cst_103 [1] : vector<16x16xf32> to vector<16xf32>
    %168 = vector.shape_cast %167 : vector<16xf32> to vector<16x1xf32>
    %169 = tpu.reciprocal %168 {approx = true} : vector<16x1xf32> -> vector<16x1xf32>
    %170 = arith.truncf %166 : vector<16x16xf32> to vector<16x16xbf16>
    %cst_104 = arith.constant dense<0.000000e+00> : vector<16x64xf32>
    %171 = tpu.matmul %170, %160, %cst_104 {dimension_numbers = #tpu.dot_dimension_numbers<[1], [0], [0], [1], [0, 0, 1, 1], [], []>} : vector<16x16xbf16>, vector<16x64xbf16>, vector<16x64xf32> -> vector<16x64xf32>
    %172 = vector.broadcast %169 : vector<16x1xf32> to vector<16x64xf32>
    %173 = arith.mulf %171, %172 : vector<16x64xf32>
    %174 = arith.truncf %173 : vector<16x64xf32> to vector<16x64xbf16>
    %c16_105 = arith.constant 16 : index
    %c0_106 = arith.constant 0 : index
    %175 = vector.load %arg11[%c16_105, %c0_106] : memref<32x512xbf16, #tpu.memory_space<vmem>>, vector<16x64xbf16>
    tpu.vector_store %arg11[%c16_105, %c0_106], %174 {strides = array<i32>} : memref<32x512xbf16, #tpu.memory_space<vmem>>, vector<16x64xbf16>,
    %c16_107 = arith.constant 16 : index
    %c64_108 = arith.constant 64 : index
    %176 = vector.load %arg10[%c16_107, %c64_108] : memref<32x512xbf16, #tpu.memory_space<vmem>>, vector<16x64xbf16>
    %c16_109 = arith.constant 16 : index
    %c64_110 = arith.constant 64 : index
    %177 = vector.load %arg8[%c16_109, %c64_110] : memref<32x512xbf16, #tpu.memory_space<vmem>>, vector<16x64xbf16>
    %c16_111 = arith.constant 16 : index
    %c64_112 = arith.constant 64 : index
    %178 = vector.load %arg9[%c16_111, %c64_112] : memref<32x512xbf16, #tpu.memory_space<vmem>>, vector<16x64xbf16>
    %cst_113 = arith.constant dense<0.000000e+00> : vector<16x16xf32>
    %179 = tpu.matmul %176, %177, %cst_113 {dimension_numbers = #tpu.dot_dimension_numbers<[1], [1], [0], [0], [0, 0, 1, 0], [], []>} : vector<16x64xbf16>, vector<16x64xbf16>, vector<16x16xf32> -> vector<16x16xf32>
    %cst_114 = arith.constant dense<0xFF800000> : vector<16xf32>
    %180 = vector.multi_reduction <maximumf>, %179, %cst_114 [1] : vector<16x16xf32> to vector<16xf32>
    %181 = vector.shape_cast %180 : vector<16xf32> to vector<16x1xf32>
    %182 = vector.broadcast %181 : vector<16x1xf32> to vector<16x16xf32>
    %183 = arith.subf %179, %182 : vector<16x16xf32>
    %184 = math.exp %183 : vector<16x16xf32>
    %cst_115 = arith.constant dense<0.000000e+00> : vector<16xf32>
    %185 = vector.multi_reduction <add>, %184, %cst_115 [1] : vector<16x16xf32> to vector<16xf32>
    %186 = vector.shape_cast %185 : vector<16xf32> to vector<16x1xf32>
    %187 = tpu.reciprocal %186 {approx = true} : vector<16x1xf32> -> vector<16x1xf32>
    %188 = arith.truncf %184 : vector<16x16xf32> to vector<16x16xbf16>
    %cst_116 = arith.constant dense<0.000000e+00> : vector<16x64xf32>
    %189 = tpu.matmul %188, %178, %cst_116 {dimension_numbers = #tpu.dot_dimension_numbers<[1], [0], [0], [1], [0, 0, 1, 1], [], []>} : vector<16x16xbf16>, vector<16x64xbf16>, vector<16x64xf32> -> vector<16x64xf32>
    %190 = vector.broadcast %187 : vector<16x1xf32> to vector<16x64xf32>
    %191 = arith.mulf %189, %190 : vector<16x64xf32>
    %192 = arith.truncf %191 : vector<16x64xf32> to vector<16x64xbf16>
    %c16_117 = arith.constant 16 : index
    %c64_118 = arith.constant 64 : index
    %193 = vector.load %arg11[%c16_117, %c64_118] : memref<32x512xbf16, #tpu.memory_space<vmem>>, vector<16x64xbf16>
    tpu.vector_store %arg11[%c16_117, %c64_118], %192 {strides = array<i32>} : memref<32x512xbf16, #tpu.memory_space<vmem>>, vector<16x64xbf16>,
    %c16_119 = arith.constant 16 : index
    %c128_120 = arith.constant 128 : index
    %194 = vector.load %arg10[%c16_119, %c128_120] : memref<32x512xbf16, #tpu.memory_space<vmem>>, vector<16x64xbf16>
    %c16_121 = arith.constant 16 : index
    %c128_122 = arith.constant 128 : index
    %195 = vector.load %arg8[%c16_121, %c128_122] : memref<32x512xbf16, #tpu.memory_space<vmem>>, vector<16x64xbf16>
    %c16_123 = arith.constant 16 : index
    %c128_124 = arith.constant 128 : index
    %196 = vector.load %arg9[%c16_123, %c128_124] : memref<32x512xbf16, #tpu.memory_space<vmem>>, vector<16x64xbf16>
    %cst_125 = arith.constant dense<0.000000e+00> : vector<16x16xf32>
    %197 = tpu.matmul %194, %195, %cst_125 {dimension_numbers = #tpu.dot_dimension_numbers<[1], [1], [0], [0], [0, 0, 1, 0], [], []>} : vector<16x64xbf16>, vector<16x64xbf16>, vector<16x16xf32> -> vector<16x16xf32>
    %cst_126 = arith.constant dense<0xFF800000> : vector<16xf32>
    %198 = vector.multi_reduction <maximumf>, %197, %cst_126 [1] : vector<16x16xf32> to vector<16xf32>
    %199 = vector.shape_cast %198 : vector<16xf32> to vector<16x1xf32>
    %200 = vector.broadcast %199 : vector<16x1xf32> to vector<16x16xf32>
    %201 = arith.subf %197, %200 : vector<16x16xf32>
    %202 = math.exp %201 : vector<16x16xf32>
    %cst_127 = arith.constant dense<0.000000e+00> : vector<16xf32>
    %203 = vector.multi_reduction <add>, %202, %cst_127 [1] : vector<16x16xf32> to vector<16xf32>
    %204 = vector.shape_cast %203 : vector<16xf32> to vector<16x1xf32>
    %205 = tpu.reciprocal %204 {approx = true} : vector<16x1xf32> -> vector<16x1xf32>
    %206 = arith.truncf %202 : vector<16x16xf32> to vector<16x16xbf16>
    %cst_128 = arith.constant dense<0.000000e+00> : vector<16x64xf32>
    %207 = tpu.matmul %206, %196, %cst_128 {dimension_numbers = #tpu.dot_dimension_numbers<[1], [0], [0], [1], [0, 0, 1, 1], [], []>} : vector<16x16xbf16>, vector<16x64xbf16>, vector<16x64xf32> -> vector<16x64xf32>
    %208 = vector.broadcast %205 : vector<16x1xf32> to vector<16x64xf32>
    %209 = arith.mulf %207, %208 : vector<16x64xf32>
    %210 = arith.truncf %209 : vector<16x64xf32> to vector<16x64xbf16>
    %c16_129 = arith.constant 16 : index
    %c128_130 = arith.constant 128 : index
    %211 = vector.load %arg11[%c16_129, %c128_130] : memref<32x512xbf16, #tpu.memory_space<vmem>>, vector<16x64xbf16>
    tpu.vector_store %arg11[%c16_129, %c128_130], %210 {strides = array<i32>} : memref<32x512xbf16, #tpu.memory_space<vmem>>, vector<16x64xbf16>,
    %c16_131 = arith.constant 16 : index
    %c192_132 = arith.constant 192 : index
    %212 = vector.load %arg10[%c16_131, %c192_132] : memref<32x512xbf16, #tpu.memory_space<vmem>>, vector<16x64xbf16>
    %c16_133 = arith.constant 16 : index
    %c192_134 = arith.constant 192 : index
    %213 = vector.load %arg8[%c16_133, %c192_134] : memref<32x512xbf16, #tpu.memory_space<vmem>>, vector<16x64xbf16>
    %c16_135 = arith.constant 16 : index
    %c192_136 = arith.constant 192 : index
    %214 = vector.load %arg9[%c16_135, %c192_136] : memref<32x512xbf16, #tpu.memory_space<vmem>>, vector<16x64xbf16>
    %cst_137 = arith.constant dense<0.000000e+00> : vector<16x16xf32>
    %215 = tpu.matmul %212, %213, %cst_137 {dimension_numbers = #tpu.dot_dimension_numbers<[1], [1], [0], [0], [0, 0, 1, 0], [], []>} : vector<16x64xbf16>, vector<16x64xbf16>, vector<16x16xf32> -> vector<16x16xf32>
    %cst_138 = arith.constant dense<0xFF800000> : vector<16xf32>
    %216 = vector.multi_reduction <maximumf>, %215, %cst_138 [1] : vector<16x16xf32> to vector<16xf32>
    %217 = vector.shape_cast %216 : vector<16xf32> to vector<16x1xf32>
    %218 = vector.broadcast %217 : vector<16x1xf32> to vector<16x16xf32>
    %219 = arith.subf %215, %218 : vector<16x16xf32>
    %220 = math.exp %219 : vector<16x16xf32>
    %cst_139 = arith.constant dense<0.000000e+00> : vector<16xf32>
    %221 = vector.multi_reduction <add>, %220, %cst_139 [1] : vector<16x16xf32> to vector<16xf32>
    %222 = vector.shape_cast %221 : vector<16xf32> to vector<16x1xf32>
    %223 = tpu.reciprocal %222 {approx = true} : vector<16x1xf32> -> vector<16x1xf32>
    %224 = arith.truncf %220 : vector<16x16xf32> to vector<16x16xbf16>
    %cst_140 = arith.constant dense<0.000000e+00> : vector<16x64xf32>
    %225 = tpu.matmul %224, %214, %cst_140 {dimension_numbers = #tpu.dot_dimension_numbers<[1], [0], [0], [1], [0, 0, 1, 1], [], []>} : vector<16x16xbf16>, vector<16x64xbf16>, vector<16x64xf32> -> vector<16x64xf32>
    %226 = vector.broadcast %223 : vector<16x1xf32> to vector<16x64xf32>
    %227 = arith.mulf %225, %226 : vector<16x64xf32>
    %228 = arith.truncf %227 : vector<16x64xf32> to vector<16x64xbf16>
    %c16_141 = arith.constant 16 : index
    %c192_142 = arith.constant 192 : index
    %229 = vector.load %arg11[%c16_141, %c192_142] : memref<32x512xbf16, #tpu.memory_space<vmem>>, vector<16x64xbf16>
    tpu.vector_store %arg11[%c16_141, %c192_142], %228 {strides = array<i32>} : memref<32x512xbf16, #tpu.memory_space<vmem>>, vector<16x64xbf16>,
    %c16_143 = arith.constant 16 : index
    %c256_144 = arith.constant 256 : index
    %230 = vector.load %arg10[%c16_143, %c256_144] : memref<32x512xbf16, #tpu.memory_space<vmem>>, vector<16x64xbf16>
    %c16_145 = arith.constant 16 : index
    %c256_146 = arith.constant 256 : index
    %231 = vector.load %arg8[%c16_145, %c256_146] : memref<32x512xbf16, #tpu.memory_space<vmem>>, vector<16x64xbf16>
    %c16_147 = arith.constant 16 : index
    %c256_148 = arith.constant 256 : index
    %232 = vector.load %arg9[%c16_147, %c256_148] : memref<32x512xbf16, #tpu.memory_space<vmem>>, vector<16x64xbf16>
    %cst_149 = arith.constant dense<0.000000e+00> : vector<16x16xf32>
    %233 = tpu.matmul %230, %231, %cst_149 {dimension_numbers = #tpu.dot_dimension_numbers<[1], [1], [0], [0], [0, 0, 1, 0], [], []>} : vector<16x64xbf16>, vector<16x64xbf16>, vector<16x16xf32> -> vector<16x16xf32>
    %cst_150 = arith.constant dense<0xFF800000> : vector<16xf32>
    %234 = vector.multi_reduction <maximumf>, %233, %cst_150 [1] : vector<16x16xf32> to vector<16xf32>
    %235 = vector.shape_cast %234 : vector<16xf32> to vector<16x1xf32>
    %236 = vector.broadcast %235 : vector<16x1xf32> to vector<16x16xf32>
    %237 = arith.subf %233, %236 : vector<16x16xf32>
    %238 = math.exp %237 : vector<16x16xf32>
    %cst_151 = arith.constant dense<0.000000e+00> : vector<16xf32>
    %239 = vector.multi_reduction <add>, %238, %cst_151 [1] : vector<16x16xf32> to vector<16xf32>
    %240 = vector.shape_cast %239 : vector<16xf32> to vector<16x1xf32>
    %241 = tpu.reciprocal %240 {approx = true} : vector<16x1xf32> -> vector<16x1xf32>
    %242 = arith.truncf %238 : vector<16x16xf32> to vector<16x16xbf16>
    %cst_152 = arith.constant dense<0.000000e+00> : vector<16x64xf32>
    %243 = tpu.matmul %242, %232, %cst_152 {dimension_numbers = #tpu.dot_dimension_numbers<[1], [0], [0], [1], [0, 0, 1, 1], [], []>} : vector<16x16xbf16>, vector<16x64xbf16>, vector<16x64xf32> -> vector<16x64xf32>
    %244 = vector.broadcast %241 : vector<16x1xf32> to vector<16x64xf32>
    %245 = arith.mulf %243, %244 : vector<16x64xf32>
    %246 = arith.truncf %245 : vector<16x64xf32> to vector<16x64xbf16>
    %c16_153 = arith.constant 16 : index
    %c256_154 = arith.constant 256 : index
    %247 = vector.load %arg11[%c16_153, %c256_154] : memref<32x512xbf16, #tpu.memory_space<vmem>>, vector<16x64xbf16>
    tpu.vector_store %arg11[%c16_153, %c256_154], %246 {strides = array<i32>} : memref<32x512xbf16, #tpu.memory_space<vmem>>, vector<16x64xbf16>,
    %c16_155 = arith.constant 16 : index
    %c320_156 = arith.constant 320 : index
    %248 = vector.load %arg10[%c16_155, %c320_156] : memref<32x512xbf16, #tpu.memory_space<vmem>>, vector<16x64xbf16>
    %c16_157 = arith.constant 16 : index
    %c320_158 = arith.constant 320 : index
    %249 = vector.load %arg8[%c16_157, %c320_158] : memref<32x512xbf16, #tpu.memory_space<vmem>>, vector<16x64xbf16>
    %c16_159 = arith.constant 16 : index
    %c320_160 = arith.constant 320 : index
    %250 = vector.load %arg9[%c16_159, %c320_160] : memref<32x512xbf16, #tpu.memory_space<vmem>>, vector<16x64xbf16>
    %cst_161 = arith.constant dense<0.000000e+00> : vector<16x16xf32>
    %251 = tpu.matmul %248, %249, %cst_161 {dimension_numbers = #tpu.dot_dimension_numbers<[1], [1], [0], [0], [0, 0, 1, 0], [], []>} : vector<16x64xbf16>, vector<16x64xbf16>, vector<16x16xf32> -> vector<16x16xf32>
    %cst_162 = arith.constant dense<0xFF800000> : vector<16xf32>
    %252 = vector.multi_reduction <maximumf>, %251, %cst_162 [1] : vector<16x16xf32> to vector<16xf32>
    %253 = vector.shape_cast %252 : vector<16xf32> to vector<16x1xf32>
    %254 = vector.broadcast %253 : vector<16x1xf32> to vector<16x16xf32>
    %255 = arith.subf %251, %254 : vector<16x16xf32>
    %256 = math.exp %255 : vector<16x16xf32>
    %cst_163 = arith.constant dense<0.000000e+00> : vector<16xf32>
    %257 = vector.multi_reduction <add>, %256, %cst_163 [1] : vector<16x16xf32> to vector<16xf32>
    %258 = vector.shape_cast %257 : vector<16xf32> to vector<16x1xf32>
    %259 = tpu.reciprocal %258 {approx = true} : vector<16x1xf32> -> vector<16x1xf32>
    %260 = arith.truncf %256 : vector<16x16xf32> to vector<16x16xbf16>
    %cst_164 = arith.constant dense<0.000000e+00> : vector<16x64xf32>
    %261 = tpu.matmul %260, %250, %cst_164 {dimension_numbers = #tpu.dot_dimension_numbers<[1], [0], [0], [1], [0, 0, 1, 1], [], []>} : vector<16x16xbf16>, vector<16x64xbf16>, vector<16x64xf32> -> vector<16x64xf32>
    %262 = vector.broadcast %259 : vector<16x1xf32> to vector<16x64xf32>
    %263 = arith.mulf %261, %262 : vector<16x64xf32>
    %264 = arith.truncf %263 : vector<16x64xf32> to vector<16x64xbf16>
    %c16_165 = arith.constant 16 : index
    %c320_166 = arith.constant 320 : index
    %265 = vector.load %arg11[%c16_165, %c320_166] : memref<32x512xbf16, #tpu.memory_space<vmem>>, vector<16x64xbf16>
    tpu.vector_store %arg11[%c16_165, %c320_166], %264 {strides = array<i32>} : memref<32x512xbf16, #tpu.memory_space<vmem>>, vector<16x64xbf16>,
    %c16_167 = arith.constant 16 : index
    %c384_168 = arith.constant 384 : index
    %266 = vector.load %arg10[%c16_167, %c384_168] : memref<32x512xbf16, #tpu.memory_space<vmem>>, vector<16x64xbf16>
    %c16_169 = arith.constant 16 : index
    %c384_170 = arith.constant 384 : index
    %267 = vector.load %arg8[%c16_169, %c384_170] : memref<32x512xbf16, #tpu.memory_space<vmem>>, vector<16x64xbf16>
    %c16_171 = arith.constant 16 : index
    %c384_172 = arith.constant 384 : index
    %268 = vector.load %arg9[%c16_171, %c384_172] : memref<32x512xbf16, #tpu.memory_space<vmem>>, vector<16x64xbf16>
    %cst_173 = arith.constant dense<0.000000e+00> : vector<16x16xf32>
    %269 = tpu.matmul %266, %267, %cst_173 {dimension_numbers = #tpu.dot_dimension_numbers<[1], [1], [0], [0], [0, 0, 1, 0], [], []>} : vector<16x64xbf16>, vector<16x64xbf16>, vector<16x16xf32> -> vector<16x16xf32>
    %cst_174 = arith.constant dense<0xFF800000> : vector<16xf32>
    %270 = vector.multi_reduction <maximumf>, %269, %cst_174 [1] : vector<16x16xf32> to vector<16xf32>
    %271 = vector.shape_cast %270 : vector<16xf32> to vector<16x1xf32>
    %272 = vector.broadcast %271 : vector<16x1xf32> to vector<16x16xf32>
    %273 = arith.subf %269, %272 : vector<16x16xf32>
    %274 = math.exp %273 : vector<16x16xf32>
    %cst_175 = arith.constant dense<0.000000e+00> : vector<16xf32>
    %275 = vector.multi_reduction <add>, %274, %cst_175 [1] : vector<16x16xf32> to vector<16xf32>
    %276 = vector.shape_cast %275 : vector<16xf32> to vector<16x1xf32>
    %277 = tpu.reciprocal %276 {approx = true} : vector<16x1xf32> -> vector<16x1xf32>
    %278 = arith.truncf %274 : vector<16x16xf32> to vector<16x16xbf16>
    %cst_176 = arith.constant dense<0.000000e+00> : vector<16x64xf32>
    %279 = tpu.matmul %278, %268, %cst_176 {dimension_numbers = #tpu.dot_dimension_numbers<[1], [0], [0], [1], [0, 0, 1, 1], [], []>} : vector<16x16xbf16>, vector<16x64xbf16>, vector<16x64xf32> -> vector<16x64xf32>
    %280 = vector.broadcast %277 : vector<16x1xf32> to vector<16x64xf32>
    %281 = arith.mulf %279, %280 : vector<16x64xf32>
    %282 = arith.truncf %281 : vector<16x64xf32> to vector<16x64xbf16>
    %c16_177 = arith.constant 16 : index
    %c384_178 = arith.constant 384 : index
    %283 = vector.load %arg11[%c16_177, %c384_178] : memref<32x512xbf16, #tpu.memory_space<vmem>>, vector<16x64xbf16>
    tpu.vector_store %arg11[%c16_177, %c384_178], %282 {strides = array<i32>} : memref<32x512xbf16, #tpu.memory_space<vmem>>, vector<16x64xbf16>,
    %c16_179 = arith.constant 16 : index
    %c448_180 = arith.constant 448 : index
    %284 = vector.load %arg10[%c16_179, %c448_180] : memref<32x512xbf16, #tpu.memory_space<vmem>>, vector<16x64xbf16>
    %c16_181 = arith.constant 16 : index
    %c448_182 = arith.constant 448 : index
    %285 = vector.load %arg8[%c16_181, %c448_182] : memref<32x512xbf16, #tpu.memory_space<vmem>>, vector<16x64xbf16>
    %c16_183 = arith.constant 16 : index
    %c448_184 = arith.constant 448 : index
    %286 = vector.load %arg9[%c16_183, %c448_184] : memref<32x512xbf16, #tpu.memory_space<vmem>>, vector<16x64xbf16>
    %cst_185 = arith.constant dense<0.000000e+00> : vector<16x16xf32>
    %287 = tpu.matmul %284, %285, %cst_185 {dimension_numbers = #tpu.dot_dimension_numbers<[1], [1], [0], [0], [0, 0, 1, 0], [], []>} : vector<16x64xbf16>, vector<16x64xbf16>, vector<16x16xf32> -> vector<16x16xf32>
    %cst_186 = arith.constant dense<0xFF800000> : vector<16xf32>
    %288 = vector.multi_reduction <maximumf>, %287, %cst_186 [1] : vector<16x16xf32> to vector<16xf32>
    %289 = vector.shape_cast %288 : vector<16xf32> to vector<16x1xf32>
    %290 = vector.broadcast %289 : vector<16x1xf32> to vector<16x16xf32>
    %291 = arith.subf %287, %290 : vector<16x16xf32>
    %292 = math.exp %291 : vector<16x16xf32>
    %cst_187 = arith.constant dense<0.000000e+00> : vector<16xf32>
    %293 = vector.multi_reduction <add>, %292, %cst_187 [1] : vector<16x16xf32> to vector<16xf32>
    %294 = vector.shape_cast %293 : vector<16xf32> to vector<16x1xf32>
    %295 = tpu.reciprocal %294 {approx = true} : vector<16x1xf32> -> vector<16x1xf32>
    %296 = arith.truncf %292 : vector<16x16xf32> to vector<16x16xbf16>
    %cst_188 = arith.constant dense<0.000000e+00> : vector<16x64xf32>
    %297 = tpu.matmul %296, %286, %cst_188 {dimension_numbers = #tpu.dot_dimension_numbers<[1], [0], [0], [1], [0, 0, 1, 1], [], []>} : vector<16x16xbf16>, vector<16x64xbf16>, vector<16x64xf32> -> vector<16x64xf32>
    %298 = vector.broadcast %295 : vector<16x1xf32> to vector<16x64xf32>
    %299 = arith.mulf %297, %298 : vector<16x64xf32>
    %300 = arith.truncf %299 : vector<16x64xf32> to vector<16x64xbf16>
    %c16_189 = arith.constant 16 : index
    %c448_190 = arith.constant 448 : index
    %301 = vector.load %arg11[%c16_189, %c448_190] : memref<32x512xbf16, #tpu.memory_space<vmem>>, vector<16x64xbf16>
    tpu.vector_store %arg11[%c16_189, %c448_190], %300 {strides = array<i32>} : memref<32x512xbf16, #tpu.memory_space<vmem>>, vector<16x64xbf16>,
    %c0_191 = arith.constant 0 : index
    %c0_192 = arith.constant 0 : index
    %302 = vector.load %arg11[%c0_191, %c0_192] : memref<32x512xbf16, #tpu.memory_space<vmem>>, vector<32x512xbf16>
    %c0_193 = arith.constant 0 : index
    %c0_194 = arith.constant 0 : index
    %303 = vector.load %arg5[%c0_193, %c0_194] : memref<512x512xbf16, #tpu.memory_space<vmem>>, vector<512x512xbf16>
    %cst_195 = arith.constant dense<0.000000e+00> : vector<32x512xf32>
    %304 = tpu.matmul %302, %303, %cst_195 {dimension_numbers = #tpu.dot_dimension_numbers<[1], [0], [0], [1], [0, 0, 1, 1], [], []>} : vector<32x512xbf16>, vector<512x512xbf16>, vector<32x512xf32> -> vector<32x512xf32>
    %c0_196 = arith.constant 0 : index
    %c0_197 = arith.constant 0 : index
    %305 = vector.load %arg6[%c0_196, %c0_197] : memref<1x512xf32, #tpu.memory_space<vmem>>, vector<1x512xf32>
    %306 = vector.broadcast %305 : vector<1x512xf32> to vector<32x512xf32>
    %307 = arith.addf %304, %306 : vector<32x512xf32>
    %c0_198 = arith.constant 0 : index
    %c0_199 = arith.constant 0 : index
    %308 = vector.load %arg7[%c0_198, %c0_199] : memref<32x512xf32, #tpu.memory_space<vmem>>, vector<32x512xf32>
    tpu.vector_store %arg7[%c0_198, %c0_199], %307 {strides = array<i32>} : memref<32x512xf32, #tpu.memory_space<vmem>>, vector<32x512xf32>,
    return
  }
  func.func @transform_0(%arg0: i32, %arg1: i32) -> (i32, i32) {
    %c0_i32 = arith.constant 0 : i32
    %c0_i32_0 = arith.constant 0 : i32
    return %arg0, %c0_i32 : i32, i32
  }
  func.func @transform_1(%arg0: i32, %arg1: i32) -> (i32, i32) {
    %c0_i32 = arith.constant 0 : i32
    %c0_i32_0 = arith.constant 0 : i32
    %c0_i32_1 = arith.constant 0 : i32
    return %c0_i32, %c0_i32_0 : i32, i32
  }
  func.func @transform_2(%arg0: i32, %arg1: i32) -> (i32, i32) {
    %c0_i32 = arith.constant 0 : i32
    %c0_i32_0 = arith.constant 0 : i32
    %c0_i32_1 = arith.constant 0 : i32
    return %c0_i32, %c0_i32_0 : i32, i32
  }
  func.func @transform_3(%arg0: i32, %arg1: i32) -> (i32, i32) {
    %c0_i32 = arith.constant 0 : i32
    %c0_i32_0 = arith.constant 0 : i32
    %c0_i32_1 = arith.constant 0 : i32
    return %c0_i32, %c0_i32_0 : i32, i32
  }
  func.func @transform_4(%arg0: i32, %arg1: i32) -> (i32, i32) {
    %c0_i32 = arith.constant 0 : i32
    %c0_i32_0 = arith.constant 0 : i32
    %c0_i32_1 = arith.constant 0 : i32
    return %c0_i32, %c0_i32_0 : i32, i32
  }
  func.func @transform_5(%arg0: i32, %arg1: i32) -> (i32, i32) {
    %c1_i32 = arith.constant 1 : i32
    %0 = arith.muli %arg0, %c1_i32 : i32
    %1 = arith.addi %0, %arg1 : i32
    %c0_i32 = arith.constant 0 : i32
    %c0_i32_0 = arith.constant 0 : i32
    return %1, %c0_i32 : i32, i32
  }
}

module attributes {stable_mosaic.version = 11 : i64} {
  func.func @_mhsa_kernel(%arg0: i32, %arg1: i32, %arg2: memref<32x512xbf16, #tpu.memory_space<vmem>>, %arg3: memref<512x1536xbf16, #tpu.memory_space<vmem>>, %arg4: memref<1x1536xf32, #tpu.memory_space<vmem>>, %arg5: memref<512x512xbf16, #tpu.memory_space<vmem>>, %arg6: memref<1x512xf32, #tpu.memory_space<vmem>>, %arg7: memref<32x512xf32, #tpu.memory_space<vmem>>, %arg8: memref<32x512xbf16, #tpu.memory_space<vmem>>, %arg9: memref<32x512xbf16, #tpu.memory_space<vmem>>, %arg10: memref<32x512xbf16, #tpu.memory_space<vmem>>, %arg11: memref<32x512xbf16, #tpu.memory_space<vmem>>) attributes {dimension_semantics = [#tpu.dimension_semantics<parallel>, #tpu.dimension_semantics<arbitrary>], iteration_bounds = array<i64: 1, 1>, scalar_prefetch = 0 : i64, scratch_operands = 4 : i64, tpu.core_type = #tpu.core_type<tc>, window_params = [{transform_indices = @transform_0, window_bounds = array<i64: 32, 512>}, {pipeline_mode = #tpu.pipeline_mode<synchronous>, transform_indices = @transform_1, window_bounds = array<i64: 512, 1536>}, {pipeline_mode = #tpu.pipeline_mode<synchronous>, transform_indices = @transform_2, window_bounds = array<i64: 1, 1536>}, {pipeline_mode = #tpu.pipeline_mode<synchronous>, transform_indices = @transform_3, window_bounds = array<i64: 512, 512>}, {pipeline_mode = #tpu.pipeline_mode<synchronous>, transform_indices = @transform_4, window_bounds = array<i64: 1, 512>}, {transform_indices = @transform_5, window_bounds = array<i64: 32, 512>}]} {
    %c0_i32 = arith.constant 0 : i32
    %0 = arith.cmpi eq, %arg1, %c0_i32 : i32
    %1 = arith.extui %0 : i1 to i32
    %c0_i32_0 = arith.constant 0 : i32
    %2 = arith.cmpi ne, %1, %c0_i32_0 : i32
    scf.if %2 {
      %c0_200 = arith.constant 0 : index
      %c0_201 = arith.constant 0 : index
      %309 = vector.load %arg2[%c0_200, %c0_201] : memref<32x512xbf16, #tpu.memory_space<vmem>>, vector<32x512xbf16>
      %c0_202 = arith.constant 0 : index
      %c512 = arith.constant 512 : index
      %310 = vector.load %arg3[%c0_202, %c512] : memref<512x1536xbf16, #tpu.memory_space<vmem>>, vector<512x512xbf16>
      %cst_203 = arith.constant dense<0.000000e+00> : vector<32x512xf32>
      %311 = tpu.matmul %309, %310, %cst_203 {dimension_numbers = #tpu.dot_dimension_numbers<[1], [0], [0], [1], [0, 0, 1, 1], [], []>} : vector<32x512xbf16>, vector<512x512xbf16>, vector<32x512xf32> -> vector<32x512xf32>
      %c0_204 = arith.constant 0 : index
      %c512_205 = arith.constant 512 : index
      %312 = vector.load %arg4[%c0_204, %c512_205] : memref<1x1536xf32, #tpu.memory_space<vmem>>, vector<1x512xf32>
      %313 = vector.broadcast %312 : vector<1x512xf32> to vector<32x512xf32>
      %314 = arith.addf %311, %313 : vector<32x512xf32>
      %315 = arith.truncf %314 : vector<32x512xf32> to vector<32x512xbf16>
      %c0_206 = arith.constant 0 : index
      %c0_207 = arith.constant 0 : index
      %316 = vector.load %arg8[%c0_206, %c0_207] : memref<32x512xbf16, #tpu.memory_space<vmem>>, vector<32x512xbf16>
      tpu.vector_store %arg8[%c0_206, %c0_207], %315 {strides = array<i32>} : memref<32x512xbf16, #tpu.memory_space<vmem>>, vector<32x512xbf16>,
      %c0_208 = arith.constant 0 : index
      %c1024 = arith.constant 1024 : index
      %317 = vector.load %arg3[%c0_208, %c1024] : memref<512x1536xbf16, #tpu.memory_space<vmem>>, vector<512x512xbf16>
      %cst_209 = arith.constant dense<0.000000e+00> : vector<32x512xf32>
      %318 = tpu.matmul %309, %317, %cst_209 {dimension_numbers = #tpu.dot_dimension_numbers<[1], [0], [0], [1], [0, 0, 1, 1], [], []>} : vector<32x512xbf16>, vector<512x512xbf16>, vector<32x512xf32> -> vector<32x512xf32>
      %c0_210 = arith.constant 0 : index
      %c1024_211 = arith.constant 1024 : index
      %319 = vector.load %arg4[%c0_210, %c1024_211] : memref<1x1536xf32, #tpu.memory_space<vmem>>, vector<1x512xf32>
      %320 = vector.broadcast %319 : vector<1x512xf32> to vector<32x512xf32>
      %321 = arith.addf %318, %320 : vector<32x512xf32>
      %322 = arith.truncf %321 : vector<32x512xf32> to vector<32x512xbf16>
      %c0_212 = arith.constant 0 : index
      %c0_213 = arith.constant 0 : index
      %323 = vector.load %arg9[%c0_212, %c0_213] : memref<32x512xbf16, #tpu.memory_space<vmem>>, vector<32x512xbf16>
      tpu.vector_store %arg9[%c0_212, %c0_213], %322 {strides = array<i32>} : memref<32x512xbf16, #tpu.memory_space<vmem>>, vector<32x512xbf16>,
    } else {
    }
    %c32_i32 = arith.constant 32 : i32
    %3 = arith.muli %arg1, %c32_i32 : i32
    %4 = tpu.assume_multiple %3, 32 : i32
    %5 = arith.index_cast %4 : i32 to index
    %c0 = arith.constant 0 : index
    %6 = vector.load %arg2[%5, %c0] : memref<32x512xbf16, #tpu.memory_space<vmem>>, vector<32x512xbf16>
    %c0_1 = arith.constant 0 : index
    %c0_2 = arith.constant 0 : index
    %7 = vector.load %arg3[%c0_1, %c0_2] : memref<512x1536xbf16, #tpu.memory_space<vmem>>, vector<512x512xbf16>
    %cst = arith.constant dense<0.000000e+00> : vector<32x512xf32>
    %8 = tpu.matmul %6, %7, %cst {dimension_numbers = #tpu.dot_dimension_numbers<[1], [0], [0], [1], [0, 0, 1, 1], [], []>} : vector<32x512xbf16>, vector<512x512xbf16>, vector<32x512xf32> -> vector<32x512xf32>
    %c0_3 = arith.constant 0 : index
    %c0_4 = arith.constant 0 : index
    %9 = vector.load %arg4[%c0_3, %c0_4] : memref<1x1536xf32, #tpu.memory_space<vmem>>, vector<1x512xf32>
    %10 = vector.broadcast %9 : vector<1x512xf32> to vector<32x512xf32>
    %11 = arith.addf %8, %10 : vector<32x512xf32>
    %12 = arith.truncf %11 : vector<32x512xf32> to vector<32x512xbf16>
    %c0_5 = arith.constant 0 : index
    %c0_6 = arith.constant 0 : index
    %13 = vector.load %arg10[%c0_5, %c0_6] : memref<32x512xbf16, #tpu.memory_space<vmem>>, vector<32x512xbf16>
    tpu.vector_store %arg10[%c0_5, %c0_6], %12 {strides = array<i32>} : memref<32x512xbf16, #tpu.memory_space<vmem>>, vector<32x512xbf16>,
    %c0_7 = arith.constant 0 : index
    %c0_8 = arith.constant 0 : index
    %14 = vector.load %arg10[%c0_7, %c0_8] : memref<32x512xbf16, #tpu.memory_space<vmem>>, vector<16x64xbf16>
    %c0_9 = arith.constant 0 : index
    %c0_10 = arith.constant 0 : index
    %15 = vector.load %arg8[%c0_9, %c0_10] : memref<32x512xbf16, #tpu.memory_space<vmem>>, vector<16x64xbf16>
    %c0_11 = arith.constant 0 : index
    %c0_12 = arith.constant 0 : index
    %16 = vector.load %arg9[%c0_11, %c0_12] : memref<32x512xbf16, #tpu.memory_space<vmem>>, vector<16x64xbf16>
    %cst_13 = arith.constant dense<0.000000e+00> : vector<16x16xf32>
    %17 = tpu.matmul %14, %15, %cst_13 {dimension_numbers = #tpu.dot_dimension_numbers<[1], [1], [0], [0], [0, 0, 1, 0], [], []>} : vector<16x64xbf16>, vector<16x64xbf16>, vector<16x16xf32> -> vector<16x16xf32>
    %cst_14 = arith.constant dense<0xFF800000> : vector<16xf32>
    %18 = vector.multi_reduction <maximumf>, %17, %cst_14 [1] : vector<16x16xf32> to vector<16xf32>
    %19 = vector.shape_cast %18 : vector<16xf32> to vector<16x1xf32>
    %20 = vector.broadcast %19 : vector<16x1xf32> to vector<16x16xf32>
    %21 = arith.subf %17, %20 : vector<16x16xf32>
    %22 = math.exp %21 : vector<16x16xf32>
    %cst_15 = arith.constant dense<0.000000e+00> : vector<16xf32>
    %23 = vector.multi_reduction <add>, %22, %cst_15 [1] : vector<16x16xf32> to vector<16xf32>
    %24 = vector.shape_cast %23 : vector<16xf32> to vector<16x1xf32>
    %25 = tpu.reciprocal %24 {approx = true} : vector<16x1xf32> -> vector<16x1xf32>
    %26 = arith.truncf %22 : vector<16x16xf32> to vector<16x16xbf16>
    %cst_16 = arith.constant dense<0.000000e+00> : vector<16x64xf32>
    %27 = tpu.matmul %26, %16, %cst_16 {dimension_numbers = #tpu.dot_dimension_numbers<[1], [0], [0], [1], [0, 0, 1, 1], [], []>} : vector<16x16xbf16>, vector<16x64xbf16>, vector<16x64xf32> -> vector<16x64xf32>
    %28 = vector.broadcast %25 : vector<16x1xf32> to vector<16x64xf32>
    %29 = arith.mulf %27, %28 : vector<16x64xf32>
    %30 = arith.truncf %29 : vector<16x64xf32> to vector<16x64xbf16>
    %c0_17 = arith.constant 0 : index
    %c0_18 = arith.constant 0 : index
    %31 = vector.load %arg11[%c0_17, %c0_18] : memref<32x512xbf16, #tpu.memory_space<vmem>>, vector<16x64xbf16>
    tpu.vector_store %arg11[%c0_17, %c0_18], %30 {strides = array<i32>} : memref<32x512xbf16, #tpu.memory_space<vmem>>, vector<16x64xbf16>,
    %c0_19 = arith.constant 0 : index
    %c64 = arith.constant 64 : index
    %32 = vector.load %arg10[%c0_19, %c64] : memref<32x512xbf16, #tpu.memory_space<vmem>>, vector<16x64xbf16>
    %c0_20 = arith.constant 0 : index
    %c64_21 = arith.constant 64 : index
    %33 = vector.load %arg8[%c0_20, %c64_21] : memref<32x512xbf16, #tpu.memory_space<vmem>>, vector<16x64xbf16>
    %c0_22 = arith.constant 0 : index
    %c64_23 = arith.constant 64 : index
    %34 = vector.load %arg9[%c0_22, %c64_23] : memref<32x512xbf16, #tpu.memory_space<vmem>>, vector<16x64xbf16>
    %cst_24 = arith.constant dense<0.000000e+00> : vector<16x16xf32>
    %35 = tpu.matmul %32, %33, %cst_24 {dimension_numbers = #tpu.dot_dimension_numbers<[1], [1], [0], [0], [0, 0, 1, 0], [], []>} : vector<16x64xbf16>, vector<16x64xbf16>, vector<16x16xf32> -> vector<16x16xf32>
    %cst_25 = arith.constant dense<0xFF800000> : vector<16xf32>
    %36 = vector.multi_reduction <maximumf>, %35, %cst_25 [1] : vector<16x16xf32> to vector<16xf32>
    %37 = vector.shape_cast %36 : vector<16xf32> to vector<16x1xf32>
    %38 = vector.broadcast %37 : vector<16x1xf32> to vector<16x16xf32>
    %39 = arith.subf %35, %38 : vector<16x16xf32>
    %40 = math.exp %39 : vector<16x16xf32>
    %cst_26 = arith.constant dense<0.000000e+00> : vector<16xf32>
    %41 = vector.multi_reduction <add>, %40, %cst_26 [1] : vector<16x16xf32> to vector<16xf32>
    %42 = vector.shape_cast %41 : vector<16xf32> to vector<16x1xf32>
    %43 = tpu.reciprocal %42 {approx = true} : vector<16x1xf32> -> vector<16x1xf32>
    %44 = arith.truncf %40 : vector<16x16xf32> to vector<16x16xbf16>
    %cst_27 = arith.constant dense<0.000000e+00> : vector<16x64xf32>
    %45 = tpu.matmul %44, %34, %cst_27 {dimension_numbers = #tpu.dot_dimension_numbers<[1], [0], [0], [1], [0, 0, 1, 1], [], []>} : vector<16x16xbf16>, vector<16x64xbf16>, vector<16x64xf32> -> vector<16x64xf32>
    %46 = vector.broadcast %43 : vector<16x1xf32> to vector<16x64xf32>
    %47 = arith.mulf %45, %46 : vector<16x64xf32>
    %48 = arith.truncf %47 : vector<16x64xf32> to vector<16x64xbf16>
    %c0_28 = arith.constant 0 : index
    %c64_29 = arith.constant 64 : index
    %49 = vector.load %arg11[%c0_28, %c64_29] : memref<32x512xbf16, #tpu.memory_space<vmem>>, vector<16x64xbf16>
    tpu.vector_store %arg11[%c0_28, %c64_29], %48 {strides = array<i32>} : memref<32x512xbf16, #tpu.memory_space<vmem>>, vector<16x64xbf16>,
    %c0_30 = arith.constant 0 : index
    %c128 = arith.constant 128 : index
    %50 = vector.load %arg10[%c0_30, %c128] : memref<32x512xbf16, #tpu.memory_space<vmem>>, vector<16x64xbf16>
    %c0_31 = arith.constant 0 : index
    %c128_32 = arith.constant 128 : index
    %51 = vector.load %arg8[%c0_31, %c128_32] : memref<32x512xbf16, #tpu.memory_space<vmem>>, vector<16x64xbf16>
    %c0_33 = arith.constant 0 : index
    %c128_34 = arith.constant 128 : index
    %52 = vector.load %arg9[%c0_33, %c128_34] : memref<32x512xbf16, #tpu.memory_space<vmem>>, vector<16x64xbf16>
    %cst_35 = arith.constant dense<0.000000e+00> : vector<16x16xf32>
    %53 = tpu.matmul %50, %51, %cst_35 {dimension_numbers = #tpu.dot_dimension_numbers<[1], [1], [0], [0], [0, 0, 1, 0], [], []>} : vector<16x64xbf16>, vector<16x64xbf16>, vector<16x16xf32> -> vector<16x16xf32>
    %cst_36 = arith.constant dense<0xFF800000> : vector<16xf32>
    %54 = vector.multi_reduction <maximumf>, %53, %cst_36 [1] : vector<16x16xf32> to vector<16xf32>
    %55 = vector.shape_cast %54 : vector<16xf32> to vector<16x1xf32>
    %56 = vector.broadcast %55 : vector<16x1xf32> to vector<16x16xf32>
    %57 = arith.subf %53, %56 : vector<16x16xf32>
    %58 = math.exp %57 : vector<16x16xf32>
    %cst_37 = arith.constant dense<0.000000e+00> : vector<16xf32>
    %59 = vector.multi_reduction <add>, %58, %cst_37 [1] : vector<16x16xf32> to vector<16xf32>
    %60 = vector.shape_cast %59 : vector<16xf32> to vector<16x1xf32>
    %61 = tpu.reciprocal %60 {approx = true} : vector<16x1xf32> -> vector<16x1xf32>
    %62 = arith.truncf %58 : vector<16x16xf32> to vector<16x16xbf16>
    %cst_38 = arith.constant dense<0.000000e+00> : vector<16x64xf32>
    %63 = tpu.matmul %62, %52, %cst_38 {dimension_numbers = #tpu.dot_dimension_numbers<[1], [0], [0], [1], [0, 0, 1, 1], [], []>} : vector<16x16xbf16>, vector<16x64xbf16>, vector<16x64xf32> -> vector<16x64xf32>
    %64 = vector.broadcast %61 : vector<16x1xf32> to vector<16x64xf32>
    %65 = arith.mulf %63, %64 : vector<16x64xf32>
    %66 = arith.truncf %65 : vector<16x64xf32> to vector<16x64xbf16>
    %c0_39 = arith.constant 0 : index
    %c128_40 = arith.constant 128 : index
    %67 = vector.load %arg11[%c0_39, %c128_40] : memref<32x512xbf16, #tpu.memory_space<vmem>>, vector<16x64xbf16>
    tpu.vector_store %arg11[%c0_39, %c128_40], %66 {strides = array<i32>} : memref<32x512xbf16, #tpu.memory_space<vmem>>, vector<16x64xbf16>,
    %c0_41 = arith.constant 0 : index
    %c192 = arith.constant 192 : index
    %68 = vector.load %arg10[%c0_41, %c192] : memref<32x512xbf16, #tpu.memory_space<vmem>>, vector<16x64xbf16>
    %c0_42 = arith.constant 0 : index
    %c192_43 = arith.constant 192 : index
    %69 = vector.load %arg8[%c0_42, %c192_43] : memref<32x512xbf16, #tpu.memory_space<vmem>>, vector<16x64xbf16>
    %c0_44 = arith.constant 0 : index
    %c192_45 = arith.constant 192 : index
    %70 = vector.load %arg9[%c0_44, %c192_45] : memref<32x512xbf16, #tpu.memory_space<vmem>>, vector<16x64xbf16>
    %cst_46 = arith.constant dense<0.000000e+00> : vector<16x16xf32>
    %71 = tpu.matmul %68, %69, %cst_46 {dimension_numbers = #tpu.dot_dimension_numbers<[1], [1], [0], [0], [0, 0, 1, 0], [], []>} : vector<16x64xbf16>, vector<16x64xbf16>, vector<16x16xf32> -> vector<16x16xf32>
    %cst_47 = arith.constant dense<0xFF800000> : vector<16xf32>
    %72 = vector.multi_reduction <maximumf>, %71, %cst_47 [1] : vector<16x16xf32> to vector<16xf32>
    %73 = vector.shape_cast %72 : vector<16xf32> to vector<16x1xf32>
    %74 = vector.broadcast %73 : vector<16x1xf32> to vector<16x16xf32>
    %75 = arith.subf %71, %74 : vector<16x16xf32>
    %76 = math.exp %75 : vector<16x16xf32>
    %cst_48 = arith.constant dense<0.000000e+00> : vector<16xf32>
    %77 = vector.multi_reduction <add>, %76, %cst_48 [1] : vector<16x16xf32> to vector<16xf32>
    %78 = vector.shape_cast %77 : vector<16xf32> to vector<16x1xf32>
    %79 = tpu.reciprocal %78 {approx = true} : vector<16x1xf32> -> vector<16x1xf32>
    %80 = arith.truncf %76 : vector<16x16xf32> to vector<16x16xbf16>
    %cst_49 = arith.constant dense<0.000000e+00> : vector<16x64xf32>
    %81 = tpu.matmul %80, %70, %cst_49 {dimension_numbers = #tpu.dot_dimension_numbers<[1], [0], [0], [1], [0, 0, 1, 1], [], []>} : vector<16x16xbf16>, vector<16x64xbf16>, vector<16x64xf32> -> vector<16x64xf32>
    %82 = vector.broadcast %79 : vector<16x1xf32> to vector<16x64xf32>
    %83 = arith.mulf %81, %82 : vector<16x64xf32>
    %84 = arith.truncf %83 : vector<16x64xf32> to vector<16x64xbf16>
    %c0_50 = arith.constant 0 : index
    %c192_51 = arith.constant 192 : index
    %85 = vector.load %arg11[%c0_50, %c192_51] : memref<32x512xbf16, #tpu.memory_space<vmem>>, vector<16x64xbf16>
    tpu.vector_store %arg11[%c0_50, %c192_51], %84 {strides = array<i32>} : memref<32x512xbf16, #tpu.memory_space<vmem>>, vector<16x64xbf16>,
    %c0_52 = arith.constant 0 : index
    %c256 = arith.constant 256 : index
    %86 = vector.load %arg10[%c0_52, %c256] : memref<32x512xbf16, #tpu.memory_space<vmem>>, vector<16x64xbf16>
    %c0_53 = arith.constant 0 : index
    %c256_54 = arith.constant 256 : index
    %87 = vector.load %arg8[%c0_53, %c256_54] : memref<32x512xbf16, #tpu.memory_space<vmem>>, vector<16x64xbf16>
    %c0_55 = arith.constant 0 : index
    %c256_56 = arith.constant 256 : index
    %88 = vector.load %arg9[%c0_55, %c256_56] : memref<32x512xbf16, #tpu.memory_space<vmem>>, vector<16x64xbf16>
    %cst_57 = arith.constant dense<0.000000e+00> : vector<16x16xf32>
    %89 = tpu.matmul %86, %87, %cst_57 {dimension_numbers = #tpu.dot_dimension_numbers<[1], [1], [0], [0], [0, 0, 1, 0], [], []>} : vector<16x64xbf16>, vector<16x64xbf16>, vector<16x16xf32> -> vector<16x16xf32>
    %cst_58 = arith.constant dense<0xFF800000> : vector<16xf32>
    %90 = vector.multi_reduction <maximumf>, %89, %cst_58 [1] : vector<16x16xf32> to vector<16xf32>
    %91 = vector.shape_cast %90 : vector<16xf32> to vector<16x1xf32>
    %92 = vector.broadcast %91 : vector<16x1xf32> to vector<16x16xf32>
    %93 = arith.subf %89, %92 : vector<16x16xf32>
    %94 = math.exp %93 : vector<16x16xf32>
    %cst_59 = arith.constant dense<0.000000e+00> : vector<16xf32>
    %95 = vector.multi_reduction <add>, %94, %cst_59 [1] : vector<16x16xf32> to vector<16xf32>
    %96 = vector.shape_cast %95 : vector<16xf32> to vector<16x1xf32>
    %97 = tpu.reciprocal %96 {approx = true} : vector<16x1xf32> -> vector<16x1xf32>
    %98 = arith.truncf %94 : vector<16x16xf32> to vector<16x16xbf16>
    %cst_60 = arith.constant dense<0.000000e+00> : vector<16x64xf32>
    %99 = tpu.matmul %98, %88, %cst_60 {dimension_numbers = #tpu.dot_dimension_numbers<[1], [0], [0], [1], [0, 0, 1, 1], [], []>} : vector<16x16xbf16>, vector<16x64xbf16>, vector<16x64xf32> -> vector<16x64xf32>
    %100 = vector.broadcast %97 : vector<16x1xf32> to vector<16x64xf32>
    %101 = arith.mulf %99, %100 : vector<16x64xf32>
    %102 = arith.truncf %101 : vector<16x64xf32> to vector<16x64xbf16>
    %c0_61 = arith.constant 0 : index
    %c256_62 = arith.constant 256 : index
    %103 = vector.load %arg11[%c0_61, %c256_62] : memref<32x512xbf16, #tpu.memory_space<vmem>>, vector<16x64xbf16>
    tpu.vector_store %arg11[%c0_61, %c256_62], %102 {strides = array<i32>} : memref<32x512xbf16, #tpu.memory_space<vmem>>, vector<16x64xbf16>,
    %c0_63 = arith.constant 0 : index
    %c320 = arith.constant 320 : index
    %104 = vector.load %arg10[%c0_63, %c320] : memref<32x512xbf16, #tpu.memory_space<vmem>>, vector<16x64xbf16>
    %c0_64 = arith.constant 0 : index
    %c320_65 = arith.constant 320 : index
    %105 = vector.load %arg8[%c0_64, %c320_65] : memref<32x512xbf16, #tpu.memory_space<vmem>>, vector<16x64xbf16>
    %c0_66 = arith.constant 0 : index
    %c320_67 = arith.constant 320 : index
    %106 = vector.load %arg9[%c0_66, %c320_67] : memref<32x512xbf16, #tpu.memory_space<vmem>>, vector<16x64xbf16>
    %cst_68 = arith.constant dense<0.000000e+00> : vector<16x16xf32>
    %107 = tpu.matmul %104, %105, %cst_68 {dimension_numbers = #tpu.dot_dimension_numbers<[1], [1], [0], [0], [0, 0, 1, 0], [], []>} : vector<16x64xbf16>, vector<16x64xbf16>, vector<16x16xf32> -> vector<16x16xf32>
    %cst_69 = arith.constant dense<0xFF800000> : vector<16xf32>
    %108 = vector.multi_reduction <maximumf>, %107, %cst_69 [1] : vector<16x16xf32> to vector<16xf32>
    %109 = vector.shape_cast %108 : vector<16xf32> to vector<16x1xf32>
    %110 = vector.broadcast %109 : vector<16x1xf32> to vector<16x16xf32>
    %111 = arith.subf %107, %110 : vector<16x16xf32>
    %112 = math.exp %111 : vector<16x16xf32>
    %cst_70 = arith.constant dense<0.000000e+00> : vector<16xf32>
    %113 = vector.multi_reduction <add>, %112, %cst_70 [1] : vector<16x16xf32> to vector<16xf32>
    %114 = vector.shape_cast %113 : vector<16xf32> to vector<16x1xf32>
    %115 = tpu.reciprocal %114 {approx = true} : vector<16x1xf32> -> vector<16x1xf32>
    %116 = arith.truncf %112 : vector<16x16xf32> to vector<16x16xbf16>
    %cst_71 = arith.constant dense<0.000000e+00> : vector<16x64xf32>
    %117 = tpu.matmul %116, %106, %cst_71 {dimension_numbers = #tpu.dot_dimension_numbers<[1], [0], [0], [1], [0, 0, 1, 1], [], []>} : vector<16x16xbf16>, vector<16x64xbf16>, vector<16x64xf32> -> vector<16x64xf32>
    %118 = vector.broadcast %115 : vector<16x1xf32> to vector<16x64xf32>
    %119 = arith.mulf %117, %118 : vector<16x64xf32>
    %120 = arith.truncf %119 : vector<16x64xf32> to vector<16x64xbf16>
    %c0_72 = arith.constant 0 : index
    %c320_73 = arith.constant 320 : index
    %121 = vector.load %arg11[%c0_72, %c320_73] : memref<32x512xbf16, #tpu.memory_space<vmem>>, vector<16x64xbf16>
    tpu.vector_store %arg11[%c0_72, %c320_73], %120 {strides = array<i32>} : memref<32x512xbf16, #tpu.memory_space<vmem>>, vector<16x64xbf16>,
    %c0_74 = arith.constant 0 : index
    %c384 = arith.constant 384 : index
    %122 = vector.load %arg10[%c0_74, %c384] : memref<32x512xbf16, #tpu.memory_space<vmem>>, vector<16x64xbf16>
    %c0_75 = arith.constant 0 : index
    %c384_76 = arith.constant 384 : index
    %123 = vector.load %arg8[%c0_75, %c384_76] : memref<32x512xbf16, #tpu.memory_space<vmem>>, vector<16x64xbf16>
    %c0_77 = arith.constant 0 : index
    %c384_78 = arith.constant 384 : index
    %124 = vector.load %arg9[%c0_77, %c384_78] : memref<32x512xbf16, #tpu.memory_space<vmem>>, vector<16x64xbf16>
    %cst_79 = arith.constant dense<0.000000e+00> : vector<16x16xf32>
    %125 = tpu.matmul %122, %123, %cst_79 {dimension_numbers = #tpu.dot_dimension_numbers<[1], [1], [0], [0], [0, 0, 1, 0], [], []>} : vector<16x64xbf16>, vector<16x64xbf16>, vector<16x16xf32> -> vector<16x16xf32>
    %cst_80 = arith.constant dense<0xFF800000> : vector<16xf32>
    %126 = vector.multi_reduction <maximumf>, %125, %cst_80 [1] : vector<16x16xf32> to vector<16xf32>
    %127 = vector.shape_cast %126 : vector<16xf32> to vector<16x1xf32>
    %128 = vector.broadcast %127 : vector<16x1xf32> to vector<16x16xf32>
    %129 = arith.subf %125, %128 : vector<16x16xf32>
    %130 = math.exp %129 : vector<16x16xf32>
    %cst_81 = arith.constant dense<0.000000e+00> : vector<16xf32>
    %131 = vector.multi_reduction <add>, %130, %cst_81 [1] : vector<16x16xf32> to vector<16xf32>
    %132 = vector.shape_cast %131 : vector<16xf32> to vector<16x1xf32>
    %133 = tpu.reciprocal %132 {approx = true} : vector<16x1xf32> -> vector<16x1xf32>
    %134 = arith.truncf %130 : vector<16x16xf32> to vector<16x16xbf16>
    %cst_82 = arith.constant dense<0.000000e+00> : vector<16x64xf32>
    %135 = tpu.matmul %134, %124, %cst_82 {dimension_numbers = #tpu.dot_dimension_numbers<[1], [0], [0], [1], [0, 0, 1, 1], [], []>} : vector<16x16xbf16>, vector<16x64xbf16>, vector<16x64xf32> -> vector<16x64xf32>
    %136 = vector.broadcast %133 : vector<16x1xf32> to vector<16x64xf32>
    %137 = arith.mulf %135, %136 : vector<16x64xf32>
    %138 = arith.truncf %137 : vector<16x64xf32> to vector<16x64xbf16>
    %c0_83 = arith.constant 0 : index
    %c384_84 = arith.constant 384 : index
    %139 = vector.load %arg11[%c0_83, %c384_84] : memref<32x512xbf16, #tpu.memory_space<vmem>>, vector<16x64xbf16>
    tpu.vector_store %arg11[%c0_83, %c384_84], %138 {strides = array<i32>} : memref<32x512xbf16, #tpu.memory_space<vmem>>, vector<16x64xbf16>,
    %c0_85 = arith.constant 0 : index
    %c448 = arith.constant 448 : index
    %140 = vector.load %arg10[%c0_85, %c448] : memref<32x512xbf16, #tpu.memory_space<vmem>>, vector<16x64xbf16>
    %c0_86 = arith.constant 0 : index
    %c448_87 = arith.constant 448 : index
    %141 = vector.load %arg8[%c0_86, %c448_87] : memref<32x512xbf16, #tpu.memory_space<vmem>>, vector<16x64xbf16>
    %c0_88 = arith.constant 0 : index
    %c448_89 = arith.constant 448 : index
    %142 = vector.load %arg9[%c0_88, %c448_89] : memref<32x512xbf16, #tpu.memory_space<vmem>>, vector<16x64xbf16>
    %cst_90 = arith.constant dense<0.000000e+00> : vector<16x16xf32>
    %143 = tpu.matmul %140, %141, %cst_90 {dimension_numbers = #tpu.dot_dimension_numbers<[1], [1], [0], [0], [0, 0, 1, 0], [], []>} : vector<16x64xbf16>, vector<16x64xbf16>, vector<16x16xf32> -> vector<16x16xf32>
    %cst_91 = arith.constant dense<0xFF800000> : vector<16xf32>
    %144 = vector.multi_reduction <maximumf>, %143, %cst_91 [1] : vector<16x16xf32> to vector<16xf32>
    %145 = vector.shape_cast %144 : vector<16xf32> to vector<16x1xf32>
    %146 = vector.broadcast %145 : vector<16x1xf32> to vector<16x16xf32>
    %147 = arith.subf %143, %146 : vector<16x16xf32>
    %148 = math.exp %147 : vector<16x16xf32>
    %cst_92 = arith.constant dense<0.000000e+00> : vector<16xf32>
    %149 = vector.multi_reduction <add>, %148, %cst_92 [1] : vector<16x16xf32> to vector<16xf32>
    %150 = vector.shape_cast %149 : vector<16xf32> to vector<16x1xf32>
    %151 = tpu.reciprocal %150 {approx = true} : vector<16x1xf32> -> vector<16x1xf32>
    %152 = arith.truncf %148 : vector<16x16xf32> to vector<16x16xbf16>
    %cst_93 = arith.constant dense<0.000000e+00> : vector<16x64xf32>
    %153 = tpu.matmul %152, %142, %cst_93 {dimension_numbers = #tpu.dot_dimension_numbers<[1], [0], [0], [1], [0, 0, 1, 1], [], []>} : vector<16x16xbf16>, vector<16x64xbf16>, vector<16x64xf32> -> vector<16x64xf32>
    %154 = vector.broadcast %151 : vector<16x1xf32> to vector<16x64xf32>
    %155 = arith.mulf %153, %154 : vector<16x64xf32>
    %156 = arith.truncf %155 : vector<16x64xf32> to vector<16x64xbf16>
    %c0_94 = arith.constant 0 : index
    %c448_95 = arith.constant 448 : index
    %157 = vector.load %arg11[%c0_94, %c448_95] : memref<32x512xbf16, #tpu.memory_space<vmem>>, vector<16x64xbf16>
    tpu.vector_store %arg11[%c0_94, %c448_95], %156 {strides = array<i32>} : memref<32x512xbf16, #tpu.memory_space<vmem>>, vector<16x64xbf16>,
    %c16 = arith.constant 16 : index
    %c0_96 = arith.constant 0 : index
    %158 = vector.load %arg10[%c16, %c0_96] : memref<32x512xbf16, #tpu.memory_space<vmem>>, vector<16x64xbf16>
    %c16_97 = arith.constant 16 : index
    %c0_98 = arith.constant 0 : index
    %159 = vector.load %arg8[%c16_97, %c0_98] : memref<32x512xbf16, #tpu.memory_space<vmem>>, vector<16x64xbf16>
    %c16_99 = arith.constant 16 : index
    %c0_100 = arith.constant 0 : index
    %160 = vector.load %arg9[%c16_99, %c0_100] : memref<32x512xbf16, #tpu.memory_space<vmem>>, vector<16x64xbf16>
    %cst_101 = arith.constant dense<0.000000e+00> : vector<16x16xf32>
    %161 = tpu.matmul %158, %159, %cst_101 {dimension_numbers = #tpu.dot_dimension_numbers<[1], [1], [0], [0], [0, 0, 1, 0], [], []>} : vector<16x64xbf16>, vector<16x64xbf16>, vector<16x16xf32> -> vector<16x16xf32>
    %cst_102 = arith.constant dense<0xFF800000> : vector<16xf32>
    %162 = vector.multi_reduction <maximumf>, %161, %cst_102 [1] : vector<16x16xf32> to vector<16xf32>
    %163 = vector.shape_cast %162 : vector<16xf32> to vector<16x1xf32>
    %164 = vector.broadcast %163 : vector<16x1xf32> to vector<16x16xf32>
    %165 = arith.subf %161, %164 : vector<16x16xf32>
    %166 = math.exp %165 : vector<16x16xf32>
    %cst_103 = arith.constant dense<0.000000e+00> : vector<16xf32>
    %167 = vector.multi_reduction <add>, %166, %cst_103 [1] : vector<16x16xf32> to vector<16xf32>
    %168 = vector.shape_cast %167 : vector<16xf32> to vector<16x1xf32>
    %169 = tpu.reciprocal %168 {approx = true} : vector<16x1xf32> -> vector<16x1xf32>
    %170 = arith.truncf %166 : vector<16x16xf32> to vector<16x16xbf16>
    %cst_104 = arith.constant dense<0.000000e+00> : vector<16x64xf32>
    %171 = tpu.matmul %170, %160, %cst_104 {dimension_numbers = #tpu.dot_dimension_numbers<[1], [0], [0], [1], [0, 0, 1, 1], [], []>} : vector<16x16xbf16>, vector<16x64xbf16>, vector<16x64xf32> -> vector<16x64xf32>
    %172 = vector.broadcast %169 : vector<16x1xf32> to vector<16x64xf32>
    %173 = arith.mulf %171, %172 : vector<16x64xf32>
    %174 = arith.truncf %173 : vector<16x64xf32> to vector<16x64xbf16>
    %c16_105 = arith.constant 16 : index
    %c0_106 = arith.constant 0 : index
    %175 = vector.load %arg11[%c16_105, %c0_106] : memref<32x512xbf16, #tpu.memory_space<vmem>>, vector<16x64xbf16>
    tpu.vector_store %arg11[%c16_105, %c0_106], %174 {strides = array<i32>} : memref<32x512xbf16, #tpu.memory_space<vmem>>, vector<16x64xbf16>,
    %c16_107 = arith.constant 16 : index
    %c64_108 = arith.constant 64 : index
    %176 = vector.load %arg10[%c16_107, %c64_108] : memref<32x512xbf16, #tpu.memory_space<vmem>>, vector<16x64xbf16>
    %c16_109 = arith.constant 16 : index
    %c64_110 = arith.constant 64 : index
    %177 = vector.load %arg8[%c16_109, %c64_110] : memref<32x512xbf16, #tpu.memory_space<vmem>>, vector<16x64xbf16>
    %c16_111 = arith.constant 16 : index
    %c64_112 = arith.constant 64 : index
    %178 = vector.load %arg9[%c16_111, %c64_112] : memref<32x512xbf16, #tpu.memory_space<vmem>>, vector<16x64xbf16>
    %cst_113 = arith.constant dense<0.000000e+00> : vector<16x16xf32>
    %179 = tpu.matmul %176, %177, %cst_113 {dimension_numbers = #tpu.dot_dimension_numbers<[1], [1], [0], [0], [0, 0, 1, 0], [], []>} : vector<16x64xbf16>, vector<16x64xbf16>, vector<16x16xf32> -> vector<16x16xf32>
    %cst_114 = arith.constant dense<0xFF800000> : vector<16xf32>
    %180 = vector.multi_reduction <maximumf>, %179, %cst_114 [1] : vector<16x16xf32> to vector<16xf32>
    %181 = vector.shape_cast %180 : vector<16xf32> to vector<16x1xf32>
    %182 = vector.broadcast %181 : vector<16x1xf32> to vector<16x16xf32>
    %183 = arith.subf %179, %182 : vector<16x16xf32>
    %184 = math.exp %183 : vector<16x16xf32>
    %cst_115 = arith.constant dense<0.000000e+00> : vector<16xf32>
    %185 = vector.multi_reduction <add>, %184, %cst_115 [1] : vector<16x16xf32> to vector<16xf32>
    %186 = vector.shape_cast %185 : vector<16xf32> to vector<16x1xf32>
    %187 = tpu.reciprocal %186 {approx = true} : vector<16x1xf32> -> vector<16x1xf32>
    %188 = arith.truncf %184 : vector<16x16xf32> to vector<16x16xbf16>
    %cst_116 = arith.constant dense<0.000000e+00> : vector<16x64xf32>
    %189 = tpu.matmul %188, %178, %cst_116 {dimension_numbers = #tpu.dot_dimension_numbers<[1], [0], [0], [1], [0, 0, 1, 1], [], []>} : vector<16x16xbf16>, vector<16x64xbf16>, vector<16x64xf32> -> vector<16x64xf32>
    %190 = vector.broadcast %187 : vector<16x1xf32> to vector<16x64xf32>
    %191 = arith.mulf %189, %190 : vector<16x64xf32>
    %192 = arith.truncf %191 : vector<16x64xf32> to vector<16x64xbf16>
    %c16_117 = arith.constant 16 : index
    %c64_118 = arith.constant 64 : index
    %193 = vector.load %arg11[%c16_117, %c64_118] : memref<32x512xbf16, #tpu.memory_space<vmem>>, vector<16x64xbf16>
    tpu.vector_store %arg11[%c16_117, %c64_118], %192 {strides = array<i32>} : memref<32x512xbf16, #tpu.memory_space<vmem>>, vector<16x64xbf16>,
    %c16_119 = arith.constant 16 : index
    %c128_120 = arith.constant 128 : index
    %194 = vector.load %arg10[%c16_119, %c128_120] : memref<32x512xbf16, #tpu.memory_space<vmem>>, vector<16x64xbf16>
    %c16_121 = arith.constant 16 : index
    %c128_122 = arith.constant 128 : index
    %195 = vector.load %arg8[%c16_121, %c128_122] : memref<32x512xbf16, #tpu.memory_space<vmem>>, vector<16x64xbf16>
    %c16_123 = arith.constant 16 : index
    %c128_124 = arith.constant 128 : index
    %196 = vector.load %arg9[%c16_123, %c128_124] : memref<32x512xbf16, #tpu.memory_space<vmem>>, vector<16x64xbf16>
    %cst_125 = arith.constant dense<0.000000e+00> : vector<16x16xf32>
    %197 = tpu.matmul %194, %195, %cst_125 {dimension_numbers = #tpu.dot_dimension_numbers<[1], [1], [0], [0], [0, 0, 1, 0], [], []>} : vector<16x64xbf16>, vector<16x64xbf16>, vector<16x16xf32> -> vector<16x16xf32>
    %cst_126 = arith.constant dense<0xFF800000> : vector<16xf32>
    %198 = vector.multi_reduction <maximumf>, %197, %cst_126 [1] : vector<16x16xf32> to vector<16xf32>
    %199 = vector.shape_cast %198 : vector<16xf32> to vector<16x1xf32>
    %200 = vector.broadcast %199 : vector<16x1xf32> to vector<16x16xf32>
    %201 = arith.subf %197, %200 : vector<16x16xf32>
    %202 = math.exp %201 : vector<16x16xf32>
    %cst_127 = arith.constant dense<0.000000e+00> : vector<16xf32>
    %203 = vector.multi_reduction <add>, %202, %cst_127 [1] : vector<16x16xf32> to vector<16xf32>
    %204 = vector.shape_cast %203 : vector<16xf32> to vector<16x1xf32>
    %205 = tpu.reciprocal %204 {approx = true} : vector<16x1xf32> -> vector<16x1xf32>
    %206 = arith.truncf %202 : vector<16x16xf32> to vector<16x16xbf16>
    %cst_128 = arith.constant dense<0.000000e+00> : vector<16x64xf32>
    %207 = tpu.matmul %206, %196, %cst_128 {dimension_numbers = #tpu.dot_dimension_numbers<[1], [0], [0], [1], [0, 0, 1, 1], [], []>} : vector<16x16xbf16>, vector<16x64xbf16>, vector<16x64xf32> -> vector<16x64xf32>
    %208 = vector.broadcast %205 : vector<16x1xf32> to vector<16x64xf32>
    %209 = arith.mulf %207, %208 : vector<16x64xf32>
    %210 = arith.truncf %209 : vector<16x64xf32> to vector<16x64xbf16>
    %c16_129 = arith.constant 16 : index
    %c128_130 = arith.constant 128 : index
    %211 = vector.load %arg11[%c16_129, %c128_130] : memref<32x512xbf16, #tpu.memory_space<vmem>>, vector<16x64xbf16>
    tpu.vector_store %arg11[%c16_129, %c128_130], %210 {strides = array<i32>} : memref<32x512xbf16, #tpu.memory_space<vmem>>, vector<16x64xbf16>,
    %c16_131 = arith.constant 16 : index
    %c192_132 = arith.constant 192 : index
    %212 = vector.load %arg10[%c16_131, %c192_132] : memref<32x512xbf16, #tpu.memory_space<vmem>>, vector<16x64xbf16>
    %c16_133 = arith.constant 16 : index
    %c192_134 = arith.constant 192 : index
    %213 = vector.load %arg8[%c16_133, %c192_134] : memref<32x512xbf16, #tpu.memory_space<vmem>>, vector<16x64xbf16>
    %c16_135 = arith.constant 16 : index
    %c192_136 = arith.constant 192 : index
    %214 = vector.load %arg9[%c16_135, %c192_136] : memref<32x512xbf16, #tpu.memory_space<vmem>>, vector<16x64xbf16>
    %cst_137 = arith.constant dense<0.000000e+00> : vector<16x16xf32>
    %215 = tpu.matmul %212, %213, %cst_137 {dimension_numbers = #tpu.dot_dimension_numbers<[1], [1], [0], [0], [0, 0, 1, 0], [], []>} : vector<16x64xbf16>, vector<16x64xbf16>, vector<16x16xf32> -> vector<16x16xf32>
    %cst_138 = arith.constant dense<0xFF800000> : vector<16xf32>
    %216 = vector.multi_reduction <maximumf>, %215, %cst_138 [1] : vector<16x16xf32> to vector<16xf32>
    %217 = vector.shape_cast %216 : vector<16xf32> to vector<16x1xf32>
    %218 = vector.broadcast %217 : vector<16x1xf32> to vector<16x16xf32>
    %219 = arith.subf %215, %218 : vector<16x16xf32>
    %220 = math.exp %219 : vector<16x16xf32>
    %cst_139 = arith.constant dense<0.000000e+00> : vector<16xf32>
    %221 = vector.multi_reduction <add>, %220, %cst_139 [1] : vector<16x16xf32> to vector<16xf32>
    %222 = vector.shape_cast %221 : vector<16xf32> to vector<16x1xf32>
    %223 = tpu.reciprocal %222 {approx = true} : vector<16x1xf32> -> vector<16x1xf32>
    %224 = arith.truncf %220 : vector<16x16xf32> to vector<16x16xbf16>
    %cst_140 = arith.constant dense<0.000000e+00> : vector<16x64xf32>
    %225 = tpu.matmul %224, %214, %cst_140 {dimension_numbers = #tpu.dot_dimension_numbers<[1], [0], [0], [1], [0, 0, 1, 1], [], []>} : vector<16x16xbf16>, vector<16x64xbf16>, vector<16x64xf32> -> vector<16x64xf32>
    %226 = vector.broadcast %223 : vector<16x1xf32> to vector<16x64xf32>
    %227 = arith.mulf %225, %226 : vector<16x64xf32>
    %228 = arith.truncf %227 : vector<16x64xf32> to vector<16x64xbf16>
    %c16_141 = arith.constant 16 : index
    %c192_142 = arith.constant 192 : index
    %229 = vector.load %arg11[%c16_141, %c192_142] : memref<32x512xbf16, #tpu.memory_space<vmem>>, vector<16x64xbf16>
    tpu.vector_store %arg11[%c16_141, %c192_142], %228 {strides = array<i32>} : memref<32x512xbf16, #tpu.memory_space<vmem>>, vector<16x64xbf16>,
    %c16_143 = arith.constant 16 : index
    %c256_144 = arith.constant 256 : index
    %230 = vector.load %arg10[%c16_143, %c256_144] : memref<32x512xbf16, #tpu.memory_space<vmem>>, vector<16x64xbf16>
    %c16_145 = arith.constant 16 : index
    %c256_146 = arith.constant 256 : index
    %231 = vector.load %arg8[%c16_145, %c256_146] : memref<32x512xbf16, #tpu.memory_space<vmem>>, vector<16x64xbf16>
    %c16_147 = arith.constant 16 : index
    %c256_148 = arith.constant 256 : index
    %232 = vector.load %arg9[%c16_147, %c256_148] : memref<32x512xbf16, #tpu.memory_space<vmem>>, vector<16x64xbf16>
    %cst_149 = arith.constant dense<0.000000e+00> : vector<16x16xf32>
    %233 = tpu.matmul %230, %231, %cst_149 {dimension_numbers = #tpu.dot_dimension_numbers<[1], [1], [0], [0], [0, 0, 1, 0], [], []>} : vector<16x64xbf16>, vector<16x64xbf16>, vector<16x16xf32> -> vector<16x16xf32>
    %cst_150 = arith.constant dense<0xFF800000> : vector<16xf32>
    %234 = vector.multi_reduction <maximumf>, %233, %cst_150 [1] : vector<16x16xf32> to vector<16xf32>
    %235 = vector.shape_cast %234 : vector<16xf32> to vector<16x1xf32>
    %236 = vector.broadcast %235 : vector<16x1xf32> to vector<16x16xf32>
    %237 = arith.subf %233, %236 : vector<16x16xf32>
    %238 = math.exp %237 : vector<16x16xf32>
    %cst_151 = arith.constant dense<0.000000e+00> : vector<16xf32>
    %239 = vector.multi_reduction <add>, %238, %cst_151 [1] : vector<16x16xf32> to vector<16xf32>
    %240 = vector.shape_cast %239 : vector<16xf32> to vector<16x1xf32>
    %241 = tpu.reciprocal %240 {approx = true} : vector<16x1xf32> -> vector<16x1xf32>
    %242 = arith.truncf %238 : vector<16x16xf32> to vector<16x16xbf16>
    %cst_152 = arith.constant dense<0.000000e+00> : vector<16x64xf32>
    %243 = tpu.matmul %242, %232, %cst_152 {dimension_numbers = #tpu.dot_dimension_numbers<[1], [0], [0], [1], [0, 0, 1, 1], [], []>} : vector<16x16xbf16>, vector<16x64xbf16>, vector<16x64xf32> -> vector<16x64xf32>
    %244 = vector.broadcast %241 : vector<16x1xf32> to vector<16x64xf32>
    %245 = arith.mulf %243, %244 : vector<16x64xf32>
    %246 = arith.truncf %245 : vector<16x64xf32> to vector<16x64xbf16>
    %c16_153 = arith.constant 16 : index
    %c256_154 = arith.constant 256 : index
    %247 = vector.load %arg11[%c16_153, %c256_154] : memref<32x512xbf16, #tpu.memory_space<vmem>>, vector<16x64xbf16>
    tpu.vector_store %arg11[%c16_153, %c256_154], %246 {strides = array<i32>} : memref<32x512xbf16, #tpu.memory_space<vmem>>, vector<16x64xbf16>,
    %c16_155 = arith.constant 16 : index
    %c320_156 = arith.constant 320 : index
    %248 = vector.load %arg10[%c16_155, %c320_156] : memref<32x512xbf16, #tpu.memory_space<vmem>>, vector<16x64xbf16>
    %c16_157 = arith.constant 16 : index
    %c320_158 = arith.constant 320 : index
    %249 = vector.load %arg8[%c16_157, %c320_158] : memref<32x512xbf16, #tpu.memory_space<vmem>>, vector<16x64xbf16>
    %c16_159 = arith.constant 16 : index
    %c320_160 = arith.constant 320 : index
    %250 = vector.load %arg9[%c16_159, %c320_160] : memref<32x512xbf16, #tpu.memory_space<vmem>>, vector<16x64xbf16>
    %cst_161 = arith.constant dense<0.000000e+00> : vector<16x16xf32>
    %251 = tpu.matmul %248, %249, %cst_161 {dimension_numbers = #tpu.dot_dimension_numbers<[1], [1], [0], [0], [0, 0, 1, 0], [], []>} : vector<16x64xbf16>, vector<16x64xbf16>, vector<16x16xf32> -> vector<16x16xf32>
    %cst_162 = arith.constant dense<0xFF800000> : vector<16xf32>
    %252 = vector.multi_reduction <maximumf>, %251, %cst_162 [1] : vector<16x16xf32> to vector<16xf32>
    %253 = vector.shape_cast %252 : vector<16xf32> to vector<16x1xf32>
    %254 = vector.broadcast %253 : vector<16x1xf32> to vector<16x16xf32>
    %255 = arith.subf %251, %254 : vector<16x16xf32>
    %256 = math.exp %255 : vector<16x16xf32>
    %cst_163 = arith.constant dense<0.000000e+00> : vector<16xf32>
    %257 = vector.multi_reduction <add>, %256, %cst_163 [1] : vector<16x16xf32> to vector<16xf32>
    %258 = vector.shape_cast %257 : vector<16xf32> to vector<16x1xf32>
    %259 = tpu.reciprocal %258 {approx = true} : vector<16x1xf32> -> vector<16x1xf32>
    %260 = arith.truncf %256 : vector<16x16xf32> to vector<16x16xbf16>
    %cst_164 = arith.constant dense<0.000000e+00> : vector<16x64xf32>
    %261 = tpu.matmul %260, %250, %cst_164 {dimension_numbers = #tpu.dot_dimension_numbers<[1], [0], [0], [1], [0, 0, 1, 1], [], []>} : vector<16x16xbf16>, vector<16x64xbf16>, vector<16x64xf32> -> vector<16x64xf32>
    %262 = vector.broadcast %259 : vector<16x1xf32> to vector<16x64xf32>
    %263 = arith.mulf %261, %262 : vector<16x64xf32>
    %264 = arith.truncf %263 : vector<16x64xf32> to vector<16x64xbf16>
    %c16_165 = arith.constant 16 : index
    %c320_166 = arith.constant 320 : index
    %265 = vector.load %arg11[%c16_165, %c320_166] : memref<32x512xbf16, #tpu.memory_space<vmem>>, vector<16x64xbf16>
    tpu.vector_store %arg11[%c16_165, %c320_166], %264 {strides = array<i32>} : memref<32x512xbf16, #tpu.memory_space<vmem>>, vector<16x64xbf16>,
    %c16_167 = arith.constant 16 : index
    %c384_168 = arith.constant 384 : index
    %266 = vector.load %arg10[%c16_167, %c384_168] : memref<32x512xbf16, #tpu.memory_space<vmem>>, vector<16x64xbf16>
    %c16_169 = arith.constant 16 : index
    %c384_170 = arith.constant 384 : index
    %267 = vector.load %arg8[%c16_169, %c384_170] : memref<32x512xbf16, #tpu.memory_space<vmem>>, vector<16x64xbf16>
    %c16_171 = arith.constant 16 : index
    %c384_172 = arith.constant 384 : index
    %268 = vector.load %arg9[%c16_171, %c384_172] : memref<32x512xbf16, #tpu.memory_space<vmem>>, vector<16x64xbf16>
    %cst_173 = arith.constant dense<0.000000e+00> : vector<16x16xf32>
    %269 = tpu.matmul %266, %267, %cst_173 {dimension_numbers = #tpu.dot_dimension_numbers<[1], [1], [0], [0], [0, 0, 1, 0], [], []>} : vector<16x64xbf16>, vector<16x64xbf16>, vector<16x16xf32> -> vector<16x16xf32>
    %cst_174 = arith.constant dense<0xFF800000> : vector<16xf32>
    %270 = vector.multi_reduction <maximumf>, %269, %cst_174 [1] : vector<16x16xf32> to vector<16xf32>
    %271 = vector.shape_cast %270 : vector<16xf32> to vector<16x1xf32>
    %272 = vector.broadcast %271 : vector<16x1xf32> to vector<16x16xf32>
    %273 = arith.subf %269, %272 : vector<16x16xf32>
    %274 = math.exp %273 : vector<16x16xf32>
    %cst_175 = arith.constant dense<0.000000e+00> : vector<16xf32>
    %275 = vector.multi_reduction <add>, %274, %cst_175 [1] : vector<16x16xf32> to vector<16xf32>
    %276 = vector.shape_cast %275 : vector<16xf32> to vector<16x1xf32>
    %277 = tpu.reciprocal %276 {approx = true} : vector<16x1xf32> -> vector<16x1xf32>
    %278 = arith.truncf %274 : vector<16x16xf32> to vector<16x16xbf16>
    %cst_176 = arith.constant dense<0.000000e+00> : vector<16x64xf32>
    %279 = tpu.matmul %278, %268, %cst_176 {dimension_numbers = #tpu.dot_dimension_numbers<[1], [0], [0], [1], [0, 0, 1, 1], [], []>} : vector<16x16xbf16>, vector<16x64xbf16>, vector<16x64xf32> -> vector<16x64xf32>
    %280 = vector.broadcast %277 : vector<16x1xf32> to vector<16x64xf32>
    %281 = arith.mulf %279, %280 : vector<16x64xf32>
    %282 = arith.truncf %281 : vector<16x64xf32> to vector<16x64xbf16>
    %c16_177 = arith.constant 16 : index
    %c384_178 = arith.constant 384 : index
    %283 = vector.load %arg11[%c16_177, %c384_178] : memref<32x512xbf16, #tpu.memory_space<vmem>>, vector<16x64xbf16>
    tpu.vector_store %arg11[%c16_177, %c384_178], %282 {strides = array<i32>} : memref<32x512xbf16, #tpu.memory_space<vmem>>, vector<16x64xbf16>,
    %c16_179 = arith.constant 16 : index
    %c448_180 = arith.constant 448 : index
    %284 = vector.load %arg10[%c16_179, %c448_180] : memref<32x512xbf16, #tpu.memory_space<vmem>>, vector<16x64xbf16>
    %c16_181 = arith.constant 16 : index
    %c448_182 = arith.constant 448 : index
    %285 = vector.load %arg8[%c16_181, %c448_182] : memref<32x512xbf16, #tpu.memory_space<vmem>>, vector<16x64xbf16>
    %c16_183 = arith.constant 16 : index
    %c448_184 = arith.constant 448 : index
    %286 = vector.load %arg9[%c16_183, %c448_184] : memref<32x512xbf16, #tpu.memory_space<vmem>>, vector<16x64xbf16>
    %cst_185 = arith.constant dense<0.000000e+00> : vector<16x16xf32>
    %287 = tpu.matmul %284, %285, %cst_185 {dimension_numbers = #tpu.dot_dimension_numbers<[1], [1], [0], [0], [0, 0, 1, 0], [], []>} : vector<16x64xbf16>, vector<16x64xbf16>, vector<16x16xf32> -> vector<16x16xf32>
    %cst_186 = arith.constant dense<0xFF800000> : vector<16xf32>
    %288 = vector.multi_reduction <maximumf>, %287, %cst_186 [1] : vector<16x16xf32> to vector<16xf32>
    %289 = vector.shape_cast %288 : vector<16xf32> to vector<16x1xf32>
    %290 = vector.broadcast %289 : vector<16x1xf32> to vector<16x16xf32>
    %291 = arith.subf %287, %290 : vector<16x16xf32>
    %292 = math.exp %291 : vector<16x16xf32>
    %cst_187 = arith.constant dense<0.000000e+00> : vector<16xf32>
    %293 = vector.multi_reduction <add>, %292, %cst_187 [1] : vector<16x16xf32> to vector<16xf32>
    %294 = vector.shape_cast %293 : vector<16xf32> to vector<16x1xf32>
    %295 = tpu.reciprocal %294 {approx = true} : vector<16x1xf32> -> vector<16x1xf32>
    %296 = arith.truncf %292 : vector<16x16xf32> to vector<16x16xbf16>
    %cst_188 = arith.constant dense<0.000000e+00> : vector<16x64xf32>
    %297 = tpu.matmul %296, %286, %cst_188 {dimension_numbers = #tpu.dot_dimension_numbers<[1], [0], [0], [1], [0, 0, 1, 1], [], []>} : vector<16x16xbf16>, vector<16x64xbf16>, vector<16x64xf32> -> vector<16x64xf32>
    %298 = vector.broadcast %295 : vector<16x1xf32> to vector<16x64xf32>
    %299 = arith.mulf %297, %298 : vector<16x64xf32>
    %300 = arith.truncf %299 : vector<16x64xf32> to vector<16x64xbf16>
    %c16_189 = arith.constant 16 : index
    %c448_190 = arith.constant 448 : index
    %301 = vector.load %arg11[%c16_189, %c448_190] : memref<32x512xbf16, #tpu.memory_space<vmem>>, vector<16x64xbf16>
    tpu.vector_store %arg11[%c16_189, %c448_190], %300 {strides = array<i32>} : memref<32x512xbf16, #tpu.memory_space<vmem>>, vector<16x64xbf16>,
    %c0_191 = arith.constant 0 : index
    %c0_192 = arith.constant 0 : index
    %302 = vector.load %arg11[%c0_191, %c0_192] : memref<32x512xbf16, #tpu.memory_space<vmem>>, vector<32x512xbf16>
    %c0_193 = arith.constant 0 : index
    %c0_194 = arith.constant 0 : index
    %303 = vector.load %arg5[%c0_193, %c0_194] : memref<512x512xbf16, #tpu.memory_space<vmem>>, vector<512x512xbf16>
    %cst_195 = arith.constant dense<0.000000e+00> : vector<32x512xf32>
    %304 = tpu.matmul %302, %303, %cst_195 {dimension_numbers = #tpu.dot_dimension_numbers<[1], [0], [0], [1], [0, 0, 1, 1], [], []>} : vector<32x512xbf16>, vector<512x512xbf16>, vector<32x512xf32> -> vector<32x512xf32>
    %c0_196 = arith.constant 0 : index
    %c0_197 = arith.constant 0 : index
    %305 = vector.load %arg6[%c0_196, %c0_197] : memref<1x512xf32, #tpu.memory_space<vmem>>, vector<1x512xf32>
    %306 = vector.broadcast %305 : vector<1x512xf32> to vector<32x512xf32>
    %307 = arith.addf %304, %306 : vector<32x512xf32>
    %c0_198 = arith.constant 0 : index
    %c0_199 = arith.constant 0 : index
    %308 = vector.load %arg7[%c0_198, %c0_199] : memref<32x512xf32, #tpu.memory_space<vmem>>, vector<32x512xf32>
    tpu.vector_store %arg7[%c0_198, %c0_199], %307 {strides = array<i32>} : memref<32x512xf32, #tpu.memory_space<vmem>>, vector<32x512xf32>,
    return
  }
  func.func @transform_0(%arg0: i32, %arg1: i32) -> (i32, i32) {
    %c0_i32 = arith.constant 0 : i32
    %c0_i32_0 = arith.constant 0 : i32
    return %arg0, %c0_i32 : i32, i32
  }
  func.func @transform_1(%arg0: i32, %arg1: i32) -> (i32, i32) {
    %c0_i32 = arith.constant 0 : i32
    %c0_i32_0 = arith.constant 0 : i32
    %c0_i32_1 = arith.constant 0 : i32
    return %c0_i32, %c0_i32_0 : i32, i32
  }
  func.func @transform_2(%arg0: i32, %arg1: i32) -> (i32, i32) {
    %c0_i32 = arith.constant 0 : i32
    %c0_i32_0 = arith.constant 0 : i32
    %c0_i32_1 = arith.constant 0 : i32
    return %c0_i32, %c0_i32_0 : i32, i32
  }
  func.func @transform_3(%arg0: i32, %arg1: i32) -> (i32, i32) {
    %c0_i32 = arith.constant 0 : i32
    %c0_i32_0 = arith.constant 0 : i32
    %c0_i32_1 = arith.constant 0 : i32
    return %c0_i32, %c0_i32_0 : i32, i32
  }
  func.func @transform_4(%arg0: i32, %arg1: i32) -> (i32, i32) {
    %c0_i32 = arith.constant 0 : i32
    %c0_i32_0 = arith.constant 0 : i32
    %c0_i32_1 = arith.constant 0 : i32
    return %c0_i32, %c0_i32_0 : i32, i32
  }
  func.func @transform_5(%arg0: i32, %arg1: i32) -> (i32, i32) {
    %c1_i32 = arith.constant 1 : i32
    %0 = arith.muli %arg0, %c1_i32 : i32
    %1 = arith.addi %0, %arg1 : i32
    %c0_i32 = arith.constant 0 : i32
    %c0_i32_0 = arith.constant 0 : i32
    return %1, %c0_i32 : i32, i32
  }
}

</mosaic_0001>

<bundles_post_ra>
// kernel: tpu_custom_call.1
= control target key start
LH: loop header
LB: loop body
LE: loop exit
PB: predicated region body
PF: predicated region fallthrough
CT: control target
= control target key end

     0   :  { %10 = vsyncpa [#allocation7], 0  ;;  %s9084_s0 = inlined_call_operand.hbm [shape: bf16[32,512], index: 0, kind: input, shape index: {}]   ;;  %s9085_s1 = inlined_call_operand.hbm [shape: bf16[512,1536], index: 1, kind: input, shape index: {}]   ;;  %s9086_s2 = inlined_call_operand.hbm [shape: f32[1,1536], index: 2, kind: input, shape index: {}]   ;;  %s9087_s3 = inlined_call_operand.hbm [shape: bf16[512,512], index: 3, kind: input, shape index: {}]   ;;  %s9088_s4 = inlined_call_operand.hbm [shape: f32[1,512], index: 4, kind: input, shape index: {}]   ;;  %s9089_s5 = inlined_call_operand.hbm [shape: f32[32,512], index: 5, kind: output, shape index: {}]  }
   0x1   :  { %11 = vsyncpa [#allocation10], 0 }
   0x2   :  { %12 = vsyncpa [#allocation13], 0 }
   0x3   :  { %13 = vsyncpa [#allocation8], 0  ;;  %s8338_s18 = smov [#allocation9]   ;;  %s8198_s22 = scalar_lea.hbm %s9085_s1, 49152 }
   0x4   :  { %s31_s19 = sshll.u32 %s8338_s18, 4  ;;  %p8199_p0 = scmp.ne.s32.totalorder %s9085_s1, %s8198_s22  ;;  %s32_s19 = int_to_ptr.vmem [resolvable:$true] %s31_s19 }
   0x5   :  { %p8202_p1 = scmp.lt.u32.totalorder %s8198_s22, %s9085_s1 }
   0x7   :  { %p8204_p2 = pnand %p8202_p1, %p8199_p0 }
   0x9   :  { %8207 = shalt.err (!%p8204_p2)
}
   0xa   :  { %s8208_s27 = scalar_lea.vmem %s32_s19, 49152  ;;  %p8213_p4 = scmp.lt.s32.totalorder %s32_s19, %s32_s19 }
   0xb   :  { %p8209_p3 = scmp.ne.s32.totalorder %s32_s19, %s8208_s27  ;;  %p8214_p5 = scmp.lt.s32.totalorder %s8208_s27, %s8208_s27 }
   0xd   :  { %p8215_p6 = por %p8214_p5, %p8213_p4 }
   0xf   :  { %p8216_p7 = pnand %p8215_p6, %p8209_p3 }
  0x11   :  { %8219 = shalt.err (!%p8216_p7)
}
  0x12   :  { %s8339_s28 = smov 768   ;;  %s8340_s29 = smov 48  }
  0x13   :  { %37 = dma.hbm_to_vmem [thread:$0]  %s9085_s1, 49152, %s32_s19, [#allocation10], %s8339_s28, %s8339_s28, %s8340_s29  }
  0x14   :  { %s8341_s7 = smov [#allocation12]   ;;  %s8342_s9 = smov [#allocation6]  }
  0x15   :  { %s53_s8 = sshll.u32 %s8341_s7, 4  ;;  %s19_s10 = sshll.u32 %s8342_s9, 4  ;;  %s54_s8 = int_to_ptr.vmem [resolvable:$true] %s53_s8  ;;  %s20_s10 = int_to_ptr.vmem [resolvable:$true] %s19_s10 }
  0x16   :  { %s8220_s13 = scalar_lea.hbm %s9087_s3, 16384 }
  0x17   :  { %p8221_p8 = scmp.ne.s32.totalorder %s9087_s3, %s8220_s13  ;;  %p8224_p9 = scmp.lt.u32.totalorder %s8220_s13, %s9087_s3 }
  0x19   :  { %p8226_p10 = pnand %p8224_p9, %p8221_p8 }
  0x1b   :  { %8229 = shalt.err (!%p8226_p10)
}
  0x1c   :  { %s8230_s1 = scalar_lea.vmem %s54_s8, 16384  ;;  %p8235_p12 = scmp.lt.s32.totalorder %s54_s8, %s54_s8 }
  0x1d   :  { %p8231_p11 = scmp.ne.s32.totalorder %s54_s8, %s8230_s1  ;;  %p8236_p13 = scmp.lt.s32.totalorder %s8230_s1, %s8230_s1 }
  0x1f   :  { %p8237_p0 = por %p8236_p13, %p8235_p12 }
  0x21   :  { %p8238_p1 = pnand %p8237_p0, %p8231_p11 }
  0x23   :  { %8241 = shalt.err (!%p8238_p1)
}
  0x24   :  { %s8343_s18 = smov 256   ;;  %s8344_s19 = smov 16  }
  0x25   :  { %59 = dma.hbm_to_vmem [thread:$0]  %s9087_s3, 16384, %s54_s8, [#allocation13], %s8343_s18, %s8343_s18, %s8344_s19  }
  0x26   :  { %s8242_s24 = scalar_lea.hbm %s9084_s0, 1024 }
  0x27   :  { %p8243_p2 = scmp.ne.s32.totalorder %s9084_s0, %s8242_s24  ;;  %p8246_p3 = scmp.lt.u32.totalorder %s8242_s24, %s9084_s0 }
  0x29   :  { %p8248_p4 = pnand %p8246_p3, %p8243_p2 }
  0x2b   :  { %8251 = shalt.err (!%p8248_p4)
}
  0x2c   :  { %s8252_s29 = scalar_lea.vmem %s20_s10, 1024  ;;  %p8257_p6 = scmp.lt.s32.totalorder %s20_s10, %s20_s10 }
  0x2d   :  { %p8253_p5 = scmp.ne.s32.totalorder %s20_s10, %s8252_s29  ;;  %p8258_p7 = scmp.lt.s32.totalorder %s8252_s29, %s8252_s29 }
  0x2f   :  { %p8259_p8 = por %p8258_p7, %p8257_p6 }
  0x31   :  { %p8260_p9 = pnand %p8259_p8, %p8253_p5 }
  0x33   :  { %8263 = shalt.err (!%p8260_p9)
}
  0x34   :  { %25 = dma.hbm_to_vmem [thread:$0]  %s9084_s0, 1024, %s20_s10, [#allocation7], %s8343_s18, %s8343_s18, %s8344_s19  }
  0x35   :  { %s8345_s6 = smov [#allocation11]   ;;  %s8346_s8 = smov [#allocation14]  }
  0x36   :  { %s44_s7 = sshll.u32 %s8345_s6, 4  ;;  %s66_s9 = sshll.u32 %s8346_s8, 4  ;;  %s45_s7 = int_to_ptr.vmem [resolvable:$true] %s44_s7  ;;  %s67_s9 = int_to_ptr.vmem [resolvable:$true] %s66_s9 }
  0x37   :  { %s8264_s13 = scalar_lea.hbm %s9086_s2, 192 }
  0x38   :  { %p8265_p10 = scmp.ne.s32.totalorder %s9086_s2, %s8264_s13  ;;  %p8268_p11 = scmp.lt.u32.totalorder %s8264_s13, %s9086_s2 }
  0x3a   :  { %p8270_p12 = pnand %p8268_p11, %p8265_p10 }
  0x3c   :  { %8273 = shalt.err (!%p8270_p12)
}
  0x3d   :  { %s8274_s0 = scalar_lea.vmem %s45_s7, 192  ;;  %p8279_p0 = scmp.lt.s32.totalorder %s45_s7, %s45_s7 }
  0x3e   :  { %p8275_p13 = scmp.ne.s32.totalorder %s45_s7, %s8274_s0  ;;  %p8280_p1 = scmp.lt.s32.totalorder %s8274_s0, %s8274_s0 }
  0x40   :  { %p8281_p2 = por %p8280_p1, %p8279_p0 }
  0x42   :  { %p8282_p3 = pnand %p8281_p2, %p8275_p13 }
  0x44   :  { %8285 = shalt.err (!%p8282_p3)
}
  0x45   :  { %47 = dma.hbm_to_vmem [thread:$0]  %s9086_s2, 192, %s45_s7, [#allocation10]  }
  0x46   :  { %s8286_s20 = scalar_lea.hbm %s9088_s4, 64 }
  0x47   :  { %p8287_p4 = scmp.ne.s32.totalorder %s9088_s4, %s8286_s20  ;;  %p8290_p5 = scmp.lt.u32.totalorder %s8286_s20, %s9088_s4 }
  0x49   :  { %p8292_p6 = pnand %p8290_p5, %p8287_p4 }
  0x4b   :  { %8295 = shalt.err (!%p8292_p6)
}
  0x4c   :  { %s8296_s25 = scalar_lea.vmem %s67_s9, 64  ;;  %p8301_p8 = scmp.lt.s32.totalorder %s67_s9, %s67_s9 }
  0x4d   :  { %p8297_p7 = scmp.ne.s32.totalorder %s67_s9, %s8296_s25  ;;  %p8302_p9 = scmp.lt.s32.totalorder %s8296_s25, %s8296_s25 }
  0x4f   :  { %p8303_p10 = por %p8302_p9, %p8301_p8 }
  0x51   :  { %p8304_p11 = pnand %p8303_p10, %p8297_p7 }
  0x53   :  { %8307 = shalt.err (!%p8304_p11)
}
  0x54   :  { %69 = dma.hbm_to_vmem [thread:$0]  %s9088_s4, 64, %s67_s9, [#allocation13]  }
  0x55   :  { %8330 = dma.done.wait [#allocation7], 1024  }
  0x56   :  { %8331 = vsyncadd [#allocation7], 4294966272 }
  0x57   :  { %8332 = dma.done.wait [#allocation10], 49344  }
  0x58   :  { %8333 = vsyncadd [#allocation10], 4294917952 }
  0x59   :  { %8334 = dma.done.wait [#allocation13], 16448  }
  0x5a   :  { %8335 = vsyncadd [#allocation13], 4294950848  ;;  %v7278_v0 = vld [vmem:[#allocation9 + $0x14] ss:$48 sps:$4 sm:$0xff]   ;;  %v7280_v1 = vld [vmem:[#allocation9 + $0x1c] ss:$48 sps:$4 sm:$0xff]  }
  0x5b   :  { %930 = vmatprep.subr.bf16.mxu0 %v7278_v0  ;;  %v7282_v2 = vld [vmem:[#allocation9 + $0x10] ss:$48 sps:$4 sm:$0xff]   ;;  %v7283_v3 = vld [vmem:[#allocation9 + $0x18] ss:$48 sps:$4 sm:$0xff]   ;;  %1036 = vmatprep.subr.bf16.mxu1 %v7280_v1  ;;  %v7284_v4 = vld [vmem:[#allocation9 + $0x74] ss:$48 sps:$4 sm:$0xff]  }
  0x5c   :  { %931 = vmatpush1.bf16.msra.mxu0 %v7282_v2  ;;  %1037 = vmatpush1.bf16.msra.mxu1 %v7283_v3  ;;  %v7286_v5 = vld [vmem:[#allocation9 + $0x7c] ss:$48 sps:$4 sm:$0xff]   ;;  %v7288_v6 = vld [vmem:[#allocation9 + $0x70] ss:$48 sps:$4 sm:$0xff]   ;;  %v7289_v7 = vld [vmem:[#allocation9 + $0x78] ss:$48 sps:$4 sm:$0xff]  }
  0x5d   :  { %932 = vmatprep.subr.bf16.mxu0 %v7284_v4  ;;  %1038 = vmatprep.subr.bf16.mxu1 %v7286_v5  ;;  %v7290_v8 = vld [vmem:[#allocation9 + $0xd4] ss:$48 sps:$4 sm:$0xff]   ;;  %v7292_v9 = vld [vmem:[#allocation9 + $0xdc] ss:$48 sps:$4 sm:$0xff]   ;;  %v7294_v10 = vld [vmem:[#allocation9 + $0xd0] ss:$48 sps:$4 sm:$0xff]  }
  0x5e   :  { %v7295_v11 = vld [vmem:[#allocation9 + $0xd8] ss:$48 sps:$4 sm:$0xff]   ;;  %v7296_v12 = vld [vmem:[#allocation9 + $0x134] ss:$48 sps:$4 sm:$0xff]   ;;  %v7298_v13 = vld [vmem:[#allocation9 + $0x13c] ss:$48 sps:$4 sm:$0xff]  }
  0x5f   :  { %v7300_v14 = vld [vmem:[#allocation9 + $0x130] ss:$48 sps:$4 sm:$0xff]   ;;  %v7301_v15 = vld [vmem:[#allocation9 + $0x138] ss:$48 sps:$4 sm:$0xff]   ;;  %v7302_v16 = vld [vmem:[#allocation9 + $0x194] ss:$48 sps:$4 sm:$0xff]  }
  0x60   :  { %933 = vmatpush1.bf16.msra.mxu0 %v7288_v6  ;;  %1039 = vmatpush1.bf16.msra.mxu1 %v7289_v7  ;;  %v7304_v17 = vld [vmem:[#allocation9 + $0x19c] ss:$48 sps:$4 sm:$0xff]   ;;  %v7306_v18 = vld [vmem:[#allocation9 + $0x190] ss:$48 sps:$4 sm:$0xff]   ;;  %v7307_v19 = vld [vmem:[#allocation9 + $0x198] ss:$48 sps:$4 sm:$0xff]  }
  0x61   :  { %934 = vmatprep.subr.bf16.mxu0 %v7290_v8  ;;  %1040 = vmatprep.subr.bf16.mxu1 %v7292_v9  ;;  %v7308_v20 = vld [vmem:[#allocation9 + $0x1f4] ss:$48 sps:$4 sm:$0xff]   ;;  %v7310_v21 = vld [vmem:[#allocation9 + $0x1fc] ss:$48 sps:$4 sm:$0xff]   ;;  %v7312_v22 = vld [vmem:[#allocation9 + $0x1f0] ss:$48 sps:$4 sm:$0xff]  }
  0x62   :  { %v7313_v23 = vld [vmem:[#allocation9 + $0x1f8] ss:$48 sps:$4 sm:$0xff]   ;;  %v7314_v24 = vld [vmem:[#allocation9 + $0x254] ss:$48 sps:$4 sm:$0xff]   ;;  %v7316_v25 = vld [vmem:[#allocation9 + $0x25c] ss:$48 sps:$4 sm:$0xff]  }
  0x63   :  { %v7318_v26 = vld [vmem:[#allocation9 + $0x250] ss:$48 sps:$4 sm:$0xff]   ;;  %v7319_v27 = vld [vmem:[#allocation9 + $0x258] ss:$48 sps:$4 sm:$0xff]   ;;  %v7320_v28 = vld [vmem:[#allocation9 + $0x2b4] ss:$48 sps:$4 sm:$0xff]  }
  0x64   :  { %935 = vmatpush1.bf16.msra.mxu0 %v7294_v10  ;;  %1041 = vmatpush1.bf16.msra.mxu1 %v7295_v11  ;;  %v7322_v29 = vld [vmem:[#allocation9 + $0x2bc] ss:$48 sps:$4 sm:$0xff]   ;;  %v7324_v30 = vld [vmem:[#allocation9 + $0x2b0] ss:$48 sps:$4 sm:$0xff]   ;;  %v7325_v31 = vld [vmem:[#allocation9 + $0x2b8] ss:$48 sps:$4 sm:$0xff]  }
  0x65   :  { %936 = vmatprep.subr.bf16.mxu0 %v7296_v12  ;;  %1042 = vmatprep.subr.bf16.mxu1 %v7298_v13  ;;  %v7326_v32 = vld [vmem:[#allocation9 + $0x314] ss:$48 sps:$4 sm:$0xff]   ;;  %v7328_v33 = vld [vmem:[#allocation9 + $0x31c] ss:$48 sps:$4 sm:$0xff]   ;;  %v7330_v34 = vld [vmem:[#allocation9 + $0x310] ss:$48 sps:$4 sm:$0xff]  }
  0x66   :  { %v7331_v35 = vld [vmem:[#allocation9 + $0x318] ss:$48 sps:$4 sm:$0xff]   ;;  %v7332_v36 = vld [vmem:[#allocation9 + $0x374] ss:$48 sps:$4 sm:$0xff]   ;;  %v7334_v37 = vld [vmem:[#allocation9 + $0x37c] ss:$48 sps:$4 sm:$0xff]  }
  0x67   :  { %v7336_v38 = vld [vmem:[#allocation9 + $0x370] ss:$48 sps:$4 sm:$0xff]   ;;  %v7337_v39 = vld [vmem:[#allocation9 + $0x378] ss:$48 sps:$4 sm:$0xff]   ;;  %v7338_v40 = vld [vmem:[#allocation9 + $0x3d4] ss:$48 sps:$4 sm:$0xff]  }
  0x68   :  { %937 = vmatpush1.bf16.msra.mxu0 %v7300_v14  ;;  %1043 = vmatpush1.bf16.msra.mxu1 %v7301_v15  ;;  %v7340_v41 = vld [vmem:[#allocation9 + $0x3dc] ss:$48 sps:$4 sm:$0xff]   ;;  %v7342_v42 = vld [vmem:[#allocation9 + $0x3d0] ss:$48 sps:$4 sm:$0xff]   ;;  %v7343_v43 = vld [vmem:[#allocation9 + $0x3d8] ss:$48 sps:$4 sm:$0xff]  }
  0x69   :  { %938 = vmatprep.subr.bf16.mxu0 %v7302_v16  ;;  %1044 = vmatprep.subr.bf16.mxu1 %v7304_v17  ;;  %v7344_v44 = vld [vmem:[#allocation9 + $0x434] ss:$48 sps:$4 sm:$0xff]   ;;  %v7346_v45 = vld [vmem:[#allocation9 + $0x43c] ss:$48 sps:$4 sm:$0xff]   ;;  %v7348_v46 = vld [vmem:[#allocation9 + $0x430] ss:$48 sps:$4 sm:$0xff]  }
  0x6a   :  { %v8443_v47 = vld [vmem:[#allocation6 + $0x4] ss:$16 sps:$4 sm:$0xff]   ;;  %v7349_v48 = vld [vmem:[#allocation9 + $0x438] ss:$48 sps:$4 sm:$0xff]   ;;  %v7352_v50 = vld [vmem:[#allocation9 + $0x49c] ss:$48 sps:$4 sm:$0xff]  }
  0x6b   :  { %v7350_v49 = vld [vmem:[#allocation9 + $0x494] ss:$48 sps:$4 sm:$0xff]   ;;  %962 = vmatprep.mubr.bf16.mxu0 %v8443_v47  ;;  %1068 = vmatprep.mubr.bf16.mxu1 %v8443_v47  ;;  %v7354_v51 = vld [vmem:[#allocation9 + $0x490] ss:$48 sps:$4 sm:$0xff]   ;;  %v7355_v52 = vld [vmem:[#allocation9 + $0x498] ss:$48 sps:$4 sm:$0xff]  }
  0x6c   :  { %939 = vmatpush1.bf16.msra.mxu0 %v7306_v18  ;;  %1045 = vmatpush1.bf16.msra.mxu1 %v7307_v19  ;;  %v7356_v53 = vld [vmem:[#allocation9 + $0x4f4] ss:$48 sps:$4 sm:$0xff]   ;;  %v7358_v54 = vld [vmem:[#allocation9 + $0x4fc] ss:$48 sps:$4 sm:$0xff]   ;;  %v7360_v55 = vld [vmem:[#allocation9 + $0x4f0] ss:$48 sps:$4 sm:$0xff]  }
  0x6d   :  { %940 = vmatprep.subr.bf16.mxu0 %v7308_v20  ;;  %1046 = vmatprep.subr.bf16.mxu1 %v7310_v21  ;;  %v7361_v56 = vld [vmem:[#allocation9 + $0x4f8] ss:$48 sps:$4 sm:$0xff]   ;;  %v7362_v57 = vld [vmem:[#allocation9 + $0x554] ss:$48 sps:$4 sm:$0xff]   ;;  %v7364_v58 = vld [vmem:[#allocation9 + $0x55c] ss:$48 sps:$4 sm:$0xff]  }
  0x6e   :  { %v7366_v59 = vld [vmem:[#allocation9 + $0x550] ss:$48 sps:$4 sm:$0xff]   ;;  %v7367_v60 = vld [vmem:[#allocation9 + $0x558] ss:$48 sps:$4 sm:$0xff]   ;;  %v7368_v61 = vld [vmem:[#allocation9 + $0x5b4] ss:$48 sps:$4 sm:$0xff]  }
  0x6f   :  { %v7370_v62 = vld [vmem:[#allocation9 + $0x5bc] ss:$48 sps:$4 sm:$0xff]   ;;  %v7372_v63 = vld [vmem:[#allocation9 + $0x5b0] ss:$48 sps:$4 sm:$0xff]   ;;  %v7373_v0 = vld [vmem:[#allocation9 + $0x5b8] ss:$48 sps:$4 sm:$0xff]  }
  0x70   :  { %941 = vmatpush1.bf16.msra.mxu0 %v7312_v22  ;;  %1047 = vmatpush1.bf16.msra.mxu1 %v7313_v23  ;;  %v7378_v1 = vld [vmem:[#allocation9 + $0x614] ss:$48 sps:$4 sm:$0xff]   ;;  %v7381_v2 = vld [vmem:[#allocation9 + $0x61c] ss:$48 sps:$4 sm:$0xff]   ;;  %v7376_v3 = vld [vmem:[#allocation9 + $0x610] ss:$48 sps:$4 sm:$0xff]  }
  0x71   :  { %942 = vmatprep.subr.bf16.mxu0 %v7314_v24  ;;  %1048 = vmatprep.subr.bf16.mxu1 %v7316_v25  ;;  %v7379_v4 = vld [vmem:[#allocation9 + $0x618] ss:$48 sps:$4 sm:$0xff]   ;;  %v8447_v5 = vld [vmem:[#allocation6] ss:$16 sps:$4 sm:$0xff]   ;;  %v7385_v6 = vld [vmem:[#allocation9 + $0x674] ss:$48 sps:$4 sm:$0xff]  }
  0x72   :  { %v7388_v7 = vld [vmem:[#allocation9 + $0x67c] ss:$48 sps:$4 sm:$0xff]   ;;  %v7383_v8 = vld [vmem:[#allocation9 + $0x670] ss:$48 sps:$4 sm:$0xff]   ;;  %v7386_v9 = vld [vmem:[#allocation9 + $0x678] ss:$48 sps:$4 sm:$0xff]  }
  0x73   :  { %v7391_v10 = vld [vmem:[#allocation9 + $0x6d4] ss:$48 sps:$4 sm:$0xff]   ;;  %v7394_v11 = vld [vmem:[#allocation9 + $0x6dc] ss:$48 sps:$4 sm:$0xff]   ;;  %v7389_v12 = vld [vmem:[#allocation9 + $0x6d0] ss:$48 sps:$4 sm:$0xff]  }
  0x74   :  { %943 = vmatpush1.bf16.msra.mxu0 %v7318_v26  ;;  %1049 = vmatpush1.bf16.msra.mxu1 %v7319_v27  ;;  %v7392_v13 = vld [vmem:[#allocation9 + $0x6d8] ss:$48 sps:$4 sm:$0xff]   ;;  %v7397_v14 = vld [vmem:[#allocation9 + $0x734] ss:$48 sps:$4 sm:$0xff]   ;;  %v7400_v15 = vld [vmem:[#allocation9 + $0x73c] ss:$48 sps:$4 sm:$0xff]  }
  0x75   :  { %944 = vmatprep.subr.bf16.mxu0 %v7320_v28  ;;  %1050 = vmatprep.subr.bf16.mxu1 %v7322_v29  ;;  %v7395_v16 = vld [vmem:[#allocation9 + $0x730] ss:$48 sps:$4 sm:$0xff]   ;;  %v7398_v17 = vld [vmem:[#allocation9 + $0x738] ss:$48 sps:$4 sm:$0xff]   ;;  %v7403_v18 = vld [vmem:[#allocation9 + $0x794] ss:$48 sps:$4 sm:$0xff]  }
  0x76   :  { %v7406_v19 = vld [vmem:[#allocation9 + $0x79c] ss:$48 sps:$4 sm:$0xff]   ;;  %v7401_v20 = vld [vmem:[#allocation9 + $0x790] ss:$48 sps:$4 sm:$0xff]   ;;  %v7404_v21 = vld [vmem:[#allocation9 + $0x798] ss:$48 sps:$4 sm:$0xff]  }
  0x77   :  { %v7409_v22 = vld [vmem:[#allocation9 + $0x7f4] ss:$48 sps:$4 sm:$0xff]   ;;  %v7412_v23 = vld [vmem:[#allocation9 + $0x7fc] ss:$48 sps:$4 sm:$0xff]   ;;  %v7407_v24 = vld [vmem:[#allocation9 + $0x7f0] ss:$48 sps:$4 sm:$0xff]  }
  0x78   :  { %945 = vmatpush1.bf16.msra.mxu0 %v7324_v30  ;;  %1051 = vmatpush1.bf16.msra.mxu1 %v7325_v31  ;;  %v8451_v25 = vld [vmem:[#allocation6 + $0x24] ss:$16 sps:$4 sm:$0xff]   ;;  %v7410_v26 = vld [vmem:[#allocation9 + $0x7f8] ss:$48 sps:$4 sm:$0xff]   ;;  %v8453_v27 = vld [vmem:[#allocation6 + $0x20] ss:$16 sps:$4 sm:$0xff]  }
  0x79   :  { %946 = vmatprep.subr.bf16.mxu0 %v7326_v32  ;;  %1052 = vmatprep.subr.bf16.mxu1 %v7328_v33  ;;  %v7415_v28 = vld [vmem:[#allocation9 + $0x854] ss:$48 sps:$4 sm:$0xff]   ;;  %v7418_v29 = vld [vmem:[#allocation9 + $0x85c] ss:$48 sps:$4 sm:$0xff]   ;;  %v7413_v30 = vld [vmem:[#allocation9 + $0x850] ss:$48 sps:$4 sm:$0xff]  }
  0x7a   :  { %v7416_v31 = vld [vmem:[#allocation9 + $0x858] ss:$48 sps:$4 sm:$0xff]   ;;  %v7421_v32 = vld [vmem:[#allocation9 + $0x8b4] ss:$48 sps:$4 sm:$0xff]   ;;  %v7424_v33 = vld [vmem:[#allocation9 + $0x8bc] ss:$48 sps:$4 sm:$0xff]  }
  0x7b   :  { %s8347_s4 = smov 64   ;;  %vm3251_vm0 = vcmask 523264   ;;  %vm8349_vm1 = vmmov 0   ;;  %vm3299_vm2 = vcmask 130048   ;;  %vm3501_vm3 = vcmask 1048064   ;;  %s8350_s27 = smov [#allocation15]  }
  0x7c   :  { %947 = vmatpush1.bf16.msra.mxu0 %v7330_v34  ;;  %1053 = vmatpush1.bf16.msra.mxu1 %v7331_v35  ;;  %v8459_v34 = vld [vmem:[#allocation6 + $0xc] ss:$16 sps:$4 sm:$0xff]   ;;  %v7419_v35 = vld [vmem:[#allocation9 + $0x8b0] ss:$48 sps:$4 sm:$0xff]   ;;  %s6303_s28 = sshll.u32 %s8350_s27, 4  ;;  %s6304_s28 = int_to_ptr.vmem [resolvable:$true] %s6303_s28 }
  0x7d   :  { %948 = vmatprep.subr.bf16.mxu0 %v7332_v36  ;;  %1054 = vmatprep.subr.bf16.mxu1 %v7334_v37  ;;  %v7422_v36 = vld [vmem:[#allocation9 + $0x8b8] ss:$48 sps:$4 sm:$0xff]   ;;  %v7427_v37 = vld [vmem:[#allocation9 + $0x914] ss:$48 sps:$4 sm:$0xff]   ;;  %s8308_s29 = scalar_lea.vmem %s6304_s28, 2048  ;;  %p8313_p13 = scmp.lt.s32.totalorder %s6304_s28, %s6304_s28 }
  0x7e   :  { %p8309_p12 = scmp.ne.s32.totalorder %s6304_s28, %s8308_s29  ;;  %p8314_p0 = scmp.lt.s32.totalorder %s8308_s29, %s8308_s29 }
  0x80   :  { %949 = vmatpush1.bf16.msra.mxu0 %v7336_v38  ;;  %1055 = vmatpush1.bf16.msra.mxu1 %v7337_v39  ;;  %v7430_v38 = vld [vmem:[#allocation9 + $0x91c] ss:$48 sps:$4 sm:$0xff]   ;;  %v7425_v39 = vld [vmem:[#allocation9 + $0x910] ss:$48 sps:$4 sm:$0xff]   ;;  %p8315_p1 = por %p8314_p0, %p8313_p13 }
  0x81   :  { %950 = vmatprep.subr.bf16.mxu0 %v7338_v40  ;;  %1056 = vmatprep.subr.bf16.mxu1 %v7340_v41  ;;  %v7428_v40 = vld [vmem:[#allocation9 + $0x918] ss:$48 sps:$4 sm:$0xff]   ;;  %v7433_v41 = vld [vmem:[#allocation9 + $0x974] ss:$48 sps:$4 sm:$0xff]  }
  0x82   :  { %p8316_p2 = pnand %p8315_p1, %p8309_p12 }
  0x84   :  { %951 = vmatpush1.bf16.msra.mxu0 %v7342_v42  ;;  %1057 = vmatpush1.bf16.msra.mxu1 %v7343_v43  ;;  %v7436_v42 = vld [vmem:[#allocation9 + $0x97c] ss:$48 sps:$4 sm:$0xff]   ;;  %v7431_v43 = vld [vmem:[#allocation9 + $0x970] ss:$48 sps:$4 sm:$0xff]  }
  0x85   :  { %952 = vmatprep.subr.bf16.mxu0 %v7344_v44  ;;  %1058 = vmatprep.subr.bf16.mxu1 %v7346_v45  ;;  %v7434_v44 = vld [vmem:[#allocation9 + $0x978] ss:$48 sps:$4 sm:$0xff]   ;;  %v7439_v45 = vld [vmem:[#allocation9 + $0x9d4] ss:$48 sps:$4 sm:$0xff]  }
  0x88   :  { %953 = vmatpush1.bf16.msra.mxu0 %v7348_v46  ;;  %1059 = vmatpush1.bf16.msra.mxu1 %v7349_v48  ;;  %v7442_v46 = vld [vmem:[#allocation9 + $0x9dc] ss:$48 sps:$4 sm:$0xff]   ;;  %v7437_v48 = vld [vmem:[#allocation9 + $0x9d0] ss:$48 sps:$4 sm:$0xff]  }
  0x89   :  { %954 = vmatprep.subr.bf16.mxu0 %v7350_v49  ;;  %1060 = vmatprep.subr.bf16.mxu1 %v7352_v50  ;;  %v7440_v49 = vld [vmem:[#allocation9 + $0x9d8] ss:$48 sps:$4 sm:$0xff]   ;;  %v7445_v50 = vld [vmem:[#allocation9 + $0xa34] ss:$48 sps:$4 sm:$0xff]  }
  0x8c   :  { %955 = vmatpush1.bf16.msra.mxu0 %v7354_v51  ;;  %1061 = vmatpush1.bf16.msra.mxu1 %v7355_v52  ;;  %v7448_v51 = vld [vmem:[#allocation9 + $0xa3c] ss:$48 sps:$4 sm:$0xff]   ;;  %v7443_v52 = vld [vmem:[#allocation9 + $0xa30] ss:$48 sps:$4 sm:$0xff]  }
  0x8d   :  { %956 = vmatprep.subr.bf16.mxu0 %v7356_v53  ;;  %1062 = vmatprep.subr.bf16.mxu1 %v7358_v54  ;;  %v7446_v53 = vld [vmem:[#allocation9 + $0xa38] ss:$48 sps:$4 sm:$0xff]   ;;  %v7451_v54 = vld [vmem:[#allocation9 + $0xa94] ss:$48 sps:$4 sm:$0xff]  }
  0x90   :  { %957 = vmatpush1.bf16.msra.mxu0 %v7360_v55  ;;  %1063 = vmatpush1.bf16.msra.mxu1 %v7361_v56  ;;  %v7454_v55 = vld [vmem:[#allocation9 + $0xa9c] ss:$48 sps:$4 sm:$0xff]   ;;  %v7449_v56 = vld [vmem:[#allocation9 + $0xa90] ss:$48 sps:$4 sm:$0xff]  }
  0x91   :  { %958 = vmatprep.subr.bf16.mxu0 %v7362_v57  ;;  %1064 = vmatprep.subr.bf16.mxu1 %v7364_v58  ;;  %v7452_v57 = vld [vmem:[#allocation9 + $0xa98] ss:$48 sps:$4 sm:$0xff]   ;;  %v7457_v58 = vld [vmem:[#allocation9 + $0xaf4] ss:$48 sps:$4 sm:$0xff]  }
  0x94   :  { %959 = vmatpush1.bf16.msra.mxu0 %v7366_v59  ;;  %1065 = vmatpush1.bf16.msra.mxu1 %v7367_v60  ;;  %v7460_v59 = vld [vmem:[#allocation9 + $0xafc] ss:$48 sps:$4 sm:$0xff]   ;;  %v7455_v60 = vld [vmem:[#allocation9 + $0xaf0] ss:$48 sps:$4 sm:$0xff]  }
  0x95   :  { %960 = vmatprep.subr.bf16.mxu0 %v7368_v61  ;;  %1066 = vmatprep.subr.bf16.mxu1 %v7370_v62  ;;  %v7458_v61 = vld [vmem:[#allocation9 + $0xaf8] ss:$48 sps:$4 sm:$0xff]   ;;  %v7466_v62 = vld [vmem:[#allocation9 + $0xb54] ss:$48 sps:$4 sm:$0xff]  }
  0x98   :  { %961 = vmatpush1.bf16.msra.mxu0 %v7372_v63  ;;  %1067 = vmatpush1.bf16.msra.mxu1 %v7373_v0  ;;  %v7469_v63 = vld [vmem:[#allocation9 + $0xb5c] ss:$48 sps:$4 sm:$0xff]   ;;  %v7464_v0 = vld [vmem:[#allocation9 + $0xb50] ss:$48 sps:$4 sm:$0xff]  }
  0x99   :  { %983 = vmatprep.subr.bf16.mxu0 %v7378_v1  ;;  %1089 = vmatprep.subr.bf16.mxu1 %v7381_v2  ;;  %v7467_v1 = vld [vmem:[#allocation9 + $0xb58] ss:$48 sps:$4 sm:$0xff]   ;;  %v7472_v2 = vld [vmem:[#allocation9 + $0xbb4] ss:$48 sps:$4 sm:$0xff]  }
  0x9b   :  { %963 = vmatmul.mubr.bf16.vlgmr.msra.gmra.mrb[0].mxu0 %v8447_v5  ;;  %1069 = vmatmul.mubr.bf16.vlgmr.msra.gmra.mrb[0].mxu1 %v8447_v5 }
  0x9c   :  { %984 = vmatpush1.bf16.msra.mxu0 %v7376_v3  ;;  %1090 = vmatpush1.bf16.msra.mxu1 %v7379_v4  ;;  %v7475_v3 = vld [vmem:[#allocation9 + $0xbbc] ss:$48 sps:$4 sm:$0xff]   ;;  %v7470_v4 = vld [vmem:[#allocation9 + $0xbb0] ss:$48 sps:$4 sm:$0xff]  }
  0x9d   :  { %985 = vmatprep.subr.bf16.mxu0 %v7385_v6  ;;  %1091 = vmatprep.subr.bf16.mxu1 %v7388_v7  ;;  %v7473_v6 = vld [vmem:[#allocation9 + $0xbb8] ss:$48 sps:$4 sm:$0xff]   ;;  %v7481_v7 = vld [vmem:[#allocation9 + $0x24] ss:$48 sps:$4 sm:$0xff]  }
  0x9e   :  { %972 = vmatprep.mubr.bf16.mxu0 %v8451_v25  ;;  %1078 = vmatprep.mubr.bf16.mxu1 %v8451_v25 }
  0xa0   :  { %986 = vmatpush1.bf16.msra.mxu0 %v7383_v8  ;;  %1092 = vmatpush1.bf16.msra.mxu1 %v7386_v9  ;;  %v7484_v8 = vld [vmem:[#allocation9 + $0x2c] ss:$48 sps:$4 sm:$0xff]   ;;  %v8463_v9 = vld [vmem:[#allocation6 + $0x8] ss:$16 sps:$4 sm:$0xff]  }
  0xa1   :  { %987 = vmatprep.subr.bf16.mxu0 %v7391_v10  ;;  %1093 = vmatprep.subr.bf16.mxu1 %v7394_v11  ;;  %v7479_v10 = vld [vmem:[#allocation9 + $0x20] ss:$48 sps:$4 sm:$0xff]   ;;  %v7482_v11 = vld [vmem:[#allocation9 + $0x28] ss:$48 sps:$4 sm:$0xff]  }
  0xa3   :  { %973 = vmatmul.mubr.bf16.gmra.mrb[4].mxu0 %v8453_v27  ;;  %1079 = vmatmul.mubr.bf16.gmra.mrb[4].mxu1 %v8453_v27 }
  0xa4   :  { %988 = vmatpush1.bf16.msra.mxu0 %v7389_v12  ;;  %1094 = vmatpush1.bf16.msra.mxu1 %v7392_v13  ;;  %v7487_v12 = vld [vmem:[#allocation9 + $0x84] ss:$48 sps:$4 sm:$0xff]   ;;  %v7490_v13 = vld [vmem:[#allocation9 + $0x8c] ss:$48 sps:$4 sm:$0xff]  }
  0xa5   :  { %989 = vmatprep.subr.bf16.mxu0 %v7397_v14  ;;  %1095 = vmatprep.subr.bf16.mxu1 %v7400_v15  ;;  %v8465_v14 = vld [vmem:[#allocation6 + $0x2c] ss:$16 sps:$4 sm:$0xff]   ;;  %v7485_v15 = vld [vmem:[#allocation9 + $0x80] ss:$48 sps:$4 sm:$0xff]  }
  0xa6   :  { %1015 = vmatprep.mubr.bf16.mxu0 %v8459_v34  ;;  %1121 = vmatprep.mubr.bf16.mxu1 %v8459_v34 }
  0xa8   :  { %990 = vmatpush1.bf16.msra.mxu0 %v7395_v16  ;;  %1096 = vmatpush1.bf16.msra.mxu1 %v7398_v17  ;;  %v7488_v16 = vld [vmem:[#allocation9 + $0x88] ss:$48 sps:$4 sm:$0xff]   ;;  %v7496_v17 = vld [vmem:[#allocation9 + $0xe4] ss:$48 sps:$4 sm:$0xff]  }
  0xa9   :  { %991 = vmatprep.subr.bf16.mxu0 %v7403_v18  ;;  %1097 = vmatprep.subr.bf16.mxu1 %v7406_v19  ;;  %v7499_v18 = vld [vmem:[#allocation9 + $0xec] ss:$48 sps:$4 sm:$0xff]   ;;  %v8470_v19 = vld [vmem:[#allocation6 + $0x28] ss:$16 sps:$4 sm:$0xff]  }
  0xac   :  { %992 = vmatpush1.bf16.msra.mxu0 %v7401_v20  ;;  %1098 = vmatpush1.bf16.msra.mxu1 %v7404_v21  ;;  %v7494_v20 = vld [vmem:[#allocation9 + $0xe0] ss:$48 sps:$4 sm:$0xff]   ;;  %v7497_v21 = vld [vmem:[#allocation9 + $0xe8] ss:$48 sps:$4 sm:$0xff]  }
  0xad   :  { %993 = vmatprep.subr.bf16.mxu0 %v7409_v22  ;;  %1099 = vmatprep.subr.bf16.mxu1 %v7412_v23  ;;  %v7502_v22 = vld [vmem:[#allocation9 + $0x144] ss:$48 sps:$4 sm:$0xff]   ;;  %v7505_v23 = vld [vmem:[#allocation9 + $0x14c] ss:$48 sps:$4 sm:$0xff]  }
  0xb0   :  { %994 = vmatpush1.bf16.msra.mxu0 %v7407_v24  ;;  %1100 = vmatpush1.bf16.msra.mxu1 %v7410_v26  ;;  %v7500_v24 = vld [vmem:[#allocation9 + $0x140] ss:$48 sps:$4 sm:$0xff]   ;;  %v7503_v26 = vld [vmem:[#allocation9 + $0x148] ss:$48 sps:$4 sm:$0xff]  }
  0xb1   :  { %995 = vmatprep.subr.bf16.mxu0 %v7415_v28  ;;  %1101 = vmatprep.subr.bf16.mxu1 %v7418_v29  ;;  %v7508_v28 = vld [vmem:[#allocation9 + $0x1a4] ss:$48 sps:$4 sm:$0xff]   ;;  %v7511_v29 = vld [vmem:[#allocation9 + $0x1ac] ss:$48 sps:$4 sm:$0xff]  }
  0xb4   :  { %996 = vmatpush1.bf16.msra.mxu0 %v7413_v30  ;;  %1102 = vmatpush1.bf16.msra.mxu1 %v7416_v31  ;;  %v7506_v30 = vld [vmem:[#allocation9 + $0x1a0] ss:$48 sps:$4 sm:$0xff]   ;;  %v7509_v31 = vld [vmem:[#allocation9 + $0x1a8] ss:$48 sps:$4 sm:$0xff]  }
  0xb5   :  { %997 = vmatprep.subr.bf16.mxu0 %v7421_v32  ;;  %1103 = vmatprep.subr.bf16.mxu1 %v7424_v33  ;;  %v7514_v32 = vld [vmem:[#allocation9 + $0x204] ss:$48 sps:$4 sm:$0xff]   ;;  %v7517_v33 = vld [vmem:[#allocation9 + $0x20c] ss:$48 sps:$4 sm:$0xff]  }
  0xb8   :  { %998 = vmatpush1.bf16.msra.mxu0 %v7419_v35  ;;  %1104 = vmatpush1.bf16.msra.mxu1 %v7422_v36  ;;  %v7512_v35 = vld [vmem:[#allocation9 + $0x200] ss:$48 sps:$4 sm:$0xff]   ;;  %v7515_v36 = vld [vmem:[#allocation9 + $0x208] ss:$48 sps:$4 sm:$0xff]  }
  0xb9   :  { %999 = vmatprep.subr.bf16.mxu0 %v7427_v37  ;;  %1105 = vmatprep.subr.bf16.mxu1 %v7430_v38  ;;  %v7520_v37 = vld [vmem:[#allocation9 + $0x264] ss:$48 sps:$4 sm:$0xff]   ;;  %v7523_v38 = vld [vmem:[#allocation9 + $0x26c] ss:$48 sps:$4 sm:$0xff]  }
  0xbc   :  { %1000 = vmatpush1.bf16.msra.mxu0 %v7425_v39  ;;  %1106 = vmatpush1.bf16.msra.mxu1 %v7428_v40  ;;  %v7518_v39 = vld [vmem:[#allocation9 + $0x260] ss:$48 sps:$4 sm:$0xff]   ;;  %v7521_v40 = vld [vmem:[#allocation9 + $0x268] ss:$48 sps:$4 sm:$0xff]  }
  0xbd   :  { %1001 = vmatprep.subr.bf16.mxu0 %v7433_v41  ;;  %1107 = vmatprep.subr.bf16.mxu1 %v7436_v42  ;;  %v7529_v41 = vld [vmem:[#allocation9 + $0x2cc] ss:$48 sps:$4 sm:$0xff]   ;;  %v7524_v42 = vld [vmem:[#allocation9 + $0x2c0] ss:$48 sps:$4 sm:$0xff]  }
  0xc0   :  { %1002 = vmatpush1.bf16.msra.mxu0 %v7431_v43  ;;  %1108 = vmatpush1.bf16.msra.mxu1 %v7434_v44  ;;  %v7527_v43 = vld [vmem:[#allocation9 + $0x2c8] ss:$48 sps:$4 sm:$0xff]   ;;  %v7532_v44 = vld [vmem:[#allocation9 + $0x324] ss:$48 sps:$4 sm:$0xff]  }
  0xc1   :  { %1003 = vmatprep.subr.bf16.mxu0 %v7439_v45  ;;  %1109 = vmatprep.subr.bf16.mxu1 %v7442_v46  ;;  %v7535_v45 = vld [vmem:[#allocation9 + $0x32c] ss:$48 sps:$4 sm:$0xff]   ;;  %v7530_v46 = vld [vmem:[#allocation9 + $0x320] ss:$48 sps:$4 sm:$0xff]  }
  0xc4   :  { %1004 = vmatpush1.bf16.msra.mxu0 %v7437_v48  ;;  %1110 = vmatpush1.bf16.msra.mxu1 %v7440_v49  ;;  %v7533_v48 = vld [vmem:[#allocation9 + $0x328] ss:$48 sps:$4 sm:$0xff]   ;;  %v7538_v49 = vld [vmem:[#allocation9 + $0x384] ss:$48 sps:$4 sm:$0xff]  }
  0xc5   :  { %1005 = vmatprep.subr.bf16.mxu0 %v7445_v50  ;;  %1111 = vmatprep.subr.bf16.mxu1 %v7448_v51  ;;  %v7541_v50 = vld [vmem:[#allocation9 + $0x38c] ss:$48 sps:$4 sm:$0xff]   ;;  %v7536_v51 = vld [vmem:[#allocation9 + $0x380] ss:$48 sps:$4 sm:$0xff]  }
  0xc8   :  { %1006 = vmatpush1.bf16.msra.mxu0 %v7443_v52  ;;  %1112 = vmatpush1.bf16.msra.mxu1 %v7446_v53  ;;  %v7539_v52 = vld [vmem:[#allocation9 + $0x388] ss:$48 sps:$4 sm:$0xff]   ;;  %v7544_v53 = vld [vmem:[#allocation9 + $0x3e4] ss:$48 sps:$4 sm:$0xff]  }
  0xc9   :  { %1007 = vmatprep.subr.bf16.mxu0 %v7451_v54  ;;  %1113 = vmatprep.subr.bf16.mxu1 %v7454_v55  ;;  %v7547_v54 = vld [vmem:[#allocation9 + $0x3ec] ss:$48 sps:$4 sm:$0xff]   ;;  %v7542_v55 = vld [vmem:[#allocation9 + $0x3e0] ss:$48 sps:$4 sm:$0xff]  }
  0xcc   :  { %1008 = vmatpush1.bf16.msra.mxu0 %v7449_v56  ;;  %1114 = vmatpush1.bf16.msra.mxu1 %v7452_v57  ;;  %v7545_v56 = vld [vmem:[#allocation9 + $0x3e8] ss:$48 sps:$4 sm:$0xff]   ;;  %v7550_v57 = vld [vmem:[#allocation9 + $0x444] ss:$48 sps:$4 sm:$0xff]  }
  0xcd   :  { %1009 = vmatprep.subr.bf16.mxu0 %v7457_v58  ;;  %1115 = vmatprep.subr.bf16.mxu1 %v7460_v59  ;;  %v7553_v58 = vld [vmem:[#allocation9 + $0x44c] ss:$48 sps:$4 sm:$0xff]   ;;  %v7548_v59 = vld [vmem:[#allocation9 + $0x440] ss:$48 sps:$4 sm:$0xff]  }
  0xd0   :  { %1010 = vmatpush1.bf16.msra.mxu0 %v7455_v60  ;;  %1116 = vmatpush1.bf16.msra.mxu1 %v7458_v61  ;;  %v7551_v60 = vld [vmem:[#allocation9 + $0x448] ss:$48 sps:$4 sm:$0xff]   ;;  %v7556_v61 = vld [vmem:[#allocation9 + $0x4a4] ss:$48 sps:$4 sm:$0xff]  }
  0xd1   :  { %1011 = vmatprep.subr.bf16.mxu0 %v7466_v62  ;;  %1117 = vmatprep.subr.bf16.mxu1 %v7469_v63  ;;  %v7559_v62 = vld [vmem:[#allocation9 + $0x4ac] ss:$48 sps:$4 sm:$0xff]   ;;  %v7554_v63 = vld [vmem:[#allocation9 + $0x4a0] ss:$48 sps:$4 sm:$0xff]  }
  0xd4   :  { %1012 = vmatpush1.bf16.msra.mxu0 %v7464_v0  ;;  %1118 = vmatpush1.bf16.msra.mxu1 %v7467_v1  ;;  %v7557_v0 = vld [vmem:[#allocation9 + $0x4a8] ss:$48 sps:$4 sm:$0xff]   ;;  %v7562_v1 = vld [vmem:[#allocation9 + $0x504] ss:$48 sps:$4 sm:$0xff]  }
  0xd5   :  { %1013 = vmatprep.subr.bf16.mxu0 %v7472_v2  ;;  %1119 = vmatprep.subr.bf16.mxu1 %v7475_v3  ;;  %v7565_v2 = vld [vmem:[#allocation9 + $0x50c] ss:$48 sps:$4 sm:$0xff]   ;;  %v7560_v3 = vld [vmem:[#allocation9 + $0x500] ss:$48 sps:$4 sm:$0xff]  }
  0xd8   :  { %1014 = vmatpush1.bf16.msra.mxu0 %v7470_v4  ;;  %1120 = vmatpush1.bf16.msra.mxu1 %v7473_v6  ;;  %v7563_v4 = vld [vmem:[#allocation9 + $0x508] ss:$48 sps:$4 sm:$0xff]   ;;  %v7568_v6 = vld [vmem:[#allocation9 + $0x564] ss:$48 sps:$4 sm:$0xff]  }
  0xd9   :  { %1948 = vmatprep.subr.bf16.mxu0 %v7481_v7  ;;  %2054 = vmatprep.subr.bf16.mxu1 %v7484_v8  ;;  %v7571_v7 = vld [vmem:[#allocation9 + $0x56c] ss:$48 sps:$4 sm:$0xff]   ;;  %v7566_v8 = vld [vmem:[#allocation9 + $0x560] ss:$48 sps:$4 sm:$0xff]  }
  0xdb   :  { %1016 = vmatmul.mubr.bf16.vlgmr.msra.gmra.mrb[0].mxu0 %v8463_v9  ;;  %1122 = vmatmul.mubr.bf16.vlgmr.msra.gmra.mrb[0].mxu1 %v8463_v9 }
  0xdc   :  { %1949 = vmatpush1.bf16.msra.mxu0 %v7479_v10  ;;  %2055 = vmatpush1.bf16.msra.mxu1 %v7482_v11  ;;  %v7569_v10 = vld [vmem:[#allocation9 + $0x568] ss:$48 sps:$4 sm:$0xff]   ;;  %v7574_v11 = vld [vmem:[#allocation9 + $0x5c4] ss:$48 sps:$4 sm:$0xff]  }
  0xdd   :  { %1950 = vmatprep.subr.bf16.mxu0 %v7487_v12  ;;  %2056 = vmatprep.subr.bf16.mxu1 %v7490_v13  ;;  %v7577_v12 = vld [vmem:[#allocation9 + $0x5cc] ss:$48 sps:$4 sm:$0xff]   ;;  %v7572_v13 = vld [vmem:[#allocation9 + $0x5c0] ss:$48 sps:$4 sm:$0xff]  }
  0xde   :  { %1025 = vmatprep.mubr.bf16.mxu0 %v8465_v14  ;;  %1131 = vmatprep.mubr.bf16.mxu1 %v8465_v14 }
  0xe0   :  { %1951 = vmatpush1.bf16.msra.mxu0 %v7485_v15  ;;  %2057 = vmatpush1.bf16.msra.mxu1 %v7488_v16  ;;  %v7575_v15 = vld [vmem:[#allocation9 + $0x5c8] ss:$48 sps:$4 sm:$0xff]   ;;  %v7580_v16 = vld [vmem:[#allocation9 + $0x624] ss:$48 sps:$4 sm:$0xff]  }
  0xe1   :  { %1952 = vmatprep.subr.bf16.mxu0 %v7496_v17  ;;  %2058 = vmatprep.subr.bf16.mxu1 %v7499_v18  ;;  %v7583_v17 = vld [vmem:[#allocation9 + $0x62c] ss:$48 sps:$4 sm:$0xff]   ;;  %v7578_v18 = vld [vmem:[#allocation9 + $0x620] ss:$48 sps:$4 sm:$0xff]  }
  0xe3   :  { %1026 = vmatmul.mubr.bf16.gmra.mrb[4].mxu0 %v8470_v19  ;;  %1132 = vmatmul.mubr.bf16.gmra.mrb[4].mxu1 %v8470_v19 }
  0xe4   :  { %1953 = vmatpush1.bf16.msra.mxu0 %v7494_v20  ;;  %2059 = vmatpush1.bf16.msra.mxu1 %v7497_v21  ;;  %v7581_v20 = vld [vmem:[#allocation9 + $0x628] ss:$48 sps:$4 sm:$0xff]   ;;  %v7586_v21 = vld [vmem:[#allocation9 + $0x684] ss:$48 sps:$4 sm:$0xff]  }
  0xe5   :  { %1954 = vmatprep.subr.bf16.mxu0 %v7502_v22  ;;  %2060 = vmatprep.subr.bf16.mxu1 %v7505_v23  ;;  %v7589_v22 = vld [vmem:[#allocation9 + $0x68c] ss:$48 sps:$4 sm:$0xff]   ;;  %v7584_v23 = vld [vmem:[#allocation9 + $0x680] ss:$48 sps:$4 sm:$0xff]  }
  0xe6   :  { %1980 = vmatprep.mubr.bf16.mxu0 %v8443_v47  ;;  %2086 = vmatprep.mubr.bf16.mxu1 %v8443_v47  ;;  %v7526_v47 = vld [vmem:[#allocation9 + $0x2c4] ss:$48 sps:$4 sm:$0xff]  }
  0xe8   :  { %1955 = vmatpush1.bf16.msra.mxu0 %v7500_v24  ;;  %2061 = vmatpush1.bf16.msra.mxu1 %v7503_v26  ;;  %v7587_v24 = vld [vmem:[#allocation9 + $0x688] ss:$48 sps:$4 sm:$0xff]   ;;  %v7592_v26 = vld [vmem:[#allocation9 + $0x6e4] ss:$48 sps:$4 sm:$0xff]  }
  0xe9   :  { %1956 = vmatprep.subr.bf16.mxu0 %v7508_v28  ;;  %2062 = vmatprep.subr.bf16.mxu1 %v7511_v29  ;;  %v7595_v28 = vld [vmem:[#allocation9 + $0x6ec] ss:$48 sps:$4 sm:$0xff]   ;;  %v7590_v29 = vld [vmem:[#allocation9 + $0x6e0] ss:$48 sps:$4 sm:$0xff]  }
  0xec   :  { %1957 = vmatpush1.bf16.msra.mxu0 %v7506_v30  ;;  %2063 = vmatpush1.bf16.msra.mxu1 %v7509_v31  ;;  %v7593_v30 = vld [vmem:[#allocation9 + $0x6e8] ss:$48 sps:$4 sm:$0xff]   ;;  %v7598_v31 = vld [vmem:[#allocation9 + $0x744] ss:$48 sps:$4 sm:$0xff]  }
  0xed   :  { %1958 = vmatprep.subr.bf16.mxu0 %v7514_v32  ;;  %2064 = vmatprep.subr.bf16.mxu1 %v7517_v33  ;;  %v7596_v32 = vld [vmem:[#allocation9 + $0x740] ss:$48 sps:$4 sm:$0xff]   ;;  %v7599_v33 = vld [vmem:[#allocation9 + $0x748] ss:$48 sps:$4 sm:$0xff]  }
  0xf0   :  { %1959 = vmatpush1.bf16.msra.mxu0 %v7512_v35  ;;  %2065 = vmatpush1.bf16.msra.mxu1 %v7515_v36  ;;  %v7604_v35 = vld [vmem:[#allocation9 + $0x7a4] ss:$48 sps:$4 sm:$0xff]   ;;  %v7602_v36 = vld [vmem:[#allocation9 + $0x7a0] ss:$48 sps:$4 sm:$0xff]  }
  0xf1   :  { %1960 = vmatprep.subr.bf16.mxu0 %v7520_v37  ;;  %2066 = vmatprep.subr.bf16.mxu1 %v7523_v38  ;;  %v7605_v37 = vld [vmem:[#allocation9 + $0x7a8] ss:$48 sps:$4 sm:$0xff]   ;;  %v7610_v38 = vld [vmem:[#allocation9 + $0x804] ss:$48 sps:$4 sm:$0xff]  }
  0xf4   :  { %1961 = vmatpush1.bf16.msra.mxu0 %v7518_v39  ;;  %2067 = vmatpush1.bf16.msra.mxu1 %v7521_v40  ;;  %v7613_v39 = vld [vmem:[#allocation9 + $0x80c] ss:$48 sps:$4 sm:$0xff]   ;;  %v7608_v40 = vld [vmem:[#allocation9 + $0x800] ss:$48 sps:$4 sm:$0xff]  }
  0xf5   :  { %1962 = vmatprep.subr.bf16.mxu0 %v7526_v47  ;;  %2068 = vmatprep.subr.bf16.mxu1 %v7529_v41  ;;  %v7616_v47 = vld [vmem:[#allocation9 + $0x864] ss:$48 sps:$4 sm:$0xff]   ;;  %v7619_v41 = vld [vmem:[#allocation9 + $0x86c] ss:$48 sps:$4 sm:$0xff]  }
  0xf8   :  { %1963 = vmatpush1.bf16.msra.mxu0 %v7524_v42  ;;  %2069 = vmatpush1.bf16.msra.mxu1 %v7527_v43  ;;  %v7614_v42 = vld [vmem:[#allocation9 + $0x860] ss:$48 sps:$4 sm:$0xff]   ;;  %v7617_v43 = vld [vmem:[#allocation9 + $0x868] ss:$48 sps:$4 sm:$0xff]  }
  0xf9   :  { %1964 = vmatprep.subr.bf16.mxu0 %v7532_v44  ;;  %2070 = vmatprep.subr.bf16.mxu1 %v7535_v45  ;;  %v7625_v44 = vld [vmem:[#allocation9 + $0x8cc] ss:$48 sps:$4 sm:$0xff]   ;;  %v7620_v45 = vld [vmem:[#allocation9 + $0x8c0] ss:$48 sps:$4 sm:$0xff]  }
  0xfc   :  { %1965 = vmatpush1.bf16.msra.mxu0 %v7530_v46  ;;  %2071 = vmatpush1.bf16.msra.mxu1 %v7533_v48  ;;  %v7623_v46 = vld [vmem:[#allocation9 + $0x8c8] ss:$48 sps:$4 sm:$0xff]   ;;  %v7628_v48 = vld [vmem:[#allocation9 + $0x924] ss:$48 sps:$4 sm:$0xff]  }
  0xfd   :  { %1966 = vmatprep.subr.bf16.mxu0 %v7538_v49  ;;  %2072 = vmatprep.subr.bf16.mxu1 %v7541_v50  ;;  %v7631_v49 = vld [vmem:[#allocation9 + $0x92c] ss:$48 sps:$4 sm:$0xff]   ;;  %v7626_v50 = vld [vmem:[#allocation9 + $0x920] ss:$48 sps:$4 sm:$0xff]  }
 0x100   :  { %1967 = vmatpush1.bf16.msra.mxu0 %v7536_v51  ;;  %2073 = vmatpush1.bf16.msra.mxu1 %v7539_v52  ;;  %v7629_v51 = vld [vmem:[#allocation9 + $0x928] ss:$48 sps:$4 sm:$0xff]   ;;  %v7634_v52 = vld [vmem:[#allocation9 + $0x984] ss:$48 sps:$4 sm:$0xff]  }
 0x101   :  { %1968 = vmatprep.subr.bf16.mxu0 %v7544_v53  ;;  %2074 = vmatprep.subr.bf16.mxu1 %v7547_v54  ;;  %v7637_v53 = vld [vmem:[#allocation9 + $0x98c] ss:$48 sps:$4 sm:$0xff]   ;;  %v7632_v54 = vld [vmem:[#allocation9 + $0x980] ss:$48 sps:$4 sm:$0xff]  }
 0x104   :  { %1969 = vmatpush1.bf16.msra.mxu0 %v7542_v55  ;;  %2075 = vmatpush1.bf16.msra.mxu1 %v7545_v56  ;;  %v7635_v55 = vld [vmem:[#allocation9 + $0x988] ss:$48 sps:$4 sm:$0xff]   ;;  %v7640_v56 = vld [vmem:[#allocation9 + $0x9e4] ss:$48 sps:$4 sm:$0xff]  }
 0x105   :  { %1970 = vmatprep.subr.bf16.mxu0 %v7550_v57  ;;  %2076 = vmatprep.subr.bf16.mxu1 %v7553_v58  ;;  %v7643_v57 = vld [vmem:[#allocation9 + $0x9ec] ss:$48 sps:$4 sm:$0xff]   ;;  %v7638_v58 = vld [vmem:[#allocation9 + $0x9e0] ss:$48 sps:$4 sm:$0xff]  }
 0x108   :  { %1971 = vmatpush1.bf16.msra.mxu0 %v7548_v59  ;;  %2077 = vmatpush1.bf16.msra.mxu1 %v7551_v60  ;;  %v7641_v59 = vld [vmem:[#allocation9 + $0x9e8] ss:$48 sps:$4 sm:$0xff]   ;;  %v7646_v60 = vld [vmem:[#allocation9 + $0xa44] ss:$48 sps:$4 sm:$0xff]  }
 0x109   :  { %1972 = vmatprep.subr.bf16.mxu0 %v7556_v61  ;;  %2078 = vmatprep.subr.bf16.mxu1 %v7559_v62  ;;  %v7649_v61 = vld [vmem:[#allocation9 + $0xa4c] ss:$48 sps:$4 sm:$0xff]   ;;  %v7644_v62 = vld [vmem:[#allocation9 + $0xa40] ss:$48 sps:$4 sm:$0xff]  }
 0x10c   :  { %1973 = vmatpush1.bf16.msra.mxu0 %v7554_v63  ;;  %2079 = vmatpush1.bf16.msra.mxu1 %v7557_v0  ;;  %v7647_v63 = vld [vmem:[#allocation9 + $0xa48] ss:$48 sps:$4 sm:$0xff]   ;;  %v7652_v0 = vld [vmem:[#allocation9 + $0xaa4] ss:$48 sps:$4 sm:$0xff]  }
 0x10d   :  { %1974 = vmatprep.subr.bf16.mxu0 %v7562_v1  ;;  %2080 = vmatprep.subr.bf16.mxu1 %v7565_v2  ;;  %v7655_v1 = vld [vmem:[#allocation9 + $0xaac] ss:$48 sps:$4 sm:$0xff]   ;;  %v7650_v2 = vld [vmem:[#allocation9 + $0xaa0] ss:$48 sps:$4 sm:$0xff]  }
 0x110   :  { %1975 = vmatpush1.bf16.msra.mxu0 %v7560_v3  ;;  %2081 = vmatpush1.bf16.msra.mxu1 %v7563_v4  ;;  %v7653_v3 = vld [vmem:[#allocation9 + $0xaa8] ss:$48 sps:$4 sm:$0xff]   ;;  %v7658_v4 = vld [vmem:[#allocation9 + $0xb04] ss:$48 sps:$4 sm:$0xff]  }
 0x111   :  { %1976 = vmatprep.subr.bf16.mxu0 %v7568_v6  ;;  %2082 = vmatprep.subr.bf16.mxu1 %v7571_v7  ;;  %v7661_v6 = vld [vmem:[#allocation9 + $0xb0c] ss:$48 sps:$4 sm:$0xff]   ;;  %v7656_v7 = vld [vmem:[#allocation9 + $0xb00] ss:$48 sps:$4 sm:$0xff]  }
 0x114   :  { %1977 = vmatpush1.bf16.msra.mxu0 %v7566_v8  ;;  %2083 = vmatpush1.bf16.msra.mxu1 %v7569_v10  ;;  %v7659_v8 = vld [vmem:[#allocation9 + $0xb08] ss:$48 sps:$4 sm:$0xff]   ;;  %v7664_v10 = vld [vmem:[#allocation9 + $0xb64] ss:$48 sps:$4 sm:$0xff]  }
 0x115   :  { %1978 = vmatprep.subr.bf16.mxu0 %v7574_v11  ;;  %2084 = vmatprep.subr.bf16.mxu1 %v7577_v12  ;;  %v7667_v11 = vld [vmem:[#allocation9 + $0xb6c] ss:$48 sps:$4 sm:$0xff]   ;;  %v7662_v12 = vld [vmem:[#allocation9 + $0xb60] ss:$48 sps:$4 sm:$0xff]  }
 0x118   :  { %1979 = vmatpush1.bf16.msra.mxu0 %v7572_v13  ;;  %2085 = vmatpush1.bf16.msra.mxu1 %v7575_v15  ;;  %v7665_v13 = vld [vmem:[#allocation9 + $0xb68] ss:$48 sps:$4 sm:$0xff]   ;;  %v7670_v15 = vld [vmem:[#allocation9 + $0xbc4] ss:$48 sps:$4 sm:$0xff]  }
 0x119   :  { %2001 = vmatprep.subr.bf16.mxu0 %v7580_v16  ;;  %2107 = vmatprep.subr.bf16.mxu1 %v7583_v17  ;;  %v7673_v16 = vld [vmem:[#allocation9 + $0xbcc] ss:$48 sps:$4 sm:$0xff]   ;;  %v7668_v17 = vld [vmem:[#allocation9 + $0xbc0] ss:$48 sps:$4 sm:$0xff]  }
 0x11b   :  { %1981 = vmatmul.mubr.bf16.vlgmr.msra.gmra.mrb[8].mxu0 %v8447_v5  ;;  %2087 = vmatmul.mubr.bf16.vlgmr.msra.gmra.mrb[8].mxu1 %v8447_v5  ;;  %v7601_v5 = vld [vmem:[#allocation9 + $0x74c] ss:$48 sps:$4 sm:$0xff]  }
 0x11c   :  { %2002 = vmatpush1.bf16.msra.mxu0 %v7578_v18  ;;  %2108 = vmatpush1.bf16.msra.mxu1 %v7581_v20  ;;  %v7671_v18 = vld [vmem:[#allocation9 + $0xbc8] ss:$48 sps:$4 sm:$0xff]   ;;  %v7676_v20 = vld [vmem:[#allocation9 + $0x4] ss:$48 sps:$4 sm:$0xff]  }
 0x11d   :  { %2003 = vmatprep.subr.bf16.mxu0 %v7586_v21  ;;  %2109 = vmatprep.subr.bf16.mxu1 %v7589_v22  ;;  %v7679_v21 = vld [vmem:[#allocation9 + $0xc] ss:$48 sps:$4 sm:$0xff]   ;;  %v7674_v22 = vld [vmem:[#allocation9] ss:$48 sps:$4 sm:$0xff]  }
 0x11e   :  { %1990 = vmatprep.mubr.bf16.mxu0 %v8451_v25  ;;  %2096 = vmatprep.mubr.bf16.mxu1 %v8451_v25  ;;  %v7607_v25 = vld [vmem:[#allocation9 + $0x7ac] ss:$48 sps:$4 sm:$0xff]  }
 0x120   :  { %2004 = vmatpush1.bf16.msra.mxu0 %v7584_v23  ;;  %2110 = vmatpush1.bf16.msra.mxu1 %v7587_v24  ;;  %v7677_v23 = vld [vmem:[#allocation9 + $0x8] ss:$48 sps:$4 sm:$0xff]   ;;  %v7682_v24 = vld [vmem:[#allocation9 + $0x64] ss:$48 sps:$4 sm:$0xff]  }
 0x121   :  { %2005 = vmatprep.subr.bf16.mxu0 %v7592_v26  ;;  %2111 = vmatprep.subr.bf16.mxu1 %v7595_v28  ;;  %v7685_v26 = vld [vmem:[#allocation9 + $0x6c] ss:$48 sps:$4 sm:$0xff]   ;;  %v7680_v28 = vld [vmem:[#allocation9 + $0x60] ss:$48 sps:$4 sm:$0xff]  }
 0x123   :  { %1991 = vmatmul.mubr.bf16.gmra.mrb[12].mxu0 %v8453_v27  ;;  %2097 = vmatmul.mubr.bf16.gmra.mrb[12].mxu1 %v8453_v27  ;;  %v7611_v27 = vld [vmem:[#allocation9 + $0x808] ss:$48 sps:$4 sm:$0xff]  }
 0x124   :  { %2006 = vmatpush1.bf16.msra.mxu0 %v7590_v29  ;;  %2112 = vmatpush1.bf16.msra.mxu1 %v7593_v30  ;;  %v7683_v29 = vld [vmem:[#allocation9 + $0x68] ss:$48 sps:$4 sm:$0xff]   ;;  %v7688_v30 = vld [vmem:[#allocation9 + $0xc4] ss:$48 sps:$4 sm:$0xff]  }
 0x125   :  { %2007 = vmatprep.subr.bf16.mxu0 %v7598_v31  ;;  %2113 = vmatprep.subr.bf16.mxu1 %v7601_v5  ;;  %v7691_v31 = vld [vmem:[#allocation9 + $0xcc] ss:$48 sps:$4 sm:$0xff]   ;;  %v7686_v5 = vld [vmem:[#allocation9 + $0xc0] ss:$48 sps:$4 sm:$0xff]  }
 0x126   :  { %2033 = vmatprep.mubr.bf16.mxu0 %v8459_v34  ;;  %2139 = vmatprep.mubr.bf16.mxu1 %v8459_v34  ;;  %v7622_v34 = vld [vmem:[#allocation9 + $0x8c4] ss:$48 sps:$4 sm:$0xff]  }
 0x128   :  { %2008 = vmatpush1.bf16.msra.mxu0 %v7596_v32  ;;  %2114 = vmatpush1.bf16.msra.mxu1 %v7599_v33  ;;  %v7689_v32 = vld [vmem:[#allocation9 + $0xc8] ss:$48 sps:$4 sm:$0xff]   ;;  %v7694_v33 = vld [vmem:[#allocation9 + $0x124] ss:$48 sps:$4 sm:$0xff]  }
 0x129   :  { %2009 = vmatprep.subr.bf16.mxu0 %v7604_v35  ;;  %2115 = vmatprep.subr.bf16.mxu1 %v7607_v25  ;;  %v7692_v35 = vld [vmem:[#allocation9 + $0x120] ss:$48 sps:$4 sm:$0xff]   ;;  %v7695_v25 = vld [vmem:[#allocation9 + $0x128] ss:$48 sps:$4 sm:$0xff]  }
 0x12c   :  { %2010 = vmatpush1.bf16.msra.mxu0 %v7602_v36  ;;  %2116 = vmatpush1.bf16.msra.mxu1 %v7605_v37  ;;  %v7772_v36 = vld [vmem:[#allocation6 + $0x4] ss:$16 sps:$4 sm:$0xff]  }
 0x12d   :  { %2011 = vmatprep.subr.bf16.mxu0 %v7610_v38  ;;  %2117 = vmatprep.subr.bf16.mxu1 %v7613_v39  ;;  %v7700_v37 = vld [vmem:[#allocation9 + $0x184] ss:$48 sps:$4 sm:$0xff]   ;;  %v7703_v38 = vld [vmem:[#allocation9 + $0x18c] ss:$48 sps:$4 sm:$0xff]   ;;  %v7701_v39 = vld [vmem:[#allocation9 + $0x188] ss:$48 sps:$4 sm:$0xff]  }
 0x130   :  { %2012 = vmatpush1.bf16.msra.mxu0 %v7608_v40  ;;  %2118 = vmatpush1.bf16.msra.mxu1 %v7611_v27  ;;  %v7706_v40 = vld [vmem:[#allocation9 + $0x1e4] ss:$48 sps:$4 sm:$0xff]   ;;  %v7709_v27 = vld [vmem:[#allocation9 + $0x1ec] ss:$48 sps:$4 sm:$0xff]  }
 0x131   :  { %2013 = vmatprep.subr.bf16.mxu0 %v7616_v47  ;;  %2119 = vmatprep.subr.bf16.mxu1 %v7619_v41  ;;  %v7704_v47 = vld [vmem:[#allocation9 + $0x1e0] ss:$48 sps:$4 sm:$0xff]   ;;  %v7707_v41 = vld [vmem:[#allocation9 + $0x1e8] ss:$48 sps:$4 sm:$0xff]  }
 0x134   :  { %2014 = vmatpush1.bf16.msra.mxu0 %v7614_v42  ;;  %2120 = vmatpush1.bf16.msra.mxu1 %v7617_v43  ;;  %v7712_v42 = vld [vmem:[#allocation9 + $0x244] ss:$48 sps:$4 sm:$0xff]   ;;  %v7715_v43 = vld [vmem:[#allocation9 + $0x24c] ss:$48 sps:$4 sm:$0xff]  }
 0x135   :  { %2015 = vmatprep.subr.bf16.mxu0 %v7622_v34  ;;  %2121 = vmatprep.subr.bf16.mxu1 %v7625_v44  ;;  %v7713_v34 = vld [vmem:[#allocation9 + $0x248] ss:$48 sps:$4 sm:$0xff]   ;;  %v7718_v44 = vld [vmem:[#allocation9 + $0x2a4] ss:$48 sps:$4 sm:$0xff]  }
 0x138   :  { %2016 = vmatpush1.bf16.msra.mxu0 %v7620_v45  ;;  %2122 = vmatpush1.bf16.msra.mxu1 %v7623_v46  ;;  %v7721_v45 = vld [vmem:[#allocation9 + $0x2ac] ss:$48 sps:$4 sm:$0xff]   ;;  %v7716_v46 = vld [vmem:[#allocation9 + $0x2a0] ss:$48 sps:$4 sm:$0xff]  }
 0x139   :  { %2017 = vmatprep.subr.bf16.mxu0 %v7628_v48  ;;  %2123 = vmatprep.subr.bf16.mxu1 %v7631_v49  ;;  %v7719_v48 = vld [vmem:[#allocation9 + $0x2a8] ss:$48 sps:$4 sm:$0xff]   ;;  %v7724_v49 = vld [vmem:[#allocation9 + $0x304] ss:$48 sps:$4 sm:$0xff]  }
 0x13c   :  { %2018 = vmatpush1.bf16.msra.mxu0 %v7626_v50  ;;  %2124 = vmatpush1.bf16.msra.mxu1 %v7629_v51  ;;  %v7727_v50 = vld [vmem:[#allocation9 + $0x30c] ss:$48 sps:$4 sm:$0xff]   ;;  %v7722_v51 = vld [vmem:[#allocation9 + $0x300] ss:$48 sps:$4 sm:$0xff]  }
 0x13d   :  { %2019 = vmatprep.subr.bf16.mxu0 %v7634_v52  ;;  %2125 = vmatprep.subr.bf16.mxu1 %v7637_v53  ;;  %v7725_v52 = vld [vmem:[#allocation9 + $0x308] ss:$48 sps:$4 sm:$0xff]   ;;  %v7730_v53 = vld [vmem:[#allocation9 + $0x364] ss:$48 sps:$4 sm:$0xff]  }
 0x140   :  { %2020 = vmatpush1.bf16.msra.mxu0 %v7632_v54  ;;  %2126 = vmatpush1.bf16.msra.mxu1 %v7635_v55  ;;  %v7733_v54 = vld [vmem:[#allocation9 + $0x36c] ss:$48 sps:$4 sm:$0xff]   ;;  %v7728_v55 = vld [vmem:[#allocation9 + $0x360] ss:$48 sps:$4 sm:$0xff]  }
 0x141   :  { %2021 = vmatprep.subr.bf16.mxu0 %v7640_v56  ;;  %2127 = vmatprep.subr.bf16.mxu1 %v7643_v57  ;;  %v7731_v56 = vld [vmem:[#allocation9 + $0x368] ss:$48 sps:$4 sm:$0xff]   ;;  %v7736_v57 = vld [vmem:[#allocation9 + $0x3c4] ss:$48 sps:$4 sm:$0xff]  }
 0x144   :  { %2022 = vmatpush1.bf16.msra.mxu0 %v7638_v58  ;;  %2128 = vmatpush1.bf16.msra.mxu1 %v7641_v59  ;;  %v7739_v58 = vld [vmem:[#allocation9 + $0x3cc] ss:$48 sps:$4 sm:$0xff]   ;;  %v7734_v59 = vld [vmem:[#allocation9 + $0x3c0] ss:$48 sps:$4 sm:$0xff]  }
 0x145   :  { %2023 = vmatprep.subr.bf16.mxu0 %v7646_v60  ;;  %2129 = vmatprep.subr.bf16.mxu1 %v7649_v61  ;;  %v7737_v60 = vld [vmem:[#allocation9 + $0x3c8] ss:$48 sps:$4 sm:$0xff]   ;;  %v7742_v61 = vld [vmem:[#allocation9 + $0x424] ss:$48 sps:$4 sm:$0xff]  }
 0x148   :  { %2024 = vmatpush1.bf16.msra.mxu0 %v7644_v62  ;;  %2130 = vmatpush1.bf16.msra.mxu1 %v7647_v63  ;;  %v7745_v62 = vld [vmem:[#allocation9 + $0x42c] ss:$48 sps:$4 sm:$0xff]   ;;  %v7740_v63 = vld [vmem:[#allocation9 + $0x420] ss:$48 sps:$4 sm:$0xff]  }
 0x149   :  { %2025 = vmatprep.subr.bf16.mxu0 %v7652_v0  ;;  %2131 = vmatprep.subr.bf16.mxu1 %v7655_v1  ;;  %v7743_v0 = vld [vmem:[#allocation9 + $0x428] ss:$48 sps:$4 sm:$0xff]   ;;  %v7748_v1 = vld [vmem:[#allocation9 + $0x484] ss:$48 sps:$4 sm:$0xff]  }
 0x14c   :  { %2026 = vmatpush1.bf16.msra.mxu0 %v7650_v2  ;;  %2132 = vmatpush1.bf16.msra.mxu1 %v7653_v3  ;;  %v7751_v2 = vld [vmem:[#allocation9 + $0x48c] ss:$48 sps:$4 sm:$0xff]   ;;  %v7746_v3 = vld [vmem:[#allocation9 + $0x480] ss:$48 sps:$4 sm:$0xff]  }
 0x14d   :  { %2027 = vmatprep.subr.bf16.mxu0 %v7658_v4  ;;  %2133 = vmatprep.subr.bf16.mxu1 %v7661_v6  ;;  %v7749_v4 = vld [vmem:[#allocation9 + $0x488] ss:$48 sps:$4 sm:$0xff]   ;;  %v7754_v6 = vld [vmem:[#allocation9 + $0x4e4] ss:$48 sps:$4 sm:$0xff]  }
 0x150   :  { %2028 = vmatpush1.bf16.msra.mxu0 %v7656_v7  ;;  %2134 = vmatpush1.bf16.msra.mxu1 %v7659_v8  ;;  %v7757_v7 = vld [vmem:[#allocation9 + $0x4ec] ss:$48 sps:$4 sm:$0xff]   ;;  %v7752_v8 = vld [vmem:[#allocation9 + $0x4e0] ss:$48 sps:$4 sm:$0xff]  }
 0x151   :  { %2029 = vmatprep.subr.bf16.mxu0 %v7664_v10  ;;  %2135 = vmatprep.subr.bf16.mxu1 %v7667_v11  ;;  %v7755_v10 = vld [vmem:[#allocation9 + $0x4e8] ss:$48 sps:$4 sm:$0xff]   ;;  %v7760_v11 = vld [vmem:[#allocation9 + $0x544] ss:$48 sps:$4 sm:$0xff]  }
 0x154   :  { %2030 = vmatpush1.bf16.msra.mxu0 %v7662_v12  ;;  %2136 = vmatpush1.bf16.msra.mxu1 %v7665_v13  ;;  %v7763_v12 = vld [vmem:[#allocation9 + $0x54c] ss:$48 sps:$4 sm:$0xff]   ;;  %v7758_v13 = vld [vmem:[#allocation9 + $0x540] ss:$48 sps:$4 sm:$0xff]  }
 0x155   :  { %2031 = vmatprep.subr.bf16.mxu0 %v7670_v15  ;;  %2137 = vmatprep.subr.bf16.mxu1 %v7673_v16  ;;  %v7761_v15 = vld [vmem:[#allocation9 + $0x548] ss:$48 sps:$4 sm:$0xff]   ;;  %v7766_v16 = vld [vmem:[#allocation9 + $0x5a4] ss:$48 sps:$4 sm:$0xff]  }
 0x158   :  { %2032 = vmatpush1.bf16.msra.mxu0 %v7668_v17  ;;  %2138 = vmatpush1.bf16.msra.mxu1 %v7671_v18  ;;  %v7769_v17 = vld [vmem:[#allocation9 + $0x5ac] ss:$48 sps:$4 sm:$0xff]   ;;  %v7764_v18 = vld [vmem:[#allocation9 + $0x5a0] ss:$48 sps:$4 sm:$0xff]  }
 0x159   :  { %3020 = vmatprep.subr.bf16.mxu0 %v7676_v20  ;;  %3126 = vmatprep.subr.bf16.mxu1 %v7679_v21  ;;  %v7767_v20 = vld [vmem:[#allocation9 + $0x5a8] ss:$48 sps:$4 sm:$0xff]   ;;  %v7775_v21 = vld [vmem:[#allocation9 + $0x604] ss:$48 sps:$4 sm:$0xff]  }
 0x15b   :  { %2034 = vmatmul.mubr.bf16.vlgmr.msra.gmra.mrb[8].mxu0 %v8463_v9  ;;  %2140 = vmatmul.mubr.bf16.vlgmr.msra.gmra.mrb[8].mxu1 %v8463_v9  ;;  %v7697_v9 = vld [vmem:[#allocation9 + $0x12c] ss:$48 sps:$4 sm:$0xff]  }
 0x15c   :  { %3021 = vmatpush1.bf16.msra.mxu0 %v7674_v22  ;;  %3127 = vmatpush1.bf16.msra.mxu1 %v7677_v23  ;;  %v7778_v22 = vld [vmem:[#allocation9 + $0x60c] ss:$48 sps:$4 sm:$0xff]   ;;  %v7770_v23 = vld [vmem:[#allocation6] ss:$16 sps:$4 sm:$0xff]  }
 0x15d   :  { %3022 = vmatprep.subr.bf16.mxu0 %v7682_v24  ;;  %3128 = vmatprep.subr.bf16.mxu1 %v7685_v26  ;;  %v7773_v24 = vld [vmem:[#allocation9 + $0x600] ss:$48 sps:$4 sm:$0xff]   ;;  %v7776_v26 = vld [vmem:[#allocation9 + $0x608] ss:$48 sps:$4 sm:$0xff]  }
 0x15e   :  { %2043 = vmatprep.mubr.bf16.mxu0 %v8465_v14  ;;  %2149 = vmatprep.mubr.bf16.mxu1 %v8465_v14  ;;  %v7698_v14 = vld [vmem:[#allocation9 + $0x180] ss:$48 sps:$4 sm:$0xff]  }
 0x160   :  { %3023 = vmatpush1.bf16.msra.mxu0 %v7680_v28  ;;  %3129 = vmatpush1.bf16.msra.mxu1 %v7683_v29  ;;  %v7781_v28 = vld [vmem:[#allocation9 + $0x664] ss:$48 sps:$4 sm:$0xff]   ;;  %v7784_v29 = vld [vmem:[#allocation9 + $0x66c] ss:$48 sps:$4 sm:$0xff]  }
 0x161   :  { %3024 = vmatprep.subr.bf16.mxu0 %v7688_v30  ;;  %3130 = vmatprep.subr.bf16.mxu1 %v7691_v31  ;;  %v7857_v30 = vld [vmem:[#allocation6 + $0x24] ss:$16 sps:$4 sm:$0xff]   ;;  %v7779_v31 = vld [vmem:[#allocation9 + $0x660] ss:$48 sps:$4 sm:$0xff]  }
 0x163   :  { %2044 = vmatmul.mubr.bf16.gmra.mrb[12].mxu0 %v8470_v19  ;;  %2150 = vmatmul.mubr.bf16.gmra.mrb[12].mxu1 %v8470_v19  ;;  %v7710_v19 = vld [vmem:[#allocation9 + $0x240] ss:$48 sps:$4 sm:$0xff]  }
 0x164   :  { %3025 = vmatpush1.bf16.msra.mxu0 %v7686_v5  ;;  %3131 = vmatpush1.bf16.msra.mxu1 %v7689_v32  ;;  %v7782_v5 = vld [vmem:[#allocation9 + $0x668] ss:$48 sps:$4 sm:$0xff]   ;;  %v7787_v32 = vld [vmem:[#allocation9 + $0x6c4] ss:$48 sps:$4 sm:$0xff]  }
 0x165   :  { %3026 = vmatprep.subr.bf16.mxu0 %v7694_v33  ;;  %3132 = vmatprep.subr.bf16.mxu1 %v7697_v9  ;;  %v7790_v33 = vld [vmem:[#allocation9 + $0x6cc] ss:$48 sps:$4 sm:$0xff]   ;;  %v230_v9 = vlaneseq }
 0x166   :  { %3052 = vmatprep.mubr.bf16.mxu0 %v7772_v36  ;;  %3158 = vmatprep.mubr.bf16.mxu1 %v7772_v36  ;;  %v7788_v36 = vld [vmem:[#allocation9 + $0x6c8] ss:$48 sps:$4 sm:$0xff]  }
 0x168   :  { %3027 = vmatpush1.bf16.msra.mxu0 %v7692_v35  ;;  %3133 = vmatpush1.bf16.msra.mxu1 %v7695_v25  ;;  %v7859_v35 = vld [vmem:[#allocation6 + $0x20] ss:$16 sps:$4 sm:$0xff]  }
 0x169   :  { %3028 = vmatprep.subr.bf16.mxu0 %v7700_v37  ;;  %3134 = vmatprep.subr.bf16.mxu1 %v7703_v38  ;;  %v7785_v25 = vld [vmem:[#allocation9 + $0x6c0] ss:$48 sps:$4 sm:$0xff]   ;;  %v7793_v37 = vld [vmem:[#allocation9 + $0x724] ss:$48 sps:$4 sm:$0xff]   ;;  %v7796_v38 = vld [vmem:[#allocation9 + $0x72c] ss:$48 sps:$4 sm:$0xff]  }
 0x16c   :  { %3029 = vmatpush1.bf16.msra.mxu0 %v7698_v14  ;;  %3135 = vmatpush1.bf16.msra.mxu1 %v7701_v39  ;;  %v7874_v14 = vld [vmem:[#allocation6 + $0xc] ss:$16 sps:$4 sm:$0xff]   ;;  %v231_v39 = vshrl.u32 %v230_v9, 7 }
 0x16d   :  { %3030 = vmatprep.subr.bf16.mxu0 %v7706_v40  ;;  %3136 = vmatprep.subr.bf16.mxu1 %v7709_v27  ;;  %v7791_v40 = vld [vmem:[#allocation9 + $0x720] ss:$48 sps:$4 sm:$0xff]   ;;  %v7794_v27 = vld [vmem:[#allocation9 + $0x728] ss:$48 sps:$4 sm:$0xff]  }
 0x170   :  { %3031 = vmatpush1.bf16.msra.mxu0 %v7704_v47  ;;  %3137 = vmatpush1.bf16.msra.mxu1 %v7707_v41  ;;  %v7799_v47 = vld [vmem:[#allocation9 + $0x784] ss:$48 sps:$4 sm:$0xff]   ;;  %v7802_v41 = vld [vmem:[#allocation9 + $0x78c] ss:$48 sps:$4 sm:$0xff]  }
 0x171   :  { %3032 = vmatprep.subr.bf16.mxu0 %v7712_v42  ;;  %3138 = vmatprep.subr.bf16.mxu1 %v7715_v43  ;;  %v8491_v42 = vsub.s32 2, %v231_v39  ;;  %v8493_v43 = vsub.s32 3, %v231_v39 }
 0x174   :  { %3033 = vmatpush1.bf16.msra.mxu0 %v7710_v19  ;;  %3139 = vmatpush1.bf16.msra.mxu1 %v7713_v34  ;;  %v7797_v19 = vld [vmem:[#allocation9 + $0x780] ss:$48 sps:$4 sm:$0xff]   ;;  %v7800_v34 = vld [vmem:[#allocation9 + $0x788] ss:$48 sps:$4 sm:$0xff]  }
 0x175   :  { %3034 = vmatprep.subr.bf16.mxu0 %v7718_v44  ;;  %3140 = vmatprep.subr.bf16.mxu1 %v7721_v45  ;;  %v228_v44 = vld [vmem:[#allocation11 + $0x4] sm:$0xf]  ;;  %v8495_v45 = vsub.s32 0, %v231_v39 }
 0x178   :  { %3035 = vmatpush1.bf16.msra.mxu0 %v7716_v46  ;;  %3141 = vmatpush1.bf16.msra.mxu1 %v7719_v48  ;;  %v7805_v46 = vld [vmem:[#allocation9 + $0x7e4] ss:$48 sps:$4 sm:$0xff]   ;;  %v7808_v48 = vld [vmem:[#allocation9 + $0x7ec] ss:$48 sps:$4 sm:$0xff]  }
 0x179   :  { %3036 = vmatprep.subr.bf16.mxu0 %v7724_v49  ;;  %3142 = vmatprep.subr.bf16.mxu1 %v7727_v50  ;;  %v8497_v49 = vsub.s32 1, %v231_v39  ;;  %v8500_v50 = vrot.slane %v228_v44, %v8491_v42  ;;  %v7829_v39 = vld [vmem:[#allocation9 + $0x964] ss:$48 sps:$4 sm:$0xff]  }
 0x17c   :  { %3037 = vmatpush1.bf16.msra.mxu0 %v7722_v51  ;;  %3143 = vmatpush1.bf16.msra.mxu1 %v7725_v52  ;;  %v8503_v51 = vrot.slane %v228_v44, %v8493_v43  ;;  %v7803_v52 = vld [vmem:[#allocation9 + $0x7e0] ss:$48 sps:$4 sm:$0xff]  }
 0x17d   :  { %3038 = vmatprep.subr.bf16.mxu0 %v7730_v53  ;;  %3144 = vmatprep.subr.bf16.mxu1 %v7733_v54  ;;  %v7806_v53 = vld [vmem:[#allocation9 + $0x7e8] ss:$48 sps:$4 sm:$0xff]   ;;  %v233_v54 = vrot.slane %v228_v44, %v8495_v45 }
 0x180   :  { %3039 = vmatpush1.bf16.msra.mxu0 %v7728_v55  ;;  %3145 = vmatpush1.bf16.msra.mxu1 %v7731_v56  ;;  %v7811_v55 = vld [vmem:[#allocation9 + $0x844] ss:$48 sps:$4 sm:$0xff]   ;;  %v7814_v56 = vld [vmem:[#allocation9 + $0x84c] ss:$48 sps:$4 sm:$0xff]  }
 0x181   :  { %3040 = vmatprep.subr.bf16.mxu0 %v7736_v57  ;;  %3146 = vmatprep.subr.bf16.mxu1 %v7739_v58 }
 0x184   :  { %3041 = vmatpush1.bf16.msra.mxu0 %v7734_v59  ;;  %3147 = vmatpush1.bf16.msra.mxu1 %v7737_v60  ;;  %v237_v59 = vrot.slane %v228_v44, %v8497_v49 }
 0x185   :  { %3042 = vmatprep.subr.bf16.mxu0 %v7742_v61  ;;  %3148 = vmatprep.subr.bf16.mxu1 %v7745_v62 }
 0x188   :  { %3043 = vmatpush1.bf16.msra.mxu0 %v7740_v63  ;;  %3149 = vmatpush1.bf16.msra.mxu1 %v7743_v0 }
 0x189   :  { %3044 = vmatprep.subr.bf16.mxu0 %v7748_v1  ;;  %3150 = vmatprep.subr.bf16.mxu1 %v7751_v2  ;;  %v7809_v2 = vld [vmem:[#allocation9 + $0x840] ss:$48 sps:$4 sm:$0xff]  }
 0x18c   :  { %3045 = vmatpush1.bf16.msra.mxu0 %v7746_v3  ;;  %3151 = vmatpush1.bf16.msra.mxu1 %v7749_v4  ;;  %v7812_v3 = vld [vmem:[#allocation9 + $0x848] ss:$48 sps:$4 sm:$0xff]  }
 0x18d   :  { %3046 = vmatprep.subr.bf16.mxu0 %v7754_v6  ;;  %3152 = vmatprep.subr.bf16.mxu1 %v7757_v7 }
 0x190   :  { %3047 = vmatpush1.bf16.msra.mxu0 %v7752_v8  ;;  %3153 = vmatpush1.bf16.msra.mxu1 %v7755_v10 }
 0x191   :  { %3048 = vmatprep.subr.bf16.mxu0 %v7760_v11  ;;  %3154 = vmatprep.subr.bf16.mxu1 %v7763_v12  ;;  %v7817_v11 = vld [vmem:[#allocation9 + $0x8a4] ss:$48 sps:$4 sm:$0xff]  }
 0x194   :  { %3049 = vmatpush1.bf16.msra.mxu0 %v7758_v13  ;;  %3155 = vmatpush1.bf16.msra.mxu1 %v7761_v15 }
 0x195   :  { %3050 = vmatprep.subr.bf16.mxu0 %v7766_v16  ;;  %3156 = vmatprep.subr.bf16.mxu1 %v7769_v17  ;;  %v7820_v16 = vld [vmem:[#allocation9 + $0x8ac] ss:$48 sps:$4 sm:$0xff]  }
 0x198   :  { %3051 = vmatpush1.bf16.msra.mxu0 %v7764_v18  ;;  %3157 = vmatpush1.bf16.msra.mxu1 %v7767_v20 }
 0x199   :  { %3073 = vmatprep.subr.bf16.mxu0 %v7775_v21  ;;  %3179 = vmatprep.subr.bf16.mxu1 %v7778_v22  ;;  %v7815_v22 = vld [vmem:[#allocation9 + $0x8a0] ss:$48 sps:$4 sm:$0xff]  }
 0x19b   :  { %3053 = vmatmul.mubr.bf16.vlgmr.msra.gmra.mrb[16].mxu0 %v7770_v23  ;;  %3159 = vmatmul.mubr.bf16.vlgmr.msra.gmra.mrb[16].mxu1 %v7770_v23  ;;  %v7818_v23 = vld [vmem:[#allocation9 + $0x8a8] ss:$48 sps:$4 sm:$0xff]  }
 0x19c   :  { %3074 = vmatpush1.bf16.msra.mxu0 %v7773_v24  ;;  %3180 = vmatpush1.bf16.msra.mxu1 %v7776_v26  ;;  %v7823_v24 = vld [vmem:[#allocation9 + $0x904] ss:$48 sps:$4 sm:$0xff]   ;;  %v7826_v26 = vld [vmem:[#allocation9 + $0x90c] ss:$48 sps:$4 sm:$0xff]  }
 0x19d   :  { %3075 = vmatprep.subr.bf16.mxu0 %v7781_v28  ;;  %3181 = vmatprep.subr.bf16.mxu1 %v7784_v29 }
 0x19e   :  { %3062 = vmatprep.mubr.bf16.mxu0 %v7857_v30  ;;  %3168 = vmatprep.mubr.bf16.mxu1 %v7857_v30 }
 0x1a0   :  { %3076 = vmatpush1.bf16.msra.mxu0 %v7779_v31  ;;  %3182 = vmatpush1.bf16.msra.mxu1 %v7782_v5 }
 0x1a1   :  { %3077 = vmatprep.subr.bf16.mxu0 %v7787_v32  ;;  %3183 = vmatprep.subr.bf16.mxu1 %v7790_v33 }
 0x1a3   :  { %3063 = vmatmul.mubr.bf16.gmra.mrb[20].mxu0 %v7859_v35  ;;  %3169 = vmatmul.mubr.bf16.gmra.mrb[20].mxu1 %v7859_v35  ;;  %v7821_v35 = vld [vmem:[#allocation9 + $0x900] ss:$48 sps:$4 sm:$0xff]  }
 0x1a4   :  { %3078 = vmatpush1.bf16.msra.mxu0 %v7785_v25  ;;  %3184 = vmatpush1.bf16.msra.mxu1 %v7788_v36  ;;  %v7824_v25 = vld [vmem:[#allocation9 + $0x908] ss:$48 sps:$4 sm:$0xff]  }
 0x1a5   :  { %3079 = vmatprep.subr.bf16.mxu0 %v7793_v37  ;;  %3185 = vmatprep.subr.bf16.mxu1 %v7796_v38 }
 0x1a6   :  { %3105 = vmatprep.mubr.bf16.mxu0 %v7874_v14  ;;  %3211 = vmatprep.mubr.bf16.mxu1 %v7874_v14 }
 0x1a8   :  { %3080 = vmatpush1.bf16.msra.mxu0 %v7791_v40  ;;  %3186 = vmatpush1.bf16.msra.mxu1 %v7794_v27  ;;  %v7832_v40 = vld [vmem:[#allocation9 + $0x96c] ss:$48 sps:$4 sm:$0xff]  }
 0x1a9   :  { %3081 = vmatprep.subr.bf16.mxu0 %v7799_v47  ;;  %3187 = vmatprep.subr.bf16.mxu1 %v7802_v41 }
 0x1ac   :  { %3082 = vmatpush1.bf16.msra.mxu0 %v7797_v19  ;;  %3188 = vmatpush1.bf16.msra.mxu1 %v7800_v34 }
 0x1ad   :  { %3083 = vmatprep.subr.bf16.mxu0 %v7805_v46  ;;  %3189 = vmatprep.subr.bf16.mxu1 %v7808_v48  ;;  %v7827_v48 = vld [vmem:[#allocation9 + $0x960] ss:$48 sps:$4 sm:$0xff]  }
 0x1ae   :  { %v1017_v57 = vpop.f32.mrb[0].mxu0  ;;  %v1123_v58 = vpop.f32.mrb[0].mxu1 }
 0x1af   :  { %v7143_v60 = vadd.f32 %v1123_v58, %v8500_v50  ;;  %v1019_v61 = vpop.f32.mrb[1].mxu0  ;;  %v1125_v62 = vpop.f32.mrb[1].mxu1  ;;  %v7135_v4 = vadd.f32 %v1017_v57, %v233_v54  ;;  %v7844_v57 = vld [vmem:[#allocation9 + $0xa2c] ss:$48 sps:$4 sm:$0xff]   ;;  %v7839_v58 = vld [vmem:[#allocation9 + $0xa20] ss:$48 sps:$4 sm:$0xff]  }
 0x1b0   :  { %v7144_v63 = vadd.f32 %v1125_v62, %v8503_v51  ;;  %v1021_v0 = vpop.f32.mrb[2].mxu0  ;;  %v1127_v1 = vpop.f32.mrb[2].mxu1  ;;  %3084 = vmatpush1.bf16.msra.mxu0 %v7803_v52  ;;  %3190 = vmatpush1.bf16.msra.mxu1 %v7806_v53  ;;  %v7136_v12 = vadd.f32 %v1019_v61, %v237_v59  ;;  %v7830_v52 = vld [vmem:[#allocation9 + $0x968] ss:$48 sps:$4 sm:$0xff]   ;;  %v7850_v61 = vld [vmem:[#allocation9 + $0xa8c] ss:$48 sps:$4 sm:$0xff]  }
 0x1b1   :  { %v7137_v6 = vadd.f32 %v1021_v0, %v233_v54  ;;  %v7145_v7 = vadd.f32 %v1127_v1, %v8500_v50  ;;  %v1023_v8 = vpop.f32.mrb[3].mxu0  ;;  %v1129_v10 = vpop.f32.mrb[3].mxu1  ;;  %3085 = vmatprep.subr.bf16.mxu0 %v7811_v55  ;;  %3191 = vmatprep.subr.bf16.mxu1 %v7814_v56  ;;  %v7833_v55 = vld [vmem:[#allocation9 + $0x9c0] ss:$48 sps:$4 sm:$0xff]   ;;  %v7841_v56 = vld [vmem:[#allocation9 + $0xa24] ss:$48 sps:$4 sm:$0xff]  }
 0x1b2   :  { %v7138_v13 = vadd.f32 %v1023_v8, %v237_v59  ;;  %v7146_v15 = vadd.f32 %v1129_v10, %v8503_v51  ;;  %v7845_v62 = vld [vmem:[#allocation9 + $0xa80] ss:$48 sps:$4 sm:$0xff]   ;;  %v7853_v0 = vld [vmem:[#allocation9 + $0xae4] ss:$48 sps:$4 sm:$0xff]   ;;  %v7856_v1 = vld [vmem:[#allocation9 + $0xaec] ss:$48 sps:$4 sm:$0xff]  }
 0x1b3   :  { %v8511_v17 = vpack.c.bf16 %v7145_v7, %v7143_v60  ;;  %v8513_v18 = vpack.c.bf16 %v7137_v6, %v7135_v4  ;;  %v7847_v60 = vld [vmem:[#allocation9 + $0xa84] ss:$48 sps:$4 sm:$0xff]   ;;  %v7865_v6 = vld [vmem:[#allocation9 + $0xb4c] ss:$48 sps:$4 sm:$0xff]   ;;  %v7860_v7 = vld [vmem:[#allocation9 + $0xb40] ss:$48 sps:$4 sm:$0xff]  }
 0x1b4   :  { %v8515_v20 = vpack.c.bf16 %v7146_v15, %v7144_v63  ;;  %3086 = vmatpush1.bf16.msra.mxu0 %v7809_v2  ;;  %3192 = vmatpush1.bf16.msra.mxu1 %v7812_v3  ;;  %v8517_v21 = vpack.c.bf16 %v7138_v13, %v7136_v12  ;;  %v7848_v63 = vld [vmem:[#allocation9 + $0xa88] ss:$48 sps:$4 sm:$0xff]   ;;  %v7851_v2 = vld [vmem:[#allocation9 + $0xae0] ss:$48 sps:$4 sm:$0xff]   ;;  %v7862_v4 = vld [vmem:[#allocation9 + $0xb44] ss:$48 sps:$4 sm:$0xff]  }
 0x1b5   :  { %3376 = vrot.lane.b32.xlu0 %v8513_v18, %s8347_s4  ;;  %3087 = vmatprep.subr.bf16.mxu0 %v7817_v11  ;;  %v7854_v3 = vld [vmem:[#allocation9 + $0xae8] ss:$48 sps:$4 sm:$0xff]   ;;  %v7868_v10 = vld [vmem:[#allocation9 + $0xba4] ss:$48 sps:$4 sm:$0xff]   ;;  %v7871_v11 = vld [vmem:[#allocation9 + $0xbac] ss:$48 sps:$4 sm:$0xff]  }
 0x1b6   :  { %v1027_v28 = vpop.f32.mrb[4].mxu0  ;;  %3629 = vrot.lane.b32.xlu1 %v8517_v21, %s8347_s4  ;;  %3193 = vmatprep.subr.bf16.mxu1 %v7820_v16  ;;  %v1133_v29 = vpop.f32.mrb[4].mxu1  ;;  %v7863_v8 = vld [vmem:[#allocation9 + $0xb48] ss:$48 sps:$4 sm:$0xff]   ;;  %v7866_v12 = vld [vmem:[#allocation9 + $0xba0] ss:$48 sps:$4 sm:$0xff]  }
 0x1b7   :  { %v7139_v30 = vadd.f32 %v1027_v28, %v233_v54  ;;  %v1029_v31 = vpop.f32.mrb[5].mxu0  ;;  %v7147_v5 = vadd.f32 %v1133_v29, %v8500_v50  ;;  %v1135_v32 = vpop.f32.mrb[5].mxu1  ;;  %v7869_v13 = vld [vmem:[#allocation9 + $0xba8] ss:$48 sps:$4 sm:$0xff]   ;;  %v7875_v16 = vld [vmem:[#allocation6 + $0x2c] ss:$16 sps:$4 sm:$0xff]  }
 0x1b8   :  { %v7140_v33 = vadd.f32 %v1029_v31, %v237_v59  ;;  %v1031_v9 = vpop.f32.mrb[6].mxu0  ;;  %3088 = vmatpush1.bf16.msra.mxu0 %v7815_v22  ;;  %3194 = vmatpush1.bf16.msra.mxu1 %v7818_v23  ;;  %v7148_v36 = vadd.f32 %v1135_v32, %v8503_v51  ;;  %v1137_v37 = vpop.f32.mrb[6].mxu1  ;;  %v7872_v15 = vld [vmem:[#allocation6 + $0x8] ss:$16 sps:$4 sm:$0xff]   ;;  %v8348_v22 = vmov 0.0  }
 0x1b9   :  { %v7141_v38 = vadd.f32 %v1031_v9, %v233_v54  ;;  %v1033_v14 = vpop.f32.mrb[7].mxu0  ;;  %3089 = vmatprep.subr.bf16.mxu0 %v7823_v24  ;;  %3195 = vmatprep.subr.bf16.mxu1 %v7826_v26  ;;  %v7149_v27 = vadd.f32 %v1137_v37, %v8500_v50  ;;  %v1139_v47 = vpop.f32.mrb[7].mxu1  ;;  %v7835_v54 = vld [vmem:[#allocation9 + $0x9c4] ss:$48 sps:$4 sm:$0xff]   ;;  %v7838_v50 = vld [vmem:[#allocation9 + $0x9cc] ss:$48 sps:$4 sm:$0xff]  }
 0x1ba   :  { %v7142_v41 = vadd.f32 %v1033_v14, %v237_v59  ;;  %v7150_v19 = vadd.f32 %v1139_v47, %v8503_v51  ;;  %v7836_v51 = vld [vmem:[#allocation9 + $0x9c8] ss:$48 sps:$4 sm:$0xff]   ;;  %v3256_v24 = vsel %vm3251_vm0, %v8513_v18, 0 }
 0x1bb   :  { %v8527_v34 = vpack.c.bf16 %v7141_v38, %v7139_v30  ;;  %v8529_v44 = vpack.c.bf16 %v7149_v27, %v7147_v5  ;;  %v7842_v59 = vld [vmem:[#allocation9 + $0xa28] ss:$48 sps:$4 sm:$0xff]  }
 0x1bc   :  { %v8531_v46 = vpack.c.bf16 %v7142_v41, %v7140_v33  ;;  %3090 = vmatpush1.bf16.msra.mxu0 %v7821_v35  ;;  %3196 = vmatpush1.bf16.msra.mxu1 %v7824_v25  ;;  %v8533_v53 = vpack.c.bf16 %v7150_v19, %v7148_v36  ;;  %v7877_v23 = vld [vmem:[#allocation6 + $0x28] ss:$16 sps:$4 sm:$0xff]  }
 0x1bd   :  { %3091 = vmatprep.subr.bf16.mxu0 %v7829_v39  ;;  %3197 = vmatprep.subr.bf16.mxu1 %v7832_v40  ;;  %v1286_v26 = vld [vmem:[#allocation11 + $0x8] sm:$0xf] }
 0x1be   :  { %v1299_v28 = vrot.slane %v1286_v26, %v8491_v42  ;;  %v1295_v29 = vrot.slane %v1286_v26, %v8497_v49  ;;  %v1303_v30 = vrot.slane %v1286_v26, %v8493_v43  ;;  %v1291_v31 = vrot.slane %v1286_v26, %v8495_v45 }
 0x1c0   :  { %3092 = vmatpush1.bf16.msra.mxu0 %v7827_v48  ;;  %3198 = vmatpush1.bf16.msra.mxu1 %v7830_v52 }
 0x1c1   :  { %3093 = vmatprep.subr.bf16.mxu0 %v7835_v54  ;;  %3199 = vmatprep.subr.bf16.mxu1 %v7838_v50 }
 0x1c4   :  { %3094 = vmatpush1.bf16.msra.mxu0 %v7833_v55  ;;  %3200 = vmatpush1.bf16.msra.mxu1 %v7836_v51 }
 0x1c5   :  { %3095 = vmatprep.subr.bf16.mxu0 %v7841_v56  ;;  %3201 = vmatprep.subr.bf16.mxu1 %v7844_v57 }
 0x1c8   :  { %3096 = vmatpush1.bf16.msra.mxu0 %v7839_v58  ;;  %3202 = vmatpush1.bf16.msra.mxu1 %v7842_v59 }
 0x1c9   :  { %3097 = vmatprep.subr.bf16.mxu0 %v7847_v60  ;;  %3203 = vmatprep.subr.bf16.mxu1 %v7850_v61 }
 0x1cc   :  { %3098 = vmatpush1.bf16.msra.mxu0 %v7845_v62  ;;  %3204 = vmatpush1.bf16.msra.mxu1 %v7848_v63 }
 0x1cd   :  { %3099 = vmatprep.subr.bf16.mxu0 %v7853_v0  ;;  %3205 = vmatprep.subr.bf16.mxu1 %v7856_v1 }
 0x1d0   :  { %3100 = vmatpush1.bf16.msra.mxu0 %v7851_v2  ;;  %3206 = vmatpush1.bf16.msra.mxu1 %v7854_v3 }
 0x1d1   :  { %3101 = vmatprep.subr.bf16.mxu0 %v7862_v4  ;;  %3207 = vmatprep.subr.bf16.mxu1 %v7865_v6 }
 0x1d4   :  { %3102 = vmatpush1.bf16.msra.mxu0 %v7860_v7  ;;  %3208 = vmatpush1.bf16.msra.mxu1 %v7863_v8 }
 0x1d5   :  { %3103 = vmatprep.subr.bf16.mxu0 %v7868_v10  ;;  %3209 = vmatprep.subr.bf16.mxu1 %v7871_v11  ;;  %v2318_v11 = vld [vmem:[#allocation11] sm:$0xf] }
 0x1d8   :  { %3104 = vmatpush1.bf16.msra.mxu0 %v7866_v12  ;;  %3210 = vmatpush1.bf16.msra.mxu1 %v7869_v13  ;;  %v2323_v12 = vrot.slane %v2318_v11, %v8495_v45  ;;  %v2331_v13 = vrot.slane %v2318_v11, %v8491_v42 }
 0x1d9   :  { %6943 = vmatprep.subr.bf16.mxu0 %v8348_v22  ;;  %6949 = vmatprep.subr.bf16.mxu1 %v8348_v22 }
 0x1db   :  { %3106 = vmatmul.mubr.bf16.vlgmr.msra.gmra.mrb[16].mxu0 %v7872_v15  ;;  %3212 = vmatmul.mubr.bf16.vlgmr.msra.gmra.mrb[16].mxu1 %v7872_v15 }
 0x1dc   :  { %3115 = vmatprep.mubr.bf16.mxu0 %v7875_v16  ;;  %3221 = vmatprep.mubr.bf16.mxu1 %v7875_v16 }
 0x1e1   :  { %6944 = vmatpush3.bf16.xpose.msra.mxu0 %v3256_v24  ;;  %v2335_v24 = vrot.slane %v2318_v11, %v8493_v43 }
 0x1e2   :  { %6955 = vmatprep.subr.bf16.mxu0 %v8348_v22 }
 0x1e3   :  { %3116 = vmatmul.mubr.bf16.gmra.mrb[20].mxu0 %v7877_v23  ;;  %3222 = vmatmul.mubr.bf16.gmra.mrb[20].mxu1 %v7877_v23  ;;  %v2327_v23 = vrot.slane %v2318_v11, %v8497_v49 }
 0x1e4   :  { %6945 = vmatprep.mubr.msk.bf16.mxu0 %vm8349_vm1, %v8348_v22  ;;  %6951 = vmatprep.mubr.msk.bf16.mxu1 %vm8349_vm1, %v8348_v22 }
 0x22e   :  { %v2035_v5 = vpop.f32.mrb[8].mxu0  ;;  %v2141_v32 = vpop.f32.mrb[8].mxu1 }
 0x22f   :  { %v7159_v33 = vadd.f32 %v2141_v32, %v1299_v28  ;;  %v2037_v9 = vpop.f32.mrb[9].mxu0  ;;  %v2143_v35 = vpop.f32.mrb[9].mxu1  ;;  %v7151_v38 = vadd.f32 %v2035_v5, %v1291_v31 }
 0x230   :  { %v7152_v18 = vadd.f32 %v2037_v9, %v1295_v29  ;;  %v7160_v25 = vadd.f32 %v2143_v35, %v1303_v30  ;;  %v2039_v36 = vpop.f32.mrb[10].mxu0  ;;  %v2145_v37 = vpop.f32.mrb[10].mxu1 }
 0x231   :  { %v7153_v14 = vadd.f32 %v2039_v36, %v1291_v31  ;;  %v7161_v39 = vadd.f32 %v2145_v37, %v1299_v28  ;;  %v2041_v40 = vpop.f32.mrb[11].mxu0  ;;  %v2147_v27 = vpop.f32.mrb[11].mxu1 }
 0x232   :  { %v7154_v47 = vadd.f32 %v2041_v40, %v1295_v29  ;;  %v7162_v41 = vadd.f32 %v2147_v27, %v1303_v30 }
 0x233   :  { %v8544_v19 = vpack.c.bf16 %v7153_v14, %v7151_v38  ;;  %v8546_v48 = vpack.c.bf16 %v7161_v39, %v7159_v33 }
 0x234   :  { %v8548_v52 = vpack.c.bf16 %v7154_v47, %v7152_v18  ;;  %v8550_v54 = vpack.c.bf16 %v7162_v41, %v7160_v25  ;;  %v3377_v18 = vpop.permute.xlu0 %3376 }
 0x235   :  { %6950 = vmatpush3.bf16.msra.mxu1 %v8544_v19  ;;  %v3382_v47 = vsel %vm3251_vm0, %v3377_v18, 0 }
 0x236   :  { %v2045_v50 = vpop.f32.mrb[12].mxu0  ;;  %v2151_v55 = vpop.f32.mrb[12].mxu1  ;;  %6961 = vmatprep.subr.bf16.mxu1 %v8348_v22 }
 0x237   :  { %v7155_v51 = vadd.f32 %v2045_v50, %v1291_v31  ;;  %v2047_v56 = vpop.f32.mrb[13].mxu0  ;;  %v7163_v57 = vadd.f32 %v2151_v55, %v1299_v28  ;;  %v2153_v58 = vpop.f32.mrb[13].mxu1 }
 0x238   :  { %v7156_v59 = vadd.f32 %v2047_v56, %v1295_v29  ;;  %v2049_v60 = vpop.f32.mrb[14].mxu0  ;;  %v7164_v61 = vadd.f32 %v2153_v58, %v1303_v30  ;;  %v2155_v62 = vpop.f32.mrb[14].mxu1 }
 0x239   :  { %v7157_v63 = vadd.f32 %v2049_v60, %v1291_v31  ;;  %v2051_v0 = vpop.f32.mrb[15].mxu0  ;;  %v7165_v1 = vadd.f32 %v2155_v62, %v1299_v28  ;;  %v2157_v2 = vpop.f32.mrb[15].mxu1 }
 0x23a   :  { %v7158_v3 = vadd.f32 %v2051_v0, %v1295_v29  ;;  %v7166_v4 = vadd.f32 %v2157_v2, %v1303_v30 }
 0x23b   :  { %v8558_v6 = vpack.c.bf16 %v7157_v63, %v7155_v51  ;;  %v8560_v7 = vpack.c.bf16 %v7165_v1, %v7163_v57 }
 0x23c   :  { %v8562_v8 = vpack.c.bf16 %v7158_v3, %v7156_v59  ;;  %v8564_v10 = vpack.c.bf16 %v7166_v4, %v7164_v61 }
 0x2ae   :  { %v3107_v15 = vpop.f32.mrb[16].mxu0  ;;  %v3213_v16 = vpop.f32.mrb[16].mxu1 }
 0x2af   :  { %v3109_v26 = vpop.f32.mrb[17].mxu0  ;;  %v3215_v28 = vpop.f32.mrb[17].mxu1  ;;  %v7167_v31 = vadd.f32 %v3107_v15, %v2323_v12  ;;  %v7175_v5 = vadd.f32 %v3213_v16, %v2331_v13 }
 0x2b0   :  { %v3111_v29 = vpop.f32.mrb[18].mxu0  ;;  %v3217_v30 = vpop.f32.mrb[18].mxu1  ;;  %v7168_v25 = vadd.f32 %v3109_v26, %v2327_v23  ;;  %v7176_v36 = vadd.f32 %v3215_v28, %v2335_v24 }
 0x2b1   :  { %v7169_v32 = vadd.f32 %v3111_v29, %v2323_v12  ;;  %v7177_v33 = vadd.f32 %v3217_v30, %v2331_v13  ;;  %v3113_v9 = vpop.f32.mrb[19].mxu0  ;;  %v3219_v35 = vpop.f32.mrb[19].mxu1 }
 0x2b2   :  { %v7170_v37 = vadd.f32 %v3113_v9, %v2327_v23  ;;  %v7178_v38 = vadd.f32 %v3219_v35, %v2335_v24 }
 0x2b3   :  { %v3232_v14 = vpack.c.bf16 %v7169_v32, %v7167_v31  ;;  %v8570_v39 = vpack.c.bf16 %v7177_v33, %v7175_v5 }
 0x2b4   :  { %v3233_v40 = vpack.c.bf16 %v7170_v37, %v7168_v25  ;;  %v8572_v27 = vpack.c.bf16 %v7178_v38, %v7176_v36 }
 0x2b5   :  { %3373 = vrot.lane.b32.xlu0 %v3232_v14, %s8347_s4  ;;  %6946 = vmatmul.mubr.msk.bf16.vlgmr.msra.gmra.mrb[24].mxu0 %vm3251_vm0, %v3232_v14  ;;  %v5022_v14 = vsel %vm3251_vm0, %v8533_v53, 0 }
 0x2b6   :  { %6956 = vmatpush3.bf16.xpose.msra.mxu0 %v3382_v47  ;;  %v3117_v41 = vpop.f32.mrb[20].mxu0  ;;  %3626 = vrot.lane.b32.xlu1 %v3233_v40, %s8347_s4  ;;  %v3223_v50 = vpop.f32.mrb[20].mxu1 }
 0x2b7   :  { %v3119_v55 = vpop.f32.mrb[21].mxu0  ;;  %v7179_v51 = vadd.f32 %v3223_v50, %v2331_v13  ;;  %v3225_v56 = vpop.f32.mrb[21].mxu1  ;;  %6957 = vmatprep.mubr.msk.bf16.mxu0 %vm8349_vm1, %v8348_v22  ;;  %6967 = vmatprep.subr.bf16.mxu0 %v8348_v22  ;;  %v7171_v60 = vadd.f32 %v3117_v41, %v2323_v12 }
 0x2b8   :  { %v3121_v57 = vpop.f32.mrb[22].mxu0  ;;  %v7180_v58 = vadd.f32 %v3225_v56, %v2335_v24  ;;  %v3227_v59 = vpop.f32.mrb[22].mxu1  ;;  %v7172_v1 = vadd.f32 %v3119_v55, %v2327_v23 }
 0x2b9   :  { %v7173_v61 = vadd.f32 %v3121_v57, %v2323_v12  ;;  %v3123_v62 = vpop.f32.mrb[23].mxu0  ;;  %3881 = vrot.lane.b32.xlu0 %v8511_v17, %s8347_s4  ;;  %v7181_v63 = vadd.f32 %v3227_v59, %v2331_v13  ;;  %v3229_v0 = vpop.f32.mrb[23].mxu1  ;;  %v3510_v13 = vsel %vm3251_vm0, %v8517_v21, 0  ;;  %v3762_v21 = vsel %vm3251_vm0, %v8511_v17, 0 }
 0x2ba   :  { %v7174_v2 = vadd.f32 %v3123_v62, %v2327_v23  ;;  %3878 = vrot.lane.b32.xlu1 %v8570_v39, %s8347_s4  ;;  %v7182_v3 = vadd.f32 %v3229_v0, %v2335_v24  ;;  %v3630_v23 = vpop.permute.xlu1 %3629  ;;  %v4014_v17 = vsel %vm3251_vm0, %v8515_v20, 0 }
 0x2bb   :  { %v3236_v4 = vpack.c.bf16 %v7173_v61, %v7171_v60  ;;  %v8585_v11 = vpack.c.bf16 %v7181_v63, %v7179_v51  ;;  %v3635_v24 = vsel %vm3251_vm0, %v3630_v23, 0 }
 0x2bc   :  { %v8587_v15 = vpack.c.bf16 %v7174_v2, %v7172_v1  ;;  %v8589_v16 = vpack.c.bf16 %v7182_v3, %v7180_v58 }
 0x2bd   :  { %4133 = vrot.lane.b32.xlu0 %v8515_v20, %s8347_s4  ;;  %v4266_v20 = vsel %vm3251_vm0, %v8527_v34, 0 }
 0x2be   :  { %4130 = vrot.lane.b32.xlu1 %v8572_v27, %s8347_s4 }
 0x2c1   :  { %4385 = vrot.lane.b32.xlu0 %v8527_v34, %s8347_s4  ;;  %v4518_v34 = vsel %vm3251_vm0, %v8531_v46, 0 }
 0x2c2   :  { %4382 = vrot.lane.b32.xlu1 %v3236_v4, %s8347_s4 }
 0x2c5   :  { %4637 = vrot.lane.b32.xlu0 %v8531_v46, %s8347_s4  ;;  %v4770_v46 = vsel %vm3251_vm0, %v8529_v44, 0 }
 0x2c6   :  { %4634 = vrot.lane.b32.xlu1 %v8587_v15, %s8347_s4 }
 0x2c9   :  { %4889 = vrot.lane.b32.xlu0 %v8529_v44, %s8347_s4 }
 0x2ca   :  { %4886 = vrot.lane.b32.xlu1 %v8585_v11, %s8347_s4 }
 0x2cd   :  { %5141 = vrot.lane.b32.xlu0 %v8533_v53, %s8347_s4 }
 0x2ce   :  { %5138 = vrot.lane.b32.xlu1 %v8589_v16, %s8347_s4 }
 0x2d1   :  { %3952 = vrot.lane.b32.xlu0 %v8546_v48, %s8347_s4 }
 0x2d2   :  { %3447 = vrot.lane.b32.xlu1 %v8544_v19, %s8347_s4 }
 0x2d6   :  { %3700 = vrot.lane.b32.xlu1 %v8548_v52, %s8347_s4 }
 0x327   :  { %v3374_v12 = vpop.permute.xlu0 %3373 }
 0x328   :  { %6958 = vmatmul.mubr.msk.bf16.vlgmr.msra.gmra.mrb[28].mxu0 %vm3251_vm0, %v3374_v12  ;;  %v3627_v19 = vpop.permute.xlu1 %3626 }
 0x329   :  { %6968 = vmatpush3.bf16.xpose.msra.mxu0 %v3510_v13  ;;  %6969 = vmatprep.mubr.msk.bf16.mxu0 %vm8349_vm1, %v8348_v22 }
 0x32a   :  { %6979 = vmatprep.subr.bf16.mxu0 %v8348_v22 }
 0x32b   :  { %v3882_v26 = vpop.permute.xlu0 %3881 }
 0x32c   :  { %v3887_v28 = vsel %vm3251_vm0, %v3882_v26, 0  ;;  %v3879_v29 = vpop.permute.xlu1 %3878 }
 0x32f   :  { %v4134_v30 = vpop.permute.xlu0 %4133 }
 0x330   :  { %6970 = vmatmul.mubr.msk.bf16.vlgmr.msra.gmra.mrb[32].mxu0 %vm3251_vm0, %v3233_v40  ;;  %v4139_v31 = vsel %vm3251_vm0, %v4134_v30, 0  ;;  %v4131_v5 = vpop.permute.xlu1 %4130 }
 0x331   :  { %6980 = vmatpush3.bf16.xpose.msra.mxu0 %v3635_v24  ;;  %6981 = vmatprep.mubr.msk.bf16.mxu0 %vm8349_vm1, %v8348_v22 }
 0x332   :  { %6991 = vmatprep.subr.bf16.mxu0 %v8348_v22 }
 0x333   :  { %v4386_v32 = vpop.permute.xlu0 %4385 }
 0x334   :  { %v4391_v33 = vsel %vm3251_vm0, %v4386_v32, 0  ;;  %v4383_v9 = vpop.permute.xlu1 %4382 }
 0x337   :  { %v4638_v35 = vpop.permute.xlu0 %4637 }
 0x338   :  { %6982 = vmatmul.mubr.msk.bf16.vlgmr.msra.gmra.mrb[36].mxu0 %vm3251_vm0, %v3627_v19  ;;  %v4643_v18 = vsel %vm3251_vm0, %v4638_v35, 0  ;;  %v4635_v25 = vpop.permute.xlu1 %4634 }
 0x339   :  { %6992 = vmatpush3.bf16.xpose.msra.mxu0 %v3762_v21  ;;  %6993 = vmatprep.mubr.msk.bf16.mxu0 %vm8349_vm1, %v8348_v22 }
 0x33a   :  { %7003 = vmatprep.subr.bf16.mxu0 %v8348_v22 }
 0x33b   :  { %v4890_v36 = vpop.permute.xlu0 %4889 }
 0x33c   :  { %v4895_v37 = vsel %vm3251_vm0, %v4890_v36, 0  ;;  %v4887_v44 = vpop.permute.xlu1 %4886 }
 0x33f   :  { %v5142_v50 = vpop.permute.xlu0 %5141 }
 0x340   :  { %6994 = vmatmul.mubr.msk.bf16.vlgmr.msra.gmra.mrb[40].mxu0 %vm3251_vm0, %v8570_v39  ;;  %v5147_v55 = vsel %vm3251_vm0, %v5142_v50, 0  ;;  %v5139_v53 = vpop.permute.xlu1 %5138 }
 0x341   :  { %7004 = vmatpush3.bf16.xpose.msra.mxu0 %v3887_v28  ;;  %7005 = vmatprep.mubr.msk.bf16.mxu0 %vm8349_vm1, %v8348_v22 }
 0x342   :  { %7015 = vmatprep.subr.bf16.mxu0 %v8348_v22 }
 0x343   :  { %v8724_v23 = vpop.permute.xlu0 %3952 }
 0x344   :  { %v3448_v13 = vpop.permute.xlu1 %3447 }
 0x348   :  { %7006 = vmatmul.mubr.msk.bf16.vlgmr.msra.gmra.mrb[44].mxu0 %vm3251_vm0, %v3879_v29  ;;  %v8730_v26 = vpop.permute.xlu1 %3700 }
 0x349   :  { %7016 = vmatpush3.bf16.xpose.msra.mxu0 %v4014_v17  ;;  %7017 = vmatprep.mubr.msk.bf16.mxu0 %vm8349_vm1, %v8348_v22 }
 0x34a   :  { %7027 = vmatprep.subr.bf16.mxu0 %v8348_v22 }
 0x350   :  { %7018 = vmatmul.mubr.msk.bf16.vlgmr.msra.gmra.mrb[48].mxu0 %vm3251_vm0, %v8572_v27 }
 0x351   :  { %7028 = vmatpush3.bf16.xpose.msra.mxu0 %v4139_v31  ;;  %7029 = vmatprep.mubr.msk.bf16.mxu0 %vm8349_vm1, %v8348_v22 }
 0x352   :  { %7039 = vmatprep.subr.bf16.mxu0 %v8348_v22 }
 0x358   :  { %7030 = vmatmul.mubr.msk.bf16.vlgmr.msra.gmra.mrb[52].mxu0 %vm3251_vm0, %v4131_v5 }
 0x359   :  { %7040 = vmatpush3.bf16.xpose.msra.mxu0 %v4266_v20  ;;  %7041 = vmatprep.mubr.msk.bf16.mxu0 %vm8349_vm1, %v8348_v22 }
 0x35a   :  { %7051 = vmatprep.subr.bf16.mxu0 %v8348_v22 }
 0x360   :  { %7042 = vmatmul.mubr.msk.bf16.vlgmr.msra.gmra.mrb[56].mxu0 %vm3251_vm0, %v3236_v4 }
 0x361   :  { %7052 = vmatpush3.bf16.xpose.msra.mxu0 %v4391_v33  ;;  %7053 = vmatprep.mubr.msk.bf16.mxu0 %vm8349_vm1, %v8348_v22 }
 0x362   :  { %7063 = vmatprep.subr.bf16.mxu0 %v8348_v22 }
 0x368   :  { %7054 = vmatmul.mubr.msk.bf16.vlgmr.msra.gmra.mrb[60].mxu0 %vm3251_vm0, %v4383_v9 }
 0x369   :  { %7064 = vmatpush3.bf16.xpose.msra.mxu0 %v4518_v34  ;;  %7065 = vmatprep.mubr.msk.bf16.mxu0 %vm8349_vm1, %v8348_v22 }
 0x36a   :  { %7075 = vmatprep.subr.bf16.mxu0 %v8348_v22 }
 0x370   :  { %7066 = vmatmul.mubr.msk.bf16.vlgmr.msra.gmra.mrb[64].mxu0 %vm3251_vm0, %v8587_v15 }
 0x371   :  { %7076 = vmatpush3.bf16.xpose.msra.mxu0 %v4643_v18  ;;  %7077 = vmatprep.mubr.msk.bf16.mxu0 %vm8349_vm1, %v8348_v22 }
 0x372   :  { %7087 = vmatprep.subr.bf16.mxu0 %v8348_v22 }
 0x378   :  { %7078 = vmatmul.mubr.msk.bf16.vlgmr.msra.gmra.mrb[68].mxu0 %vm3251_vm0, %v4635_v25 }
 0x379   :  { %7088 = vmatpush3.bf16.xpose.msra.mxu0 %v4770_v46  ;;  %7089 = vmatprep.mubr.msk.bf16.mxu0 %vm8349_vm1, %v8348_v22 }
 0x37a   :  { %7099 = vmatprep.subr.bf16.mxu0 %v8348_v22 }
 0x380   :  { %7090 = vmatmul.mubr.msk.bf16.vlgmr.msra.gmra.mrb[72].mxu0 %vm3251_vm0, %v8585_v11 }
 0x381   :  { %7100 = vmatpush3.bf16.xpose.msra.mxu0 %v4895_v37  ;;  %7101 = vmatprep.mubr.msk.bf16.mxu0 %vm8349_vm1, %v8348_v22 }
 0x382   :  { %7111 = vmatprep.subr.bf16.mxu0 %v8348_v22 }
 0x388   :  { %v3292_v38 = vpop.f32.mrb[24].mxu0  ;;  %7102 = vmatmul.mubr.msk.bf16.vlgmr.msra.gmra.mrb[76].mxu0 %vm3251_vm0, %v4887_v44 }
 0x389   :  { %7112 = vmatpush3.bf16.xpose.msra.mxu0 %v5022_v14  ;;  %v6947_v39 = vpop.f32.mrb[25].mxu0  ;;  %v3300_v40 = vsel %vm3299_vm2, %v3292_v38, -inf  ;;  %7113 = vmatprep.mubr.msk.bf16.mxu0 %vm8349_vm1, %v8348_v22 }
 0x38a   :  { %3301 = vmax.xlane.f32.xlu0 %v3300_v40  ;;  %v3295_v27 = vpop.f32.mrb[26].mxu0  ;;  %7123 = vmatprep.subr.bf16.mxu0 %v8348_v22 }
 0x38b   :  { %v6948_v47 = vpop.f32.mrb[27].mxu0  ;;  %v3303_v41 = vsel %vm3299_vm2, %v3295_v27, -inf }
 0x38c   :  { %3304 = vmax.xlane.f32.xlu1 %v3303_v41 }
 0x390   :  { %7114 = vmatmul.mubr.msk.bf16.vlgmr.msra.gmra.mrb[80].mxu0 %vm3251_vm0, %v8589_v16 }
 0x391   :  { %7124 = vmatpush3.bf16.xpose.msra.mxu0 %v5147_v55  ;;  %7125 = vmatprep.mubr.msk.bf16.mxu0 %vm8349_vm1, %v8348_v22 }
 0x398   :  { %7126 = vmatmul.mubr.msk.bf16.vlgmr.msra.gmra.mrb[84].mxu0 %vm3251_vm0, %v5139_v53 }
 0x3fb   :  { %v8700_v51 = vpop.f32.mrb[28].mxu0 }
 0x3fc   :  { %v6959_v56 = vpop.f32.mrb[29].mxu0  ;;  %v3425_v57 = vsel %vm3299_vm2, %v8700_v51, -inf }
 0x3fd   :  { %3426 = vmax.xlane.f32.xlu0 %v3425_v57  ;;  %v8704_v58 = vpop.f32.mrb[30].mxu0 }
 0x3fe   :  { %v6960_v59 = vpop.f32.mrb[31].mxu0  ;;  %v3428_v60 = vsel %vm3299_vm2, %v8704_v58, -inf }
 0x401   :  { %3429 = vmax.xlane.f32.xlu0 %v3428_v60 }
 0x403   :  { %v8708_v61 = vpop.f32.mrb[32].mxu0 }
 0x404   :  { %v6971_v62 = vpop.f32.mrb[33].mxu0  ;;  %v3553_v63 = vsel %vm3299_vm2, %v8708_v61, -inf }
 0x405   :  { %3554 = vmax.xlane.f32.xlu1 %v3553_v63  ;;  %v8712_v0 = vpop.f32.mrb[34].mxu0 }
 0x406   :  { %v6972_v1 = vpop.f32.mrb[35].mxu0  ;;  %v3556_v2 = vsel %vm3299_vm2, %v8712_v0, -inf }
 0x407   :  { %3557 = vmax.xlane.f32.xlu0 %v3556_v2 }
 0x40b   :  { %v8716_v3 = vpop.f32.mrb[36].mxu0 }
 0x40c   :  { %v6983_v4 = vpop.f32.mrb[37].mxu0  ;;  %v3678_v11 = vsel %vm3299_vm2, %v8716_v3, -inf }
 0x40d   :  { %3679 = vmax.xlane.f32.xlu1 %v3678_v11  ;;  %v8720_v15 = vpop.f32.mrb[38].mxu0 }
 0x40e   :  { %v6984_v16 = vpop.f32.mrb[39].mxu0  ;;  %v3681_v12 = vsel %vm3299_vm2, %v8720_v15, -inf }
 0x40f   :  { %3682 = vmax.xlane.f32.xlu0 %v3681_v12 }
 0x413   :  { %v8726_v24 = vpop.f32.mrb[40].mxu0 }
 0x414   :  { %v6995_v19 = vpop.f32.mrb[41].mxu0  ;;  %v3805_v21 = vsel %vm3299_vm2, %v8726_v24, -inf }
 0x415   :  { %3806 = vmax.xlane.f32.xlu1 %v3805_v21  ;;  %v8732_v28 = vpop.f32.mrb[42].mxu0 }
 0x416   :  { %v6996_v29 = vpop.f32.mrb[43].mxu0  ;;  %v3808_v17 = vsel %vm3299_vm2, %v8732_v28, -inf }
 0x417   :  { %v3302_v30 = vpop.xlane.xlu0 %3301  ;;  %3809 = vmax.xlane.f32.xlu0 %v3808_v17 }
 0x418   :  { %v3306_v31 = vsub.f32 %v3292_v38, %v3302_v30 }
 0x419   :  { %v3305_v5 = vpop.xlane.xlu1 %3304 }
 0x41a   :  { %v3308_v20 = vmul.f32 1.442695, %v3306_v31  ;;  %v3307_v32 = vsub.f32 %v3295_v27, %v3305_v5 }
 0x41b   :  { %v8736_v33 = vpop.f32.mrb[44].mxu0 }
 0x41c   :  { %v3310_v9 = vmul.f32 1.442695, %v3307_v32  ;;  %v7007_v34 = vpop.f32.mrb[45].mxu0  ;;  %v3930_v35 = vsel %vm3299_vm2, %v8736_v33, -inf  ;;  %8070 = vpow2.f32 %v3308_v20 }
 0x41d   :  { %3931 = vmax.xlane.f32.xlu0 %v3930_v35  ;;  %v8740_v18 = vpop.f32.mrb[46].mxu0 }
 0x41e   :  { %8072 = vpow2.f32 %v3310_v9  ;;  %v7008_v25 = vpop.f32.mrb[47].mxu0  ;;  %v3933_v46 = vsel %vm3299_vm2, %v8740_v18, -inf }
 0x421   :  { %3934 = vmax.xlane.f32.xlu0 %v3933_v46 }
 0x423   :  { %v8744_v36 = vpop.f32.mrb[48].mxu0 }
 0x424   :  { %v7019_v37 = vpop.f32.mrb[49].mxu0  ;;  %v4057_v44 = vsel %vm3299_vm2, %v8744_v36, -inf }
 0x425   :  { %4058 = vmax.xlane.f32.xlu0 %v4057_v44  ;;  %v8748_v38 = vpop.f32.mrb[50].mxu0 }
 0x426   :  { %4204 = vrot.lane.b32.xlu1 %v8550_v54, %s8347_s4  ;;  %v7020_v14 = vpop.f32.mrb[51].mxu0  ;;  %v8752_v39 = vpop.eup %8070  ;;  %v4060_v27 = vsel %vm3299_vm2, %v8748_v38, -inf }
 0x428   :  { %v8754_v40 = vpop.eup %8072 }
 0x429   :  { %v3320_v47 = vpack.c.bf16 %v8754_v40, %v8752_v39  ;;  %4061 = vmax.xlane.f32.xlu0 %v4060_v27 }
 0x42b   :  { %6952 = vmatmul.mubr.msk.bf16.vlgmr.msra.gmra.mrb[24].mxu1 %vm3299_vm2, %v3320_v47  ;;  %v8761_v41 = vpop.f32.mrb[52].mxu0 }
 0x42c   :  { %6962 = vmatpush3.bf16.msra.mxu1 %v3448_v13  ;;  %v7031_v50 = vpop.f32.mrb[53].mxu0  ;;  %v4182_v55 = vsel %vm3299_vm2, %v8761_v41, -inf  ;;  %6963 = vmatprep.mubr.msk.bf16.mxu1 %vm8349_vm1, %v8348_v22 }
 0x42d   :  { %4183 = vmax.xlane.f32.xlu0 %v4182_v55  ;;  %v8767_v53 = vpop.f32.mrb[54].mxu0  ;;  %6973 = vmatprep.subr.bf16.mxu1 %v8348_v22 }
 0x42e   :  { %v7032_v56 = vpop.f32.mrb[55].mxu0  ;;  %v4185_v17 = vsel %vm3299_vm2, %v8767_v53, -inf }
 0x433   :  { %v8770_v57 = vpop.f32.mrb[56].mxu0 }
 0x434   :  { %v7043_v59 = vpop.f32.mrb[57].mxu0  ;;  %v4309_v60 = vsel %vm3299_vm2, %v8770_v57, -inf }
 0x435   :  { %4310 = vmax.xlane.f32.xlu0 %v4309_v60  ;;  %v8774_v62 = vpop.f32.mrb[58].mxu0 }
 0x436   :  { %v7044_v63 = vpop.f32.mrb[59].mxu0  ;;  %v4312_v1 = vsel %vm3299_vm2, %v8774_v62, -inf }
 0x439   :  { %4313 = vmax.xlane.f32.xlu0 %v4312_v1 }
 0x43b   :  { %v8778_v2 = vpop.f32.mrb[60].mxu0 }
 0x43c   :  { %v7055_v4 = vpop.f32.mrb[61].mxu0  ;;  %v4434_v11 = vsel %vm3299_vm2, %v8778_v2, -inf }
 0x43d   :  { %4435 = vmax.xlane.f32.xlu0 %v4434_v11  ;;  %v8782_v16 = vpop.f32.mrb[62].mxu0 }
 0x43e   :  { %v7056_v12 = vpop.f32.mrb[63].mxu0  ;;  %v4437_v20 = vsel %vm3299_vm2, %v8782_v16, -inf }
 0x443   :  { %v8784_v13 = vpop.f32.mrb[64].mxu0 }
 0x444   :  { %v7067_v19 = vpop.f32.mrb[65].mxu0  ;;  %v4561_v9 = vsel %vm3299_vm2, %v8784_v13, -inf }
 0x445   :  { %v8786_v21 = vpop.f32.mrb[66].mxu0 }
 0x446   :  { %v7068_v29 = vpop.f32.mrb[67].mxu0  ;;  %v4564_v46 = vsel %vm3299_vm2, %v8786_v21, -inf }
 0x44a   :  { %4186 = vmax.xlane.f32.xlu1 %v4185_v17 }
 0x44b   :  { %v8790_v30 = vpop.f32.mrb[68].mxu0 }
 0x44c   :  { %v7079_v31 = vpop.f32.mrb[69].mxu0  ;;  %v4686_v17 = vsel %vm3299_vm2, %v8790_v30, -inf }
 0x44d   :  { %v8792_v5 = vpop.f32.mrb[70].mxu0 }
 0x44e   :  { %4438 = vmax.xlane.f32.xlu1 %v4437_v20  ;;  %v7080_v32 = vpop.f32.mrb[71].mxu0  ;;  %v4689_v44 = vsel %vm3299_vm2, %v8792_v5, -inf }
 0x452   :  { %4562 = vmax.xlane.f32.xlu1 %v4561_v9 }
 0x453   :  { %4456 = vrot.lane.b32.xlu0 %v8558_v6, %s8347_s4  ;;  %v8800_v34 = vpop.f32.mrb[72].mxu0 }
 0x454   :  { %v7091_v35 = vpop.f32.mrb[73].mxu0  ;;  %v4813_v31 = vsel %vm3299_vm2, %v8800_v34, -inf }
 0x455   :  { %v8802_v25 = vpop.f32.mrb[74].mxu0 }
 0x456   :  { %4565 = vmax.xlane.f32.xlu1 %v4564_v46  ;;  %v7092_v37 = vpop.f32.mrb[75].mxu0  ;;  %v4816_v20 = vsel %vm3299_vm2, %v8802_v25, -inf }
 0x45a   :  { %4690 = vmax.xlane.f32.xlu1 %v4689_v44 }
 0x45b   :  { %v8808_v14 = vpop.f32.mrb[76].mxu0 }
 0x45c   :  { %v7103_v27 = vpop.f32.mrb[77].mxu0  ;;  %v4938_v32 = vsel %vm3299_vm2, %v8808_v14, -inf }
 0x45d   :  { %v8810_v47 = vpop.f32.mrb[78].mxu0 }
 0x45e   :  { %v7104_v50 = vpop.f32.mrb[79].mxu0  ;;  %v4941_v55 = vsel %vm3299_vm2, %v8810_v47, -inf }
 0x45f   :  { %4942 = vmax.xlane.f32.xlu1 %v4941_v55 }
 0x463   :  { %v8814_v56 = vpop.f32.mrb[80].mxu0 }
 0x464   :  { %v7115_v59 = vpop.f32.mrb[81].mxu0  ;;  %v5065_v60 = vsel %vm3299_vm2, %v8814_v56, -inf }
 0x465   :  { %5066 = vmax.xlane.f32.xlu1 %v5065_v60  ;;  %v8818_v63 = vpop.f32.mrb[82].mxu0 }
 0x466   :  { %v7116_v1 = vpop.f32.mrb[83].mxu0  ;;  %v5068_v4 = vsel %vm3299_vm2, %v8818_v63, -inf }
 0x469   :  { %5069 = vmax.xlane.f32.xlu1 %v5068_v4 }
 0x46b   :  { %v8822_v11 = vpop.f32.mrb[84].mxu0 }
 0x46c   :  { %v7127_v12 = vpop.f32.mrb[85].mxu0  ;;  %v5190_v9 = vsel %vm3299_vm2, %v8822_v11, -inf }
 0x46d   :  { %v8824_v19 = vpop.f32.mrb[86].mxu0 }
 0x46e   :  { %v7128_v29 = vpop.f32.mrb[87].mxu0 }
 0x472   :  { %4687 = vmax.xlane.f32.xlu0 %v4686_v17 }
 0x476   :  { %4814 = vmax.xlane.f32.xlu0 %v4813_v31 }
 0x47a   :  { %4817 = vmax.xlane.f32.xlu0 %v4816_v20  ;;  %4708 = vrot.lane.b32.xlu1 %v8562_v8, %s8347_s4 }
 0x47e   :  { %4939 = vmax.xlane.f32.xlu0 %v4938_v32 }
 0x482   :  { %5191 = vmax.xlane.f32.xlu0 %v5190_v9 }
 0x48a   :  { %v3427_v35 = vpop.xlane.xlu0 %3426 }
 0x48b   :  { %v3431_v46 = vsub.f32 %v8700_v51, %v3427_v35 }
 0x48d   :  { %v3433_v37 = vmul.f32 1.442695, %v3431_v46 }
 0x48e   :  { %v3430_v44 = vpop.xlane.xlu0 %3429 }
 0x48f   :  { %v3432_v27 = vsub.f32 %v8704_v58, %v3430_v44  ;;  %8074 = vpow2.f32 %v3433_v37 }
 0x491   :  { %v3435_v50 = vmul.f32 1.442695, %v3432_v27 }
 0x492   :  { %v3555_v55 = vpop.xlane.xlu1 %3554 }
 0x493   :  { %8076 = vpow2.f32 %v3435_v50  ;;  %v3559_v59 = vsub.f32 %v8708_v61, %v3555_v55 }
 0x494   :  { %v3558_v60 = vpop.xlane.xlu0 %3557 }
 0x495   :  { %v3561_v1 = vmul.f32 1.442695, %v3559_v59  ;;  %v3560_v4 = vsub.f32 %v8712_v0, %v3558_v60  ;;  %v5193_v0 = vsel %vm3299_vm2, %v8824_v19, -inf }
 0x497   :  { %v3563_v12 = vmul.f32 1.442695, %v3560_v4  ;;  %8078 = vpow2.f32 %v3561_v1 }
 0x498   :  { %4960 = vrot.lane.b32.xlu0 %v8560_v7, %s8347_s4 }
 0x499   :  { %8080 = vpow2.f32 %v3563_v12  ;;  %v8075_v58 = vpop.eup %8074 }
 0x49a   :  { %v3680_v51 = vpop.xlane.xlu1 %3679 }
 0x49b   :  { %v3684_v29 = vsub.f32 %v8716_v3, %v3680_v51  ;;  %v3437_v3 = vsel %vm3299_vm2, %v8075_v58, 0.0 }
 0x49c   :  { %v3683_v17 = vpop.xlane.xlu0 %3682  ;;  %5212 = vrot.lane.b32.xlu0 %v8564_v10, %s8347_s4 }
 0x49d   :  { %v8077_v31 = vpop.eup %8076  ;;  %v3686_v61 = vmul.f32 1.442695, %v3684_v29  ;;  %v3685_v20 = vsub.f32 %v8720_v15, %v3683_v17 }
 0x49e   :  { %5194 = vmax.xlane.f32.xlu1 %v5193_v0  ;;  %v3445_v32 = vpack.c.bf16 %v8077_v31, %v8075_v58 }
 0x49f   :  { %v3688_v9 = vmul.f32 1.442695, %v3685_v20  ;;  %8082 = vpow2.f32 %v3686_v61 }
 0x4a0   :  { %6964 = vmatmul.mubr.msk.bf16.vlgmr.msra.gmra.mrb[28].mxu1 %vm3299_vm2, %v3445_v32 }
 0x4a1   :  { %8084 = vpow2.f32 %v3688_v9  ;;  %6974 = vmatpush3.bf16.msra.mxu1 %v8548_v52  ;;  %6975 = vmatprep.mubr.msk.bf16.mxu1 %vm8349_vm1, %v8348_v22  ;;  %v8079_v35 = vpop.eup %8078  ;;  %v3440_v52 = vsel %vm3299_vm2, %v8077_v31, 0.0 }
 0x4a2   :  { %v3807_v46 = vpop.xlane.xlu1 %3806  ;;  %3438 = vadd.xlane.f32.xlu1 %v3437_v3  ;;  %6985 = vmatprep.subr.bf16.mxu1 %v8348_v22 }
 0x4a3   :  { %v8081_v15 = vpop.eup %8080  ;;  %v3811_v37 = vsub.f32 %v8726_v24, %v3807_v46 }
 0x4a4   :  { %v3810_v44 = vpop.xlane.xlu0 %3809  ;;  %v3573_v27 = vpack.c.bf16 %v8081_v15, %v8079_v35 }
 0x4a5   :  { %v3813_v50 = vmul.f32 1.442695, %v3811_v37  ;;  %v3812_v55 = vsub.f32 %v8732_v28, %v3810_v44 }
 0x4a6   :  { %3441 = vadd.xlane.f32.xlu1 %v3440_v52  ;;  %v3315_v52 = vsel %vm3299_vm2, %v8754_v40, 0.0 }
 0x4a7   :  { %v3815_v59 = vmul.f32 1.442695, %v3812_v55  ;;  %8086 = vpow2.f32 %v3813_v50 }
 0x4a8   :  { %6976 = vmatmul.mubr.msk.bf16.vlgmr.msra.gmra.mrb[32].mxu1 %vm3299_vm2, %v3573_v27 }
 0x4a9   :  { %8088 = vpow2.f32 %v3815_v59  ;;  %6986 = vmatpush3.bf16.msra.mxu1 %v8730_v26  ;;  %6987 = vmatprep.mubr.msk.bf16.mxu1 %vm8349_vm1, %v8348_v22  ;;  %v8083_v60 = vpop.eup %8082  ;;  %v3565_v26 = vsel %vm3299_vm2, %v8079_v35, 0.0 }
 0x4aa   :  { %v3932_v24 = vpop.xlane.xlu0 %3931  ;;  %6997 = vmatprep.subr.bf16.mxu1 %v8348_v22  ;;  %v3690_v37 = vsel %vm3299_vm2, %v8083_v60, 0.0 }
 0x4ab   :  { %v8085_v1 = vpop.eup %8084  ;;  %v3936_v28 = vsub.f32 %v8736_v33, %v3932_v24 }
 0x4ac   :  { %v3693_v4 = vsel %vm3299_vm2, %v8085_v1, 0.0  ;;  %v3698_v12 = vpack.c.bf16 %v8085_v1, %v8083_v60 }
 0x4ad   :  { %v3938_v51 = vmul.f32 1.442695, %v3936_v28  ;;  %3694 = vadd.xlane.f32.xlu1 %v3693_v4 }
 0x4ae   :  { %v3935_v29 = vpop.xlane.xlu0 %3934 }
 0x4af   :  { %8090 = vpow2.f32 %v3938_v51  ;;  %v3937_v58 = vsub.f32 %v8740_v18, %v3935_v29  ;;  %v3312_v18 = vsel %vm3299_vm2, %v8752_v39, 0.0 }
 0x4b0   :  { %6988 = vmatmul.mubr.msk.bf16.vlgmr.msra.gmra.mrb[36].mxu1 %vm3299_vm2, %v3698_v12  ;;  %v4205_v12 = vpop.permute.xlu1 %4204 }
 0x4b1   :  { %v3940_v17 = vmul.f32 1.442695, %v3937_v58  ;;  %6998 = vmatpush3.bf16.msra.mxu1 %v8546_v48  ;;  %3566 = vadd.xlane.f32.xlu1 %v3565_v26  ;;  %v8087_v31 = vpop.eup %8086 }
 0x4b2   :  { %v4059_v61 = vpop.xlane.xlu0 %4058  ;;  %6999 = vmatprep.mubr.msk.bf16.mxu1 %vm8349_vm1, %v8348_v22  ;;  %7009 = vmatprep.subr.bf16.mxu1 %v8348_v22  ;;  %v3817_v3 = vsel %vm3299_vm2, %v8087_v31, 0.0 }
 0x4b3   :  { %v8089_v33 = vpop.eup %8088  ;;  %8092 = vpow2.f32 %v3940_v17  ;;  %v4063_v20 = vsub.f32 %v8744_v36, %v4059_v61 }
 0x4b4   :  { %v3825_v0 = vpack.c.bf16 %v8089_v33, %v8087_v31 }
 0x4b5   :  { %v4065_v32 = vmul.f32 1.442695, %v4063_v20  ;;  %3313 = vadd.xlane.f32.xlu1 %v3312_v18 }
 0x4b6   :  { %v4062_v9 = vpop.xlane.xlu0 %4061 }
 0x4b7   :  { %8094 = vpow2.f32 %v4065_v32  ;;  %v4064_v48 = vsub.f32 %v8748_v38, %v4062_v9 }
 0x4b8   :  { %7000 = vmatmul.mubr.msk.bf16.vlgmr.msra.gmra.mrb[40].mxu1 %vm3299_vm2, %v3825_v0 }
 0x4b9   :  { %v8091_v35 = vpop.eup %8090  ;;  %v4067_v46 = vmul.f32 1.442695, %v4064_v48  ;;  %7010 = vmatpush3.bf16.msra.mxu1 %v8724_v23  ;;  %3818 = vadd.xlane.f32.xlu1 %v3817_v3  ;;  %v3568_v23 = vsel %vm3299_vm2, %v8081_v15, 0.0 }
 0x4ba   :  { %v4184_v36 = vpop.xlane.xlu0 %4183  ;;  %7011 = vmatprep.mubr.msk.bf16.mxu1 %vm8349_vm1, %v8348_v22  ;;  %7021 = vmatprep.subr.bf16.mxu1 %v8348_v22  ;;  %v3942_v39 = vsel %vm3299_vm2, %v8091_v35, 0.0 }
 0x4bb   :  { %8096 = vpow2.f32 %v4067_v46  ;;  %v4188_v38 = vsub.f32 %v8761_v41, %v4184_v36  ;;  %3691 = vadd.xlane.f32.xlu0 %v3690_v37 }
 0x4bd   :  { %v8093_v44 = vpop.eup %8092  ;;  %v4190_v27 = vmul.f32 1.442695, %v4188_v38  ;;  %3943 = vadd.xlane.f32.xlu1 %v3942_v39 }
 0x4be   :  { %v3950_v50 = vpack.c.bf16 %v8093_v44, %v8091_v35  ;;  %v3945_v29 = vsel %vm3299_vm2, %v8093_v44, 0.0 }
 0x4bf   :  { %8098 = vpow2.f32 %v4190_v27  ;;  %3569 = vadd.xlane.f32.xlu0 %v3568_v23 }
 0x4c0   :  { %7012 = vmatmul.mubr.msk.bf16.vlgmr.msra.gmra.mrb[44].mxu1 %vm3299_vm2, %v3950_v50 }
 0x4c1   :  { %v8095_v55 = vpop.eup %8094  ;;  %7022 = vmatpush3.bf16.msra.mxu1 %v8550_v54  ;;  %7023 = vmatprep.mubr.msk.bf16.mxu1 %vm8349_vm1, %v8348_v22  ;;  %v3820_v54 = vsel %vm3299_vm2, %v8089_v33, 0.0 }
 0x4c2   :  { %v4311_v41 = vpop.xlane.xlu0 %4310  ;;  %v4069_v59 = vsel %vm3299_vm2, %v8095_v55, 0.0  ;;  %7033 = vmatprep.subr.bf16.mxu1 %v8348_v22 }
 0x4c3   :  { %v4315_v15 = vsub.f32 %v8770_v57, %v4311_v41  ;;  %3316 = vadd.xlane.f32.xlu0 %v3315_v52  ;;  %4070 = vadd.xlane.f32.xlu1 %v4069_v59 }
 0x4c5   :  { %v8097_v60 = vpop.eup %8096  ;;  %v4317_v24 = vmul.f32 1.442695, %v4315_v15 }
 0x4c6   :  { %v4314_v1 = vpop.xlane.xlu0 %4313  ;;  %v4077_v28 = vpack.c.bf16 %v8097_v60, %v8095_v55  ;;  %v4072_v17 = vsel %vm3299_vm2, %v8097_v60, 0.0 }
 0x4c7   :  { %8100 = vpow2.f32 %v4317_v24  ;;  %v4316_v4 = vsub.f32 %v8774_v62, %v4314_v1  ;;  %3821 = vadd.xlane.f32.xlu0 %v3820_v54 }
 0x4c8   :  { %7024 = vmatmul.mubr.msk.bf16.vlgmr.msra.gmra.mrb[48].mxu1 %vm3299_vm2, %v4077_v28 }
 0x4c9   :  { %v8099_v40 = vpop.eup %8098  ;;  %v4319_v51 = vmul.f32 1.442695, %v4316_v4  ;;  %7034 = vmatpush3.bf16.msra.mxu1 %v4205_v12  ;;  %7035 = vmatprep.mubr.msk.bf16.mxu1 %vm8349_vm1, %v8348_v22 }
 0x4ca   :  { %v4436_v57 = vpop.xlane.xlu0 %4435  ;;  %v4194_v58 = vsel %vm3299_vm2, %v8099_v40, 0.0  ;;  %7045 = vmatprep.subr.bf16.mxu1 %v8348_v22 }
 0x4cb   :  { %8102 = vpow2.f32 %v4319_v51  ;;  %v4440_v62 = vsub.f32 %v8778_v2, %v4436_v57  ;;  %3946 = vadd.xlane.f32.xlu0 %v3945_v29  ;;  %4195 = vadd.xlane.f32.xlu1 %v4194_v58 }
 0x4cd   :  { %v4442_v26 = vmul.f32 1.442695, %v4440_v62 }
 0x4cf   :  { %8104 = vpow2.f32 %v4442_v26  ;;  %4073 = vadd.xlane.f32.xlu0 %v4072_v17 }
 0x4d1   :  { %v8101_v31 = vpop.eup %8100 }
 0x4d2   :  { %v4321_v61 = vsel %vm3299_vm2, %v8101_v31, 0.0 }
 0x4d3   :  { %4322 = vadd.xlane.f32.xlu1 %v4321_v61 }
 0x4d5   :  { %v8103_v33 = vpop.eup %8102 }
 0x4d6   :  { %v4329_v20 = vpack.c.bf16 %v8103_v33, %v8101_v31 }
 0x4d7   :  { %v4187_v18 = vpop.xlane.xlu1 %4186 }
 0x4d8   :  { %v4189_v0 = vsub.f32 %v8767_v53, %v4187_v18 }
 0x4d9   :  { %v8105_v32 = vpop.eup %8104 }
 0x4da   :  { %v4192_v9 = vmul.f32 1.442695, %v4189_v0  ;;  %v4446_v2 = vsel %vm3299_vm2, %v8105_v32, 0.0 }
 0x4db   :  { %v4439_v48 = vpop.xlane.xlu1 %4438  ;;  %4447 = vadd.xlane.f32.xlu1 %v4446_v2 }
 0x4dc   :  { %8106 = vpow2.f32 %v4192_v9  ;;  %v4441_v3 = vsub.f32 %v8782_v16, %v4439_v48 }
 0x4de   :  { %v4444_v35 = vmul.f32 1.442695, %v4441_v3 }
 0x4df   :  { %v4563_v46 = vpop.xlane.xlu1 %4562 }
 0x4e0   :  { %8108 = vpow2.f32 %v4444_v35  ;;  %v4567_v36 = vsub.f32 %v8784_v13, %v4563_v46  ;;  %v4324_v13 = vsel %vm3299_vm2, %v8103_v33, 0.0 }
 0x4e2   :  { %v4569_v37 = vmul.f32 1.442695, %v4567_v36 }
 0x4e3   :  { %v4566_v38 = vpop.xlane.xlu1 %4565 }
 0x4e4   :  { %8110 = vpow2.f32 %v4569_v37  ;;  %v4568_v39 = vsub.f32 %v8786_v21, %v4566_v38 }
 0x4e6   :  { %v8107_v53 = vpop.eup %8106  ;;  %v4571_v44 = vmul.f32 1.442695, %v4568_v39 }
 0x4e7   :  { %v4691_v27 = vpop.xlane.xlu1 %4690  ;;  %v4197_v23 = vsel %vm3299_vm2, %v8107_v53, 0.0  ;;  %v4202_v50 = vpack.c.bf16 %v8107_v53, %v8099_v40 }
 0x4e8   :  { %8112 = vpow2.f32 %v4571_v44  ;;  %4198 = vadd.xlane.f32.xlu0 %v4197_v23  ;;  %v4693_v57 = vsub.f32 %v8792_v5, %v4691_v27 }
 0x4e9   :  { %7036 = vmatmul.mubr.msk.bf16.vlgmr.msra.gmra.mrb[52].mxu1 %vm3299_vm2, %v4202_v50 }
 0x4ea   :  { %v8109_v16 = vpop.eup %8108  ;;  %7046 = vmatpush3.bf16.msra.mxu1 %v8558_v6  ;;  %7047 = vmatprep.mubr.msk.bf16.mxu1 %vm8349_vm1, %v8348_v22  ;;  %v4457_v6 = vpop.permute.xlu0 %4456  ;;  %v4696_v58 = vmul.f32 1.442695, %v4693_v57 }
 0x4eb   :  { %7057 = vmatprep.subr.bf16.mxu1 %v8348_v22  ;;  %v4454_v21 = vpack.c.bf16 %v8109_v16, %v8105_v32  ;;  %v4449_v15 = vsel %vm3299_vm2, %v8109_v16, 0.0 }
 0x4ec   :  { %v4943_v55 = vpop.xlane.xlu1 %4942  ;;  %4325 = vadd.xlane.f32.xlu0 %v4324_v13 }
 0x4ed   :  { %v4945_v41 = vsub.f32 %v8810_v47, %v4943_v55 }
 0x4ee   :  { %v8111_v52 = vpop.eup %8110 }
 0x4ef   :  { %v4948_v59 = vmul.f32 1.442695, %v4945_v41  ;;  %v4573_v60 = vsel %vm3299_vm2, %v8111_v52, 0.0 }
 0x4f0   :  { %4450 = vadd.xlane.f32.xlu0 %v4449_v15  ;;  %4574 = vadd.xlane.f32.xlu1 %v4573_v60 }
 0x4f1   :  { %8114 = vpow2.f32 %v4948_v59  ;;  %7048 = vmatmul.mubr.msk.bf16.vlgmr.msra.gmra.mrb[56].mxu1 %vm3299_vm2, %v4329_v20 }
 0x4f2   :  { %v8113_v24 = vpop.eup %8112  ;;  %7058 = vmatpush3.bf16.msra.mxu1 %v4457_v6  ;;  %v5067_v1 = vpop.xlane.xlu1 %5066  ;;  %7059 = vmatprep.mubr.msk.bf16.mxu1 %vm8349_vm1, %v8348_v22 }
 0x4f3   :  { %v5071_v47 = vsub.f32 %v8814_v56, %v5067_v1  ;;  %v4576_v54 = vsel %vm3299_vm2, %v8113_v24, 0.0  ;;  %7069 = vmatprep.subr.bf16.mxu1 %v8348_v22  ;;  %v4581_v28 = vpack.c.bf16 %v8113_v24, %v8111_v52 }
 0x4f4   :  { %4577 = vadd.xlane.f32.xlu0 %v4576_v54 }
 0x4f5   :  { %v5073_v4 = vmul.f32 1.442695, %v5071_v47  ;;  %v7880_v47 = vld [vmem:[#allocation12 + $0x4] ss:$16 sps:$4 sm:$0xff]  }
 0x4f6   :  { %v5070_v12 = vpop.xlane.xlu1 %5069  ;;  %6065 = vmatprep.subr.bf16.mxu0 %v7880_v47  ;;  %v7941_v47 = vld [vmem:[#allocation12 + $0x148] ss:$16 sps:$4 sm:$0xff]  }
 0x4f7   :  { %v5072_v40 = vsub.f32 %v8818_v63, %v5070_v12  ;;  %8116 = vpow2.f32 %v5073_v4  ;;  %v7886_v12 = vld [vmem:[#allocation12 + $0x24] ss:$16 sps:$4 sm:$0xff]  }
 0x4f9   :  { %v5075_v51 = vmul.f32 1.442695, %v5072_v40  ;;  %7060 = vmatmul.mubr.msk.bf16.vlgmr.msra.gmra.mrb[60].mxu1 %vm3299_vm2, %v4454_v21  ;;  %v7889_v40 = vld [vmem:[#allocation12 + $0x2c] ss:$16 sps:$4 sm:$0xff]  }
 0x4fa   :  { %7070 = vmatpush3.bf16.msra.mxu1 %v8562_v8  ;;  %7071 = vmatprep.mubr.msk.bf16.mxu1 %vm8349_vm1, %v8348_v22  ;;  %v4709_v31 = vpop.permute.xlu1 %4708 }
 0x4fb   :  { %v8933_v56 = vpop.eup %8114  ;;  %8118 = vpow2.f32 %v5075_v51  ;;  %7081 = vmatprep.subr.bf16.mxu1 %v8348_v22  ;;  %v7884_v51 = vld [vmem:[#allocation12 + $0x20] ss:$16 sps:$4 sm:$0xff]  }
 0x4fc   :  { %v4953_v29 = vsel %vm3299_vm2, %v8933_v56, 0.0  ;;  %8120 = vpow2.f32 %v4696_v58  ;;  %v7892_v58 = vld [vmem:[#allocation12 + $0x44] ss:$16 sps:$4 sm:$0xff]  }
 0x4fd   :  { %4954 = vadd.xlane.f32.xlu0 %v4953_v29 }
 0x4fe   :  { %v8939_v63 = vpop.f32.mrb[24].mxu1 }
 0x4ff   :  { %v6953_v62 = vpop.f32.mrb[25].mxu1  ;;  %v4688_v26 = vpop.xlane.xlu0 %4687 }
 0x500   :  { %v4692_v8 = vsub.f32 %v8790_v30, %v4688_v26  ;;  %v8942_v17 = vpop.f32.mrb[26].mxu1  ;;  %v7895_v62 = vld [vmem:[#allocation12 + $0x4c] ss:$16 sps:$4 sm:$0xff]   ;;  %v7890_v26 = vld [vmem:[#allocation12 + $0x40] ss:$16 sps:$4 sm:$0xff]  }
 0x501   :  { %v6954_v61 = vpop.f32.mrb[27].mxu1  ;;  %7072 = vmatmul.mubr.msk.bf16.vlgmr.msra.gmra.mrb[64].mxu1 %vm3299_vm2, %v4581_v28  ;;  %v8948_v20 = vpop.eup %8116  ;;  %v7881_v28 = vld [vmem:[#allocation12 + $0x8] ss:$16 sps:$4 sm:$0xff]  }
 0x502   :  { %v4694_v5 = vmul.f32 1.442695, %v4692_v8  ;;  %7082 = vmatpush3.bf16.msra.mxu1 %v4709_v31  ;;  %7083 = vmatprep.mubr.msk.bf16.mxu1 %vm8349_vm1, %v8348_v22  ;;  %v7893_v8 = vld [vmem:[#allocation12 + $0x48] ss:$16 sps:$4 sm:$0xff]   ;;  %v7896_v61 = vld [vmem:[#allocation12 + $0x60] ss:$16 sps:$4 sm:$0xff]  }
 0x503   :  { %v4815_v33 = vpop.xlane.xlu0 %4814  ;;  %7093 = vmatprep.subr.bf16.mxu1 %v8348_v22 }
 0x504   :  { %8122 = vpow2.f32 %v4694_v5  ;;  %v4819_v30 = vsub.f32 %v8800_v34, %v4815_v33  ;;  %v7898_v5 = vld [vmem:[#allocation12 + $0x64] ss:$16 sps:$4 sm:$0xff]   ;;  %v7899_v33 = vld [vmem:[#allocation12 + $0x68] ss:$16 sps:$4 sm:$0xff]  }
 0x505   :  { %v8951_v18 = vpop.eup %8118 }
 0x506   :  { %v5085_v0 = vpack.c.bf16 %v8951_v18, %v8948_v20  ;;  %v4821_v32 = vmul.f32 1.442695, %v4819_v30  ;;  %v8121_v46 = vpop.eup %8120  ;;  %v7901_v30 = vld [vmem:[#allocation12 + $0x6c] ss:$16 sps:$4 sm:$0xff]  }
 0x507   :  { %v4818_v9 = vpop.xlane.xlu0 %4817 }
 0x508   :  { %v4820_v2 = vsub.f32 %v8802_v25, %v4818_v9  ;;  %8124 = vpow2.f32 %v4821_v32  ;;  %v7907_v32 = vld [vmem:[#allocation12 + $0x8c] ss:$16 sps:$4 sm:$0xff]   ;;  %v7902_v9 = vld [vmem:[#allocation12 + $0x80] ss:$16 sps:$4 sm:$0xff]  }
 0x50a   :  { %v4823_v48 = vmul.f32 1.442695, %v4820_v2  ;;  %v7905_v2 = vld [vmem:[#allocation12 + $0x88] ss:$16 sps:$4 sm:$0xff]  }
 0x50b   :  { %v4940_v3 = vpop.xlane.xlu0 %4939 }
 0x50c   :  { %8126 = vpow2.f32 %v4823_v48  ;;  %v4944_v35 = vsub.f32 %v8808_v14, %v4940_v3  ;;  %v4701_v14 = vsel %vm3299_vm2, %v8121_v46, 0.0  ;;  %v7910_v3 = vld [vmem:[#allocation12 + $0xa4] ss:$16 sps:$4 sm:$0xff]  }
 0x50e   :  { %v8123_v36 = vpop.eup %8122  ;;  %v4946_v37 = vmul.f32 1.442695, %v4944_v35  ;;  %v7913_v35 = vld [vmem:[#allocation12 + $0xac] ss:$16 sps:$4 sm:$0xff]  }
 0x50f   :  { %v5192_v38 = vpop.xlane.xlu0 %5191  ;;  %v4698_v34 = vsel %vm3299_vm2, %v8123_v36, 0.0  ;;  %v4706_v39 = vpack.c.bf16 %v8121_v46, %v8123_v36  ;;  %v7908_v46 = vld [vmem:[#allocation12 + $0xa0] ss:$16 sps:$4 sm:$0xff]   ;;  %v7911_v36 = vld [vmem:[#allocation12 + $0xa8] ss:$16 sps:$4 sm:$0xff]  }
 0x510   :  { %8128 = vpow2.f32 %v4946_v37  ;;  %v5196_v53 = vsub.f32 %v8822_v11, %v5192_v38  ;;  %4699 = vadd.xlane.f32.xlu1 %v4698_v34  ;;  %v7916_v38 = vld [vmem:[#allocation12 + $0xc4] ss:$16 sps:$4 sm:$0xff]  }
 0x511   :  { %7084 = vmatmul.mubr.msk.bf16.vlgmr.msra.gmra.mrb[68].mxu1 %vm3299_vm2, %v4706_v39 }
 0x512   :  { %v5198_v25 = vmul.f32 1.442695, %v5196_v53  ;;  %7094 = vmatpush3.bf16.msra.mxu1 %v8560_v7  ;;  %7095 = vmatprep.mubr.msk.bf16.mxu1 %vm8349_vm1, %v8348_v22  ;;  %v8965_v44 = vpop.eup %8124  ;;  %v7914_v53 = vld [vmem:[#allocation12 + $0xc0] ss:$16 sps:$4 sm:$0xff]  }
 0x513   :  { %7105 = vmatprep.subr.bf16.mxu1 %v8348_v22  ;;  %v4961_v23 = vpop.permute.xlu0 %4960 }
 0x514   :  { %8130 = vpow2.f32 %v5198_v25  ;;  %4702 = vadd.xlane.f32.xlu1 %v4701_v14  ;;  %v7919_v25 = vld [vmem:[#allocation12 + $0xcc] ss:$16 sps:$4 sm:$0xff]   ;;  %v7917_v14 = vld [vmem:[#allocation12 + $0xc8] ss:$16 sps:$4 sm:$0xff]  }
 0x516   :  { %v8967_v27 = vpop.eup %8126 }
 0x517   :  { %v4833_v11 = vpack.c.bf16 %v8967_v27, %v8965_v44  ;;  %v5213_v55 = vpop.permute.xlu0 %5212 }
 0x519   :  { %7096 = vmatmul.mubr.msk.bf16.vlgmr.msra.gmra.mrb[72].mxu1 %vm3299_vm2, %v4833_v11  ;;  %v7922_v11 = vld [vmem:[#allocation12 + $0xe4] ss:$16 sps:$4 sm:$0xff]  }
 0x51a   :  { %v8129_v7 = vpop.eup %8128  ;;  %7106 = vmatpush3.bf16.msra.mxu1 %v4961_v23  ;;  %7107 = vmatprep.mubr.msk.bf16.mxu1 %vm8349_vm1, %v8348_v22  ;;  %v7925_v23 = vld [vmem:[#allocation12 + $0xec] ss:$16 sps:$4 sm:$0xff]  }
 0x51b   :  { %v4950_v50 = vsel %vm3299_vm2, %v8129_v7, 0.0  ;;  %7117 = vmatprep.subr.bf16.mxu1 %v8348_v22  ;;  %v4958_v16 = vpack.c.bf16 %v8933_v56, %v8129_v7  ;;  %v7887_v56 = vld [vmem:[#allocation12 + $0x28] ss:$16 sps:$4 sm:$0xff]  }
 0x51c   :  { %4951 = vadd.xlane.f32.xlu1 %v4950_v50  ;;  %v7920_v50 = vld [vmem:[#allocation12 + $0xe0] ss:$16 sps:$4 sm:$0xff]  }
 0x51e   :  { %v8131_v13 = vpop.eup %8130 }
 0x51f   :  { %v5202_v21 = vsel %vm3299_vm2, %v8131_v13, 0.0 }
 0x520   :  { %5203 = vadd.xlane.f32.xlu1 %v5202_v21  ;;  %v7929_v21 = vld [vmem:[#allocation12 + $0x108] ss:$16 sps:$4 sm:$0xff]  }
 0x521   :  { %7108 = vmatmul.mubr.msk.bf16.vlgmr.msra.gmra.mrb[76].mxu1 %vm3299_vm2, %v4958_v16  ;;  %v7923_v16 = vld [vmem:[#allocation12 + $0xe8] ss:$16 sps:$4 sm:$0xff]  }
 0x522   :  { %7118 = vmatpush3.bf16.msra.mxu1 %v8564_v10  ;;  %7119 = vmatprep.mubr.msk.bf16.mxu1 %vm8349_vm1, %v8348_v22 }
 0x523   :  { %7129 = vmatprep.subr.bf16.mxu1 %v8348_v22 }
 0x529   :  { %7120 = vmatmul.mubr.msk.bf16.vlgmr.msra.gmra.mrb[80].mxu1 %vm3299_vm2, %v5085_v0  ;;  %v7904_v0 = vld [vmem:[#allocation12 + $0x84] ss:$16 sps:$4 sm:$0xff]  }
 0x52a   :  { %7130 = vmatpush3.bf16.msra.mxu1 %v5213_v55  ;;  %7131 = vmatprep.mubr.msk.bf16.mxu1 %vm8349_vm1, %v8348_v22  ;;  %v7883_v22 = vld [vmem:[#allocation12 + $0xc] ss:$16 sps:$4 sm:$0xff]   ;;  %v7932_v55 = vld [vmem:[#allocation12 + $0x120] ss:$16 sps:$4 sm:$0xff]  }
 0x52b   :  { %v5195_v41 = vpop.xlane.xlu1 %5194  ;;  %6171 = vmatprep.subr.bf16.mxu1 %v7883_v22  ;;  %v7946_v22 = vld [vmem:[#allocation12 + $0x164] ss:$16 sps:$4 sm:$0xff]  }
 0x52c   :  { %v5197_v52 = vsub.f32 %v8824_v19, %v5195_v41  ;;  %v7878_v19 = vld [vmem:[#allocation12] ss:$16 sps:$4 sm:$0xff]   ;;  %v7934_v41 = vld [vmem:[#allocation12 + $0x124] ss:$16 sps:$4 sm:$0xff]  }
 0x52d   :  { %6066 = vmatpush1.bf16.msra.mxu0 %v7878_v19  ;;  %v7944_v19 = vld [vmem:[#allocation12 + $0x160] ss:$16 sps:$4 sm:$0xff]  }
 0x52e   :  { %v5200_v59 = vmul.f32 1.442695, %v5197_v52  ;;  %6067 = vmatprep.subr.bf16.mxu0 %v7886_v12  ;;  %v7935_v52 = vld [vmem:[#allocation12 + $0x128] ss:$16 sps:$4 sm:$0xff]  }
 0x52f   :  { %v8987_v15 = vpop.xlane.xlu1 %3438 }
 0x530   :  { %8132 = vpow2.f32 %v5200_v59  ;;  %v7937_v59 = vld [vmem:[#allocation12 + $0x12c] ss:$16 sps:$4 sm:$0xff]  }
 0x531   :  { %6068 = vmatpush1.bf16.msra.mxu0 %v7884_v51 }
 0x532   :  { %6069 = vmatprep.subr.bf16.mxu0 %v7892_v58  ;;  %v7955_v58 = vld [vmem:[#allocation12 + $0x18c] ss:$16 sps:$4 sm:$0xff]  }
 0x533   :  { %v8990_v24 = vpop.xlane.xlu1 %3441 }
 0x535   :  { %6070 = vmatpush1.bf16.msra.mxu0 %v7890_v26 }
 0x536   :  { %6071 = vmatprep.subr.bf16.mxu0 %v7898_v5  ;;  %v7958_v5 = vld [vmem:[#allocation12 + $0x1a4] ss:$16 sps:$4 sm:$0xff]  }
 0x539   :  { %6072 = vmatpush1.bf16.msra.mxu0 %v7896_v61  ;;  %v7953_v61 = vld [vmem:[#allocation12 + $0x188] ss:$16 sps:$4 sm:$0xff]  }
 0x53a   :  { %v8133_v10 = vpop.eup %8132  ;;  %v8993_v1 = vpop.xlane.xlu1 %3694  ;;  %6073 = vmatprep.subr.bf16.mxu0 %v7904_v0 }
 0x53b   :  { %v5205_v60 = vsel %vm3299_vm2, %v8133_v10, 0.0  ;;  %v5210_v6 = vpack.c.bf16 %v8133_v10, %v8131_v13  ;;  %v7926_v13 = vld [vmem:[#allocation12 + $0x100] ss:$16 sps:$4 sm:$0xff]   ;;  %v7940_v10 = vld [vmem:[#allocation12 + $0x144] ss:$16 sps:$4 sm:$0xff]  }
 0x53c   :  { %5206 = vadd.xlane.f32.xlu0 %v5205_v60  ;;  %v7943_v60 = vld [vmem:[#allocation12 + $0x14c] ss:$16 sps:$4 sm:$0xff]  }
 0x53d   :  { %7132 = vmatmul.mubr.msk.bf16.vlgmr.msra.gmra.mrb[84].mxu1 %vm3299_vm2, %v5210_v6  ;;  %6074 = vmatpush1.bf16.msra.mxu0 %v7902_v9  ;;  %v7938_v6 = vld [vmem:[#allocation12 + $0x140] ss:$16 sps:$4 sm:$0xff]  }
 0x53e   :  { %v8995_v54 = vpop.xlane.xlu1 %3566  ;;  %6172 = vmatpush1.bf16.msra.mxu1 %v7881_v28  ;;  %6075 = vmatprep.subr.bf16.mxu0 %v7910_v3  ;;  %v7949_v28 = vld [vmem:[#allocation12 + $0x16c] ss:$16 sps:$4 sm:$0xff]   ;;  %v7964_v3 = vld [vmem:[#allocation12 + $0x1c4] ss:$16 sps:$4 sm:$0xff]  }
 0x53f   :  { %6173 = vmatprep.subr.bf16.mxu1 %v7889_v40 }
 0x541   :  { %6076 = vmatpush1.bf16.msra.mxu0 %v7908_v46 }
 0x542   :  { %v3314_v57 = vpop.xlane.xlu1 %3313  ;;  %6174 = vmatpush1.bf16.msra.mxu1 %v7887_v56  ;;  %6077 = vmatprep.subr.bf16.mxu0 %v7916_v38  ;;  %v7965_v38 = vld [vmem:[#allocation12 + $0x1c8] ss:$16 sps:$4 sm:$0xff]  }
 0x543   :  { %8134 = vrcp.f32 %v3314_v57  ;;  %6175 = vmatprep.subr.bf16.mxu1 %v7895_v62  ;;  %v7952_v57 = vld [vmem:[#allocation12 + $0x184] ss:$16 sps:$4 sm:$0xff]  }
 0x545   :  { %6078 = vmatpush1.bf16.msra.mxu0 %v7914_v53 }
 0x546   :  { %6176 = vmatpush1.bf16.msra.mxu1 %v7893_v8  ;;  %6079 = vmatprep.subr.bf16.mxu0 %v7922_v11  ;;  %v7971_v11 = vld [vmem:[#allocation12 + $0x1e8] ss:$16 sps:$4 sm:$0xff]  }
 0x547   :  { %6177 = vmatprep.subr.bf16.mxu1 %v7901_v30  ;;  %v7961_v30 = vld [vmem:[#allocation12 + $0x1ac] ss:$16 sps:$4 sm:$0xff]  }
 0x548   :  { %v8997_v4 = vpop.xlane.xlu0 %3691 }
 0x549   :  { %6080 = vmatpush1.bf16.msra.mxu0 %v7920_v50 }
 0x54a   :  { %6178 = vmatpush1.bf16.msra.mxu1 %v7899_v33  ;;  %v7959_v33 = vld [vmem:[#allocation12 + $0x1a8] ss:$16 sps:$4 sm:$0xff]  }
 0x54b   :  { %6179 = vmatprep.subr.bf16.mxu1 %v7907_v32 }
 0x54c   :  { %v8999_v29 = vpop.xlane.xlu0 %3569 }
 0x54d   :  { %v8135_v48 = vpop.eup %8134 }
 0x54e   :  { %6180 = vmatpush1.bf16.msra.mxu1 %v7905_v2  ;;  %v3365_v34 = vmul.f32 %v8135_v48, %v8939_v63  ;;  %v7928_v63 = vld [vmem:[#allocation12 + $0x104] ss:$16 sps:$4 sm:$0xff]  }
 0x54f   :  { %6181 = vmatprep.subr.bf16.mxu1 %v7913_v35  ;;  %6081 = vmatprep.subr.bf16.mxu0 %v7928_v63  ;;  %v7967_v35 = vld [vmem:[#allocation12 + $0x1cc] ss:$16 sps:$4 sm:$0xff]  }
 0x550   :  { %v3317_v31 = vpop.xlane.xlu0 %3316  ;;  %6082 = vmatpush1.bf16.msra.mxu0 %v7926_v13 }
 0x551   :  { %8136 = vrcp.f32 %v3317_v31  ;;  %6083 = vmatprep.subr.bf16.mxu0 %v7934_v41  ;;  %v7950_v31 = vld [vmem:[#allocation12 + $0x180] ss:$16 sps:$4 sm:$0xff]  }
 0x552   :  { %6182 = vmatpush1.bf16.msra.mxu1 %v7911_v36  ;;  %8138 = vrcp.f32 %v8987_v15  ;;  %v7947_v15 = vld [vmem:[#allocation12 + $0x168] ss:$16 sps:$4 sm:$0xff]  }
 0x553   :  { %6183 = vmatprep.subr.bf16.mxu1 %v7919_v25  ;;  %8140 = vrcp.f32 %v8990_v24  ;;  %v7968_v25 = vld [vmem:[#allocation12 + $0x1e0] ss:$16 sps:$4 sm:$0xff]  }
 0x554   :  { %6084 = vmatpush1.bf16.msra.mxu0 %v7932_v55  ;;  %8142 = vrcp.f32 %v8995_v54 }
 0x555   :  { %6085 = vmatprep.subr.bf16.mxu0 %v7940_v10  ;;  %8144 = vrcp.f32 %v8999_v29  ;;  %v7956_v29 = vld [vmem:[#allocation12 + $0x1a0] ss:$16 sps:$4 sm:$0xff]  }
 0x556   :  { %6184 = vmatpush1.bf16.msra.mxu1 %v7917_v14  ;;  %8146 = vrcp.f32 %v8993_v1  ;;  %v7962_v1 = vld [vmem:[#allocation12 + $0x1c0] ss:$16 sps:$4 sm:$0xff]   ;;  %v7973_v14 = vld [vmem:[#allocation12 + $0x1ec] ss:$16 sps:$4 sm:$0xff]  }
 0x557   :  { %6185 = vmatprep.subr.bf16.mxu1 %v7925_v23  ;;  %8148 = vrcp.f32 %v8997_v4  ;;  %v7970_v4 = vld [vmem:[#allocation12 + $0x1e4] ss:$16 sps:$4 sm:$0xff]  }
 0x558   :  { %6086 = vmatpush1.bf16.msra.mxu0 %v7938_v6 }
 0x559   :  { %6087 = vmatprep.subr.bf16.mxu0 %v7946_v22 }
 0x55a   :  { %6186 = vmatpush1.bf16.msra.mxu1 %v7923_v16 }
 0x55b   :  { %v8137_v37 = vpop.eup %8136 }
 0x55c   :  { %v3366_v39 = vmul.f32 %v8137_v37, %v8942_v17  ;;  %v7931_v17 = vld [vmem:[#allocation12 + $0x10c] ss:$16 sps:$4 sm:$0xff]   ;;  %v8139_v12 = vpop.eup %8138  ;;  %6088 = vmatpush1.bf16.msra.mxu0 %v7944_v19 }
 0x55d   :  { %6187 = vmatprep.subr.bf16.mxu1 %v7931_v17  ;;  %v8141_v51 = vpop.eup %8140  ;;  %6089 = vmatprep.subr.bf16.mxu0 %v7952_v57 }
 0x55e   :  { %v3367_v7 = vpack.c.bf16 %v3366_v39, %v3365_v34  ;;  %6188 = vmatpush1.bf16.msra.mxu1 %v7929_v21  ;;  %v8143_v32 = vpop.eup %8142  ;;  %v3819_v34 = vpop.xlane.xlu1 %3818 }
 0x55f   :  { %6189 = vmatprep.subr.bf16.mxu1 %v7937_v59  ;;  %v8145_v2 = vpop.eup %8144  ;;  %v3822_v39 = vpop.xlane.xlu0 %3821  ;;  %8150 = vrcp.f32 %v3819_v34 }
 0x560   :  { %3368 = vst.msk [vmem:[#allocation5] sm:$0xff] %vm3251_vm0, %v3367_v7  ;;  %6090 = vmatpush1.bf16.msra.mxu0 %v7950_v31  ;;  %8152 = vrcp.f32 %v3822_v39  ;;  %v8147_v7 = vpop.eup %8146 }
 0x561   :  { %6091 = vmatprep.subr.bf16.mxu0 %v7958_v5  ;;  %v8149_v16 = vpop.eup %8148 }
 0x562   :  { %6190 = vmatpush1.bf16.msra.mxu1 %v7935_v52  ;;  %v3944_v17 = vpop.xlane.xlu1 %3943 }
 0x563   :  { %6191 = vmatprep.subr.bf16.mxu1 %v7943_v60  ;;  %v3947_v41 = vpop.xlane.xlu0 %3946  ;;  %8154 = vrcp.f32 %v3944_v17 }
 0x564   :  { %6092 = vmatpush1.bf16.msra.mxu0 %v7956_v29  ;;  %8156 = vrcp.f32 %v3947_v41 }
 0x565   :  { %6093 = vmatprep.subr.bf16.mxu0 %v7964_v3  ;;  %v5077_v3 = vsel %vm3299_vm2, %v8948_v20, 0.0 }
 0x566   :  { %6192 = vmatpush1.bf16.msra.mxu1 %v7941_v47 }
 0x567   :  { %6193 = vmatprep.subr.bf16.mxu1 %v7949_v28 }
 0x568   :  { %6094 = vmatpush1.bf16.msra.mxu0 %v7962_v1 }
 0x569   :  { %6095 = vmatprep.subr.bf16.mxu0 %v7970_v4  ;;  %v8151_v10 = vpop.eup %8150 }
 0x56a   :  { %6194 = vmatpush1.bf16.msra.mxu1 %v7947_v15  ;;  %v8153_v6 = vpop.eup %8152  ;;  %v4071_v15 = vpop.xlane.xlu1 %4070 }
 0x56b   :  { %6195 = vmatprep.subr.bf16.mxu1 %v7955_v58  ;;  %8158 = vrcp.f32 %v4071_v15 }
 0x56c   :  { %6096 = vmatpush1.bf16.msra.mxu0 %v7968_v25 }
 0x56e   :  { %6196 = vmatpush1.bf16.msra.mxu1 %v7953_v61  ;;  %v5080_v61 = vsel %vm3299_vm2, %v8951_v18, 0.0  ;;  %v7976_v18 = vld [vmem:[#allocation12 + $0x204] ss:$16 sps:$4 sm:$0xff]  }
 0x56f   :  { %6197 = vmatprep.subr.bf16.mxu1 %v7961_v30  ;;  %6118 = vmatprep.subr.bf16.mxu0 %v7976_v18 }
 0x572   :  { %6198 = vmatpush1.bf16.msra.mxu1 %v7959_v33  ;;  %v4828_v33 = vsel %vm3299_vm2, %v8967_v27, 0.0  ;;  %v4825_v27 = vsel %vm3299_vm2, %v8965_v44, 0.0 }
 0x573   :  { %v3487_v24 = vpop.f32.mrb[28].mxu1  ;;  %6199 = vmatprep.subr.bf16.mxu1 %v7967_v35  ;;  %v7979_v35 = vld [vmem:[#allocation12 + $0x20c] ss:$16 sps:$4 sm:$0xff]  }
 0x574   :  { %v6965_v40 = vpop.f32.mrb[29].mxu1  ;;  %v3494_v62 = vmul.f32 %v8139_v12, %v3487_v24  ;;  %v4074_v24 = vpop.xlane.xlu0 %4073 }
 0x575   :  { %v3490_v56 = vpop.f32.mrb[30].mxu1  ;;  %v8155_v40 = vpop.eup %8154  ;;  %8160 = vrcp.f32 %v4074_v24 }
 0x576   :  { %v3495_v26 = vmul.f32 %v8141_v51, %v3490_v56  ;;  %v6966_v8 = vpop.f32.mrb[31].mxu1  ;;  %6200 = vmatpush1.bf16.msra.mxu1 %v7965_v38  ;;  %v8157_v58 = vpop.eup %8156 }
 0x577   :  { %6201 = vmatprep.subr.bf16.mxu1 %v7973_v14  ;;  %v8159_v29 = vpop.eup %8158 }
 0x578   :  { %v3496_v54 = vpack.c.bf16 %v3495_v26, %v3494_v62 }
 0x57a   :  { %3498 = vrot.lane.b32.xlu0 %v3496_v54, %s8347_s4  ;;  %6202 = vmatpush1.bf16.msra.mxu1 %v7971_v11 }
 0x57b   :  { %v3611_v0 = vpop.f32.mrb[32].mxu1  ;;  %6224 = vmatprep.subr.bf16.mxu1 %v7979_v35 }
 0x57c   :  { %v6977_v9 = vpop.f32.mrb[33].mxu1  ;;  %v3618_v46 = vmul.f32 %v8143_v32, %v3611_v0 }
 0x57d   :  { %v3614_v48 = vpop.f32.mrb[34].mxu1 }
 0x57e   :  { %v3619_v36 = vmul.f32 %v8145_v2, %v3614_v48  ;;  %v6978_v37 = vpop.f32.mrb[35].mxu1 }
 0x57f   :  { %v8161_v30 = vpop.eup %8160 }
 0x580   :  { %v3620_v53 = vpack.c.bf16 %v3619_v36, %v3618_v46  ;;  %v4196_v46 = vpop.xlane.xlu1 %4195  ;;  %v4199_v36 = vpop.xlane.xlu0 %4198 }
 0x581   :  { %8162 = vrcp.f32 %v4196_v46 }
 0x582   :  { %3621 = vst.msk [vmem:[#allocation5 + $0x8] sm:$0xff] %vm3251_vm0, %v3620_v53  ;;  %8164 = vrcp.f32 %v4199_v36 }
 0x583   :  { %v3740_v23 = vpop.f32.mrb[36].mxu1 }
 0x584   :  { %v6989_v50 = vpop.f32.mrb[37].mxu1  ;;  %v3747_v13 = vmul.f32 %v8149_v16, %v3740_v23  ;;  %v4323_v37 = vpop.xlane.xlu1 %4322 }
 0x585   :  { %v3743_v63 = vpop.f32.mrb[38].mxu1  ;;  %v4326_v1 = vpop.xlane.xlu0 %4325  ;;  %8166 = vrcp.f32 %v4323_v37 }
 0x586   :  { %v3748_v21 = vmul.f32 %v8147_v7, %v3743_v63  ;;  %v6990_v55 = vpop.f32.mrb[39].mxu1  ;;  %8168 = vrcp.f32 %v4326_v1 }
 0x588   :  { %v3749_v52 = vpack.c.bf16 %v3748_v21, %v3747_v13  ;;  %v4448_v11 = vpop.xlane.xlu1 %4447 }
 0x589   :  { %v4451_v23 = vpop.xlane.xlu0 %4450  ;;  %8170 = vrcp.f32 %v4448_v11 }
 0x58a   :  { %3751 = vrot.lane.b32.xlu1 %v3749_v52, %s8347_s4  ;;  %8172 = vrcp.f32 %v4451_v23 }
 0x58b   :  { %v3863_v59 = vpop.f32.mrb[40].mxu1  ;;  %v8163_v34 = vpop.eup %8162 }
 0x58c   :  { %v7001_v60 = vpop.f32.mrb[41].mxu1  ;;  %v3870_v22 = vmul.f32 %v8151_v10, %v3863_v59  ;;  %v8165_v4 = vpop.eup %8164 }
 0x58d   :  { %v3866_v47 = vpop.f32.mrb[42].mxu1  ;;  %v4575_v41 = vpop.xlane.xlu1 %4574 }
 0x58e   :  { %v3871_v19 = vmul.f32 %v8153_v6, %v3866_v47  ;;  %v7002_v28 = vpop.f32.mrb[43].mxu1  ;;  %v4578_v52 = vpop.xlane.xlu0 %4577  ;;  %8174 = vrcp.f32 %v4575_v41 }
 0x58f   :  { %v8167_v50 = vpop.eup %8166  ;;  %8176 = vrcp.f32 %v4578_v52  ;;  %v7980_v52 = vld [vmem:[#allocation12 + $0x220] ss:$16 sps:$4 sm:$0xff]  }
 0x590   :  { %v3872_v12 = vpack.c.bf16 %v3871_v19, %v3870_v22  ;;  %v8169_v63 = vpop.eup %8168 }
 0x592   :  { %3873 = vst.msk [vmem:[#allocation5 + $0x10] sm:$0xff] %vm3251_vm0, %v3872_v12 }
 0x593   :  { %v3992_v51 = vpop.f32.mrb[44].mxu1  ;;  %v8171_v60 = vpop.eup %8170 }
 0x594   :  { %v9014_v56 = vmul.f32 %v8155_v40, %v3992_v51  ;;  %v7013_v57 = vpop.f32.mrb[45].mxu1  ;;  %v8173_v47 = vpop.eup %8172 }
 0x595   :  { %v3995_v62 = vpop.f32.mrb[46].mxu1 }
 0x596   :  { %v9016_v26 = vmul.f32 %v8157_v58, %v3995_v62  ;;  %v7014_v8 = vpop.f32.mrb[47].mxu1 }
 0x598   :  { %v4001_v31 = vpack.c.bf16 %v9016_v26, %v9014_v56  ;;  %v8175_v51 = vpop.eup %8174 }
 0x599   :  { %5081 = vadd.xlane.f32.xlu0 %v5080_v61  ;;  %v8177_v58 = vpop.eup %8176 }
 0x59b   :  { %v4115_v54 = vpop.f32.mrb[48].mxu1 }
 0x59c   :  { %v7025_v5 = vpop.f32.mrb[49].mxu1  ;;  %v4122_v32 = vmul.f32 %v8159_v29, %v4115_v54 }
 0x59d   :  { %v4118_v0 = vpop.f32.mrb[50].mxu1  ;;  %4829 = vadd.xlane.f32.xlu0 %v4828_v33  ;;  %v4700_v12 = vpop.xlane.xlu1 %4699 }
 0x59e   :  { %v4123_v9 = vmul.f32 %v8161_v30, %v4118_v0  ;;  %v7026_v2 = vpop.f32.mrb[51].mxu1  ;;  %8178 = vrcp.f32 %v4700_v12  ;;  %v4955_v33 = vpop.xlane.xlu0 %4954  ;;  %v8000_v12 = vld [vmem:[#allocation12 + $0x284] ss:$16 sps:$4 sm:$0xff]  }
 0x5a0   :  { %v4124_v48 = vpack.c.bf16 %v4123_v9, %v4122_v32 }
 0x5a1   :  { %v4703_v29 = vpop.xlane.xlu1 %4702 }
 0x5a2   :  { %4125 = vst.msk [vmem:[#allocation5 + $0x18] sm:$0xff] %vm3251_vm0, %v4124_v48  ;;  %8180 = vrcp.f32 %v4703_v29  ;;  %v7998_v29 = vld [vmem:[#allocation12 + $0x280] ss:$16 sps:$4 sm:$0xff]  }
 0x5a3   :  { %8182 = vrcp.f32 %v4955_v33  ;;  %v8006_v33 = vld [vmem:[#allocation12 + $0x2a4] ss:$16 sps:$4 sm:$0xff]  }
 0x5a8   :  { %v8179_v0 = vpop.eup %8178 }
 0x5a9   :  { %v4952_v46 = vpop.xlane.xlu1 %4951 }
 0x5aa   :  { %8184 = vrcp.f32 %v4952_v46  ;;  %v8021_v46 = vld [vmem:[#allocation12 + $0x2ec] ss:$16 sps:$4 sm:$0xff]  }
 0x5ac   :  { %v8181_v9 = vpop.eup %8180 }
 0x5ae   :  { %5078 = vadd.xlane.f32.xlu1 %v5077_v3 }
 0x5b2   :  { %4826 = vadd.xlane.f32.xlu1 %v4825_v27 }
 0x5bc   :  { %v4244_v38 = vpop.f32.mrb[52].mxu1 }
 0x5bd   :  { %v7037_v20 = vpop.f32.mrb[53].mxu1  ;;  %v9029_v53 = vmul.f32 %v8163_v34, %v4244_v38 }
 0x5be   :  { %v4247_v39 = vpop.f32.mrb[54].mxu1 }
 0x5bf   :  { %v9031_v25 = vmul.f32 %v8165_v4, %v4247_v39  ;;  %v7038_v14 = vpop.f32.mrb[55].mxu1  ;;  %v8183_v4 = vpop.eup %8182 }
 0x5c1   :  { %v4253_v44 = vpack.c.bf16 %v9031_v25, %v9029_v53  ;;  %v8185_v53 = vpop.eup %8184 }
 0x5c4   :  { %v4367_v7 = vpop.f32.mrb[56].mxu1 }
 0x5c5   :  { %v7049_v16 = vpop.f32.mrb[57].mxu1  ;;  %v4374_v13 = vmul.f32 %v8167_v50, %v4367_v7  ;;  %v5204_v7 = vpop.xlane.xlu1 %5203 }
 0x5c6   :  { %v4370_v17 = vpop.f32.mrb[58].mxu1  ;;  %8186 = vrcp.f32 %v5204_v7  ;;  %v8034_v7 = vld [vmem:[#allocation12 + $0x340] ss:$16 sps:$4 sm:$0xff]  }
 0x5c7   :  { %v4375_v21 = vmul.f32 %v8169_v63, %v4370_v17  ;;  %v7050_v55 = vpop.f32.mrb[59].mxu1  ;;  %v7977_v17 = vld [vmem:[#allocation12 + $0x208] ss:$16 sps:$4 sm:$0xff]  }
 0x5c8   :  { %v7985_v55 = vld [vmem:[#allocation12 + $0x22c] ss:$16 sps:$4 sm:$0xff]  }
 0x5c9   :  { %v4376_v59 = vpack.c.bf16 %v4375_v21, %v4374_v13  ;;  %v5207_v35 = vpop.xlane.xlu0 %5206  ;;  %v7982_v21 = vld [vmem:[#allocation12 + $0x224] ss:$16 sps:$4 sm:$0xff]  }
 0x5ca   :  { %8188 = vrcp.f32 %v5207_v35  ;;  %v8018_v35 = vld [vmem:[#allocation12 + $0x2e4] ss:$16 sps:$4 sm:$0xff]  }
 0x5cb   :  { %4377 = vst.msk [vmem:[#allocation5 + $0x20] sm:$0xff] %vm3251_vm0, %v4376_v59  ;;  %v7983_v59 = vld [vmem:[#allocation12 + $0x228] ss:$16 sps:$4 sm:$0xff]  }
 0x5cc   :  { %v4496_v10 = vpop.f32.mrb[60].mxu1 }
 0x5cd   :  { %v7061_v6 = vpop.f32.mrb[61].mxu1  ;;  %v4503_v19 = vmul.f32 %v8171_v60, %v4496_v10  ;;  %v7988_v10 = vld [vmem:[#allocation12 + $0x244] ss:$16 sps:$4 sm:$0xff]   ;;  %v7991_v60 = vld [vmem:[#allocation12 + $0x24c] ss:$16 sps:$4 sm:$0xff]  }
 0x5ce   :  { %v4499_v22 = vpop.f32.mrb[62].mxu1  ;;  %v7986_v6 = vld [vmem:[#allocation12 + $0x240] ss:$16 sps:$4 sm:$0xff]  }
 0x5cf   :  { %v4504_v28 = vmul.f32 %v8173_v47, %v4499_v22  ;;  %v7062_v15 = vpop.f32.mrb[63].mxu1  ;;  %v7989_v47 = vld [vmem:[#allocation12 + $0x248] ss:$16 sps:$4 sm:$0xff]   ;;  %v7994_v22 = vld [vmem:[#allocation12 + $0x264] ss:$16 sps:$4 sm:$0xff]  }
 0x5d0   :  { %v7995_v15 = vld [vmem:[#allocation12 + $0x268] ss:$16 sps:$4 sm:$0xff]  }
 0x5d1   :  { %v4505_v24 = vpack.c.bf16 %v4504_v28, %v4503_v19  ;;  %v7997_v19 = vld [vmem:[#allocation12 + $0x26c] ss:$16 sps:$4 sm:$0xff]   ;;  %v7992_v28 = vld [vmem:[#allocation12 + $0x260] ss:$16 sps:$4 sm:$0xff]  }
 0x5d3   :  { %4507 = vrot.lane.b32.xlu0 %v4505_v24, %s8347_s4 }
 0x5d4   :  { %v4619_v40 = vpop.f32.mrb[64].mxu1 }
 0x5d5   :  { %v7073_v57 = vpop.f32.mrb[65].mxu1  ;;  %v4626_v8 = vmul.f32 %v8175_v51, %v4619_v40  ;;  %v8003_v40 = vld [vmem:[#allocation12 + $0x28c] ss:$16 sps:$4 sm:$0xff]   ;;  %v8187_v51 = vpop.eup %8186 }
 0x5d6   :  { %v4622_v62 = vpop.f32.mrb[66].mxu1 }
 0x5d7   :  { %v4627_v61 = vmul.f32 %v8177_v58, %v4622_v62  ;;  %v7074_v54 = vpop.f32.mrb[67].mxu1  ;;  %v8189_v58 = vpop.eup %8188 }
 0x5d9   :  { %v4628_v5 = vpack.c.bf16 %v4627_v61, %v4626_v8 }
 0x5db   :  { %4629 = vst.msk [vmem:[#allocation5 + $0x28] sm:$0xff] %vm3251_vm0, %v4628_v5  ;;  %v8001_v5 = vld [vmem:[#allocation12 + $0x288] ss:$16 sps:$4 sm:$0xff]  }
 0x5e4   :  { %v4748_v30 = vpop.f32.mrb[68].mxu1 }
 0x5e5   :  { %v7085_v32 = vpop.f32.mrb[69].mxu1  ;;  %v4755_v48 = vmul.f32 %v8179_v0, %v4748_v30  ;;  %v8009_v0 = vld [vmem:[#allocation12 + $0x2ac] ss:$16 sps:$4 sm:$0xff]  }
 0x5e6   :  { %v4751_v2 = vpop.f32.mrb[70].mxu1  ;;  %v8004_v32 = vld [vmem:[#allocation12 + $0x2a0] ss:$16 sps:$4 sm:$0xff]  }
 0x5e7   :  { %v4756_v3 = vmul.f32 %v8181_v9, %v4751_v2  ;;  %v7086_v18 = vpop.f32.mrb[71].mxu1  ;;  %v8007_v9 = vld [vmem:[#allocation12 + $0x2a8] ss:$16 sps:$4 sm:$0xff]   ;;  %v8012_v2 = vld [vmem:[#allocation12 + $0x2c4] ss:$16 sps:$4 sm:$0xff]  }
 0x5e8   :  { %v8013_v18 = vld [vmem:[#allocation12 + $0x2c8] ss:$16 sps:$4 sm:$0xff]  }
 0x5e9   :  { %v4757_v36 = vpack.c.bf16 %v4756_v3, %v4755_v48  ;;  %v8015_v48 = vld [vmem:[#allocation12 + $0x2cc] ss:$16 sps:$4 sm:$0xff]   ;;  %v8010_v3 = vld [vmem:[#allocation12 + $0x2c0] ss:$16 sps:$4 sm:$0xff]  }
 0x5eb   :  { %4759 = vrot.lane.b32.xlu1 %v4757_v36, %s8347_s4  ;;  %v8016_v36 = vld [vmem:[#allocation12 + $0x2e0] ss:$16 sps:$4 sm:$0xff]  }
 0x5ec   :  { %v9039_v27 = vpop.f32.mrb[72].mxu1  ;;  %v3499_v37 = vpop.permute.xlu0 %3498 }
 0x5ed   :  { %3502 = vst.msk [vmem:[#allocation5] sm:$0xff] %vm3501_vm3, %v3499_v37  ;;  %v7097_v1 = vpop.f32.mrb[73].mxu1  ;;  %v8019_v37 = vld [vmem:[#allocation12 + $0x2e8] ss:$16 sps:$4 sm:$0xff]  }
 0x5ee   :  { %v9042_v38 = vpop.f32.mrb[74].mxu1  ;;  %v8024_v1 = vld [vmem:[#allocation12 + $0x304] ss:$16 sps:$4 sm:$0xff]  }
 0x5ef   :  { %v7098_v34 = vpop.f32.mrb[75].mxu1  ;;  %4255 = vrot.lane.b32.xlu1 %v4253_v44, %s8347_s4 }
 0x5f0   :  { %v8027_v34 = vld [vmem:[#allocation12 + $0x30c] ss:$16 sps:$4 sm:$0xff]  }
 0x5f3   :  { %4003 = vrot.lane.b32.xlu1 %v4001_v31, %s8347_s4  ;;  %v7974_v31 = vld [vmem:[#allocation12 + $0x200] ss:$16 sps:$4 sm:$0xff]  }
 0x5f4   :  { %v5000_v20 = vpop.f32.mrb[76].mxu1  ;;  %v5267_v41 = vld [vmem:[#allocation5] sm:$0xff] }
 0x5f5   :  { %v7109_v39 = vpop.f32.mrb[77].mxu1  ;;  %v5007_v14 = vmul.f32 %v8185_v53, %v5000_v20  ;;  %v8022_v20 = vld [vmem:[#allocation12 + $0x300] ss:$16 sps:$4 sm:$0xff]   ;;  %v8033_v53 = vld [vmem:[#allocation12 + $0x32c] ss:$16 sps:$4 sm:$0xff]  }
 0x5f6   :  { %v5003_v25 = vpop.f32.mrb[78].mxu1  ;;  %v8030_v39 = vld [vmem:[#allocation12 + $0x324] ss:$16 sps:$4 sm:$0xff]  }
 0x5f7   :  { %v5008_v11 = vmul.f32 %v8183_v4, %v5003_v25  ;;  %v7110_v23 = vpop.f32.mrb[79].mxu1  ;;  %v8025_v4 = vld [vmem:[#allocation12 + $0x308] ss:$16 sps:$4 sm:$0xff]   ;;  %v8028_v25 = vld [vmem:[#allocation12 + $0x320] ss:$16 sps:$4 sm:$0xff]  }
 0x5f8   :  { %v8039_v23 = vld [vmem:[#allocation12 + $0x34c] ss:$16 sps:$4 sm:$0xff]  }
 0x5f9   :  { %v5009_v50 = vpack.c.bf16 %v5008_v11, %v5007_v14  ;;  %v8031_v14 = vld [vmem:[#allocation12 + $0x328] ss:$16 sps:$4 sm:$0xff]   ;;  %v8036_v11 = vld [vmem:[#allocation12 + $0x344] ss:$16 sps:$4 sm:$0xff]  }
 0x5fb   :  { %5011 = vrot.lane.b32.xlu1 %v5009_v50, %s8347_s4  ;;  %v8037_v50 = vld [vmem:[#allocation12 + $0x348] ss:$16 sps:$4 sm:$0xff]  }
 0x5fc   :  { %v9050_v16 = vpop.f32.mrb[80].mxu1  ;;  %v3752_v44 = vpop.permute.xlu1 %3751 }
 0x5fd   :  { %3754 = vst.msk [vmem:[#allocation5 + $0x8] sm:$0xff] %vm3501_vm3, %v3752_v44  ;;  %v7121_v63 = vpop.f32.mrb[81].mxu1  ;;  %v8042_v44 = vld [vmem:[#allocation12 + $0x364] ss:$16 sps:$4 sm:$0xff]  }
 0x5fe   :  { %v9053_v56 = vpop.f32.mrb[82].mxu1  ;;  %v8045_v63 = vld [vmem:[#allocation12 + $0x36c] ss:$16 sps:$4 sm:$0xff]  }
 0x5ff   :  { %v7122_v26 = vpop.f32.mrb[83].mxu1 }
 0x600   :  { %v8040_v26 = vld [vmem:[#allocation12 + $0x360] ss:$16 sps:$4 sm:$0xff]  }
 0x604   :  { %v5268_v13 = vld [vmem:[#allocation5 + $0x8] sm:$0xff] }
 0x605   :  { %6097 = vmatprep.mubr.bf16.mxu0 %v5268_v13  ;;  %6203 = vmatprep.mubr.bf16.mxu1 %v5268_v13  ;;  %v8051_v13 = vld [vmem:[#allocation12 + $0x38c] ss:$16 sps:$4 sm:$0xff]  }
 0x606   :  { %6098 = vmatmul.mubr.bf16.vlgmr.msra.gmra.mrb[88].mxu0 %v5267_v41  ;;  %6204 = vmatmul.mubr.bf16.vlgmr.msra.gmra.mrb[88].mxu1 %v5267_v41  ;;  %v8054_v41 = vld [vmem:[#allocation12 + $0x3a4] ss:$16 sps:$4 sm:$0xff]  }
 0x607   :  { %6119 = vmatpush1.bf16.msra.mxu0 %v7974_v31  ;;  %6225 = vmatpush1.bf16.msra.mxu1 %v7977_v17  ;;  %v8043_v31 = vld [vmem:[#allocation12 + $0x368] ss:$16 sps:$4 sm:$0xff]   ;;  %v8048_v17 = vld [vmem:[#allocation12 + $0x384] ss:$16 sps:$4 sm:$0xff]  }
 0x608   :  { %6120 = vmatprep.subr.bf16.mxu0 %v7982_v21  ;;  %6226 = vmatprep.subr.bf16.mxu1 %v7985_v55  ;;  %v8046_v21 = vld [vmem:[#allocation12 + $0x380] ss:$16 sps:$4 sm:$0xff]   ;;  %v8049_v55 = vld [vmem:[#allocation12 + $0x388] ss:$16 sps:$4 sm:$0xff]  }
 0x60b   :  { %6121 = vmatpush1.bf16.msra.mxu0 %v7980_v52  ;;  %6227 = vmatpush1.bf16.msra.mxu1 %v7983_v59  ;;  %v8057_v59 = vld [vmem:[#allocation12 + $0x3ac] ss:$16 sps:$4 sm:$0xff]  }
 0x60c   :  { %6122 = vmatprep.subr.bf16.mxu0 %v7988_v10  ;;  %6228 = vmatprep.subr.bf16.mxu1 %v7991_v60  ;;  %v8052_v10 = vld [vmem:[#allocation12 + $0x3a0] ss:$16 sps:$4 sm:$0xff]   ;;  %v8055_v60 = vld [vmem:[#allocation12 + $0x3a8] ss:$16 sps:$4 sm:$0xff]  }
 0x60f   :  { %6123 = vmatpush1.bf16.msra.mxu0 %v7986_v6  ;;  %6229 = vmatpush1.bf16.msra.mxu1 %v7989_v47  ;;  %v8060_v6 = vld [vmem:[#allocation12 + $0x3c4] ss:$16 sps:$4 sm:$0xff]   ;;  %v8063_v47 = vld [vmem:[#allocation12 + $0x3cc] ss:$16 sps:$4 sm:$0xff]  }
 0x610   :  { %v5252_v24 = vpop.f32.mrb[84].mxu1  ;;  %6124 = vmatprep.subr.bf16.mxu0 %v7994_v22  ;;  %6230 = vmatprep.subr.bf16.mxu1 %v7997_v19 }
 0x611   :  { %v7133_v57 = vpop.f32.mrb[85].mxu1  ;;  %v5259_v8 = vmul.f32 %v8187_v51, %v5252_v24  ;;  %v8066_v24 = vld [vmem:[#allocation12 + $0x3e4] ss:$16 sps:$4 sm:$0xff]   ;;  %v8064_v51 = vld [vmem:[#allocation12 + $0x3e0] ss:$16 sps:$4 sm:$0xff]  }
 0x612   :  { %v5255_v62 = vpop.f32.mrb[86].mxu1  ;;  %v8067_v57 = vld [vmem:[#allocation12 + $0x3e8] ss:$16 sps:$4 sm:$0xff]  }
 0x613   :  { %v5260_v61 = vmul.f32 %v8189_v58, %v5255_v62  ;;  %v7134_v54 = vpop.f32.mrb[87].mxu1  ;;  %6125 = vmatpush1.bf16.msra.mxu0 %v7992_v28  ;;  %6231 = vmatpush1.bf16.msra.mxu1 %v7995_v15  ;;  %v8058_v28 = vld [vmem:[#allocation12 + $0x3c0] ss:$16 sps:$4 sm:$0xff]   ;;  %v8061_v15 = vld [vmem:[#allocation12 + $0x3c8] ss:$16 sps:$4 sm:$0xff]  }
 0x614   :  { %6126 = vmatprep.subr.bf16.mxu0 %v8000_v12  ;;  %6232 = vmatprep.subr.bf16.mxu1 %v8003_v40  ;;  %v8069_v12 = vld [vmem:[#allocation12 + $0x3ec] ss:$16 sps:$4 sm:$0xff]  }
 0x615   :  { %v5261_v30 = vpack.c.bf16 %v5260_v61, %v5259_v8 }
 0x617   :  { %5263 = vrot.lane.b32.xlu0 %v5261_v30, %s8347_s4  ;;  %6127 = vmatpush1.bf16.msra.mxu0 %v7998_v29 }
 0x618   :  { %6233 = vmatpush1.bf16.msra.mxu1 %v8001_v5  ;;  %6128 = vmatprep.subr.bf16.mxu0 %v8006_v33 }
 0x619   :  { %6234 = vmatprep.subr.bf16.mxu1 %v8009_v0 }
 0x61b   :  { %6129 = vmatpush1.bf16.msra.mxu0 %v8004_v32 }
 0x61c   :  { %6235 = vmatpush1.bf16.msra.mxu1 %v8007_v9  ;;  %6130 = vmatprep.subr.bf16.mxu0 %v8012_v2 }
 0x61d   :  { %6236 = vmatprep.subr.bf16.mxu1 %v8015_v48 }
 0x61f   :  { %6131 = vmatpush1.bf16.msra.mxu0 %v8010_v3 }
 0x620   :  { %6237 = vmatpush1.bf16.msra.mxu1 %v8013_v18  ;;  %6132 = vmatprep.subr.bf16.mxu0 %v8018_v35 }
 0x621   :  { %6238 = vmatprep.subr.bf16.mxu1 %v8021_v46 }
 0x623   :  { %6133 = vmatpush1.bf16.msra.mxu0 %v8016_v36  ;;  %v5403_v36 = vld [vmem:[#allocation14] sm:$0xf] }
 0x624   :  { %6239 = vmatpush1.bf16.msra.mxu1 %v8019_v37  ;;  %6134 = vmatprep.subr.bf16.mxu0 %v8024_v1  ;;  %v5408_v37 = vrot.slane %v5403_v36, %v8495_v45  ;;  %v5416_v1 = vrot.slane %v5403_v36, %v8491_v42 }
 0x625   :  { %6240 = vmatprep.subr.bf16.mxu1 %v8027_v34  ;;  %v5412_v34 = vrot.slane %v5403_v36, %v8497_v49 }
 0x626   :  { %v5082_v52 = vpop.xlane.xlu0 %5081 }
 0x627   :  { %6135 = vmatpush1.bf16.msra.mxu0 %v8022_v20  ;;  %8190 = vrcp.f32 %v5082_v52  ;;  %v5420_v20 = vrot.slane %v5403_v36, %v8493_v43 }
 0x628   :  { %6241 = vmatpush1.bf16.msra.mxu1 %v8025_v4  ;;  %6136 = vmatprep.subr.bf16.mxu0 %v8030_v39 }
 0x629   :  { %6242 = vmatprep.subr.bf16.mxu1 %v8033_v53 }
 0x62a   :  { %v4830_v22 = vpop.xlane.xlu0 %4829 }
 0x62b   :  { %6137 = vmatpush1.bf16.msra.mxu0 %v8028_v25 }
 0x62c   :  { %6243 = vmatpush1.bf16.msra.mxu1 %v8031_v14  ;;  %6138 = vmatprep.subr.bf16.mxu0 %v8036_v11 }
 0x62d   :  { %6244 = vmatprep.subr.bf16.mxu1 %v8039_v23 }
 0x62f   :  { %6139 = vmatpush1.bf16.msra.mxu0 %v8034_v7 }
 0x630   :  { %6245 = vmatpush1.bf16.msra.mxu1 %v8037_v50  ;;  %6140 = vmatprep.subr.bf16.mxu0 %v8042_v44 }
 0x631   :  { %6246 = vmatprep.subr.bf16.mxu1 %v8045_v63  ;;  %v8191_v58 = vpop.eup %8190 }
 0x632   :  { %v5131_v61 = vmul.f32 %v8191_v58, %v9053_v56 }
 0x633   :  { %6141 = vmatpush1.bf16.msra.mxu0 %v8040_v26 }
 0x634   :  { %6247 = vmatpush1.bf16.msra.mxu1 %v8043_v31  ;;  %6142 = vmatprep.subr.bf16.mxu0 %v8048_v17 }
 0x635   :  { %6248 = vmatprep.subr.bf16.mxu1 %v8051_v13 }
 0x637   :  { %6143 = vmatpush1.bf16.msra.mxu0 %v8046_v21 }
 0x638   :  { %6249 = vmatpush1.bf16.msra.mxu1 %v8049_v55  ;;  %6144 = vmatprep.subr.bf16.mxu0 %v8054_v41 }
 0x639   :  { %6250 = vmatprep.subr.bf16.mxu1 %v8057_v59 }
 0x63b   :  { %v5079_v19 = vpop.xlane.xlu1 %5078  ;;  %6145 = vmatpush1.bf16.msra.mxu0 %v8052_v10 }
 0x63c   :  { %8192 = vrcp.f32 %v5079_v19  ;;  %6251 = vmatpush1.bf16.msra.mxu1 %v8055_v60  ;;  %6146 = vmatprep.subr.bf16.mxu0 %v8060_v6 }
 0x63d   :  { %6252 = vmatprep.subr.bf16.mxu1 %v8063_v47  ;;  %8194 = vrcp.f32 %v4830_v22 }
 0x63f   :  { %v4827_v40 = vpop.xlane.xlu1 %4826  ;;  %6147 = vmatpush1.bf16.msra.mxu0 %v8058_v28 }
 0x640   :  { %8196 = vrcp.f32 %v4827_v40  ;;  %6253 = vmatpush1.bf16.msra.mxu1 %v8061_v15  ;;  %6148 = vmatprep.subr.bf16.mxu0 %v8066_v24 }
 0x641   :  { %6254 = vmatprep.subr.bf16.mxu1 %v8069_v12 }
 0x643   :  { %6149 = vmatpush1.bf16.msra.mxu0 %v8064_v51 }
 0x644   :  { %6255 = vmatpush1.bf16.msra.mxu1 %v8067_v57 }
 0x645   :  { %v4508_v62 = vpop.permute.xlu0 %4507 }
 0x646   :  { %v8193_v8 = vpop.eup %8192  ;;  %4510 = vst.msk [vmem:[#allocation5 + $0x20] sm:$0xff] %vm3501_vm3, %v4508_v62 }
 0x647   :  { %v5130_v54 = vmul.f32 %v8193_v8, %v9050_v16  ;;  %v8195_v29 = vpop.eup %8194 }
 0x648   :  { %v4879_v30 = vmul.f32 %v8195_v29, %v9042_v38 }
 0x649   :  { %v5132_v5 = vpack.c.bf16 %v5131_v61, %v5130_v54 }
 0x64a   :  { %v8197_v33 = vpop.eup %8196 }
 0x64b   :  { %v4878_v0 = vmul.f32 %v8197_v33, %v9039_v27  ;;  %5133 = vst.msk [vmem:[#allocation5 + $0x38] sm:$0xff] %vm3251_vm0, %v5132_v5 }
 0x64d   :  { %v4880_v32 = vpack.c.bf16 %v4879_v30, %v4878_v0  ;;  %v5271_v38 = vld [vmem:[#allocation5 + $0x20] sm:$0xff] }
 0x64f   :  { %4881 = vst.msk [vmem:[#allocation5 + $0x30] sm:$0xff] %vm3251_vm0, %v4880_v32 }
 0x65d   :  { %v4760_v9 = vpop.permute.xlu1 %4759 }
 0x65e   :  { %4762 = vst.msk [vmem:[#allocation5 + $0x28] sm:$0xff] %vm3501_vm3, %v4760_v9 }
 0x661   :  { %v4256_v2 = vpop.permute.xlu1 %4255 }
 0x662   :  { %4258 = vst.msk [vmem:[#allocation5 + $0x18] sm:$0xff] %vm3501_vm3, %v4256_v2 }
 0x665   :  { %v4004_v56 = vpop.permute.xlu1 %4003  ;;  %v5272_v16 = vld [vmem:[#allocation5 + $0x28] sm:$0xff] }
 0x666   :  { %4006 = vst.msk [vmem:[#allocation5 + $0x10] sm:$0xff] %vm3501_vm3, %v4004_v56  ;;  %6107 = vmatprep.mubr.bf16.mxu0 %v5272_v16  ;;  %6213 = vmatprep.mubr.bf16.mxu1 %v5272_v16 }
 0x667   :  { %6108 = vmatmul.mubr.bf16.gmra.mrb[92].mxu0 %v5271_v38  ;;  %6214 = vmatmul.mubr.bf16.gmra.mrb[92].mxu1 %v5271_v38 }
 0x669   :  { %v5270_v27 = vld [vmem:[#allocation5 + $0x18] sm:$0xff] }
 0x66a   :  { %6150 = vmatprep.mubr.bf16.mxu0 %v5270_v27  ;;  %6256 = vmatprep.mubr.bf16.mxu1 %v5270_v27 }
 0x66d   :  { %v5012_v48 = vpop.permute.xlu1 %5011  ;;  %v5269_v3 = vld [vmem:[#allocation5 + $0x10] sm:$0xff] }
 0x66e   :  { %5014 = vst.msk [vmem:[#allocation5 + $0x30] sm:$0xff] %vm3501_vm3, %v5012_v48 }
 0x66f   :  { %6151 = vmatmul.mubr.bf16.vlgmr.msra.gmra.mrb[88].mxu0 %v5269_v3  ;;  %6257 = vmatmul.mubr.bf16.vlgmr.msra.gmra.mrb[88].mxu1 %v5269_v3 }
 0x675   :  { %v5273_v46 = vld [vmem:[#allocation5 + $0x30] sm:$0xff] }
 0x689   :  { %v5264_v18 = vpop.permute.xlu0 %5263 }
 0x68a   :  { %5266 = vst.msk [vmem:[#allocation5 + $0x38] sm:$0xff] %vm3501_vm3, %v5264_v18 }
 0x691   :  { %v5274_v35 = vld [vmem:[#allocation5 + $0x38] sm:$0xff] }
 0x692   :  { %6160 = vmatprep.mubr.bf16.mxu0 %v5274_v35  ;;  %6266 = vmatprep.mubr.bf16.mxu1 %v5274_v35 }
 0x693   :  { %6161 = vmatmul.mubr.bf16.gmra.mrb[92].mxu0 %v5273_v46  ;;  %6267 = vmatmul.mubr.bf16.gmra.mrb[92].mxu1 %v5273_v46 }
 0x742   :  { %v6152_v4 = vpop.f32.mrb[88].mxu0  ;;  %v6258_v39 = vpop.f32.mrb[88].mxu1 }
 0x743   :  { %v7183_v53 = vadd.f32 %v6152_v4, %v5408_v37  ;;  %v7191_v25 = vadd.f32 %v6258_v39, %v5416_v1  ;;  %v6154_v14 = vpop.f32.mrb[89].mxu0  ;;  %v6260_v11 = vpop.f32.mrb[89].mxu1 }
 0x744   :  { %v7184_v23 = vadd.f32 %v6154_v14, %v5412_v34  ;;  %v7192_v7 = vadd.f32 %v6260_v11, %v5420_v20  ;;  %v6156_v50 = vpop.f32.mrb[90].mxu0  ;;  %v6262_v44 = vpop.f32.mrb[90].mxu1 }
 0x745   :  { %6277 = vst [vmem:[#allocation15] sm:$0xff] %v7183_v53  ;;  %6279 = vst [vmem:[#allocation15 + $0x10] sm:$0xff] %v7191_v25  ;;  %v7185_v63 = vadd.f32 %v6156_v50, %v5408_v37  ;;  %v7193_v45 = vadd.f32 %v6262_v44, %v5416_v1  ;;  %v6158_v26 = vpop.f32.mrb[91].mxu0  ;;  %v6264_v42 = vpop.f32.mrb[91].mxu1 }
 0x746   :  { %6278 = vst [vmem:[#allocation15 + $0x8] sm:$0xff] %v7184_v23  ;;  %6280 = vst [vmem:[#allocation15 + $0x18] sm:$0xff] %v7192_v7  ;;  %v7186_v49 = vadd.f32 %v6158_v26, %v5412_v34  ;;  %v7194_v43 = vadd.f32 %v6264_v42, %v5420_v20 }
 0x747   :  { %6281 = vst [vmem:[#allocation15 + $0x20] sm:$0xff] %v7185_v63  ;;  %6283 = vst [vmem:[#allocation15 + $0x30] sm:$0xff] %v7193_v45 }
 0x748   :  { %6282 = vst [vmem:[#allocation15 + $0x28] sm:$0xff] %v7186_v49  ;;  %6284 = vst [vmem:[#allocation15 + $0x38] sm:$0xff] %v7194_v43 }
 0x766   :  { %v6162_v31 = vpop.f32.mrb[92].mxu0  ;;  %v6268_v17 = vpop.f32.mrb[92].mxu1 }
 0x767   :  { %v7187_v13 = vadd.f32 %v6162_v31, %v5408_v37  ;;  %v7195_v21 = vadd.f32 %v6268_v17, %v5416_v1  ;;  %v6164_v55 = vpop.f32.mrb[93].mxu0  ;;  %v6270_v41 = vpop.f32.mrb[93].mxu1 }
 0x768   :  { %v7188_v52 = vadd.f32 %v6164_v55, %v5412_v34  ;;  %v7196_v59 = vadd.f32 %v6270_v41, %v5420_v20  ;;  %v6166_v10 = vpop.f32.mrb[94].mxu0  ;;  %v6272_v60 = vpop.f32.mrb[94].mxu1 }
 0x769   :  { %6285 = vst [vmem:[#allocation15 + $0x40] sm:$0xff] %v7187_v13  ;;  %6287 = vst [vmem:[#allocation15 + $0x50] sm:$0xff] %v7195_v21  ;;  %v7189_v6 = vadd.f32 %v6166_v10, %v5408_v37  ;;  %v7197_v47 = vadd.f32 %v6272_v60, %v5416_v1  ;;  %v6168_v22 = vpop.f32.mrb[95].mxu0  ;;  %v6274_v19 = vpop.f32.mrb[95].mxu1 }
 0x76a   :  { %6286 = vst [vmem:[#allocation15 + $0x48] sm:$0xff] %v7188_v52  ;;  %6288 = vst [vmem:[#allocation15 + $0x58] sm:$0xff] %v7196_v59  ;;  %v7190_v28 = vadd.f32 %v6168_v22, %v5412_v34  ;;  %v7198_v15 = vadd.f32 %v6274_v19, %v5420_v20 }
 0x76b   :  { %6289 = vst [vmem:[#allocation15 + $0x60] sm:$0xff] %v7189_v6  ;;  %6291 = vst [vmem:[#allocation15 + $0x70] sm:$0xff] %v7197_v47 }
 0x76c   :  { %6290 = vst [vmem:[#allocation15 + $0x68] sm:$0xff] %v7190_v28  ;;  %6292 = vst [vmem:[#allocation15 + $0x78] sm:$0xff] %v7198_v15 }
 0x76d   :  { %8319 = shalt.err (!%p8316_p2)
}
 0x76e   :  { %s8320_s6 = scalar_lea.hbm %s9089_s5, 2048 }
 0x76f   :  { %p8321_p3 = scmp.ne.s32.totalorder %s9089_s5, %s8320_s6  ;;  %p8324_p4 = scmp.lt.u32.totalorder %s8320_s6, %s9089_s5 }
 0x771   :  { %p8326_p5 = pnand %p8324_p4, %p8321_p3 }
 0x773   :  { %8329 = shalt.err (!%p8326_p5)
}
 0x774   :  { %s8351_s12 = smov 512   ;;  %s8352_s13 = smov 32  }
 0x775   :  { %6309 = dma.vmem_to_hbm [thread:$0]  %s6304_s28, 2048, %s9089_s5, [#allocation8], %s8351_s12, %s8351_s12, %s8352_s13  }
 0x776   :  { %8336 = dma.done.wait [#allocation8], 2048  }
 0x777   :  { %8337 = vsyncadd [#allocation8], 4294965248 }
 0x778   :  { %6313 = vsyncpa [#allocation7], 1 }
 0x779   :  { %6314 = vsyncpa [#allocation10], 1 }
 0x77a   :  { %6315 = vsyncpa [#allocation13], 1 }
 0x77b   :  { %6316 = vsyncpa [#allocation8], 1 }

// kernel: tpu_custom_call.1
= control target key start
LH: loop header
LB: loop body
LE: loop exit
PB: predicated region body
PF: predicated region fallthrough
CT: control target
= control target key end

     0   :  { %10 = vsyncpa [#allocation7], 0  ;;  %s9084_s0 = inlined_call_operand.hbm [shape: bf16[32,512], index: 0, kind: input, shape index: {}]   ;;  %s9085_s1 = inlined_call_operand.hbm [shape: bf16[512,1536], index: 1, kind: input, shape index: {}]   ;;  %s9086_s2 = inlined_call_operand.hbm [shape: f32[1,1536], index: 2, kind: input, shape index: {}]   ;;  %s9087_s3 = inlined_call_operand.hbm [shape: bf16[512,512], index: 3, kind: input, shape index: {}]   ;;  %s9088_s4 = inlined_call_operand.hbm [shape: f32[1,512], index: 4, kind: input, shape index: {}]   ;;  %s9089_s5 = inlined_call_operand.hbm [shape: f32[32,512], index: 5, kind: output, shape index: {}]  }
   0x1   :  { %11 = vsyncpa [#allocation10], 0 }
   0x2   :  { %12 = vsyncpa [#allocation13], 0 }
   0x3   :  { %13 = vsyncpa [#allocation8], 0  ;;  %s8338_s18 = smov [#allocation9]   ;;  %s8198_s22 = scalar_lea.hbm %s9085_s1, 49152 }
   0x4   :  { %s31_s19 = sshll.u32 %s8338_s18, 4  ;;  %p8199_p0 = scmp.ne.s32.totalorder %s9085_s1, %s8198_s22  ;;  %s32_s19 = int_to_ptr.vmem [resolvable:$true] %s31_s19 }
   0x5   :  { %p8202_p1 = scmp.lt.u32.totalorder %s8198_s22, %s9085_s1 }
   0x7   :  { %p8204_p2 = pnand %p8202_p1, %p8199_p0 }
   0x9   :  { %8207 = shalt.err (!%p8204_p2)
}
   0xa   :  { %s8208_s27 = scalar_lea.vmem %s32_s19, 49152  ;;  %p8213_p4 = scmp.lt.s32.totalorder %s32_s19, %s32_s19 }
   0xb   :  { %p8209_p3 = scmp.ne.s32.totalorder %s32_s19, %s8208_s27  ;;  %p8214_p5 = scmp.lt.s32.totalorder %s8208_s27, %s8208_s27 }
   0xd   :  { %p8215_p6 = por %p8214_p5, %p8213_p4 }
   0xf   :  { %p8216_p7 = pnand %p8215_p6, %p8209_p3 }
  0x11   :  { %8219 = shalt.err (!%p8216_p7)
}
  0x12   :  { %s8339_s28 = smov 768   ;;  %s8340_s29 = smov 48  }
  0x13   :  { %37 = dma.hbm_to_vmem [thread:$0]  %s9085_s1, 49152, %s32_s19, [#allocation10], %s8339_s28, %s8339_s28, %s8340_s29  }
  0x14   :  { %s8341_s7 = smov [#allocation12]   ;;  %s8342_s9 = smov [#allocation6]  }
  0x15   :  { %s53_s8 = sshll.u32 %s8341_s7, 4  ;;  %s19_s10 = sshll.u32 %s8342_s9, 4  ;;  %s54_s8 = int_to_ptr.vmem [resolvable:$true] %s53_s8  ;;  %s20_s10 = int_to_ptr.vmem [resolvable:$true] %s19_s10 }
  0x16   :  { %s8220_s13 = scalar_lea.hbm %s9087_s3, 16384 }
  0x17   :  { %p8221_p8 = scmp.ne.s32.totalorder %s9087_s3, %s8220_s13  ;;  %p8224_p9 = scmp.lt.u32.totalorder %s8220_s13, %s9087_s3 }
  0x19   :  { %p8226_p10 = pnand %p8224_p9, %p8221_p8 }
  0x1b   :  { %8229 = shalt.err (!%p8226_p10)
}
  0x1c   :  { %s8230_s1 = scalar_lea.vmem %s54_s8, 16384  ;;  %p8235_p12 = scmp.lt.s32.totalorder %s54_s8, %s54_s8 }
  0x1d   :  { %p8231_p11 = scmp.ne.s32.totalorder %s54_s8, %s8230_s1  ;;  %p8236_p13 = scmp.lt.s32.totalorder %s8230_s1, %s8230_s1 }
  0x1f   :  { %p8237_p0 = por %p8236_p13, %p8235_p12 }
  0x21   :  { %p8238_p1 = pnand %p8237_p0, %p8231_p11 }
  0x23   :  { %8241 = shalt.err (!%p8238_p1)
}
  0x24   :  { %s8343_s18 = smov 256   ;;  %s8344_s19 = smov 16  }
  0x25   :  { %59 = dma.hbm_to_vmem [thread:$0]  %s9087_s3, 16384, %s54_s8, [#allocation13], %s8343_s18, %s8343_s18, %s8344_s19  }
  0x26   :  { %s8242_s24 = scalar_lea.hbm %s9084_s0, 1024 }
  0x27   :  { %p8243_p2 = scmp.ne.s32.totalorder %s9084_s0, %s8242_s24  ;;  %p8246_p3 = scmp.lt.u32.totalorder %s8242_s24, %s9084_s0 }
  0x29   :  { %p8248_p4 = pnand %p8246_p3, %p8243_p2 }
  0x2b   :  { %8251 = shalt.err (!%p8248_p4)
}
  0x2c   :  { %s8252_s29 = scalar_lea.vmem %s20_s10, 1024  ;;  %p8257_p6 = scmp.lt.s32.totalorder %s20_s10, %s20_s10 }
  0x2d   :  { %p8253_p5 = scmp.ne.s32.totalorder %s20_s10, %s8252_s29  ;;  %p8258_p7 = scmp.lt.s32.totalorder %s8252_s29, %s8252_s29 }
  0x2f   :  { %p8259_p8 = por %p8258_p7, %p8257_p6 }
  0x31   :  { %p8260_p9 = pnand %p8259_p8, %p8253_p5 }
  0x33   :  { %8263 = shalt.err (!%p8260_p9)
}
  0x34   :  { %25 = dma.hbm_to_vmem [thread:$0]  %s9084_s0, 1024, %s20_s10, [#allocation7], %s8343_s18, %s8343_s18, %s8344_s19  }
  0x35   :  { %s8345_s6 = smov [#allocation11]   ;;  %s8346_s8 = smov [#allocation14]  }
  0x36   :  { %s44_s7 = sshll.u32 %s8345_s6, 4  ;;  %s66_s9 = sshll.u32 %s8346_s8, 4  ;;  %s45_s7 = int_to_ptr.vmem [resolvable:$true] %s44_s7  ;;  %s67_s9 = int_to_ptr.vmem [resolvable:$true] %s66_s9 }
  0x37   :  { %s8264_s13 = scalar_lea.hbm %s9086_s2, 192 }
  0x38   :  { %p8265_p10 = scmp.ne.s32.totalorder %s9086_s2, %s8264_s13  ;;  %p8268_p11 = scmp.lt.u32.totalorder %s8264_s13, %s9086_s2 }
  0x3a   :  { %p8270_p12 = pnand %p8268_p11, %p8265_p10 }
  0x3c   :  { %8273 = shalt.err (!%p8270_p12)
}
  0x3d   :  { %s8274_s0 = scalar_lea.vmem %s45_s7, 192  ;;  %p8279_p0 = scmp.lt.s32.totalorder %s45_s7, %s45_s7 }
  0x3e   :  { %p8275_p13 = scmp.ne.s32.totalorder %s45_s7, %s8274_s0  ;;  %p8280_p1 = scmp.lt.s32.totalorder %s8274_s0, %s8274_s0 }
  0x40   :  { %p8281_p2 = por %p8280_p1, %p8279_p0 }
  0x42   :  { %p8282_p3 = pnand %p8281_p2, %p8275_p13 }
  0x44   :  { %8285 = shalt.err (!%p8282_p3)
}
  0x45   :  { %47 = dma.hbm_to_vmem [thread:$0]  %s9086_s2, 192, %s45_s7, [#allocation10]  }
  0x46   :  { %s8286_s20 = scalar_lea.hbm %s9088_s4, 64 }
  0x47   :  { %p8287_p4 = scmp.ne.s32.totalorder %s9088_s4, %s8286_s20  ;;  %p8290_p5 = scmp.lt.u32.totalorder %s8286_s20, %s9088_s4 }
  0x49   :  { %p8292_p6 = pnand %p8290_p5, %p8287_p4 }
  0x4b   :  { %8295 = shalt.err (!%p8292_p6)
}
  0x4c   :  { %s8296_s25 = scalar_lea.vmem %s67_s9, 64  ;;  %p8301_p8 = scmp.lt.s32.totalorder %s67_s9, %s67_s9 }
  0x4d   :  { %p8297_p7 = scmp.ne.s32.totalorder %s67_s9, %s8296_s25  ;;  %p8302_p9 = scmp.lt.s32.totalorder %s8296_s25, %s8296_s25 }
  0x4f   :  { %p8303_p10 = por %p8302_p9, %p8301_p8 }
  0x51   :  { %p8304_p11 = pnand %p8303_p10, %p8297_p7 }
  0x53   :  { %8307 = shalt.err (!%p8304_p11)
}
  0x54   :  { %69 = dma.hbm_to_vmem [thread:$0]  %s9088_s4, 64, %s67_s9, [#allocation13]  }
  0x55   :  { %8330 = dma.done.wait [#allocation7], 1024  }
  0x56   :  { %8331 = vsyncadd [#allocation7], 4294966272 }
  0x57   :  { %8332 = dma.done.wait [#allocation10], 49344  }
  0x58   :  { %8333 = vsyncadd [#allocation10], 4294917952 }
  0x59   :  { %8334 = dma.done.wait [#allocation13], 16448  }
  0x5a   :  { %8335 = vsyncadd [#allocation13], 4294950848  ;;  %v7278_v0 = vld [vmem:[#allocation9 + $0x14] ss:$48 sps:$4 sm:$0xff]   ;;  %v7280_v1 = vld [vmem:[#allocation9 + $0x1c] ss:$48 sps:$4 sm:$0xff]  }
  0x5b   :  { %930 = vmatprep.subr.bf16.mxu0 %v7278_v0  ;;  %v7282_v2 = vld [vmem:[#allocation9 + $0x10] ss:$48 sps:$4 sm:$0xff]   ;;  %v7283_v3 = vld [vmem:[#allocation9 + $0x18] ss:$48 sps:$4 sm:$0xff]   ;;  %1036 = vmatprep.subr.bf16.mxu1 %v7280_v1  ;;  %v7284_v4 = vld [vmem:[#allocation9 + $0x74] ss:$48 sps:$4 sm:$0xff]  }
  0x5c   :  { %931 = vmatpush1.bf16.msra.mxu0 %v7282_v2  ;;  %1037 = vmatpush1.bf16.msra.mxu1 %v7283_v3  ;;  %v7286_v5 = vld [vmem:[#allocation9 + $0x7c] ss:$48 sps:$4 sm:$0xff]   ;;  %v7288_v6 = vld [vmem:[#allocation9 + $0x70] ss:$48 sps:$4 sm:$0xff]   ;;  %v7289_v7 = vld [vmem:[#allocation9 + $0x78] ss:$48 sps:$4 sm:$0xff]  }
  0x5d   :  { %932 = vmatprep.subr.bf16.mxu0 %v7284_v4  ;;  %1038 = vmatprep.subr.bf16.mxu1 %v7286_v5  ;;  %v7290_v8 = vld [vmem:[#allocation9 + $0xd4] ss:$48 sps:$4 sm:$0xff]   ;;  %v7292_v9 = vld [vmem:[#allocation9 + $0xdc] ss:$48 sps:$4 sm:$0xff]   ;;  %v7294_v10 = vld [vmem:[#allocation9 + $0xd0] ss:$48 sps:$4 sm:$0xff]  }
  0x5e   :  { %v7295_v11 = vld [vmem:[#allocation9 + $0xd8] ss:$48 sps:$4 sm:$0xff]   ;;  %v7296_v12 = vld [vmem:[#allocation9 + $0x134] ss:$48 sps:$4 sm:$0xff]   ;;  %v7298_v13 = vld [vmem:[#allocation9 + $0x13c] ss:$48 sps:$4 sm:$0xff]  }
  0x5f   :  { %v7300_v14 = vld [vmem:[#allocation9 + $0x130] ss:$48 sps:$4 sm:$0xff]   ;;  %v7301_v15 = vld [vmem:[#allocation9 + $0x138] ss:$48 sps:$4 sm:$0xff]   ;;  %v7302_v16 = vld [vmem:[#allocation9 + $0x194] ss:$48 sps:$4 sm:$0xff]  }
  0x60   :  { %933 = vmatpush1.bf16.msra.mxu0 %v7288_v6  ;;  %1039 = vmatpush1.bf16.msra.mxu1 %v7289_v7  ;;  %v7304_v17 = vld [vmem:[#allocation9 + $0x19c] ss:$48 sps:$4 sm:$0xff]   ;;  %v7306_v18 = vld [vmem:[#allocation9 + $0x190] ss:$48 sps:$4 sm:$0xff]   ;;  %v7307_v19 = vld [vmem:[#allocation9 + $0x198] ss:$48 sps:$4 sm:$0xff]  }
  0x61   :  { %934 = vmatprep.subr.bf16.mxu0 %v7290_v8  ;;  %1040 = vmatprep.subr.bf16.mxu1 %v7292_v9  ;;  %v7308_v20 = vld [vmem:[#allocation9 + $0x1f4] ss:$48 sps:$4 sm:$0xff]   ;;  %v7310_v21 = vld [vmem:[#allocation9 + $0x1fc] ss:$48 sps:$4 sm:$0xff]   ;;  %v7312_v22 = vld [vmem:[#allocation9 + $0x1f0] ss:$48 sps:$4 sm:$0xff]  }
  0x62   :  { %v7313_v23 = vld [vmem:[#allocation9 + $0x1f8] ss:$48 sps:$4 sm:$0xff]   ;;  %v7314_v24 = vld [vmem:[#allocation9 + $0x254] ss:$48 sps:$4 sm:$0xff]   ;;  %v7316_v25 = vld [vmem:[#allocation9 + $0x25c] ss:$48 sps:$4 sm:$0xff]  }
  0x63   :  { %v7318_v26 = vld [vmem:[#allocation9 + $0x250] ss:$48 sps:$4 sm:$0xff]   ;;  %v7319_v27 = vld [vmem:[#allocation9 + $0x258] ss:$48 sps:$4 sm:$0xff]   ;;  %v7320_v28 = vld [vmem:[#allocation9 + $0x2b4] ss:$48 sps:$4 sm:$0xff]  }
  0x64   :  { %935 = vmatpush1.bf16.msra.mxu0 %v7294_v10  ;;  %1041 = vmatpush1.bf16.msra.mxu1 %v7295_v11  ;;  %v7322_v29 = vld [vmem:[#allocation9 + $0x2bc] ss:$48 sps:$4 sm:$0xff]   ;;  %v7324_v30 = vld [vmem:[#allocation9 + $0x2b0] ss:$48 sps:$4 sm:$0xff]   ;;  %v7325_v31 = vld [vmem:[#allocation9 + $0x2b8] ss:$48 sps:$4 sm:$0xff]  }
  0x65   :  { %936 = vmatprep.subr.bf16.mxu0 %v7296_v12  ;;  %1042 = vmatprep.subr.bf16.mxu1 %v7298_v13  ;;  %v7326_v32 = vld [vmem:[#allocation9 + $0x314] ss:$48 sps:$4 sm:$0xff]   ;;  %v7328_v33 = vld [vmem:[#allocation9 + $0x31c] ss:$48 sps:$4 sm:$0xff]   ;;  %v7330_v34 = vld [vmem:[#allocation9 + $0x310] ss:$48 sps:$4 sm:$0xff]  }
  0x66   :  { %v7331_v35 = vld [vmem:[#allocation9 + $0x318] ss:$48 sps:$4 sm:$0xff]   ;;  %v7332_v36 = vld [vmem:[#allocation9 + $0x374] ss:$48 sps:$4 sm:$0xff]   ;;  %v7334_v37 = vld [vmem:[#allocation9 + $0x37c] ss:$48 sps:$4 sm:$0xff]  }
  0x67   :  { %v7336_v38 = vld [vmem:[#allocation9 + $0x370] ss:$48 sps:$4 sm:$0xff]   ;;  %v7337_v39 = vld [vmem:[#allocation9 + $0x378] ss:$48 sps:$4 sm:$0xff]   ;;  %v7338_v40 = vld [vmem:[#allocation9 + $0x3d4] ss:$48 sps:$4 sm:$0xff]  }
  0x68   :  { %937 = vmatpush1.bf16.msra.mxu0 %v7300_v14  ;;  %1043 = vmatpush1.bf16.msra.mxu1 %v7301_v15  ;;  %v7340_v41 = vld [vmem:[#allocation9 + $0x3dc] ss:$48 sps:$4 sm:$0xff]   ;;  %v7342_v42 = vld [vmem:[#allocation9 + $0x3d0] ss:$48 sps:$4 sm:$0xff]   ;;  %v7343_v43 = vld [vmem:[#allocation9 + $0x3d8] ss:$48 sps:$4 sm:$0xff]  }
  0x69   :  { %938 = vmatprep.subr.bf16.mxu0 %v7302_v16  ;;  %1044 = vmatprep.subr.bf16.mxu1 %v7304_v17  ;;  %v7344_v44 = vld [vmem:[#allocation9 + $0x434] ss:$48 sps:$4 sm:$0xff]   ;;  %v7346_v45 = vld [vmem:[#allocation9 + $0x43c] ss:$48 sps:$4 sm:$0xff]   ;;  %v7348_v46 = vld [vmem:[#allocation9 + $0x430] ss:$48 sps:$4 sm:$0xff]  }
  0x6a   :  { %v8443_v47 = vld [vmem:[#allocation6 + $0x4] ss:$16 sps:$4 sm:$0xff]   ;;  %v7349_v48 = vld [vmem:[#allocation9 + $0x438] ss:$48 sps:$4 sm:$0xff]   ;;  %v7352_v50 = vld [vmem:[#allocation9 + $0x49c] ss:$48 sps:$4 sm:$0xff]  }
  0x6b   :  { %v7350_v49 = vld [vmem:[#allocation9 + $0x494] ss:$48 sps:$4 sm:$0xff]   ;;  %962 = vmatprep.mubr.bf16.mxu0 %v8443_v47  ;;  %1068 = vmatprep.mubr.bf16.mxu1 %v8443_v47  ;;  %v7354_v51 = vld [vmem:[#allocation9 + $0x490] ss:$48 sps:$4 sm:$0xff]   ;;  %v7355_v52 = vld [vmem:[#allocation9 + $0x498] ss:$48 sps:$4 sm:$0xff]  }
  0x6c   :  { %939 = vmatpush1.bf16.msra.mxu0 %v7306_v18  ;;  %1045 = vmatpush1.bf16.msra.mxu1 %v7307_v19  ;;  %v7356_v53 = vld [vmem:[#allocation9 + $0x4f4] ss:$48 sps:$4 sm:$0xff]   ;;  %v7358_v54 = vld [vmem:[#allocation9 + $0x4fc] ss:$48 sps:$4 sm:$0xff]   ;;  %v7360_v55 = vld [vmem:[#allocation9 + $0x4f0] ss:$48 sps:$4 sm:$0xff]  }
  0x6d   :  { %940 = vmatprep.subr.bf16.mxu0 %v7308_v20  ;;  %1046 = vmatprep.subr.bf16.mxu1 %v7310_v21  ;;  %v7361_v56 = vld [vmem:[#allocation9 + $0x4f8] ss:$48 sps:$4 sm:$0xff]   ;;  %v7362_v57 = vld [vmem:[#allocation9 + $0x554] ss:$48 sps:$4 sm:$0xff]   ;;  %v7364_v58 = vld [vmem:[#allocation9 + $0x55c] ss:$48 sps:$4 sm:$0xff]  }
  0x6e   :  { %v7366_v59 = vld [vmem:[#allocation9 + $0x550] ss:$48 sps:$4 sm:$0xff]   ;;  %v7367_v60 = vld [vmem:[#allocation9 + $0x558] ss:$48 sps:$4 sm:$0xff]   ;;  %v7368_v61 = vld [vmem:[#allocation9 + $0x5b4] ss:$48 sps:$4 sm:$0xff]  }
  0x6f   :  { %v7370_v62 = vld [vmem:[#allocation9 + $0x5bc] ss:$48 sps:$4 sm:$0xff]   ;;  %v7372_v63 = vld [vmem:[#allocation9 + $0x5b0] ss:$48 sps:$4 sm:$0xff]   ;;  %v7373_v0 = vld [vmem:[#allocation9 + $0x5b8] ss:$48 sps:$4 sm:$0xff]  }
  0x70   :  { %941 = vmatpush1.bf16.msra.mxu0 %v7312_v22  ;;  %1047 = vmatpush1.bf16.msra.mxu1 %v7313_v23  ;;  %v7378_v1 = vld [vmem:[#allocation9 + $0x614] ss:$48 sps:$4 sm:$0xff]   ;;  %v7381_v2 = vld [vmem:[#allocation9 + $0x61c] ss:$48 sps:$4 sm:$0xff]   ;;  %v7376_v3 = vld [vmem:[#allocation9 + $0x610] ss:$48 sps:$4 sm:$0xff]  }
  0x71   :  { %942 = vmatprep.subr.bf16.mxu0 %v7314_v24  ;;  %1048 = vmatprep.subr.bf16.mxu1 %v7316_v25  ;;  %v7379_v4 = vld [vmem:[#allocation9 + $0x618] ss:$48 sps:$4 sm:$0xff]   ;;  %v8447_v5 = vld [vmem:[#allocation6] ss:$16 sps:$4 sm:$0xff]   ;;  %v7385_v6 = vld [vmem:[#allocation9 + $0x674] ss:$48 sps:$4 sm:$0xff]  }
  0x72   :  { %v7388_v7 = vld [vmem:[#allocation9 + $0x67c] ss:$48 sps:$4 sm:$0xff]   ;;  %v7383_v8 = vld [vmem:[#allocation9 + $0x670] ss:$48 sps:$4 sm:$0xff]   ;;  %v7386_v9 = vld [vmem:[#allocation9 + $0x678] ss:$48 sps:$4 sm:$0xff]  }
  0x73   :  { %v7391_v10 = vld [vmem:[#allocation9 + $0x6d4] ss:$48 sps:$4 sm:$0xff]   ;;  %v7394_v11 = vld [vmem:[#allocation9 + $0x6dc] ss:$48 sps:$4 sm:$0xff]   ;;  %v7389_v12 = vld [vmem:[#allocation9 + $0x6d0] ss:$48 sps:$4 sm:$0xff]  }
  0x74   :  { %943 = vmatpush1.bf16.msra.mxu0 %v7318_v26  ;;  %1049 = vmatpush1.bf16.msra.mxu1 %v7319_v27  ;;  %v7392_v13 = vld [vmem:[#allocation9 + $0x6d8] ss:$48 sps:$4 sm:$0xff]   ;;  %v7397_v14 = vld [vmem:[#allocation9 + $0x734] ss:$48 sps:$4 sm:$0xff]   ;;  %v7400_v15 = vld [vmem:[#allocation9 + $0x73c] ss:$48 sps:$4 sm:$0xff]  }
  0x75   :  { %944 = vmatprep.subr.bf16.mxu0 %v7320_v28  ;;  %1050 = vmatprep.subr.bf16.mxu1 %v7322_v29  ;;  %v7395_v16 = vld [vmem:[#allocation9 + $0x730] ss:$48 sps:$4 sm:$0xff]   ;;  %v7398_v17 = vld [vmem:[#allocation9 + $0x738] ss:$48 sps:$4 sm:$0xff]   ;;  %v7403_v18 = vld [vmem:[#allocation9 + $0x794] ss:$48 sps:$4 sm:$0xff]  }
  0x76   :  { %v7406_v19 = vld [vmem:[#allocation9 + $0x79c] ss:$48 sps:$4 sm:$0xff]   ;;  %v7401_v20 = vld [vmem:[#allocation9 + $0x790] ss:$48 sps:$4 sm:$0xff]   ;;  %v7404_v21 = vld [vmem:[#allocation9 + $0x798] ss:$48 sps:$4 sm:$0xff]  }
  0x77   :  { %v7409_v22 = vld [vmem:[#allocation9 + $0x7f4] ss:$48 sps:$4 sm:$0xff]   ;;  %v7412_v23 = vld [vmem:[#allocation9 + $0x7fc] ss:$48 sps:$4 sm:$0xff]   ;;  %v7407_v24 = vld [vmem:[#allocation9 + $0x7f0] ss:$48 sps:$4 sm:$0xff]  }
  0x78   :  { %945 = vmatpush1.bf16.msra.mxu0 %v7324_v30  ;;  %1051 = vmatpush1.bf16.msra.mxu1 %v7325_v31  ;;  %v8451_v25 = vld [vmem:[#allocation6 + $0x24] ss:$16 sps:$4 sm:$0xff]   ;;  %v7410_v26 = vld [vmem:[#allocation9 + $0x7f8] ss:$48 sps:$4 sm:$0xff]   ;;  %v8453_v27 = vld [vmem:[#allocation6 + $0x20] ss:$16 sps:$4 sm:$0xff]  }
  0x79   :  { %946 = vmatprep.subr.bf16.mxu0 %v7326_v32  ;;  %1052 = vmatprep.subr.bf16.mxu1 %v7328_v33  ;;  %v7415_v28 = vld [vmem:[#allocation9 + $0x854] ss:$48 sps:$4 sm:$0xff]   ;;  %v7418_v29 = vld [vmem:[#allocation9 + $0x85c] ss:$48 sps:$4 sm:$0xff]   ;;  %v7413_v30 = vld [vmem:[#allocation9 + $0x850] ss:$48 sps:$4 sm:$0xff]  }
  0x7a   :  { %v7416_v31 = vld [vmem:[#allocation9 + $0x858] ss:$48 sps:$4 sm:$0xff]   ;;  %v7421_v32 = vld [vmem:[#allocation9 + $0x8b4] ss:$48 sps:$4 sm:$0xff]   ;;  %v7424_v33 = vld [vmem:[#allocation9 + $0x8bc] ss:$48 sps:$4 sm:$0xff]  }
  0x7b   :  { %s8347_s4 = smov 64   ;;  %vm3251_vm0 = vcmask 523264   ;;  %vm8349_vm1 = vmmov 0   ;;  %vm3299_vm2 = vcmask 130048   ;;  %vm3501_vm3 = vcmask 1048064   ;;  %s8350_s27 = smov [#allocation15]  }
  0x7c   :  { %947 = vmatpush1.bf16.msra.mxu0 %v7330_v34  ;;  %1053 = vmatpush1.bf16.msra.mxu1 %v7331_v35  ;;  %v8459_v34 = vld [vmem:[#allocation6 + $0xc] ss:$16 sps:$4 sm:$0xff]   ;;  %v7419_v35 = vld [vmem:[#allocation9 + $0x8b0] ss:$48 sps:$4 sm:$0xff]   ;;  %s6303_s28 = sshll.u32 %s8350_s27, 4  ;;  %s6304_s28 = int_to_ptr.vmem [resolvable:$true] %s6303_s28 }
  0x7d   :  { %948 = vmatprep.subr.bf16.mxu0 %v7332_v36  ;;  %1054 = vmatprep.subr.bf16.mxu1 %v7334_v37  ;;  %v7422_v36 = vld [vmem:[#allocation9 + $0x8b8] ss:$48 sps:$4 sm:$0xff]   ;;  %v7427_v37 = vld [vmem:[#allocation9 + $0x914] ss:$48 sps:$4 sm:$0xff]   ;;  %s8308_s29 = scalar_lea.vmem %s6304_s28, 2048  ;;  %p8313_p13 = scmp.lt.s32.totalorder %s6304_s28, %s6304_s28 }
  0x7e   :  { %p8309_p12 = scmp.ne.s32.totalorder %s6304_s28, %s8308_s29  ;;  %p8314_p0 = scmp.lt.s32.totalorder %s8308_s29, %s8308_s29 }
  0x80   :  { %949 = vmatpush1.bf16.msra.mxu0 %v7336_v38  ;;  %1055 = vmatpush1.bf16.msra.mxu1 %v7337_v39  ;;  %v7430_v38 = vld [vmem:[#allocation9 + $0x91c] ss:$48 sps:$4 sm:$0xff]   ;;  %v7425_v39 = vld [vmem:[#allocation9 + $0x910] ss:$48 sps:$4 sm:$0xff]   ;;  %p8315_p1 = por %p8314_p0, %p8313_p13 }
  0x81   :  { %950 = vmatprep.subr.bf16.mxu0 %v7338_v40  ;;  %1056 = vmatprep.subr.bf16.mxu1 %v7340_v41  ;;  %v7428_v40 = vld [vmem:[#allocation9 + $0x918] ss:$48 sps:$4 sm:$0xff]   ;;  %v7433_v41 = vld [vmem:[#allocation9 + $0x974] ss:$48 sps:$4 sm:$0xff]  }
  0x82   :  { %p8316_p2 = pnand %p8315_p1, %p8309_p12 }
  0x84   :  { %951 = vmatpush1.bf16.msra.mxu0 %v7342_v42  ;;  %1057 = vmatpush1.bf16.msra.mxu1 %v7343_v43  ;;  %v7436_v42 = vld [vmem:[#allocation9 + $0x97c] ss:$48 sps:$4 sm:$0xff]   ;;  %v7431_v43 = vld [vmem:[#allocation9 + $0x970] ss:$48 sps:$4 sm:$0xff]  }
  0x85   :  { %952 = vmatprep.subr.bf16.mxu0 %v7344_v44  ;;  %1058 = vmatprep.subr.bf16.mxu1 %v7346_v45  ;;  %v7434_v44 = vld [vmem:[#allocation9 + $0x978] ss:$48 sps:$4 sm:$0xff]   ;;  %v7439_v45 = vld [vmem:[#allocation9 + $0x9d4] ss:$48 sps:$4 sm:$0xff]  }
  0x88   :  { %953 = vmatpush1.bf16.msra.mxu0 %v7348_v46  ;;  %1059 = vmatpush1.bf16.msra.mxu1 %v7349_v48  ;;  %v7442_v46 = vld [vmem:[#allocation9 + $0x9dc] ss:$48 sps:$4 sm:$0xff]   ;;  %v7437_v48 = vld [vmem:[#allocation9 + $0x9d0] ss:$48 sps:$4 sm:$0xff]  }
  0x89   :  { %954 = vmatprep.subr.bf16.mxu0 %v7350_v49  ;;  %1060 = vmatprep.subr.bf16.mxu1 %v7352_v50  ;;  %v7440_v49 = vld [vmem:[#allocation9 + $0x9d8] ss:$48 sps:$4 sm:$0xff]   ;;  %v7445_v50 = vld [vmem:[#allocation9 + $0xa34] ss:$48 sps:$4 sm:$0xff]  }
  0x8c   :  { %955 = vmatpush1.bf16.msra.mxu0 %v7354_v51  ;;  %1061 = vmatpush1.bf16.msra.mxu1 %v7355_v52  ;;  %v7448_v51 = vld [vmem:[#allocation9 + $0xa3c] ss:$48 sps:$4 sm:$0xff]   ;;  %v7443_v52 = vld [vmem:[#allocation9 + $0xa30] ss:$48 sps:$4 sm:$0xff]  }
  0x8d   :  { %956 = vmatprep.subr.bf16.mxu0 %v7356_v53  ;;  %1062 = vmatprep.subr.bf16.mxu1 %v7358_v54  ;;  %v7446_v53 = vld [vmem:[#allocation9 + $0xa38] ss:$48 sps:$4 sm:$0xff]   ;;  %v7451_v54 = vld [vmem:[#allocation9 + $0xa94] ss:$48 sps:$4 sm:$0xff]  }
  0x90   :  { %957 = vmatpush1.bf16.msra.mxu0 %v7360_v55  ;;  %1063 = vmatpush1.bf16.msra.mxu1 %v7361_v56  ;;  %v7454_v55 = vld [vmem:[#allocation9 + $0xa9c] ss:$48 sps:$4 sm:$0xff]   ;;  %v7449_v56 = vld [vmem:[#allocation9 + $0xa90] ss:$48 sps:$4 sm:$0xff]  }
  0x91   :  { %958 = vmatprep.subr.bf16.mxu0 %v7362_v57  ;;  %1064 = vmatprep.subr.bf16.mxu1 %v7364_v58  ;;  %v7452_v57 = vld [vmem:[#allocation9 + $0xa98] ss:$48 sps:$4 sm:$0xff]   ;;  %v7457_v58 = vld [vmem:[#allocation9 + $0xaf4] ss:$48 sps:$4 sm:$0xff]  }
  0x94   :  { %959 = vmatpush1.bf16.msra.mxu0 %v7366_v59  ;;  %1065 = vmatpush1.bf16.msra.mxu1 %v7367_v60  ;;  %v7460_v59 = vld [vmem:[#allocation9 + $0xafc] ss:$48 sps:$4 sm:$0xff]   ;;  %v7455_v60 = vld [vmem:[#allocation9 + $0xaf0] ss:$48 sps:$4 sm:$0xff]  }
  0x95   :  { %960 = vmatprep.subr.bf16.mxu0 %v7368_v61  ;;  %1066 = vmatprep.subr.bf16.mxu1 %v7370_v62  ;;  %v7458_v61 = vld [vmem:[#allocation9 + $0xaf8] ss:$48 sps:$4 sm:$0xff]   ;;  %v7466_v62 = vld [vmem:[#allocation9 + $0xb54] ss:$48 sps:$4 sm:$0xff]  }
  0x98   :  { %961 = vmatpush1.bf16.msra.mxu0 %v7372_v63  ;;  %1067 = vmatpush1.bf16.msra.mxu1 %v7373_v0  ;;  %v7469_v63 = vld [vmem:[#allocation9 + $0xb5c] ss:$48 sps:$4 sm:$0xff]   ;;  %v7464_v0 = vld [vmem:[#allocation9 + $0xb50] ss:$48 sps:$4 sm:$0xff]  }
  0x99   :  { %983 = vmatprep.subr.bf16.mxu0 %v7378_v1  ;;  %1089 = vmatprep.subr.bf16.mxu1 %v7381_v2  ;;  %v7467_v1 = vld [vmem:[#allocation9 + $0xb58] ss:$48 sps:$4 sm:$0xff]   ;;  %v7472_v2 = vld [vmem:[#allocation9 + $0xbb4] ss:$48 sps:$4 sm:$0xff]  }
  0x9b   :  { %963 = vmatmul.mubr.bf16.vlgmr.msra.gmra.mrb[0].mxu0 %v8447_v5  ;;  %1069 = vmatmul.mubr.bf16.vlgmr.msra.gmra.mrb[0].mxu1 %v8447_v5 }
  0x9c   :  { %984 = vmatpush1.bf16.msra.mxu0 %v7376_v3  ;;  %1090 = vmatpush1.bf16.msra.mxu1 %v7379_v4  ;;  %v7475_v3 = vld [vmem:[#allocation9 + $0xbbc] ss:$48 sps:$4 sm:$0xff]   ;;  %v7470_v4 = vld [vmem:[#allocation9 + $0xbb0] ss:$48 sps:$4 sm:$0xff]  }
  0x9d   :  { %985 = vmatprep.subr.bf16.mxu0 %v7385_v6  ;;  %1091 = vmatprep.subr.bf16.mxu1 %v7388_v7  ;;  %v7473_v6 = vld [vmem:[#allocation9 + $0xbb8] ss:$48 sps:$4 sm:$0xff]   ;;  %v7481_v7 = vld [vmem:[#allocation9 + $0x24] ss:$48 sps:$4 sm:$0xff]  }
  0x9e   :  { %972 = vmatprep.mubr.bf16.mxu0 %v8451_v25  ;;  %1078 = vmatprep.mubr.bf16.mxu1 %v8451_v25 }
  0xa0   :  { %986 = vmatpush1.bf16.msra.mxu0 %v7383_v8  ;;  %1092 = vmatpush1.bf16.msra.mxu1 %v7386_v9  ;;  %v7484_v8 = vld [vmem:[#allocation9 + $0x2c] ss:$48 sps:$4 sm:$0xff]   ;;  %v8463_v9 = vld [vmem:[#allocation6 + $0x8] ss:$16 sps:$4 sm:$0xff]  }
  0xa1   :  { %987 = vmatprep.subr.bf16.mxu0 %v7391_v10  ;;  %1093 = vmatprep.subr.bf16.mxu1 %v7394_v11  ;;  %v7479_v10 = vld [vmem:[#allocation9 + $0x20] ss:$48 sps:$4 sm:$0xff]   ;;  %v7482_v11 = vld [vmem:[#allocation9 + $0x28] ss:$48 sps:$4 sm:$0xff]  }
  0xa3   :  { %973 = vmatmul.mubr.bf16.gmra.mrb[4].mxu0 %v8453_v27  ;;  %1079 = vmatmul.mubr.bf16.gmra.mrb[4].mxu1 %v8453_v27 }
  0xa4   :  { %988 = vmatpush1.bf16.msra.mxu0 %v7389_v12  ;;  %1094 = vmatpush1.bf16.msra.mxu1 %v7392_v13  ;;  %v7487_v12 = vld [vmem:[#allocation9 + $0x84] ss:$48 sps:$4 sm:$0xff]   ;;  %v7490_v13 = vld [vmem:[#allocation9 + $0x8c] ss:$48 sps:$4 sm:$0xff]  }
  0xa5   :  { %989 = vmatprep.subr.bf16.mxu0 %v7397_v14  ;;  %1095 = vmatprep.subr.bf16.mxu1 %v7400_v15  ;;  %v8465_v14 = vld [vmem:[#allocation6 + $0x2c] ss:$16 sps:$4 sm:$0xff]   ;;  %v7485_v15 = vld [vmem:[#allocation9 + $0x80] ss:$48 sps:$4 sm:$0xff]  }
  0xa6   :  { %1015 = vmatprep.mubr.bf16.mxu0 %v8459_v34  ;;  %1121 = vmatprep.mubr.bf16.mxu1 %v8459_v34 }
  0xa8   :  { %990 = vmatpush1.bf16.msra.mxu0 %v7395_v16  ;;  %1096 = vmatpush1.bf16.msra.mxu1 %v7398_v17  ;;  %v7488_v16 = vld [vmem:[#allocation9 + $0x88] ss:$48 sps:$4 sm:$0xff]   ;;  %v7496_v17 = vld [vmem:[#allocation9 + $0xe4] ss:$48 sps:$4 sm:$0xff]  }
  0xa9   :  { %991 = vmatprep.subr.bf16.mxu0 %v7403_v18  ;;  %1097 = vmatprep.subr.bf16.mxu1 %v7406_v19  ;;  %v7499_v18 = vld [vmem:[#allocation9 + $0xec] ss:$48 sps:$4 sm:$0xff]   ;;  %v8470_v19 = vld [vmem:[#allocation6 + $0x28] ss:$16 sps:$4 sm:$0xff]  }
  0xac   :  { %992 = vmatpush1.bf16.msra.mxu0 %v7401_v20  ;;  %1098 = vmatpush1.bf16.msra.mxu1 %v7404_v21  ;;  %v7494_v20 = vld [vmem:[#allocation9 + $0xe0] ss:$48 sps:$4 sm:$0xff]   ;;  %v7497_v21 = vld [vmem:[#allocation9 + $0xe8] ss:$48 sps:$4 sm:$0xff]  }
  0xad   :  { %993 = vmatprep.subr.bf16.mxu0 %v7409_v22  ;;  %1099 = vmatprep.subr.bf16.mxu1 %v7412_v23  ;;  %v7502_v22 = vld [vmem:[#allocation9 + $0x144] ss:$48 sps:$4 sm:$0xff]   ;;  %v7505_v23 = vld [vmem:[#allocation9 + $0x14c] ss:$48 sps:$4 sm:$0xff]  }
  0xb0   :  { %994 = vmatpush1.bf16.msra.mxu0 %v7407_v24  ;;  %1100 = vmatpush1.bf16.msra.mxu1 %v7410_v26  ;;  %v7500_v24 = vld [vmem:[#allocation9 + $0x140] ss:$48 sps:$4 sm:$0xff]   ;;  %v7503_v26 = vld [vmem:[#allocation9 + $0x148] ss:$48 sps:$4 sm:$0xff]  }
  0xb1   :  { %995 = vmatprep.subr.bf16.mxu0 %v7415_v28  ;;  %1101 = vmatprep.subr.bf16.mxu1 %v7418_v29  ;;  %v7508_v28 = vld [vmem:[#allocation9 + $0x1a4] ss:$48 sps:$4 sm:$0xff]   ;;  %v7511_v29 = vld [vmem:[#allocation9 + $0x1ac] ss:$48 sps:$4 sm:$0xff]  }
  0xb4   :  { %996 = vmatpush1.bf16.msra.mxu0 %v7413_v30  ;;  %1102 = vmatpush1.bf16.msra.mxu1 %v7416_v31  ;;  %v7506_v30 = vld [vmem:[#allocation9 + $0x1a0] ss:$48 sps:$4 sm:$0xff]   ;;  %v7509_v31 = vld [vmem:[#allocation9 + $0x1a8] ss:$48 sps:$4 sm:$0xff]  }
  0xb5   :  { %997 = vmatprep.subr.bf16.mxu0 %v7421_v32  ;;  %1103 = vmatprep.subr.bf16.mxu1 %v7424_v33  ;;  %v7514_v32 = vld [vmem:[#allocation9 + $0x204] ss:$48 sps:$4 sm:$0xff]   ;;  %v7517_v33 = vld [vmem:[#allocation9 + $0x20c] ss:$48 sps:$4 sm:$0xff]  }
  0xb8   :  { %998 = vmatpush1.bf16.msra.mxu0 %v7419_v35  ;;  %1104 = vmatpush1.bf16.msra.mxu1 %v7422_v36  ;;  %v7512_v35 = vld [vmem:[#allocation9 + $0x200] ss:$48 sps:$4 sm:$0xff]   ;;  %v7515_v36 = vld [vmem:[#allocation9 + $0x208] ss:$48 sps:$4 sm:$0xff]  }
  0xb9   :  { %999 = vmatprep.subr.bf16.mxu0 %v7427_v37  ;;  %1105 = vmatprep.subr.bf16.mxu1 %v7430_v38  ;;  %v7520_v37 = vld [vmem:[#allocation9 + $0x264] ss:$48 sps:$4 sm:$0xff]   ;;  %v7523_v38 = vld [vmem:[#allocation9 + $0x26c] ss:$48 sps:$4 sm:$0xff]  }
  0xbc   :  { %1000 = vmatpush1.bf16.msra.mxu0 %v7425_v39  ;;  %1106 = vmatpush1.bf16.msra.mxu1 %v7428_v40  ;;  %v7518_v39 = vld [vmem:[#allocation9 + $0x260] ss:$48 sps:$4 sm:$0xff]   ;;  %v7521_v40 = vld [vmem:[#allocation9 + $0x268] ss:$48 sps:$4 sm:$0xff]  }
  0xbd   :  { %1001 = vmatprep.subr.bf16.mxu0 %v7433_v41  ;;  %1107 = vmatprep.subr.bf16.mxu1 %v7436_v42  ;;  %v7529_v41 = vld [vmem:[#allocation9 + $0x2cc] ss:$48 sps:$4 sm:$0xff]   ;;  %v7524_v42 = vld [vmem:[#allocation9 + $0x2c0] ss:$48 sps:$4 sm:$0xff]  }
  0xc0   :  { %1002 = vmatpush1.bf16.msra.mxu0 %v7431_v43  ;;  %1108 = vmatpush1.bf16.msra.mxu1 %v7434_v44  ;;  %v7527_v43 = vld [vmem:[#allocation9 + $0x2c8] ss:$48 sps:$4 sm:$0xff]   ;;  %v7532_v44 = vld [vmem:[#allocation9 + $0x324] ss:$48 sps:$4 sm:$0xff]  }
  0xc1   :  { %1003 = vmatprep.subr.bf16.mxu0 %v7439_v45  ;;  %1109 = vmatprep.subr.bf16.mxu1 %v7442_v46  ;;  %v7535_v45 = vld [vmem:[#allocation9 + $0x32c] ss:$48 sps:$4 sm:$0xff]   ;;  %v7530_v46 = vld [vmem:[#allocation9 + $0x320] ss:$48 sps:$4 sm:$0xff]  }
  0xc4   :  { %1004 = vmatpush1.bf16.msra.mxu0 %v7437_v48  ;;  %1110 = vmatpush1.bf16.msra.mxu1 %v7440_v49  ;;  %v7533_v48 = vld [vmem:[#allocation9 + $0x328] ss:$48 sps:$4 sm:$0xff]   ;;  %v7538_v49 = vld [vmem:[#allocation9 + $0x384] ss:$48 sps:$4 sm:$0xff]  }
  0xc5   :  { %1005 = vmatprep.subr.bf16.mxu0 %v7445_v50  ;;  %1111 = vmatprep.subr.bf16.mxu1 %v7448_v51  ;;  %v7541_v50 = vld [vmem:[#allocation9 + $0x38c] ss:$48 sps:$4 sm:$0xff]   ;;  %v7536_v51 = vld [vmem:[#allocation9 + $0x380] ss:$48 sps:$4 sm:$0xff]  }
  0xc8   :  { %1006 = vmatpush1.bf16.msra.mxu0 %v7443_v52  ;;  %1112 = vmatpush1.bf16.msra.mxu1 %v7446_v53  ;;  %v7539_v52 = vld [vmem:[#allocation9 + $0x388] ss:$48 sps:$4 sm:$0xff]   ;;  %v7544_v53 = vld [vmem:[#allocation9 + $0x3e4] ss:$48 sps:$4 sm:$0xff]  }
  0xc9   :  { %1007 = vmatprep.subr.bf16.mxu0 %v7451_v54  ;;  %1113 = vmatprep.subr.bf16.mxu1 %v7454_v55  ;;  %v7547_v54 = vld [vmem:[#allocation9 + $0x3ec] ss:$48 sps:$4 sm:$0xff]   ;;  %v7542_v55 = vld [vmem:[#allocation9 + $0x3e0] ss:$48 sps:$4 sm:$0xff]  }
  0xcc   :  { %1008 = vmatpush1.bf16.msra.mxu0 %v7449_v56  ;;  %1114 = vmatpush1.bf16.msra.mxu1 %v7452_v57  ;;  %v7545_v56 = vld [vmem:[#allocation9 + $0x3e8] ss:$48 sps:$4 sm:$0xff]   ;;  %v7550_v57 = vld [vmem:[#allocation9 + $0x444] ss:$48 sps:$4 sm:$0xff]  }
  0xcd   :  { %1009 = vmatprep.subr.bf16.mxu0 %v7457_v58  ;;  %1115 = vmatprep.subr.bf16.mxu1 %v7460_v59  ;;  %v7553_v58 = vld [vmem:[#allocation9 + $0x44c] ss:$48 sps:$4 sm:$0xff]   ;;  %v7548_v59 = vld [vmem:[#allocation9 + $0x440] ss:$48 sps:$4 sm:$0xff]  }
  0xd0   :  { %1010 = vmatpush1.bf16.msra.mxu0 %v7455_v60  ;;  %1116 = vmatpush1.bf16.msra.mxu1 %v7458_v61  ;;  %v7551_v60 = vld [vmem:[#allocation9 + $0x448] ss:$48 sps:$4 sm:$0xff]   ;;  %v7556_v61 = vld [vmem:[#allocation9 + $0x4a4] ss:$48 sps:$4 sm:$0xff]  }
  0xd1   :  { %1011 = vmatprep.subr.bf16.mxu0 %v7466_v62  ;;  %1117 = vmatprep.subr.bf16.mxu1 %v7469_v63  ;;  %v7559_v62 = vld [vmem:[#allocation9 + $0x4ac] ss:$48 sps:$4 sm:$0xff]   ;;  %v7554_v63 = vld [vmem:[#allocation9 + $0x4a0] ss:$48 sps:$4 sm:$0xff]  }
  0xd4   :  { %1012 = vmatpush1.bf16.msra.mxu0 %v7464_v0  ;;  %1118 = vmatpush1.bf16.msra.mxu1 %v7467_v1  ;;  %v7557_v0 = vld [vmem:[#allocation9 + $0x4a8] ss:$48 sps:$4 sm:$0xff]   ;;  %v7562_v1 = vld [vmem:[#allocation9 + $0x504] ss:$48 sps:$4 sm:$0xff]  }
  0xd5   :  { %1013 = vmatprep.subr.bf16.mxu0 %v7472_v2  ;;  %1119 = vmatprep.subr.bf16.mxu1 %v7475_v3  ;;  %v7565_v2 = vld [vmem:[#allocation9 + $0x50c] ss:$48 sps:$4 sm:$0xff]   ;;  %v7560_v3 = vld [vmem:[#allocation9 + $0x500] ss:$48 sps:$4 sm:$0xff]  }
  0xd8   :  { %1014 = vmatpush1.bf16.msra.mxu0 %v7470_v4  ;;  %1120 = vmatpush1.bf16.msra.mxu1 %v7473_v6  ;;  %v7563_v4 = vld [vmem:[#allocation9 + $0x508] ss:$48 sps:$4 sm:$0xff]   ;;  %v7568_v6 = vld [vmem:[#allocation9 + $0x564] ss:$48 sps:$4 sm:$0xff]  }
  0xd9   :  { %1948 = vmatprep.subr.bf16.mxu0 %v7481_v7  ;;  %2054 = vmatprep.subr.bf16.mxu1 %v7484_v8  ;;  %v7571_v7 = vld [vmem:[#allocation9 + $0x56c] ss:$48 sps:$4 sm:$0xff]   ;;  %v7566_v8 = vld [vmem:[#allocation9 + $0x560] ss:$48 sps:$4 sm:$0xff]  }
  0xdb   :  { %1016 = vmatmul.mubr.bf16.vlgmr.msra.gmra.mrb[0].mxu0 %v8463_v9  ;;  %1122 = vmatmul.mubr.bf16.vlgmr.msra.gmra.mrb[0].mxu1 %v8463_v9 }
  0xdc   :  { %1949 = vmatpush1.bf16.msra.mxu0 %v7479_v10  ;;  %2055 = vmatpush1.bf16.msra.mxu1 %v7482_v11  ;;  %v7569_v10 = vld [vmem:[#allocation9 + $0x568] ss:$48 sps:$4 sm:$0xff]   ;;  %v7574_v11 = vld [vmem:[#allocation9 + $0x5c4] ss:$48 sps:$4 sm:$0xff]  }
  0xdd   :  { %1950 = vmatprep.subr.bf16.mxu0 %v7487_v12  ;;  %2056 = vmatprep.subr.bf16.mxu1 %v7490_v13  ;;  %v7577_v12 = vld [vmem:[#allocation9 + $0x5cc] ss:$48 sps:$4 sm:$0xff]   ;;  %v7572_v13 = vld [vmem:[#allocation9 + $0x5c0] ss:$48 sps:$4 sm:$0xff]  }
  0xde   :  { %1025 = vmatprep.mubr.bf16.mxu0 %v8465_v14  ;;  %1131 = vmatprep.mubr.bf16.mxu1 %v8465_v14 }
  0xe0   :  { %1951 = vmatpush1.bf16.msra.mxu0 %v7485_v15  ;;  %2057 = vmatpush1.bf16.msra.mxu1 %v7488_v16  ;;  %v7575_v15 = vld [vmem:[#allocation9 + $0x5c8] ss:$48 sps:$4 sm:$0xff]   ;;  %v7580_v16 = vld [vmem:[#allocation9 + $0x624] ss:$48 sps:$4 sm:$0xff]  }
  0xe1   :  { %1952 = vmatprep.subr.bf16.mxu0 %v7496_v17  ;;  %2058 = vmatprep.subr.bf16.mxu1 %v7499_v18  ;;  %v7583_v17 = vld [vmem:[#allocation9 + $0x62c] ss:$48 sps:$4 sm:$0xff]   ;;  %v7578_v18 = vld [vmem:[#allocation9 + $0x620] ss:$48 sps:$4 sm:$0xff]  }
  0xe3   :  { %1026 = vmatmul.mubr.bf16.gmra.mrb[4].mxu0 %v8470_v19  ;;  %1132 = vmatmul.mubr.bf16.gmra.mrb[4].mxu1 %v8470_v19 }
  0xe4   :  { %1953 = vmatpush1.bf16.msra.mxu0 %v7494_v20  ;;  %2059 = vmatpush1.bf16.msra.mxu1 %v7497_v21  ;;  %v7581_v20 = vld [vmem:[#allocation9 + $0x628] ss:$48 sps:$4 sm:$0xff]   ;;  %v7586_v21 = vld [vmem:[#allocation9 + $0x684] ss:$48 sps:$4 sm:$0xff]  }
  0xe5   :  { %1954 = vmatprep.subr.bf16.mxu0 %v7502_v22  ;;  %2060 = vmatprep.subr.bf16.mxu1 %v7505_v23  ;;  %v7589_v22 = vld [vmem:[#allocation9 + $0x68c] ss:$48 sps:$4 sm:$0xff]   ;;  %v7584_v23 = vld [vmem:[#allocation9 + $0x680] ss:$48 sps:$4 sm:$0xff]  }
  0xe6   :  { %1980 = vmatprep.mubr.bf16.mxu0 %v8443_v47  ;;  %2086 = vmatprep.mubr.bf16.mxu1 %v8443_v47  ;;  %v7526_v47 = vld [vmem:[#allocation9 + $0x2c4] ss:$48 sps:$4 sm:$0xff]  }
  0xe8   :  { %1955 = vmatpush1.bf16.msra.mxu0 %v7500_v24  ;;  %2061 = vmatpush1.bf16.msra.mxu1 %v7503_v26  ;;  %v7587_v24 = vld [vmem:[#allocation9 + $0x688] ss:$48 sps:$4 sm:$0xff]   ;;  %v7592_v26 = vld [vmem:[#allocation9 + $0x6e4] ss:$48 sps:$4 sm:$0xff]  }
  0xe9   :  { %1956 = vmatprep.subr.bf16.mxu0 %v7508_v28  ;;  %2062 = vmatprep.subr.bf16.mxu1 %v7511_v29  ;;  %v7595_v28 = vld [vmem:[#allocation9 + $0x6ec] ss:$48 sps:$4 sm:$0xff]   ;;  %v7590_v29 = vld [vmem:[#allocation9 + $0x6e0] ss:$48 sps:$4 sm:$0xff]  }
  0xec   :  { %1957 = vmatpush1.bf16.msra.mxu0 %v7506_v30  ;;  %2063 = vmatpush1.bf16.msra.mxu1 %v7509_v31  ;;  %v7593_v30 = vld [vmem:[#allocation9 + $0x6e8] ss:$48 sps:$4 sm:$0xff]   ;;  %v7598_v31 = vld [vmem:[#allocation9 + $0x744] ss:$48 sps:$4 sm:$0xff]  }
  0xed   :  { %1958 = vmatprep.subr.bf16.mxu0 %v7514_v32  ;;  %2064 = vmatprep.subr.bf16.mxu1 %v7517_v33  ;;  %v7596_v32 = vld [vmem:[#allocation9 + $0x740] ss:$48 sps:$4 sm:$0xff]   ;;  %v7599_v33 = vld [vmem:[#allocation9 + $0x748] ss:$48 sps:$4 sm:$0xff]  }
  0xf0   :  { %1959 = vmatpush1.bf16.msra.mxu0 %v7512_v35  ;;  %2065 = vmatpush1.bf16.msra.mxu1 %v7515_v36  ;;  %v7604_v35 = vld [vmem:[#allocation9 + $0x7a4] ss:$48 sps:$4 sm:$0xff]   ;;  %v7602_v36 = vld [vmem:[#allocation9 + $0x7a0] ss:$48 sps:$4 sm:$0xff]  }
  0xf1   :  { %1960 = vmatprep.subr.bf16.mxu0 %v7520_v37  ;;  %2066 = vmatprep.subr.bf16.mxu1 %v7523_v38  ;;  %v7605_v37 = vld [vmem:[#allocation9 + $0x7a8] ss:$48 sps:$4 sm:$0xff]   ;;  %v7610_v38 = vld [vmem:[#allocation9 + $0x804] ss:$48 sps:$4 sm:$0xff]  }
  0xf4   :  { %1961 = vmatpush1.bf16.msra.mxu0 %v7518_v39  ;;  %2067 = vmatpush1.bf16.msra.mxu1 %v7521_v40  ;;  %v7613_v39 = vld [vmem:[#allocation9 + $0x80c] ss:$48 sps:$4 sm:$0xff]   ;;  %v7608_v40 = vld [vmem:[#allocation9 + $0x800] ss:$48 sps:$4 sm:$0xff]  }
  0xf5   :  { %1962 = vmatprep.subr.bf16.mxu0 %v7526_v47  ;;  %2068 = vmatprep.subr.bf16.mxu1 %v7529_v41  ;;  %v7616_v47 = vld [vmem:[#allocation9 + $0x864] ss:$48 sps:$4 sm:$0xff]   ;;  %v7619_v41 = vld [vmem:[#allocation9 + $0x86c] ss:$48 sps:$4 sm:$0xff]  }
  0xf8   :  { %1963 = vmatpush1.bf16.msra.mxu0 %v7524_v42  ;;  %2069 = vmatpush1.bf16.msra.mxu1 %v7527_v43  ;;  %v7614_v42 = vld [vmem:[#allocation9 + $0x860] ss:$48 sps:$4 sm:$0xff]   ;;  %v7617_v43 = vld [vmem:[#allocation9 + $0x868] ss:$48 sps:$4 sm:$0xff]  }
  0xf9   :  { %1964 = vmatprep.subr.bf16.mxu0 %v7532_v44  ;;  %2070 = vmatprep.subr.bf16.mxu1 %v7535_v45  ;;  %v7625_v44 = vld [vmem:[#allocation9 + $0x8cc] ss:$48 sps:$4 sm:$0xff]   ;;  %v7620_v45 = vld [vmem:[#allocation9 + $0x8c0] ss:$48 sps:$4 sm:$0xff]  }
  0xfc   :  { %1965 = vmatpush1.bf16.msra.mxu0 %v7530_v46  ;;  %2071 = vmatpush1.bf16.msra.mxu1 %v7533_v48  ;;  %v7623_v46 = vld [vmem:[#allocation9 + $0x8c8] ss:$48 sps:$4 sm:$0xff]   ;;  %v7628_v48 = vld [vmem:[#allocation9 + $0x924] ss:$48 sps:$4 sm:$0xff]  }
  0xfd   :  { %1966 = vmatprep.subr.bf16.mxu0 %v7538_v49  ;;  %2072 = vmatprep.subr.bf16.mxu1 %v7541_v50  ;;  %v7631_v49 = vld [vmem:[#allocation9 + $0x92c] ss:$48 sps:$4 sm:$0xff]   ;;  %v7626_v50 = vld [vmem:[#allocation9 + $0x920] ss:$48 sps:$4 sm:$0xff]  }
 0x100   :  { %1967 = vmatpush1.bf16.msra.mxu0 %v7536_v51  ;;  %2073 = vmatpush1.bf16.msra.mxu1 %v7539_v52  ;;  %v7629_v51 = vld [vmem:[#allocation9 + $0x928] ss:$48 sps:$4 sm:$0xff]   ;;  %v7634_v52 = vld [vmem:[#allocation9 + $0x984] ss:$48 sps:$4 sm:$0xff]  }
 0x101   :  { %1968 = vmatprep.subr.bf16.mxu0 %v7544_v53  ;;  %2074 = vmatprep.subr.bf16.mxu1 %v7547_v54  ;;  %v7637_v53 = vld [vmem:[#allocation9 + $0x98c] ss:$48 sps:$4 sm:$0xff]   ;;  %v7632_v54 = vld [vmem:[#allocation9 + $0x980] ss:$48 sps:$4 sm:$0xff]  }
 0x104   :  { %1969 = vmatpush1.bf16.msra.mxu0 %v7542_v55  ;;  %2075 = vmatpush1.bf16.msra.mxu1 %v7545_v56  ;;  %v7635_v55 = vld [vmem:[#allocation9 + $0x988] ss:$48 sps:$4 sm:$0xff]   ;;  %v7640_v56 = vld [vmem:[#allocation9 + $0x9e4] ss:$48 sps:$4 sm:$0xff]  }
 0x105   :  { %1970 = vmatprep.subr.bf16.mxu0 %v7550_v57  ;;  %2076 = vmatprep.subr.bf16.mxu1 %v7553_v58  ;;  %v7643_v57 = vld [vmem:[#allocation9 + $0x9ec] ss:$48 sps:$4 sm:$0xff]   ;;  %v7638_v58 = vld [vmem:[#allocation9 + $0x9e0] ss:$48 sps:$4 sm:$0xff]  }
 0x108   :  { %1971 = vmatpush1.bf16.msra.mxu0 %v7548_v59  ;;  %2077 = vmatpush1.bf16.msra.mxu1 %v7551_v60  ;;  %v7641_v59 = vld [vmem:[#allocation9 + $0x9e8] ss:$48 sps:$4 sm:$0xff]   ;;  %v7646_v60 = vld [vmem:[#allocation9 + $0xa44] ss:$48 sps:$4 sm:$0xff]  }
 0x109   :  { %1972 = vmatprep.subr.bf16.mxu0 %v7556_v61  ;;  %2078 = vmatprep.subr.bf16.mxu1 %v7559_v62  ;;  %v7649_v61 = vld [vmem:[#allocation9 + $0xa4c] ss:$48 sps:$4 sm:$0xff]   ;;  %v7644_v62 = vld [vmem:[#allocation9 + $0xa40] ss:$48 sps:$4 sm:$0xff]  }
 0x10c   :  { %1973 = vmatpush1.bf16.msra.mxu0 %v7554_v63  ;;  %2079 = vmatpush1.bf16.msra.mxu1 %v7557_v0  ;;  %v7647_v63 = vld [vmem:[#allocation9 + $0xa48] ss:$48 sps:$4 sm:$0xff]   ;;  %v7652_v0 = vld [vmem:[#allocation9 + $0xaa4] ss:$48 sps:$4 sm:$0xff]  }
 0x10d   :  { %1974 = vmatprep.subr.bf16.mxu0 %v7562_v1  ;;  %2080 = vmatprep.subr.bf16.mxu1 %v7565_v2  ;;  %v7655_v1 = vld [vmem:[#allocation9 + $0xaac] ss:$48 sps:$4 sm:$0xff]   ;;  %v7650_v2 = vld [vmem:[#allocation9 + $0xaa0] ss:$48 sps:$4 sm:$0xff]  }
 0x110   :  { %1975 = vmatpush1.bf16.msra.mxu0 %v7560_v3  ;;  %2081 = vmatpush1.bf16.msra.mxu1 %v7563_v4  ;;  %v7653_v3 = vld [vmem:[#allocation9 + $0xaa8] ss:$48 sps:$4 sm:$0xff]   ;;  %v7658_v4 = vld [vmem:[#allocation9 + $0xb04] ss:$48 sps:$4 sm:$0xff]  }
 0x111   :  { %1976 = vmatprep.subr.bf16.mxu0 %v7568_v6  ;;  %2082 = vmatprep.subr.bf16.mxu1 %v7571_v7  ;;  %v7661_v6 = vld [vmem:[#allocation9 + $0xb0c] ss:$48 sps:$4 sm:$0xff]   ;;  %v7656_v7 = vld [vmem:[#allocation9 + $0xb00] ss:$48 sps:$4 sm:$0xff]  }
 0x114   :  { %1977 = vmatpush1.bf16.msra.mxu0 %v7566_v8  ;;  %2083 = vmatpush1.bf16.msra.mxu1 %v7569_v10  ;;  %v7659_v8 = vld [vmem:[#allocation9 + $0xb08] ss:$48 sps:$4 sm:$0xff]   ;;  %v7664_v10 = vld [vmem:[#allocation9 + $0xb64] ss:$48 sps:$4 sm:$0xff]  }
 0x115   :  { %1978 = vmatprep.subr.bf16.mxu0 %v7574_v11  ;;  %2084 = vmatprep.subr.bf16.mxu1 %v7577_v12  ;;  %v7667_v11 = vld [vmem:[#allocation9 + $0xb6c] ss:$48 sps:$4 sm:$0xff]   ;;  %v7662_v12 = vld [vmem:[#allocation9 + $0xb60] ss:$48 sps:$4 sm:$0xff]  }
 0x118   :  { %1979 = vmatpush1.bf16.msra.mxu0 %v7572_v13  ;;  %2085 = vmatpush1.bf16.msra.mxu1 %v7575_v15  ;;  %v7665_v13 = vld [vmem:[#allocation9 + $0xb68] ss:$48 sps:$4 sm:$0xff]   ;;  %v7670_v15 = vld [vmem:[#allocation9 + $0xbc4] ss:$48 sps:$4 sm:$0xff]  }
 0x119   :  { %2001 = vmatprep.subr.bf16.mxu0 %v7580_v16  ;;  %2107 = vmatprep.subr.bf16.mxu1 %v7583_v17  ;;  %v7673_v16 = vld [vmem:[#allocation9 + $0xbcc] ss:$48 sps:$4 sm:$0xff]   ;;  %v7668_v17 = vld [vmem:[#allocation9 + $0xbc0] ss:$48 sps:$4 sm:$0xff]  }
 0x11b   :  { %1981 = vmatmul.mubr.bf16.vlgmr.msra.gmra.mrb[8].mxu0 %v8447_v5  ;;  %2087 = vmatmul.mubr.bf16.vlgmr.msra.gmra.mrb[8].mxu1 %v8447_v5  ;;  %v7601_v5 = vld [vmem:[#allocation9 + $0x74c] ss:$48 sps:$4 sm:$0xff]  }
 0x11c   :  { %2002 = vmatpush1.bf16.msra.mxu0 %v7578_v18  ;;  %2108 = vmatpush1.bf16.msra.mxu1 %v7581_v20  ;;  %v7671_v18 = vld [vmem:[#allocation9 + $0xbc8] ss:$48 sps:$4 sm:$0xff]   ;;  %v7676_v20 = vld [vmem:[#allocation9 + $0x4] ss:$48 sps:$4 sm:$0xff]  }
 0x11d   :  { %2003 = vmatprep.subr.bf16.mxu0 %v7586_v21  ;;  %2109 = vmatprep.subr.bf16.mxu1 %v7589_v22  ;;  %v7679_v21 = vld [vmem:[#allocation9 + $0xc] ss:$48 sps:$4 sm:$0xff]   ;;  %v7674_v22 = vld [vmem:[#allocation9] ss:$48 sps:$4 sm:$0xff]  }
 0x11e   :  { %1990 = vmatprep.mubr.bf16.mxu0 %v8451_v25  ;;  %2096 = vmatprep.mubr.bf16.mxu1 %v8451_v25  ;;  %v7607_v25 = vld [vmem:[#allocation9 + $0x7ac] ss:$48 sps:$4 sm:$0xff]  }
 0x120   :  { %2004 = vmatpush1.bf16.msra.mxu0 %v7584_v23  ;;  %2110 = vmatpush1.bf16.msra.mxu1 %v7587_v24  ;;  %v7677_v23 = vld [vmem:[#allocation9 + $0x8] ss:$48 sps:$4 sm:$0xff]   ;;  %v7682_v24 = vld [vmem:[#allocation9 + $0x64] ss:$48 sps:$4 sm:$0xff]  }
 0x121   :  { %2005 = vmatprep.subr.bf16.mxu0 %v7592_v26  ;;  %2111 = vmatprep.subr.bf16.mxu1 %v7595_v28  ;;  %v7685_v26 = vld [vmem:[#allocation9 + $0x6c] ss:$48 sps:$4 sm:$0xff]   ;;  %v7680_v28 = vld [vmem:[#allocation9 + $0x60] ss:$48 sps:$4 sm:$0xff]  }
 0x123   :  { %1991 = vmatmul.mubr.bf16.gmra.mrb[12].mxu0 %v8453_v27  ;;  %2097 = vmatmul.mubr.bf16.gmra.mrb[12].mxu1 %v8453_v27  ;;  %v7611_v27 = vld [vmem:[#allocation9 + $0x808] ss:$48 sps:$4 sm:$0xff]  }
 0x124   :  { %2006 = vmatpush1.bf16.msra.mxu0 %v7590_v29  ;;  %2112 = vmatpush1.bf16.msra.mxu1 %v7593_v30  ;;  %v7683_v29 = vld [vmem:[#allocation9 + $0x68] ss:$48 sps:$4 sm:$0xff]   ;;  %v7688_v30 = vld [vmem:[#allocation9 + $0xc4] ss:$48 sps:$4 sm:$0xff]  }
 0x125   :  { %2007 = vmatprep.subr.bf16.mxu0 %v7598_v31  ;;  %2113 = vmatprep.subr.bf16.mxu1 %v7601_v5  ;;  %v7691_v31 = vld [vmem:[#allocation9 + $0xcc] ss:$48 sps:$4 sm:$0xff]   ;;  %v7686_v5 = vld [vmem:[#allocation9 + $0xc0] ss:$48 sps:$4 sm:$0xff]  }
 0x126   :  { %2033 = vmatprep.mubr.bf16.mxu0 %v8459_v34  ;;  %2139 = vmatprep.mubr.bf16.mxu1 %v8459_v34  ;;  %v7622_v34 = vld [vmem:[#allocation9 + $0x8c4] ss:$48 sps:$4 sm:$0xff]  }
 0x128   :  { %2008 = vmatpush1.bf16.msra.mxu0 %v7596_v32  ;;  %2114 = vmatpush1.bf16.msra.mxu1 %v7599_v33  ;;  %v7689_v32 = vld [vmem:[#allocation9 + $0xc8] ss:$48 sps:$4 sm:$0xff]   ;;  %v7694_v33 = vld [vmem:[#allocation9 + $0x124] ss:$48 sps:$4 sm:$0xff]  }
 0x129   :  { %2009 = vmatprep.subr.bf16.mxu0 %v7604_v35  ;;  %2115 = vmatprep.subr.bf16.mxu1 %v7607_v25  ;;  %v7692_v35 = vld [vmem:[#allocation9 + $0x120] ss:$48 sps:$4 sm:$0xff]   ;;  %v7695_v25 = vld [vmem:[#allocation9 + $0x128] ss:$48 sps:$4 sm:$0xff]  }
 0x12c   :  { %2010 = vmatpush1.bf16.msra.mxu0 %v7602_v36  ;;  %2116 = vmatpush1.bf16.msra.mxu1 %v7605_v37  ;;  %v7772_v36 = vld [vmem:[#allocation6 + $0x4] ss:$16 sps:$4 sm:$0xff]  }
 0x12d   :  { %2011 = vmatprep.subr.bf16.mxu0 %v7610_v38  ;;  %2117 = vmatprep.subr.bf16.mxu1 %v7613_v39  ;;  %v7700_v37 = vld [vmem:[#allocation9 + $0x184] ss:$48 sps:$4 sm:$0xff]   ;;  %v7703_v38 = vld [vmem:[#allocation9 + $0x18c] ss:$48 sps:$4 sm:$0xff]   ;;  %v7701_v39 = vld [vmem:[#allocation9 + $0x188] ss:$48 sps:$4 sm:$0xff]  }
 0x130   :  { %2012 = vmatpush1.bf16.msra.mxu0 %v7608_v40  ;;  %2118 = vmatpush1.bf16.msra.mxu1 %v7611_v27  ;;  %v7706_v40 = vld [vmem:[#allocation9 + $0x1e4] ss:$48 sps:$4 sm:$0xff]   ;;  %v7709_v27 = vld [vmem:[#allocation9 + $0x1ec] ss:$48 sps:$4 sm:$0xff]  }
 0x131   :  { %2013 = vmatprep.subr.bf16.mxu0 %v7616_v47  ;;  %2119 = vmatprep.subr.bf16.mxu1 %v7619_v41  ;;  %v7704_v47 = vld [vmem:[#allocation9 + $0x1e0] ss:$48 sps:$4 sm:$0xff]   ;;  %v7707_v41 = vld [vmem:[#allocation9 + $0x1e8] ss:$48 sps:$4 sm:$0xff]  }
 0x134   :  { %2014 = vmatpush1.bf16.msra.mxu0 %v7614_v42  ;;  %2120 = vmatpush1.bf16.msra.mxu1 %v7617_v43  ;;  %v7712_v42 = vld [vmem:[#allocation9 + $0x244] ss:$48 sps:$4 sm:$0xff]   ;;  %v7715_v43 = vld [vmem:[#allocation9 + $0x24c] ss:$48 sps:$4 sm:$0xff]  }
 0x135   :  { %2015 = vmatprep.subr.bf16.mxu0 %v7622_v34  ;;  %2121 = vmatprep.subr.bf16.mxu1 %v7625_v44  ;;  %v7713_v34 = vld [vmem:[#allocation9 + $0x248] ss:$48 sps:$4 sm:$0xff]   ;;  %v7718_v44 = vld [vmem:[#allocation9 + $0x2a4] ss:$48 sps:$4 sm:$0xff]  }
 0x138   :  { %2016 = vmatpush1.bf16.msra.mxu0 %v7620_v45  ;;  %2122 = vmatpush1.bf16.msra.mxu1 %v7623_v46  ;;  %v7721_v45 = vld [vmem:[#allocation9 + $0x2ac] ss:$48 sps:$4 sm:$0xff]   ;;  %v7716_v46 = vld [vmem:[#allocation9 + $0x2a0] ss:$48 sps:$4 sm:$0xff]  }
 0x139   :  { %2017 = vmatprep.subr.bf16.mxu0 %v7628_v48  ;;  %2123 = vmatprep.subr.bf16.mxu1 %v7631_v49  ;;  %v7719_v48 = vld [vmem:[#allocation9 + $0x2a8] ss:$48 sps:$4 sm:$0xff]   ;;  %v7724_v49 = vld [vmem:[#allocation9 + $0x304] ss:$48 sps:$4 sm:$0xff]  }
 0x13c   :  { %2018 = vmatpush1.bf16.msra.mxu0 %v7626_v50  ;;  %2124 = vmatpush1.bf16.msra.mxu1 %v7629_v51  ;;  %v7727_v50 = vld [vmem:[#allocation9 + $0x30c] ss:$48 sps:$4 sm:$0xff]   ;;  %v7722_v51 = vld [vmem:[#allocation9 + $0x300] ss:$48 sps:$4 sm:$0xff]  }
 0x13d   :  { %2019 = vmatprep.subr.bf16.mxu0 %v7634_v52  ;;  %2125 = vmatprep.subr.bf16.mxu1 %v7637_v53  ;;  %v7725_v52 = vld [vmem:[#allocation9 + $0x308] ss:$48 sps:$4 sm:$0xff]   ;;  %v7730_v53 = vld [vmem:[#allocation9 + $0x364] ss:$48 sps:$4 sm:$0xff]  }
 0x140   :  { %2020 = vmatpush1.bf16.msra.mxu0 %v7632_v54  ;;  %2126 = vmatpush1.bf16.msra.mxu1 %v7635_v55  ;;  %v7733_v54 = vld [vmem:[#allocation9 + $0x36c] ss:$48 sps:$4 sm:$0xff]   ;;  %v7728_v55 = vld [vmem:[#allocation9 + $0x360] ss:$48 sps:$4 sm:$0xff]  }
 0x141   :  { %2021 = vmatprep.subr.bf16.mxu0 %v7640_v56  ;;  %2127 = vmatprep.subr.bf16.mxu1 %v7643_v57  ;;  %v7731_v56 = vld [vmem:[#allocation9 + $0x368] ss:$48 sps:$4 sm:$0xff]   ;;  %v7736_v57 = vld [vmem:[#allocation9 + $0x3c4] ss:$48 sps:$4 sm:$0xff]  }
 0x144   :  { %2022 = vmatpush1.bf16.msra.mxu0 %v7638_v58  ;;  %2128 = vmatpush1.bf16.msra.mxu1 %v7641_v59  ;;  %v7739_v58 = vld [vmem:[#allocation9 + $0x3cc] ss:$48 sps:$4 sm:$0xff]   ;;  %v7734_v59 = vld [vmem:[#allocation9 + $0x3c0] ss:$48 sps:$4 sm:$0xff]  }
 0x145   :  { %2023 = vmatprep.subr.bf16.mxu0 %v7646_v60  ;;  %2129 = vmatprep.subr.bf16.mxu1 %v7649_v61  ;;  %v7737_v60 = vld [vmem:[#allocation9 + $0x3c8] ss:$48 sps:$4 sm:$0xff]   ;;  %v7742_v61 = vld [vmem:[#allocation9 + $0x424] ss:$48 sps:$4 sm:$0xff]  }
 0x148   :  { %2024 = vmatpush1.bf16.msra.mxu0 %v7644_v62  ;;  %2130 = vmatpush1.bf16.msra.mxu1 %v7647_v63  ;;  %v7745_v62 = vld [vmem:[#allocation9 + $0x42c] ss:$48 sps:$4 sm:$0xff]   ;;  %v7740_v63 = vld [vmem:[#allocation9 + $0x420] ss:$48 sps:$4 sm:$0xff]  }
 0x149   :  { %2025 = vmatprep.subr.bf16.mxu0 %v7652_v0  ;;  %2131 = vmatprep.subr.bf16.mxu1 %v7655_v1  ;;  %v7743_v0 = vld [vmem:[#allocation9 + $0x428] ss:$48 sps:$4 sm:$0xff]   ;;  %v7748_v1 = vld [vmem:[#allocation9 + $0x484] ss:$48 sps:$4 sm:$0xff]  }
 0x14c   :  { %2026 = vmatpush1.bf16.msra.mxu0 %v7650_v2  ;;  %2132 = vmatpush1.bf16.msra.mxu1 %v7653_v3  ;;  %v7751_v2 = vld [vmem:[#allocation9 + $0x48c] ss:$48 sps:$4 sm:$0xff]   ;;  %v7746_v3 = vld [vmem:[#allocation9 + $0x480] ss:$48 sps:$4 sm:$0xff]  }
 0x14d   :  { %2027 = vmatprep.subr.bf16.mxu0 %v7658_v4  ;;  %2133 = vmatprep.subr.bf16.mxu1 %v7661_v6  ;;  %v7749_v4 = vld [vmem:[#allocation9 + $0x488] ss:$48 sps:$4 sm:$0xff]   ;;  %v7754_v6 = vld [vmem:[#allocation9 + $0x4e4] ss:$48 sps:$4 sm:$0xff]  }
 0x150   :  { %2028 = vmatpush1.bf16.msra.mxu0 %v7656_v7  ;;  %2134 = vmatpush1.bf16.msra.mxu1 %v7659_v8  ;;  %v7757_v7 = vld [vmem:[#allocation9 + $0x4ec] ss:$48 sps:$4 sm:$0xff]   ;;  %v7752_v8 = vld [vmem:[#allocation9 + $0x4e0] ss:$48 sps:$4 sm:$0xff]  }
 0x151   :  { %2029 = vmatprep.subr.bf16.mxu0 %v7664_v10  ;;  %2135 = vmatprep.subr.bf16.mxu1 %v7667_v11  ;;  %v7755_v10 = vld [vmem:[#allocation9 + $0x4e8] ss:$48 sps:$4 sm:$0xff]   ;;  %v7760_v11 = vld [vmem:[#allocation9 + $0x544] ss:$48 sps:$4 sm:$0xff]  }
 0x154   :  { %2030 = vmatpush1.bf16.msra.mxu0 %v7662_v12  ;;  %2136 = vmatpush1.bf16.msra.mxu1 %v7665_v13  ;;  %v7763_v12 = vld [vmem:[#allocation9 + $0x54c] ss:$48 sps:$4 sm:$0xff]   ;;  %v7758_v13 = vld [vmem:[#allocation9 + $0x540] ss:$48 sps:$4 sm:$0xff]  }
 0x155   :  { %2031 = vmatprep.subr.bf16.mxu0 %v7670_v15  ;;  %2137 = vmatprep.subr.bf16.mxu1 %v7673_v16  ;;  %v7761_v15 = vld [vmem:[#allocation9 + $0x548] ss:$48 sps:$4 sm:$0xff]   ;;  %v7766_v16 = vld [vmem:[#allocation9 + $0x5a4] ss:$48 sps:$4 sm:$0xff]  }
 0x158   :  { %2032 = vmatpush1.bf16.msra.mxu0 %v7668_v17  ;;  %2138 = vmatpush1.bf16.msra.mxu1 %v7671_v18  ;;  %v7769_v17 = vld [vmem:[#allocation9 + $0x5ac] ss:$48 sps:$4 sm:$0xff]   ;;  %v7764_v18 = vld [vmem:[#allocation9 + $0x5a0] ss:$48 sps:$4 sm:$0xff]  }
 0x159   :  { %3020 = vmatprep.subr.bf16.mxu0 %v7676_v20  ;;  %3126 = vmatprep.subr.bf16.mxu1 %v7679_v21  ;;  %v7767_v20 = vld [vmem:[#allocation9 + $0x5a8] ss:$48 sps:$4 sm:$0xff]   ;;  %v7775_v21 = vld [vmem:[#allocation9 + $0x604] ss:$48 sps:$4 sm:$0xff]  }
 0x15b   :  { %2034 = vmatmul.mubr.bf16.vlgmr.msra.gmra.mrb[8].mxu0 %v8463_v9  ;;  %2140 = vmatmul.mubr.bf16.vlgmr.msra.gmra.mrb[8].mxu1 %v8463_v9  ;;  %v7697_v9 = vld [vmem:[#allocation9 + $0x12c] ss:$48 sps:$4 sm:$0xff]  }
 0x15c   :  { %3021 = vmatpush1.bf16.msra.mxu0 %v7674_v22  ;;  %3127 = vmatpush1.bf16.msra.mxu1 %v7677_v23  ;;  %v7778_v22 = vld [vmem:[#allocation9 + $0x60c] ss:$48 sps:$4 sm:$0xff]   ;;  %v7770_v23 = vld [vmem:[#allocation6] ss:$16 sps:$4 sm:$0xff]  }
 0x15d   :  { %3022 = vmatprep.subr.bf16.mxu0 %v7682_v24  ;;  %3128 = vmatprep.subr.bf16.mxu1 %v7685_v26  ;;  %v7773_v24 = vld [vmem:[#allocation9 + $0x600] ss:$48 sps:$4 sm:$0xff]   ;;  %v7776_v26 = vld [vmem:[#allocation9 + $0x608] ss:$48 sps:$4 sm:$0xff]  }
 0x15e   :  { %2043 = vmatprep.mubr.bf16.mxu0 %v8465_v14  ;;  %2149 = vmatprep.mubr.bf16.mxu1 %v8465_v14  ;;  %v7698_v14 = vld [vmem:[#allocation9 + $0x180] ss:$48 sps:$4 sm:$0xff]  }
 0x160   :  { %3023 = vmatpush1.bf16.msra.mxu0 %v7680_v28  ;;  %3129 = vmatpush1.bf16.msra.mxu1 %v7683_v29  ;;  %v7781_v28 = vld [vmem:[#allocation9 + $0x664] ss:$48 sps:$4 sm:$0xff]   ;;  %v7784_v29 = vld [vmem:[#allocation9 + $0x66c] ss:$48 sps:$4 sm:$0xff]  }
 0x161   :  { %3024 = vmatprep.subr.bf16.mxu0 %v7688_v30  ;;  %3130 = vmatprep.subr.bf16.mxu1 %v7691_v31  ;;  %v7857_v30 = vld [vmem:[#allocation6 + $0x24] ss:$16 sps:$4 sm:$0xff]   ;;  %v7779_v31 = vld [vmem:[#allocation9 + $0x660] ss:$48 sps:$4 sm:$0xff]  }
 0x163   :  { %2044 = vmatmul.mubr.bf16.gmra.mrb[12].mxu0 %v8470_v19  ;;  %2150 = vmatmul.mubr.bf16.gmra.mrb[12].mxu1 %v8470_v19  ;;  %v7710_v19 = vld [vmem:[#allocation9 + $0x240] ss:$48 sps:$4 sm:$0xff]  }
 0x164   :  { %3025 = vmatpush1.bf16.msra.mxu0 %v7686_v5  ;;  %3131 = vmatpush1.bf16.msra.mxu1 %v7689_v32  ;;  %v7782_v5 = vld [vmem:[#allocation9 + $0x668] ss:$48 sps:$4 sm:$0xff]   ;;  %v7787_v32 = vld [vmem:[#allocation9 + $0x6c4] ss:$48 sps:$4 sm:$0xff]  }
 0x165   :  { %3026 = vmatprep.subr.bf16.mxu0 %v7694_v33  ;;  %3132 = vmatprep.subr.bf16.mxu1 %v7697_v9  ;;  %v7790_v33 = vld [vmem:[#allocation9 + $0x6cc] ss:$48 sps:$4 sm:$0xff]   ;;  %v230_v9 = vlaneseq }
 0x166   :  { %3052 = vmatprep.mubr.bf16.mxu0 %v7772_v36  ;;  %3158 = vmatprep.mubr.bf16.mxu1 %v7772_v36  ;;  %v7788_v36 = vld [vmem:[#allocation9 + $0x6c8] ss:$48 sps:$4 sm:$0xff]  }
 0x168   :  { %3027 = vmatpush1.bf16.msra.mxu0 %v7692_v35  ;;  %3133 = vmatpush1.bf16.msra.mxu1 %v7695_v25  ;;  %v7859_v35 = vld [vmem:[#allocation6 + $0x20] ss:$16 sps:$4 sm:$0xff]  }
 0x169   :  { %3028 = vmatprep.subr.bf16.mxu0 %v7700_v37  ;;  %3134 = vmatprep.subr.bf16.mxu1 %v7703_v38  ;;  %v7785_v25 = vld [vmem:[#allocation9 + $0x6c0] ss:$48 sps:$4 sm:$0xff]   ;;  %v7793_v37 = vld [vmem:[#allocation9 + $0x724] ss:$48 sps:$4 sm:$0xff]   ;;  %v7796_v38 = vld [vmem:[#allocation9 + $0x72c] ss:$48 sps:$4 sm:$0xff]  }
 0x16c   :  { %3029 = vmatpush1.bf16.msra.mxu0 %v7698_v14  ;;  %3135 = vmatpush1.bf16.msra.mxu1 %v7701_v39  ;;  %v7874_v14 = vld [vmem:[#allocation6 + $0xc] ss:$16 sps:$4 sm:$0xff]   ;;  %v231_v39 = vshrl.u32 %v230_v9, 7 }
 0x16d   :  { %3030 = vmatprep.subr.bf16.mxu0 %v7706_v40  ;;  %3136 = vmatprep.subr.bf16.mxu1 %v7709_v27  ;;  %v7791_v40 = vld [vmem:[#allocation9 + $0x720] ss:$48 sps:$4 sm:$0xff]   ;;  %v7794_v27 = vld [vmem:[#allocation9 + $0x728] ss:$48 sps:$4 sm:$0xff]  }
 0x170   :  { %3031 = vmatpush1.bf16.msra.mxu0 %v7704_v47  ;;  %3137 = vmatpush1.bf16.msra.mxu1 %v7707_v41  ;;  %v7799_v47 = vld [vmem:[#allocation9 + $0x784] ss:$48 sps:$4 sm:$0xff]   ;;  %v7802_v41 = vld [vmem:[#allocation9 + $0x78c] ss:$48 sps:$4 sm:$0xff]  }
 0x171   :  { %3032 = vmatprep.subr.bf16.mxu0 %v7712_v42  ;;  %3138 = vmatprep.subr.bf16.mxu1 %v7715_v43  ;;  %v8491_v42 = vsub.s32 2, %v231_v39  ;;  %v8493_v43 = vsub.s32 3, %v231_v39 }
 0x174   :  { %3033 = vmatpush1.bf16.msra.mxu0 %v7710_v19  ;;  %3139 = vmatpush1.bf16.msra.mxu1 %v7713_v34  ;;  %v7797_v19 = vld [vmem:[#allocation9 + $0x780] ss:$48 sps:$4 sm:$0xff]   ;;  %v7800_v34 = vld [vmem:[#allocation9 + $0x788] ss:$48 sps:$4 sm:$0xff]  }
 0x175   :  { %3034 = vmatprep.subr.bf16.mxu0 %v7718_v44  ;;  %3140 = vmatprep.subr.bf16.mxu1 %v7721_v45  ;;  %v228_v44 = vld [vmem:[#allocation11 + $0x4] sm:$0xf]  ;;  %v8495_v45 = vsub.s32 0, %v231_v39 }
 0x178   :  { %3035 = vmatpush1.bf16.msra.mxu0 %v7716_v46  ;;  %3141 = vmatpush1.bf16.msra.mxu1 %v7719_v48  ;;  %v7805_v46 = vld [vmem:[#allocation9 + $0x7e4] ss:$48 sps:$4 sm:$0xff]   ;;  %v7808_v48 = vld [vmem:[#allocation9 + $0x7ec] ss:$48 sps:$4 sm:$0xff]  }
 0x179   :  { %3036 = vmatprep.subr.bf16.mxu0 %v7724_v49  ;;  %3142 = vmatprep.subr.bf16.mxu1 %v7727_v50  ;;  %v8497_v49 = vsub.s32 1, %v231_v39  ;;  %v8500_v50 = vrot.slane %v228_v44, %v8491_v42  ;;  %v7829_v39 = vld [vmem:[#allocation9 + $0x964] ss:$48 sps:$4 sm:$0xff]  }
 0x17c   :  { %3037 = vmatpush1.bf16.msra.mxu0 %v7722_v51  ;;  %3143 = vmatpush1.bf16.msra.mxu1 %v7725_v52  ;;  %v8503_v51 = vrot.slane %v228_v44, %v8493_v43  ;;  %v7803_v52 = vld [vmem:[#allocation9 + $0x7e0] ss:$48 sps:$4 sm:$0xff]  }
 0x17d   :  { %3038 = vmatprep.subr.bf16.mxu0 %v7730_v53  ;;  %3144 = vmatprep.subr.bf16.mxu1 %v7733_v54  ;;  %v7806_v53 = vld [vmem:[#allocation9 + $0x7e8] ss:$48 sps:$4 sm:$0xff]   ;;  %v233_v54 = vrot.slane %v228_v44, %v8495_v45 }
 0x180   :  { %3039 = vmatpush1.bf16.msra.mxu0 %v7728_v55  ;;  %3145 = vmatpush1.bf16.msra.mxu1 %v7731_v56  ;;  %v7811_v55 = vld [vmem:[#allocation9 + $0x844] ss:$48 sps:$4 sm:$0xff]   ;;  %v7814_v56 = vld [vmem:[#allocation9 + $0x84c] ss:$48 sps:$4 sm:$0xff]  }
 0x181   :  { %3040 = vmatprep.subr.bf16.mxu0 %v7736_v57  ;;  %3146 = vmatprep.subr.bf16.mxu1 %v7739_v58 }
 0x184   :  { %3041 = vmatpush1.bf16.msra.mxu0 %v7734_v59  ;;  %3147 = vmatpush1.bf16.msra.mxu1 %v7737_v60  ;;  %v237_v59 = vrot.slane %v228_v44, %v8497_v49 }
 0x185   :  { %3042 = vmatprep.subr.bf16.mxu0 %v7742_v61  ;;  %3148 = vmatprep.subr.bf16.mxu1 %v7745_v62 }
 0x188   :  { %3043 = vmatpush1.bf16.msra.mxu0 %v7740_v63  ;;  %3149 = vmatpush1.bf16.msra.mxu1 %v7743_v0 }
 0x189   :  { %3044 = vmatprep.subr.bf16.mxu0 %v7748_v1  ;;  %3150 = vmatprep.subr.bf16.mxu1 %v7751_v2  ;;  %v7809_v2 = vld [vmem:[#allocation9 + $0x840] ss:$48 sps:$4 sm:$0xff]  }
 0x18c   :  { %3045 = vmatpush1.bf16.msra.mxu0 %v7746_v3  ;;  %3151 = vmatpush1.bf16.msra.mxu1 %v7749_v4  ;;  %v7812_v3 = vld [vmem:[#allocation9 + $0x848] ss:$48 sps:$4 sm:$0xff]  }
 0x18d   :  { %3046 = vmatprep.subr.bf16.mxu0 %v7754_v6  ;;  %3152 = vmatprep.subr.bf16.mxu1 %v7757_v7 }
 0x190   :  { %3047 = vmatpush1.bf16.msra.mxu0 %v7752_v8  ;;  %3153 = vmatpush1.bf16.msra.mxu1 %v7755_v10 }
 0x191   :  { %3048 = vmatprep.subr.bf16.mxu0 %v7760_v11  ;;  %3154 = vmatprep.subr.bf16.mxu1 %v7763_v12  ;;  %v7817_v11 = vld [vmem:[#allocation9 + $0x8a4] ss:$48 sps:$4 sm:$0xff]  }
 0x194   :  { %3049 = vmatpush1.bf16.msra.mxu0 %v7758_v13  ;;  %3155 = vmatpush1.bf16.msra.mxu1 %v7761_v15 }
 0x195   :  { %3050 = vmatprep.subr.bf16.mxu0 %v7766_v16  ;;  %3156 = vmatprep.subr.bf16.mxu1 %v7769_v17  ;;  %v7820_v16 = vld [vmem:[#allocation9 + $0x8ac] ss:$48 sps:$4 sm:$0xff]  }
 0x198   :  { %3051 = vmatpush1.bf16.msra.mxu0 %v7764_v18  ;;  %3157 = vmatpush1.bf16.msra.mxu1 %v7767_v20 }
 0x199   :  { %3073 = vmatprep.subr.bf16.mxu0 %v7775_v21  ;;  %3179 = vmatprep.subr.bf16.mxu1 %v7778_v22  ;;  %v7815_v22 = vld [vmem:[#allocation9 + $0x8a0] ss:$48 sps:$4 sm:$0xff]  }
 0x19b   :  { %3053 = vmatmul.mubr.bf16.vlgmr.msra.gmra.mrb[16].mxu0 %v7770_v23  ;;  %3159 = vmatmul.mubr.bf16.vlgmr.msra.gmra.mrb[16].mxu1 %v7770_v23  ;;  %v7818_v23 = vld [vmem:[#allocation9 + $0x8a8] ss:$48 sps:$4 sm:$0xff]  }
 0x19c   :  { %3074 = vmatpush1.bf16.msra.mxu0 %v7773_v24  ;;  %3180 = vmatpush1.bf16.msra.mxu1 %v7776_v26  ;;  %v7823_v24 = vld [vmem:[#allocation9 + $0x904] ss:$48 sps:$4 sm:$0xff]   ;;  %v7826_v26 = vld [vmem:[#allocation9 + $0x90c] ss:$48 sps:$4 sm:$0xff]  }
 0x19d   :  { %3075 = vmatprep.subr.bf16.mxu0 %v7781_v28  ;;  %3181 = vmatprep.subr.bf16.mxu1 %v7784_v29 }
 0x19e   :  { %3062 = vmatprep.mubr.bf16.mxu0 %v7857_v30  ;;  %3168 = vmatprep.mubr.bf16.mxu1 %v7857_v30 }
 0x1a0   :  { %3076 = vmatpush1.bf16.msra.mxu0 %v7779_v31  ;;  %3182 = vmatpush1.bf16.msra.mxu1 %v7782_v5 }
 0x1a1   :  { %3077 = vmatprep.subr.bf16.mxu0 %v7787_v32  ;;  %3183 = vmatprep.subr.bf16.mxu1 %v7790_v33 }
 0x1a3   :  { %3063 = vmatmul.mubr.bf16.gmra.mrb[20].mxu0 %v7859_v35  ;;  %3169 = vmatmul.mubr.bf16.gmra.mrb[20].mxu1 %v7859_v35  ;;  %v7821_v35 = vld [vmem:[#allocation9 + $0x900] ss:$48 sps:$4 sm:$0xff]  }
 0x1a4   :  { %3078 = vmatpush1.bf16.msra.mxu0 %v7785_v25  ;;  %3184 = vmatpush1.bf16.msra.mxu1 %v7788_v36  ;;  %v7824_v25 = vld [vmem:[#allocation9 + $0x908] ss:$48 sps:$4 sm:$0xff]  }
 0x1a5   :  { %3079 = vmatprep.subr.bf16.mxu0 %v7793_v37  ;;  %3185 = vmatprep.subr.bf16.mxu1 %v7796_v38 }
 0x1a6   :  { %3105 = vmatprep.mubr.bf16.mxu0 %v7874_v14  ;;  %3211 = vmatprep.mubr.bf16.mxu1 %v7874_v14 }
 0x1a8   :  { %3080 = vmatpush1.bf16.msra.mxu0 %v7791_v40  ;;  %3186 = vmatpush1.bf16.msra.mxu1 %v7794_v27  ;;  %v7832_v40 = vld [vmem:[#allocation9 + $0x96c] ss:$48 sps:$4 sm:$0xff]  }
 0x1a9   :  { %3081 = vmatprep.subr.bf16.mxu0 %v7799_v47  ;;  %3187 = vmatprep.subr.bf16.mxu1 %v7802_v41 }
 0x1ac   :  { %3082 = vmatpush1.bf16.msra.mxu0 %v7797_v19  ;;  %3188 = vmatpush1.bf16.msra.mxu1 %v7800_v34 }
 0x1ad   :  { %3083 = vmatprep.subr.bf16.mxu0 %v7805_v46  ;;  %3189 = vmatprep.subr.bf16.mxu1 %v7808_v48  ;;  %v7827_v48 = vld [vmem:[#allocation9 + $0x960] ss:$48 sps:$4 sm:$0xff]  }
 0x1ae   :  { %v1017_v57 = vpop.f32.mrb[0].mxu0  ;;  %v1123_v58 = vpop.f32.mrb[0].mxu1 }
 0x1af   :  { %v7143_v60 = vadd.f32 %v1123_v58, %v8500_v50  ;;  %v1019_v61 = vpop.f32.mrb[1].mxu0  ;;  %v1125_v62 = vpop.f32.mrb[1].mxu1  ;;  %v7135_v4 = vadd.f32 %v1017_v57, %v233_v54  ;;  %v7844_v57 = vld [vmem:[#allocation9 + $0xa2c] ss:$48 sps:$4 sm:$0xff]   ;;  %v7839_v58 = vld [vmem:[#allocation9 + $0xa20] ss:$48 sps:$4 sm:$0xff]  }
 0x1b0   :  { %v7144_v63 = vadd.f32 %v1125_v62, %v8503_v51  ;;  %v1021_v0 = vpop.f32.mrb[2].mxu0  ;;  %v1127_v1 = vpop.f32.mrb[2].mxu1  ;;  %3084 = vmatpush1.bf16.msra.mxu0 %v7803_v52  ;;  %3190 = vmatpush1.bf16.msra.mxu1 %v7806_v53  ;;  %v7136_v12 = vadd.f32 %v1019_v61, %v237_v59  ;;  %v7830_v52 = vld [vmem:[#allocation9 + $0x968] ss:$48 sps:$4 sm:$0xff]   ;;  %v7850_v61 = vld [vmem:[#allocation9 + $0xa8c] ss:$48 sps:$4 sm:$0xff]  }
 0x1b1   :  { %v7137_v6 = vadd.f32 %v1021_v0, %v233_v54  ;;  %v7145_v7 = vadd.f32 %v1127_v1, %v8500_v50  ;;  %v1023_v8 = vpop.f32.mrb[3].mxu0  ;;  %v1129_v10 = vpop.f32.mrb[3].mxu1  ;;  %3085 = vmatprep.subr.bf16.mxu0 %v7811_v55  ;;  %3191 = vmatprep.subr.bf16.mxu1 %v7814_v56  ;;  %v7833_v55 = vld [vmem:[#allocation9 + $0x9c0] ss:$48 sps:$4 sm:$0xff]   ;;  %v7841_v56 = vld [vmem:[#allocation9 + $0xa24] ss:$48 sps:$4 sm:$0xff]  }
 0x1b2   :  { %v7138_v13 = vadd.f32 %v1023_v8, %v237_v59  ;;  %v7146_v15 = vadd.f32 %v1129_v10, %v8503_v51  ;;  %v7845_v62 = vld [vmem:[#allocation9 + $0xa80] ss:$48 sps:$4 sm:$0xff]   ;;  %v7853_v0 = vld [vmem:[#allocation9 + $0xae4] ss:$48 sps:$4 sm:$0xff]   ;;  %v7856_v1 = vld [vmem:[#allocation9 + $0xaec] ss:$48 sps:$4 sm:$0xff]  }
 0x1b3   :  { %v8511_v17 = vpack.c.bf16 %v7145_v7, %v7143_v60  ;;  %v8513_v18 = vpack.c.bf16 %v7137_v6, %v7135_v4  ;;  %v7847_v60 = vld [vmem:[#allocation9 + $0xa84] ss:$48 sps:$4 sm:$0xff]   ;;  %v7865_v6 = vld [vmem:[#allocation9 + $0xb4c] ss:$48 sps:$4 sm:$0xff]   ;;  %v7860_v7 = vld [vmem:[#allocation9 + $0xb40] ss:$48 sps:$4 sm:$0xff]  }
 0x1b4   :  { %v8515_v20 = vpack.c.bf16 %v7146_v15, %v7144_v63  ;;  %3086 = vmatpush1.bf16.msra.mxu0 %v7809_v2  ;;  %3192 = vmatpush1.bf16.msra.mxu1 %v7812_v3  ;;  %v8517_v21 = vpack.c.bf16 %v7138_v13, %v7136_v12  ;;  %v7848_v63 = vld [vmem:[#allocation9 + $0xa88] ss:$48 sps:$4 sm:$0xff]   ;;  %v7851_v2 = vld [vmem:[#allocation9 + $0xae0] ss:$48 sps:$4 sm:$0xff]   ;;  %v7862_v4 = vld [vmem:[#allocation9 + $0xb44] ss:$48 sps:$4 sm:$0xff]  }
 0x1b5   :  { %3376 = vrot.lane.b32.xlu0 %v8513_v18, %s8347_s4  ;;  %3087 = vmatprep.subr.bf16.mxu0 %v7817_v11  ;;  %v7854_v3 = vld [vmem:[#allocation9 + $0xae8] ss:$48 sps:$4 sm:$0xff]   ;;  %v7868_v10 = vld [vmem:[#allocation9 + $0xba4] ss:$48 sps:$4 sm:$0xff]   ;;  %v7871_v11 = vld [vmem:[#allocation9 + $0xbac] ss:$48 sps:$4 sm:$0xff]  }
 0x1b6   :  { %v1027_v28 = vpop.f32.mrb[4].mxu0  ;;  %3629 = vrot.lane.b32.xlu1 %v8517_v21, %s8347_s4  ;;  %3193 = vmatprep.subr.bf16.mxu1 %v7820_v16  ;;  %v1133_v29 = vpop.f32.mrb[4].mxu1  ;;  %v7863_v8 = vld [vmem:[#allocation9 + $0xb48] ss:$48 sps:$4 sm:$0xff]   ;;  %v7866_v12 = vld [vmem:[#allocation9 + $0xba0] ss:$48 sps:$4 sm:$0xff]  }
 0x1b7   :  { %v7139_v30 = vadd.f32 %v1027_v28, %v233_v54  ;;  %v1029_v31 = vpop.f32.mrb[5].mxu0  ;;  %v7147_v5 = vadd.f32 %v1133_v29, %v8500_v50  ;;  %v1135_v32 = vpop.f32.mrb[5].mxu1  ;;  %v7869_v13 = vld [vmem:[#allocation9 + $0xba8] ss:$48 sps:$4 sm:$0xff]   ;;  %v7875_v16 = vld [vmem:[#allocation6 + $0x2c] ss:$16 sps:$4 sm:$0xff]  }
 0x1b8   :  { %v7140_v33 = vadd.f32 %v1029_v31, %v237_v59  ;;  %v1031_v9 = vpop.f32.mrb[6].mxu0  ;;  %3088 = vmatpush1.bf16.msra.mxu0 %v7815_v22  ;;  %3194 = vmatpush1.bf16.msra.mxu1 %v7818_v23  ;;  %v7148_v36 = vadd.f32 %v1135_v32, %v8503_v51  ;;  %v1137_v37 = vpop.f32.mrb[6].mxu1  ;;  %v7872_v15 = vld [vmem:[#allocation6 + $0x8] ss:$16 sps:$4 sm:$0xff]   ;;  %v8348_v22 = vmov 0.0  }
 0x1b9   :  { %v7141_v38 = vadd.f32 %v1031_v9, %v233_v54  ;;  %v1033_v14 = vpop.f32.mrb[7].mxu0  ;;  %3089 = vmatprep.subr.bf16.mxu0 %v7823_v24  ;;  %3195 = vmatprep.subr.bf16.mxu1 %v7826_v26  ;;  %v7149_v27 = vadd.f32 %v1137_v37, %v8500_v50  ;;  %v1139_v47 = vpop.f32.mrb[7].mxu1  ;;  %v7835_v54 = vld [vmem:[#allocation9 + $0x9c4] ss:$48 sps:$4 sm:$0xff]   ;;  %v7838_v50 = vld [vmem:[#allocation9 + $0x9cc] ss:$48 sps:$4 sm:$0xff]  }
 0x1ba   :  { %v7142_v41 = vadd.f32 %v1033_v14, %v237_v59  ;;  %v7150_v19 = vadd.f32 %v1139_v47, %v8503_v51  ;;  %v7836_v51 = vld [vmem:[#allocation9 + $0x9c8] ss:$48 sps:$4 sm:$0xff]   ;;  %v3256_v24 = vsel %vm3251_vm0, %v8513_v18, 0 }
 0x1bb   :  { %v8527_v34 = vpack.c.bf16 %v7141_v38, %v7139_v30  ;;  %v8529_v44 = vpack.c.bf16 %v7149_v27, %v7147_v5  ;;  %v7842_v59 = vld [vmem:[#allocation9 + $0xa28] ss:$48 sps:$4 sm:$0xff]  }
 0x1bc   :  { %v8531_v46 = vpack.c.bf16 %v7142_v41, %v7140_v33  ;;  %3090 = vmatpush1.bf16.msra.mxu0 %v7821_v35  ;;  %3196 = vmatpush1.bf16.msra.mxu1 %v7824_v25  ;;  %v8533_v53 = vpack.c.bf16 %v7150_v19, %v7148_v36  ;;  %v7877_v23 = vld [vmem:[#allocation6 + $0x28] ss:$16 sps:$4 sm:$0xff]  }
 0x1bd   :  { %3091 = vmatprep.subr.bf16.mxu0 %v7829_v39  ;;  %3197 = vmatprep.subr.bf16.mxu1 %v7832_v40  ;;  %v1286_v26 = vld [vmem:[#allocation11 + $0x8] sm:$0xf] }
 0x1be   :  { %v1299_v28 = vrot.slane %v1286_v26, %v8491_v42  ;;  %v1295_v29 = vrot.slane %v1286_v26, %v8497_v49  ;;  %v1303_v30 = vrot.slane %v1286_v26, %v8493_v43  ;;  %v1291_v31 = vrot.slane %v1286_v26, %v8495_v45 }
 0x1c0   :  { %3092 = vmatpush1.bf16.msra.mxu0 %v7827_v48  ;;  %3198 = vmatpush1.bf16.msra.mxu1 %v7830_v52 }
 0x1c1   :  { %3093 = vmatprep.subr.bf16.mxu0 %v7835_v54  ;;  %3199 = vmatprep.subr.bf16.mxu1 %v7838_v50 }
 0x1c4   :  { %3094 = vmatpush1.bf16.msra.mxu0 %v7833_v55  ;;  %3200 = vmatpush1.bf16.msra.mxu1 %v7836_v51 }
 0x1c5   :  { %3095 = vmatprep.subr.bf16.mxu0 %v7841_v56  ;;  %3201 = vmatprep.subr.bf16.mxu1 %v7844_v57 }
 0x1c8   :  { %3096 = vmatpush1.bf16.msra.mxu0 %v7839_v58  ;;  %3202 = vmatpush1.bf16.msra.mxu1 %v7842_v59 }
 0x1c9   :  { %3097 = vmatprep.subr.bf16.mxu0 %v7847_v60  ;;  %3203 = vmatprep.subr.bf16.mxu1 %v7850_v61 }
 0x1cc   :  { %3098 = vmatpush1.bf16.msra.mxu0 %v7845_v62  ;;  %3204 = vmatpush1.bf16.msra.mxu1 %v7848_v63 }
 0x1cd   :  { %3099 = vmatprep.subr.bf16.mxu0 %v7853_v0  ;;  %3205 = vmatprep.subr.bf16.mxu1 %v7856_v1 }
 0x1d0   :  { %3100 = vmatpush1.bf16.msra.mxu0 %v7851_v2  ;;  %3206 = vmatpush1.bf16.msra.mxu1 %v7854_v3 }
 0x1d1   :  { %3101 = vmatprep.subr.bf16.mxu0 %v7862_v4  ;;  %3207 = vmatprep.subr.bf16.mxu1 %v7865_v6 }
 0x1d4   :  { %3102 = vmatpush1.bf16.msra.mxu0 %v7860_v7  ;;  %3208 = vmatpush1.bf16.msra.mxu1 %v7863_v8 }
 0x1d5   :  { %3103 = vmatprep.subr.bf16.mxu0 %v7868_v10  ;;  %3209 = vmatprep.subr.bf16.mxu1 %v7871_v11  ;;  %v2318_v11 = vld [vmem:[#allocation11] sm:$0xf] }
 0x1d8   :  { %3104 = vmatpush1.bf16.msra.mxu0 %v7866_v12  ;;  %3210 = vmatpush1.bf16.msra.mxu1 %v7869_v13  ;;  %v2323_v12 = vrot.slane %v2318_v11, %v8495_v45  ;;  %v2331_v13 = vrot.slane %v2318_v11, %v8491_v42 }
 0x1d9   :  { %6943 = vmatprep.subr.bf16.mxu0 %v8348_v22  ;;  %6949 = vmatprep.subr.bf16.mxu1 %v8348_v22 }
 0x1db   :  { %3106 = vmatmul.mubr.bf16.vlgmr.msra.gmra.mrb[16].mxu0 %v7872_v15  ;;  %3212 = vmatmul.mubr.bf16.vlgmr.msra.gmra.mrb[16].mxu1 %v7872_v15 }
 0x1dc   :  { %3115 = vmatprep.mubr.bf16.mxu0 %v7875_v16  ;;  %3221 = vmatprep.mubr.bf16.mxu1 %v7875_v16 }
 0x1e1   :  { %6944 = vmatpush3.bf16.xpose.msra.mxu0 %v3256_v24  ;;  %v2335_v24 = vrot.slane %v2318_v11, %v8493_v43 }
 0x1e2   :  { %6955 = vmatprep.subr.bf16.mxu0 %v8348_v22 }
 0x1e3   :  { %3116 = vmatmul.mubr.bf16.gmra.mrb[20].mxu0 %v7877_v23  ;;  %3222 = vmatmul.mubr.bf16.gmra.mrb[20].mxu1 %v7877_v23  ;;  %v2327_v23 = vrot.slane %v2318_v11, %v8497_v49 }
 0x1e4   :  { %6945 = vmatprep.mubr.msk.bf16.mxu0 %vm8349_vm1, %v8348_v22  ;;  %6951 = vmatprep.mubr.msk.bf16.mxu1 %vm8349_vm1, %v8348_v22 }
 0x22e   :  { %v2035_v5 = vpop.f32.mrb[8].mxu0  ;;  %v2141_v32 = vpop.f32.mrb[8].mxu1 }
 0x22f   :  { %v7159_v33 = vadd.f32 %v2141_v32, %v1299_v28  ;;  %v2037_v9 = vpop.f32.mrb[9].mxu0  ;;  %v2143_v35 = vpop.f32.mrb[9].mxu1  ;;  %v7151_v38 = vadd.f32 %v2035_v5, %v1291_v31 }
 0x230   :  { %v7152_v18 = vadd.f32 %v2037_v9, %v1295_v29  ;;  %v7160_v25 = vadd.f32 %v2143_v35, %v1303_v30  ;;  %v2039_v36 = vpop.f32.mrb[10].mxu0  ;;  %v2145_v37 = vpop.f32.mrb[10].mxu1 }
 0x231   :  { %v7153_v14 = vadd.f32 %v2039_v36, %v1291_v31  ;;  %v7161_v39 = vadd.f32 %v2145_v37, %v1299_v28  ;;  %v2041_v40 = vpop.f32.mrb[11].mxu0  ;;  %v2147_v27 = vpop.f32.mrb[11].mxu1 }
 0x232   :  { %v7154_v47 = vadd.f32 %v2041_v40, %v1295_v29  ;;  %v7162_v41 = vadd.f32 %v2147_v27, %v1303_v30 }
 0x233   :  { %v8544_v19 = vpack.c.bf16 %v7153_v14, %v7151_v38  ;;  %v8546_v48 = vpack.c.bf16 %v7161_v39, %v7159_v33 }
 0x234   :  { %v8548_v52 = vpack.c.bf16 %v7154_v47, %v7152_v18  ;;  %v8550_v54 = vpack.c.bf16 %v7162_v41, %v7160_v25  ;;  %v3377_v18 = vpop.permute.xlu0 %3376 }
 0x235   :  { %6950 = vmatpush3.bf16.msra.mxu1 %v8544_v19  ;;  %v3382_v47 = vsel %vm3251_vm0, %v3377_v18, 0 }
 0x236   :  { %v2045_v50 = vpop.f32.mrb[12].mxu0  ;;  %v2151_v55 = vpop.f32.mrb[12].mxu1  ;;  %6961 = vmatprep.subr.bf16.mxu1 %v8348_v22 }
 0x237   :  { %v7155_v51 = vadd.f32 %v2045_v50, %v1291_v31  ;;  %v2047_v56 = vpop.f32.mrb[13].mxu0  ;;  %v7163_v57 = vadd.f32 %v2151_v55, %v1299_v28  ;;  %v2153_v58 = vpop.f32.mrb[13].mxu1 }
 0x238   :  { %v7156_v59 = vadd.f32 %v2047_v56, %v1295_v29  ;;  %v2049_v60 = vpop.f32.mrb[14].mxu0  ;;  %v7164_v61 = vadd.f32 %v2153_v58, %v1303_v30  ;;  %v2155_v62 = vpop.f32.mrb[14].mxu1 }
 0x239   :  { %v7157_v63 = vadd.f32 %v2049_v60, %v1291_v31  ;;  %v2051_v0 = vpop.f32.mrb[15].mxu0  ;;  %v7165_v1 = vadd.f32 %v2155_v62, %v1299_v28  ;;  %v2157_v2 = vpop.f32.mrb[15].mxu1 }
 0x23a   :  { %v7158_v3 = vadd.f32 %v2051_v0, %v1295_v29  ;;  %v7166_v4 = vadd.f32 %v2157_v2, %v1303_v30 }
 0x23b   :  { %v8558_v6 = vpack.c.bf16 %v7157_v63, %v7155_v51  ;;  %v8560_v7 = vpack.c.bf16 %v7165_v1, %v7163_v57 }
 0x23c   :  { %v8562_v8 = vpack.c.bf16 %v7158_v3, %v7156_v59  ;;  %v8564_v10 = vpack.c.bf16 %v7166_v4, %v7164_v61 }
 0x2ae   :  { %v3107_v15 = vpop.f32.mrb[16].mxu0  ;;  %v3213_v16 = vpop.f32.mrb[16].mxu1 }
 0x2af   :  { %v3109_v26 = vpop.f32.mrb[17].mxu0  ;;  %v3215_v28 = vpop.f32.mrb[17].mxu1  ;;  %v7167_v31 = vadd.f32 %v3107_v15, %v2323_v12  ;;  %v7175_v5 = vadd.f32 %v3213_v16, %v2331_v13 }
 0x2b0   :  { %v3111_v29 = vpop.f32.mrb[18].mxu0  ;;  %v3217_v30 = vpop.f32.mrb[18].mxu1  ;;  %v7168_v25 = vadd.f32 %v3109_v26, %v2327_v23  ;;  %v7176_v36 = vadd.f32 %v3215_v28, %v2335_v24 }
 0x2b1   :  { %v7169_v32 = vadd.f32 %v3111_v29, %v2323_v12  ;;  %v7177_v33 = vadd.f32 %v3217_v30, %v2331_v13  ;;  %v3113_v9 = vpop.f32.mrb[19].mxu0  ;;  %v3219_v35 = vpop.f32.mrb[19].mxu1 }
 0x2b2   :  { %v7170_v37 = vadd.f32 %v3113_v9, %v2327_v23  ;;  %v7178_v38 = vadd.f32 %v3219_v35, %v2335_v24 }
 0x2b3   :  { %v3232_v14 = vpack.c.bf16 %v7169_v32, %v7167_v31  ;;  %v8570_v39 = vpack.c.bf16 %v7177_v33, %v7175_v5 }
 0x2b4   :  { %v3233_v40 = vpack.c.bf16 %v7170_v37, %v7168_v25  ;;  %v8572_v27 = vpack.c.bf16 %v7178_v38, %v7176_v36 }
 0x2b5   :  { %3373 = vrot.lane.b32.xlu0 %v3232_v14, %s8347_s4  ;;  %6946 = vmatmul.mubr.msk.bf16.vlgmr.msra.gmra.mrb[24].mxu0 %vm3251_vm0, %v3232_v14  ;;  %v5022_v14 = vsel %vm3251_vm0, %v8533_v53, 0 }
 0x2b6   :  { %6956 = vmatpush3.bf16.xpose.msra.mxu0 %v3382_v47  ;;  %v3117_v41 = vpop.f32.mrb[20].mxu0  ;;  %3626 = vrot.lane.b32.xlu1 %v3233_v40, %s8347_s4  ;;  %v3223_v50 = vpop.f32.mrb[20].mxu1 }
 0x2b7   :  { %v3119_v55 = vpop.f32.mrb[21].mxu0  ;;  %v7179_v51 = vadd.f32 %v3223_v50, %v2331_v13  ;;  %v3225_v56 = vpop.f32.mrb[21].mxu1  ;;  %6957 = vmatprep.mubr.msk.bf16.mxu0 %vm8349_vm1, %v8348_v22  ;;  %6967 = vmatprep.subr.bf16.mxu0 %v8348_v22  ;;  %v7171_v60 = vadd.f32 %v3117_v41, %v2323_v12 }
 0x2b8   :  { %v3121_v57 = vpop.f32.mrb[22].mxu0  ;;  %v7180_v58 = vadd.f32 %v3225_v56, %v2335_v24  ;;  %v3227_v59 = vpop.f32.mrb[22].mxu1  ;;  %v7172_v1 = vadd.f32 %v3119_v55, %v2327_v23 }
 0x2b9   :  { %v7173_v61 = vadd.f32 %v3121_v57, %v2323_v12  ;;  %v3123_v62 = vpop.f32.mrb[23].mxu0  ;;  %3881 = vrot.lane.b32.xlu0 %v8511_v17, %s8347_s4  ;;  %v7181_v63 = vadd.f32 %v3227_v59, %v2331_v13  ;;  %v3229_v0 = vpop.f32.mrb[23].mxu1  ;;  %v3510_v13 = vsel %vm3251_vm0, %v8517_v21, 0  ;;  %v3762_v21 = vsel %vm3251_vm0, %v8511_v17, 0 }
 0x2ba   :  { %v7174_v2 = vadd.f32 %v3123_v62, %v2327_v23  ;;  %3878 = vrot.lane.b32.xlu1 %v8570_v39, %s8347_s4  ;;  %v7182_v3 = vadd.f32 %v3229_v0, %v2335_v24  ;;  %v3630_v23 = vpop.permute.xlu1 %3629  ;;  %v4014_v17 = vsel %vm3251_vm0, %v8515_v20, 0 }
 0x2bb   :  { %v3236_v4 = vpack.c.bf16 %v7173_v61, %v7171_v60  ;;  %v8585_v11 = vpack.c.bf16 %v7181_v63, %v7179_v51  ;;  %v3635_v24 = vsel %vm3251_vm0, %v3630_v23, 0 }
 0x2bc   :  { %v8587_v15 = vpack.c.bf16 %v7174_v2, %v7172_v1  ;;  %v8589_v16 = vpack.c.bf16 %v7182_v3, %v7180_v58 }
 0x2bd   :  { %4133 = vrot.lane.b32.xlu0 %v8515_v20, %s8347_s4  ;;  %v4266_v20 = vsel %vm3251_vm0, %v8527_v34, 0 }
 0x2be   :  { %4130 = vrot.lane.b32.xlu1 %v8572_v27, %s8347_s4 }
 0x2c1   :  { %4385 = vrot.lane.b32.xlu0 %v8527_v34, %s8347_s4  ;;  %v4518_v34 = vsel %vm3251_vm0, %v8531_v46, 0 }
 0x2c2   :  { %4382 = vrot.lane.b32.xlu1 %v3236_v4, %s8347_s4 }
 0x2c5   :  { %4637 = vrot.lane.b32.xlu0 %v8531_v46, %s8347_s4  ;;  %v4770_v46 = vsel %vm3251_vm0, %v8529_v44, 0 }
 0x2c6   :  { %4634 = vrot.lane.b32.xlu1 %v8587_v15, %s8347_s4 }
 0x2c9   :  { %4889 = vrot.lane.b32.xlu0 %v8529_v44, %s8347_s4 }
 0x2ca   :  { %4886 = vrot.lane.b32.xlu1 %v8585_v11, %s8347_s4 }
 0x2cd   :  { %5141 = vrot.lane.b32.xlu0 %v8533_v53, %s8347_s4 }
 0x2ce   :  { %5138 = vrot.lane.b32.xlu1 %v8589_v16, %s8347_s4 }
 0x2d1   :  { %3952 = vrot.lane.b32.xlu0 %v8546_v48, %s8347_s4 }
 0x2d2   :  { %3447 = vrot.lane.b32.xlu1 %v8544_v19, %s8347_s4 }
 0x2d6   :  { %3700 = vrot.lane.b32.xlu1 %v8548_v52, %s8347_s4 }
 0x327   :  { %v3374_v12 = vpop.permute.xlu0 %3373 }
 0x328   :  { %6958 = vmatmul.mubr.msk.bf16.vlgmr.msra.gmra.mrb[28].mxu0 %vm3251_vm0, %v3374_v12  ;;  %v3627_v19 = vpop.permute.xlu1 %3626 }
 0x329   :  { %6968 = vmatpush3.bf16.xpose.msra.mxu0 %v3510_v13  ;;  %6969 = vmatprep.mubr.msk.bf16.mxu0 %vm8349_vm1, %v8348_v22 }
 0x32a   :  { %6979 = vmatprep.subr.bf16.mxu0 %v8348_v22 }
 0x32b   :  { %v3882_v26 = vpop.permute.xlu0 %3881 }
 0x32c   :  { %v3887_v28 = vsel %vm3251_vm0, %v3882_v26, 0  ;;  %v3879_v29 = vpop.permute.xlu1 %3878 }
 0x32f   :  { %v4134_v30 = vpop.permute.xlu0 %4133 }
 0x330   :  { %6970 = vmatmul.mubr.msk.bf16.vlgmr.msra.gmra.mrb[32].mxu0 %vm3251_vm0, %v3233_v40  ;;  %v4139_v31 = vsel %vm3251_vm0, %v4134_v30, 0  ;;  %v4131_v5 = vpop.permute.xlu1 %4130 }
 0x331   :  { %6980 = vmatpush3.bf16.xpose.msra.mxu0 %v3635_v24  ;;  %6981 = vmatprep.mubr.msk.bf16.mxu0 %vm8349_vm1, %v8348_v22 }
 0x332   :  { %6991 = vmatprep.subr.bf16.mxu0 %v8348_v22 }
 0x333   :  { %v4386_v32 = vpop.permute.xlu0 %4385 }
 0x334   :  { %v4391_v33 = vsel %vm3251_vm0, %v4386_v32, 0  ;;  %v4383_v9 = vpop.permute.xlu1 %4382 }
 0x337   :  { %v4638_v35 = vpop.permute.xlu0 %4637 }
 0x338   :  { %6982 = vmatmul.mubr.msk.bf16.vlgmr.msra.gmra.mrb[36].mxu0 %vm3251_vm0, %v3627_v19  ;;  %v4643_v18 = vsel %vm3251_vm0, %v4638_v35, 0  ;;  %v4635_v25 = vpop.permute.xlu1 %4634 }
 0x339   :  { %6992 = vmatpush3.bf16.xpose.msra.mxu0 %v3762_v21  ;;  %6993 = vmatprep.mubr.msk.bf16.mxu0 %vm8349_vm1, %v8348_v22 }
 0x33a   :  { %7003 = vmatprep.subr.bf16.mxu0 %v8348_v22 }
 0x33b   :  { %v4890_v36 = vpop.permute.xlu0 %4889 }
 0x33c   :  { %v4895_v37 = vsel %vm3251_vm0, %v4890_v36, 0  ;;  %v4887_v44 = vpop.permute.xlu1 %4886 }
 0x33f   :  { %v5142_v50 = vpop.permute.xlu0 %5141 }
 0x340   :  { %6994 = vmatmul.mubr.msk.bf16.vlgmr.msra.gmra.mrb[40].mxu0 %vm3251_vm0, %v8570_v39  ;;  %v5147_v55 = vsel %vm3251_vm0, %v5142_v50, 0  ;;  %v5139_v53 = vpop.permute.xlu1 %5138 }
 0x341   :  { %7004 = vmatpush3.bf16.xpose.msra.mxu0 %v3887_v28  ;;  %7005 = vmatprep.mubr.msk.bf16.mxu0 %vm8349_vm1, %v8348_v22 }
 0x342   :  { %7015 = vmatprep.subr.bf16.mxu0 %v8348_v22 }
 0x343   :  { %v8724_v23 = vpop.permute.xlu0 %3952 }
 0x344   :  { %v3448_v13 = vpop.permute.xlu1 %3447 }
 0x348   :  { %7006 = vmatmul.mubr.msk.bf16.vlgmr.msra.gmra.mrb[44].mxu0 %vm3251_vm0, %v3879_v29  ;;  %v8730_v26 = vpop.permute.xlu1 %3700 }
 0x349   :  { %7016 = vmatpush3.bf16.xpose.msra.mxu0 %v4014_v17  ;;  %7017 = vmatprep.mubr.msk.bf16.mxu0 %vm8349_vm1, %v8348_v22 }
 0x34a   :  { %7027 = vmatprep.subr.bf16.mxu0 %v8348_v22 }
 0x350   :  { %7018 = vmatmul.mubr.msk.bf16.vlgmr.msra.gmra.mrb[48].mxu0 %vm3251_vm0, %v8572_v27 }
 0x351   :  { %7028 = vmatpush3.bf16.xpose.msra.mxu0 %v4139_v31  ;;  %7029 = vmatprep.mubr.msk.bf16.mxu0 %vm8349_vm1, %v8348_v22 }
 0x352   :  { %7039 = vmatprep.subr.bf16.mxu0 %v8348_v22 }
 0x358   :  { %7030 = vmatmul.mubr.msk.bf16.vlgmr.msra.gmra.mrb[52].mxu0 %vm3251_vm0, %v4131_v5 }
 0x359   :  { %7040 = vmatpush3.bf16.xpose.msra.mxu0 %v4266_v20  ;;  %7041 = vmatprep.mubr.msk.bf16.mxu0 %vm8349_vm1, %v8348_v22 }
 0x35a   :  { %7051 = vmatprep.subr.bf16.mxu0 %v8348_v22 }
 0x360   :  { %7042 = vmatmul.mubr.msk.bf16.vlgmr.msra.gmra.mrb[56].mxu0 %vm3251_vm0, %v3236_v4 }
 0x361   :  { %7052 = vmatpush3.bf16.xpose.msra.mxu0 %v4391_v33  ;;  %7053 = vmatprep.mubr.msk.bf16.mxu0 %vm8349_vm1, %v8348_v22 }
 0x362   :  { %7063 = vmatprep.subr.bf16.mxu0 %v8348_v22 }
 0x368   :  { %7054 = vmatmul.mubr.msk.bf16.vlgmr.msra.gmra.mrb[60].mxu0 %vm3251_vm0, %v4383_v9 }
 0x369   :  { %7064 = vmatpush3.bf16.xpose.msra.mxu0 %v4518_v34  ;;  %7065 = vmatprep.mubr.msk.bf16.mxu0 %vm8349_vm1, %v8348_v22 }
 0x36a   :  { %7075 = vmatprep.subr.bf16.mxu0 %v8348_v22 }
 0x370   :  { %7066 = vmatmul.mubr.msk.bf16.vlgmr.msra.gmra.mrb[64].mxu0 %vm3251_vm0, %v8587_v15 }
 0x371   :  { %7076 = vmatpush3.bf16.xpose.msra.mxu0 %v4643_v18  ;;  %7077 = vmatprep.mubr.msk.bf16.mxu0 %vm8349_vm1, %v8348_v22 }
 0x372   :  { %7087 = vmatprep.subr.bf16.mxu0 %v8348_v22 }
 0x378   :  { %7078 = vmatmul.mubr.msk.bf16.vlgmr.msra.gmra.mrb[68].mxu0 %vm3251_vm0, %v4635_v25 }
 0x379   :  { %7088 = vmatpush3.bf16.xpose.msra.mxu0 %v4770_v46  ;;  %7089 = vmatprep.mubr.msk.bf16.mxu0 %vm8349_vm1, %v8348_v22 }
 0x37a   :  { %7099 = vmatprep.subr.bf16.mxu0 %v8348_v22 }
 0x380   :  { %7090 = vmatmul.mubr.msk.bf16.vlgmr.msra.gmra.mrb[72].mxu0 %vm3251_vm0, %v8585_v11 }
 0x381   :  { %7100 = vmatpush3.bf16.xpose.msra.mxu0 %v4895_v37  ;;  %7101 = vmatprep.mubr.msk.bf16.mxu0 %vm8349_vm1, %v8348_v22 }
 0x382   :  { %7111 = vmatprep.subr.bf16.mxu0 %v8348_v22 }
 0x388   :  { %v3292_v38 = vpop.f32.mrb[24].mxu0  ;;  %7102 = vmatmul.mubr.msk.bf16.vlgmr.msra.gmra.mrb[76].mxu0 %vm3251_vm0, %v4887_v44 }
 0x389   :  { %7112 = vmatpush3.bf16.xpose.msra.mxu0 %v5022_v14  ;;  %v6947_v39 = vpop.f32.mrb[25].mxu0  ;;  %v3300_v40 = vsel %vm3299_vm2, %v3292_v38, -inf  ;;  %7113 = vmatprep.mubr.msk.bf16.mxu0 %vm8349_vm1, %v8348_v22 }
 0x38a   :  { %3301 = vmax.xlane.f32.xlu0 %v3300_v40  ;;  %v3295_v27 = vpop.f32.mrb[26].mxu0  ;;  %7123 = vmatprep.subr.bf16.mxu0 %v8348_v22 }
 0x38b   :  { %v6948_v47 = vpop.f32.mrb[27].mxu0  ;;  %v3303_v41 = vsel %vm3299_vm2, %v3295_v27, -inf }
 0x38c   :  { %3304 = vmax.xlane.f32.xlu1 %v3303_v41 }
 0x390   :  { %7114 = vmatmul.mubr.msk.bf16.vlgmr.msra.gmra.mrb[80].mxu0 %vm3251_vm0, %v8589_v16 }
 0x391   :  { %7124 = vmatpush3.bf16.xpose.msra.mxu0 %v5147_v55  ;;  %7125 = vmatprep.mubr.msk.bf16.mxu0 %vm8349_vm1, %v8348_v22 }
 0x398   :  { %7126 = vmatmul.mubr.msk.bf16.vlgmr.msra.gmra.mrb[84].mxu0 %vm3251_vm0, %v5139_v53 }
 0x3fb   :  { %v8700_v51 = vpop.f32.mrb[28].mxu0 }
 0x3fc   :  { %v6959_v56 = vpop.f32.mrb[29].mxu0  ;;  %v3425_v57 = vsel %vm3299_vm2, %v8700_v51, -inf }
 0x3fd   :  { %3426 = vmax.xlane.f32.xlu0 %v3425_v57  ;;  %v8704_v58 = vpop.f32.mrb[30].mxu0 }
 0x3fe   :  { %v6960_v59 = vpop.f32.mrb[31].mxu0  ;;  %v3428_v60 = vsel %vm3299_vm2, %v8704_v58, -inf }
 0x401   :  { %3429 = vmax.xlane.f32.xlu0 %v3428_v60 }
 0x403   :  { %v8708_v61 = vpop.f32.mrb[32].mxu0 }
 0x404   :  { %v6971_v62 = vpop.f32.mrb[33].mxu0  ;;  %v3553_v63 = vsel %vm3299_vm2, %v8708_v61, -inf }
 0x405   :  { %3554 = vmax.xlane.f32.xlu1 %v3553_v63  ;;  %v8712_v0 = vpop.f32.mrb[34].mxu0 }
 0x406   :  { %v6972_v1 = vpop.f32.mrb[35].mxu0  ;;  %v3556_v2 = vsel %vm3299_vm2, %v8712_v0, -inf }
 0x407   :  { %3557 = vmax.xlane.f32.xlu0 %v3556_v2 }
 0x40b   :  { %v8716_v3 = vpop.f32.mrb[36].mxu0 }
 0x40c   :  { %v6983_v4 = vpop.f32.mrb[37].mxu0  ;;  %v3678_v11 = vsel %vm3299_vm2, %v8716_v3, -inf }
 0x40d   :  { %3679 = vmax.xlane.f32.xlu1 %v3678_v11  ;;  %v8720_v15 = vpop.f32.mrb[38].mxu0 }
 0x40e   :  { %v6984_v16 = vpop.f32.mrb[39].mxu0  ;;  %v3681_v12 = vsel %vm3299_vm2, %v8720_v15, -inf }
 0x40f   :  { %3682 = vmax.xlane.f32.xlu0 %v3681_v12 }
 0x413   :  { %v8726_v24 = vpop.f32.mrb[40].mxu0 }
 0x414   :  { %v6995_v19 = vpop.f32.mrb[41].mxu0  ;;  %v3805_v21 = vsel %vm3299_vm2, %v8726_v24, -inf }
 0x415   :  { %3806 = vmax.xlane.f32.xlu1 %v3805_v21  ;;  %v8732_v28 = vpop.f32.mrb[42].mxu0 }
 0x416   :  { %v6996_v29 = vpop.f32.mrb[43].mxu0  ;;  %v3808_v17 = vsel %vm3299_vm2, %v8732_v28, -inf }
 0x417   :  { %v3302_v30 = vpop.xlane.xlu0 %3301  ;;  %3809 = vmax.xlane.f32.xlu0 %v3808_v17 }
 0x418   :  { %v3306_v31 = vsub.f32 %v3292_v38, %v3302_v30 }
 0x419   :  { %v3305_v5 = vpop.xlane.xlu1 %3304 }
 0x41a   :  { %v3308_v20 = vmul.f32 1.442695, %v3306_v31  ;;  %v3307_v32 = vsub.f32 %v3295_v27, %v3305_v5 }
 0x41b   :  { %v8736_v33 = vpop.f32.mrb[44].mxu0 }
 0x41c   :  { %v3310_v9 = vmul.f32 1.442695, %v3307_v32  ;;  %v7007_v34 = vpop.f32.mrb[45].mxu0  ;;  %v3930_v35 = vsel %vm3299_vm2, %v8736_v33, -inf  ;;  %8070 = vpow2.f32 %v3308_v20 }
 0x41d   :  { %3931 = vmax.xlane.f32.xlu0 %v3930_v35  ;;  %v8740_v18 = vpop.f32.mrb[46].mxu0 }
 0x41e   :  { %8072 = vpow2.f32 %v3310_v9  ;;  %v7008_v25 = vpop.f32.mrb[47].mxu0  ;;  %v3933_v46 = vsel %vm3299_vm2, %v8740_v18, -inf }
 0x421   :  { %3934 = vmax.xlane.f32.xlu0 %v3933_v46 }
 0x423   :  { %v8744_v36 = vpop.f32.mrb[48].mxu0 }
 0x424   :  { %v7019_v37 = vpop.f32.mrb[49].mxu0  ;;  %v4057_v44 = vsel %vm3299_vm2, %v8744_v36, -inf }
 0x425   :  { %4058 = vmax.xlane.f32.xlu0 %v4057_v44  ;;  %v8748_v38 = vpop.f32.mrb[50].mxu0 }
 0x426   :  { %4204 = vrot.lane.b32.xlu1 %v8550_v54, %s8347_s4  ;;  %v7020_v14 = vpop.f32.mrb[51].mxu0  ;;  %v8752_v39 = vpop.eup %8070  ;;  %v4060_v27 = vsel %vm3299_vm2, %v8748_v38, -inf }
 0x428   :  { %v8754_v40 = vpop.eup %8072 }
 0x429   :  { %v3320_v47 = vpack.c.bf16 %v8754_v40, %v8752_v39  ;;  %4061 = vmax.xlane.f32.xlu0 %v4060_v27 }
 0x42b   :  { %6952 = vmatmul.mubr.msk.bf16.vlgmr.msra.gmra.mrb[24].mxu1 %vm3299_vm2, %v3320_v47  ;;  %v8761_v41 = vpop.f32.mrb[52].mxu0 }
 0x42c   :  { %6962 = vmatpush3.bf16.msra.mxu1 %v3448_v13  ;;  %v7031_v50 = vpop.f32.mrb[53].mxu0  ;;  %v4182_v55 = vsel %vm3299_vm2, %v8761_v41, -inf  ;;  %6963 = vmatprep.mubr.msk.bf16.mxu1 %vm8349_vm1, %v8348_v22 }
 0x42d   :  { %4183 = vmax.xlane.f32.xlu0 %v4182_v55  ;;  %v8767_v53 = vpop.f32.mrb[54].mxu0  ;;  %6973 = vmatprep.subr.bf16.mxu1 %v8348_v22 }
 0x42e   :  { %v7032_v56 = vpop.f32.mrb[55].mxu0  ;;  %v4185_v17 = vsel %vm3299_vm2, %v8767_v53, -inf }
 0x433   :  { %v8770_v57 = vpop.f32.mrb[56].mxu0 }
 0x434   :  { %v7043_v59 = vpop.f32.mrb[57].mxu0  ;;  %v4309_v60 = vsel %vm3299_vm2, %v8770_v57, -inf }
 0x435   :  { %4310 = vmax.xlane.f32.xlu0 %v4309_v60  ;;  %v8774_v62 = vpop.f32.mrb[58].mxu0 }
 0x436   :  { %v7044_v63 = vpop.f32.mrb[59].mxu0  ;;  %v4312_v1 = vsel %vm3299_vm2, %v8774_v62, -inf }
 0x439   :  { %4313 = vmax.xlane.f32.xlu0 %v4312_v1 }
 0x43b   :  { %v8778_v2 = vpop.f32.mrb[60].mxu0 }
 0x43c   :  { %v7055_v4 = vpop.f32.mrb[61].mxu0  ;;  %v4434_v11 = vsel %vm3299_vm2, %v8778_v2, -inf }
 0x43d   :  { %4435 = vmax.xlane.f32.xlu0 %v4434_v11  ;;  %v8782_v16 = vpop.f32.mrb[62].mxu0 }
 0x43e   :  { %v7056_v12 = vpop.f32.mrb[63].mxu0  ;;  %v4437_v20 = vsel %vm3299_vm2, %v8782_v16, -inf }
 0x443   :  { %v8784_v13 = vpop.f32.mrb[64].mxu0 }
 0x444   :  { %v7067_v19 = vpop.f32.mrb[65].mxu0  ;;  %v4561_v9 = vsel %vm3299_vm2, %v8784_v13, -inf }
 0x445   :  { %v8786_v21 = vpop.f32.mrb[66].mxu0 }
 0x446   :  { %v7068_v29 = vpop.f32.mrb[67].mxu0  ;;  %v4564_v46 = vsel %vm3299_vm2, %v8786_v21, -inf }
 0x44a   :  { %4186 = vmax.xlane.f32.xlu1 %v4185_v17 }
 0x44b   :  { %v8790_v30 = vpop.f32.mrb[68].mxu0 }
 0x44c   :  { %v7079_v31 = vpop.f32.mrb[69].mxu0  ;;  %v4686_v17 = vsel %vm3299_vm2, %v8790_v30, -inf }
 0x44d   :  { %v8792_v5 = vpop.f32.mrb[70].mxu0 }
 0x44e   :  { %4438 = vmax.xlane.f32.xlu1 %v4437_v20  ;;  %v7080_v32 = vpop.f32.mrb[71].mxu0  ;;  %v4689_v44 = vsel %vm3299_vm2, %v8792_v5, -inf }
 0x452   :  { %4562 = vmax.xlane.f32.xlu1 %v4561_v9 }
 0x453   :  { %4456 = vrot.lane.b32.xlu0 %v8558_v6, %s8347_s4  ;;  %v8800_v34 = vpop.f32.mrb[72].mxu0 }
 0x454   :  { %v7091_v35 = vpop.f32.mrb[73].mxu0  ;;  %v4813_v31 = vsel %vm3299_vm2, %v8800_v34, -inf }
 0x455   :  { %v8802_v25 = vpop.f32.mrb[74].mxu0 }
 0x456   :  { %4565 = vmax.xlane.f32.xlu1 %v4564_v46  ;;  %v7092_v37 = vpop.f32.mrb[75].mxu0  ;;  %v4816_v20 = vsel %vm3299_vm2, %v8802_v25, -inf }
 0x45a   :  { %4690 = vmax.xlane.f32.xlu1 %v4689_v44 }
 0x45b   :  { %v8808_v14 = vpop.f32.mrb[76].mxu0 }
 0x45c   :  { %v7103_v27 = vpop.f32.mrb[77].mxu0  ;;  %v4938_v32 = vsel %vm3299_vm2, %v8808_v14, -inf }
 0x45d   :  { %v8810_v47 = vpop.f32.mrb[78].mxu0 }
 0x45e   :  { %v7104_v50 = vpop.f32.mrb[79].mxu0  ;;  %v4941_v55 = vsel %vm3299_vm2, %v8810_v47, -inf }
 0x45f   :  { %4942 = vmax.xlane.f32.xlu1 %v4941_v55 }
 0x463   :  { %v8814_v56 = vpop.f32.mrb[80].mxu0 }
 0x464   :  { %v7115_v59 = vpop.f32.mrb[81].mxu0  ;;  %v5065_v60 = vsel %vm3299_vm2, %v8814_v56, -inf }
 0x465   :  { %5066 = vmax.xlane.f32.xlu1 %v5065_v60  ;;  %v8818_v63 = vpop.f32.mrb[82].mxu0 }
 0x466   :  { %v7116_v1 = vpop.f32.mrb[83].mxu0  ;;  %v5068_v4 = vsel %vm3299_vm2, %v8818_v63, -inf }
 0x469   :  { %5069 = vmax.xlane.f32.xlu1 %v5068_v4 }
 0x46b   :  { %v8822_v11 = vpop.f32.mrb[84].mxu0 }
 0x46c   :  { %v7127_v12 = vpop.f32.mrb[85].mxu0  ;;  %v5190_v9 = vsel %vm3299_vm2, %v8822_v11, -inf }
 0x46d   :  { %v8824_v19 = vpop.f32.mrb[86].mxu0 }
 0x46e   :  { %v7128_v29 = vpop.f32.mrb[87].mxu0 }
 0x472   :  { %4687 = vmax.xlane.f32.xlu0 %v4686_v17 }
 0x476   :  { %4814 = vmax.xlane.f32.xlu0 %v4813_v31 }
 0x47a   :  { %4817 = vmax.xlane.f32.xlu0 %v4816_v20  ;;  %4708 = vrot.lane.b32.xlu1 %v8562_v8, %s8347_s4 }
 0x47e   :  { %4939 = vmax.xlane.f32.xlu0 %v4938_v32 }
 0x482   :  { %5191 = vmax.xlane.f32.xlu0 %v5190_v9 }
 0x48a   :  { %v3427_v35 = vpop.xlane.xlu0 %3426 }
 0x48b   :  { %v3431_v46 = vsub.f32 %v8700_v51, %v3427_v35 }
 0x48d   :  { %v3433_v37 = vmul.f32 1.442695, %v3431_v46 }
 0x48e   :  { %v3430_v44 = vpop.xlane.xlu0 %3429 }
 0x48f   :  { %v3432_v27 = vsub.f32 %v8704_v58, %v3430_v44  ;;  %8074 = vpow2.f32 %v3433_v37 }
 0x491   :  { %v3435_v50 = vmul.f32 1.442695, %v3432_v27 }
 0x492   :  { %v3555_v55 = vpop.xlane.xlu1 %3554 }
 0x493   :  { %8076 = vpow2.f32 %v3435_v50  ;;  %v3559_v59 = vsub.f32 %v8708_v61, %v3555_v55 }
 0x494   :  { %v3558_v60 = vpop.xlane.xlu0 %3557 }
 0x495   :  { %v3561_v1 = vmul.f32 1.442695, %v3559_v59  ;;  %v3560_v4 = vsub.f32 %v8712_v0, %v3558_v60  ;;  %v5193_v0 = vsel %vm3299_vm2, %v8824_v19, -inf }
 0x497   :  { %v3563_v12 = vmul.f32 1.442695, %v3560_v4  ;;  %8078 = vpow2.f32 %v3561_v1 }
 0x498   :  { %4960 = vrot.lane.b32.xlu0 %v8560_v7, %s8347_s4 }
 0x499   :  { %8080 = vpow2.f32 %v3563_v12  ;;  %v8075_v58 = vpop.eup %8074 }
 0x49a   :  { %v3680_v51 = vpop.xlane.xlu1 %3679 }
 0x49b   :  { %v3684_v29 = vsub.f32 %v8716_v3, %v3680_v51  ;;  %v3437_v3 = vsel %vm3299_vm2, %v8075_v58, 0.0 }
 0x49c   :  { %v3683_v17 = vpop.xlane.xlu0 %3682  ;;  %5212 = vrot.lane.b32.xlu0 %v8564_v10, %s8347_s4 }
 0x49d   :  { %v8077_v31 = vpop.eup %8076  ;;  %v3686_v61 = vmul.f32 1.442695, %v3684_v29  ;;  %v3685_v20 = vsub.f32 %v8720_v15, %v3683_v17 }
 0x49e   :  { %5194 = vmax.xlane.f32.xlu1 %v5193_v0  ;;  %v3445_v32 = vpack.c.bf16 %v8077_v31, %v8075_v58 }
 0x49f   :  { %v3688_v9 = vmul.f32 1.442695, %v3685_v20  ;;  %8082 = vpow2.f32 %v3686_v61 }
 0x4a0   :  { %6964 = vmatmul.mubr.msk.bf16.vlgmr.msra.gmra.mrb[28].mxu1 %vm3299_vm2, %v3445_v32 }
 0x4a1   :  { %8084 = vpow2.f32 %v3688_v9  ;;  %6974 = vmatpush3.bf16.msra.mxu1 %v8548_v52  ;;  %6975 = vmatprep.mubr.msk.bf16.mxu1 %vm8349_vm1, %v8348_v22  ;;  %v8079_v35 = vpop.eup %8078  ;;  %v3440_v52 = vsel %vm3299_vm2, %v8077_v31, 0.0 }
 0x4a2   :  { %v3807_v46 = vpop.xlane.xlu1 %3806  ;;  %3438 = vadd.xlane.f32.xlu1 %v3437_v3  ;;  %6985 = vmatprep.subr.bf16.mxu1 %v8348_v22 }
 0x4a3   :  { %v8081_v15 = vpop.eup %8080  ;;  %v3811_v37 = vsub.f32 %v8726_v24, %v3807_v46 }
 0x4a4   :  { %v3810_v44 = vpop.xlane.xlu0 %3809  ;;  %v3573_v27 = vpack.c.bf16 %v8081_v15, %v8079_v35 }
 0x4a5   :  { %v3813_v50 = vmul.f32 1.442695, %v3811_v37  ;;  %v3812_v55 = vsub.f32 %v8732_v28, %v3810_v44 }
 0x4a6   :  { %3441 = vadd.xlane.f32.xlu1 %v3440_v52  ;;  %v3315_v52 = vsel %vm3299_vm2, %v8754_v40, 0.0 }
 0x4a7   :  { %v3815_v59 = vmul.f32 1.442695, %v3812_v55  ;;  %8086 = vpow2.f32 %v3813_v50 }
 0x4a8   :  { %6976 = vmatmul.mubr.msk.bf16.vlgmr.msra.gmra.mrb[32].mxu1 %vm3299_vm2, %v3573_v27 }
 0x4a9   :  { %8088 = vpow2.f32 %v3815_v59  ;;  %6986 = vmatpush3.bf16.msra.mxu1 %v8730_v26  ;;  %6987 = vmatprep.mubr.msk.bf16.mxu1 %vm8349_vm1, %v8348_v22  ;;  %v8083_v60 = vpop.eup %8082  ;;  %v3565_v26 = vsel %vm3299_vm2, %v8079_v35, 0.0 }
 0x4aa   :  { %v3932_v24 = vpop.xlane.xlu0 %3931  ;;  %6997 = vmatprep.subr.bf16.mxu1 %v8348_v22  ;;  %v3690_v37 = vsel %vm3299_vm2, %v8083_v60, 0.0 }
 0x4ab   :  { %v8085_v1 = vpop.eup %8084  ;;  %v3936_v28 = vsub.f32 %v8736_v33, %v3932_v24 }
 0x4ac   :  { %v3693_v4 = vsel %vm3299_vm2, %v8085_v1, 0.0  ;;  %v3698_v12 = vpack.c.bf16 %v8085_v1, %v8083_v60 }
 0x4ad   :  { %v3938_v51 = vmul.f32 1.442695, %v3936_v28  ;;  %3694 = vadd.xlane.f32.xlu1 %v3693_v4 }
 0x4ae   :  { %v3935_v29 = vpop.xlane.xlu0 %3934 }
 0x4af   :  { %8090 = vpow2.f32 %v3938_v51  ;;  %v3937_v58 = vsub.f32 %v8740_v18, %v3935_v29  ;;  %v3312_v18 = vsel %vm3299_vm2, %v8752_v39, 0.0 }
 0x4b0   :  { %6988 = vmatmul.mubr.msk.bf16.vlgmr.msra.gmra.mrb[36].mxu1 %vm3299_vm2, %v3698_v12  ;;  %v4205_v12 = vpop.permute.xlu1 %4204 }
 0x4b1   :  { %v3940_v17 = vmul.f32 1.442695, %v3937_v58  ;;  %6998 = vmatpush3.bf16.msra.mxu1 %v8546_v48  ;;  %3566 = vadd.xlane.f32.xlu1 %v3565_v26  ;;  %v8087_v31 = vpop.eup %8086 }
 0x4b2   :  { %v4059_v61 = vpop.xlane.xlu0 %4058  ;;  %6999 = vmatprep.mubr.msk.bf16.mxu1 %vm8349_vm1, %v8348_v22  ;;  %7009 = vmatprep.subr.bf16.mxu1 %v8348_v22  ;;  %v3817_v3 = vsel %vm3299_vm2, %v8087_v31, 0.0 }
 0x4b3   :  { %v8089_v33 = vpop.eup %8088  ;;  %8092 = vpow2.f32 %v3940_v17  ;;  %v4063_v20 = vsub.f32 %v8744_v36, %v4059_v61 }
 0x4b4   :  { %v3825_v0 = vpack.c.bf16 %v8089_v33, %v8087_v31 }
 0x4b5   :  { %v4065_v32 = vmul.f32 1.442695, %v4063_v20  ;;  %3313 = vadd.xlane.f32.xlu1 %v3312_v18 }
 0x4b6   :  { %v4062_v9 = vpop.xlane.xlu0 %4061 }
 0x4b7   :  { %8094 = vpow2.f32 %v4065_v32  ;;  %v4064_v48 = vsub.f32 %v8748_v38, %v4062_v9 }
 0x4b8   :  { %7000 = vmatmul.mubr.msk.bf16.vlgmr.msra.gmra.mrb[40].mxu1 %vm3299_vm2, %v3825_v0 }
 0x4b9   :  { %v8091_v35 = vpop.eup %8090  ;;  %v4067_v46 = vmul.f32 1.442695, %v4064_v48  ;;  %7010 = vmatpush3.bf16.msra.mxu1 %v8724_v23  ;;  %3818 = vadd.xlane.f32.xlu1 %v3817_v3  ;;  %v3568_v23 = vsel %vm3299_vm2, %v8081_v15, 0.0 }
 0x4ba   :  { %v4184_v36 = vpop.xlane.xlu0 %4183  ;;  %7011 = vmatprep.mubr.msk.bf16.mxu1 %vm8349_vm1, %v8348_v22  ;;  %7021 = vmatprep.subr.bf16.mxu1 %v8348_v22  ;;  %v3942_v39 = vsel %vm3299_vm2, %v8091_v35, 0.0 }
 0x4bb   :  { %8096 = vpow2.f32 %v4067_v46  ;;  %v4188_v38 = vsub.f32 %v8761_v41, %v4184_v36  ;;  %3691 = vadd.xlane.f32.xlu0 %v3690_v37 }
 0x4bd   :  { %v8093_v44 = vpop.eup %8092  ;;  %v4190_v27 = vmul.f32 1.442695, %v4188_v38  ;;  %3943 = vadd.xlane.f32.xlu1 %v3942_v39 }
 0x4be   :  { %v3950_v50 = vpack.c.bf16 %v8093_v44, %v8091_v35  ;;  %v3945_v29 = vsel %vm3299_vm2, %v8093_v44, 0.0 }
 0x4bf   :  { %8098 = vpow2.f32 %v4190_v27  ;;  %3569 = vadd.xlane.f32.xlu0 %v3568_v23 }
 0x4c0   :  { %7012 = vmatmul.mubr.msk.bf16.vlgmr.msra.gmra.mrb[44].mxu1 %vm3299_vm2, %v3950_v50 }
 0x4c1   :  { %v8095_v55 = vpop.eup %8094  ;;  %7022 = vmatpush3.bf16.msra.mxu1 %v8550_v54  ;;  %7023 = vmatprep.mubr.msk.bf16.mxu1 %vm8349_vm1, %v8348_v22  ;;  %v3820_v54 = vsel %vm3299_vm2, %v8089_v33, 0.0 }
 0x4c2   :  { %v4311_v41 = vpop.xlane.xlu0 %4310  ;;  %v4069_v59 = vsel %vm3299_vm2, %v8095_v55, 0.0  ;;  %7033 = vmatprep.subr.bf16.mxu1 %v8348_v22 }
 0x4c3   :  { %v4315_v15 = vsub.f32 %v8770_v57, %v4311_v41  ;;  %3316 = vadd.xlane.f32.xlu0 %v3315_v52  ;;  %4070 = vadd.xlane.f32.xlu1 %v4069_v59 }
 0x4c5   :  { %v8097_v60 = vpop.eup %8096  ;;  %v4317_v24 = vmul.f32 1.442695, %v4315_v15 }
 0x4c6   :  { %v4314_v1 = vpop.xlane.xlu0 %4313  ;;  %v4077_v28 = vpack.c.bf16 %v8097_v60, %v8095_v55  ;;  %v4072_v17 = vsel %vm3299_vm2, %v8097_v60, 0.0 }
 0x4c7   :  { %8100 = vpow2.f32 %v4317_v24  ;;  %v4316_v4 = vsub.f32 %v8774_v62, %v4314_v1  ;;  %3821 = vadd.xlane.f32.xlu0 %v3820_v54 }
 0x4c8   :  { %7024 = vmatmul.mubr.msk.bf16.vlgmr.msra.gmra.mrb[48].mxu1 %vm3299_vm2, %v4077_v28 }
 0x4c9   :  { %v8099_v40 = vpop.eup %8098  ;;  %v4319_v51 = vmul.f32 1.442695, %v4316_v4  ;;  %7034 = vmatpush3.bf16.msra.mxu1 %v4205_v12  ;;  %7035 = vmatprep.mubr.msk.bf16.mxu1 %vm8349_vm1, %v8348_v22 }
 0x4ca   :  { %v4436_v57 = vpop.xlane.xlu0 %4435  ;;  %v4194_v58 = vsel %vm3299_vm2, %v8099_v40, 0.0  ;;  %7045 = vmatprep.subr.bf16.mxu1 %v8348_v22 }
 0x4cb   :  { %8102 = vpow2.f32 %v4319_v51  ;;  %v4440_v62 = vsub.f32 %v8778_v2, %v4436_v57  ;;  %3946 = vadd.xlane.f32.xlu0 %v3945_v29  ;;  %4195 = vadd.xlane.f32.xlu1 %v4194_v58 }
 0x4cd   :  { %v4442_v26 = vmul.f32 1.442695, %v4440_v62 }
 0x4cf   :  { %8104 = vpow2.f32 %v4442_v26  ;;  %4073 = vadd.xlane.f32.xlu0 %v4072_v17 }
 0x4d1   :  { %v8101_v31 = vpop.eup %8100 }
 0x4d2   :  { %v4321_v61 = vsel %vm3299_vm2, %v8101_v31, 0.0 }
 0x4d3   :  { %4322 = vadd.xlane.f32.xlu1 %v4321_v61 }
 0x4d5   :  { %v8103_v33 = vpop.eup %8102 }
 0x4d6   :  { %v4329_v20 = vpack.c.bf16 %v8103_v33, %v8101_v31 }
 0x4d7   :  { %v4187_v18 = vpop.xlane.xlu1 %4186 }
 0x4d8   :  { %v4189_v0 = vsub.f32 %v8767_v53, %v4187_v18 }
 0x4d9   :  { %v8105_v32 = vpop.eup %8104 }
 0x4da   :  { %v4192_v9 = vmul.f32 1.442695, %v4189_v0  ;;  %v4446_v2 = vsel %vm3299_vm2, %v8105_v32, 0.0 }
 0x4db   :  { %v4439_v48 = vpop.xlane.xlu1 %4438  ;;  %4447 = vadd.xlane.f32.xlu1 %v4446_v2 }
 0x4dc   :  { %8106 = vpow2.f32 %v4192_v9  ;;  %v4441_v3 = vsub.f32 %v8782_v16, %v4439_v48 }
 0x4de   :  { %v4444_v35 = vmul.f32 1.442695, %v4441_v3 }
 0x4df   :  { %v4563_v46 = vpop.xlane.xlu1 %4562 }
 0x4e0   :  { %8108 = vpow2.f32 %v4444_v35  ;;  %v4567_v36 = vsub.f32 %v8784_v13, %v4563_v46  ;;  %v4324_v13 = vsel %vm3299_vm2, %v8103_v33, 0.0 }
 0x4e2   :  { %v4569_v37 = vmul.f32 1.442695, %v4567_v36 }
 0x4e3   :  { %v4566_v38 = vpop.xlane.xlu1 %4565 }
 0x4e4   :  { %8110 = vpow2.f32 %v4569_v37  ;;  %v4568_v39 = vsub.f32 %v8786_v21, %v4566_v38 }
 0x4e6   :  { %v8107_v53 = vpop.eup %8106  ;;  %v4571_v44 = vmul.f32 1.442695, %v4568_v39 }
 0x4e7   :  { %v4691_v27 = vpop.xlane.xlu1 %4690  ;;  %v4197_v23 = vsel %vm3299_vm2, %v8107_v53, 0.0  ;;  %v4202_v50 = vpack.c.bf16 %v8107_v53, %v8099_v40 }
 0x4e8   :  { %8112 = vpow2.f32 %v4571_v44  ;;  %4198 = vadd.xlane.f32.xlu0 %v4197_v23  ;;  %v4693_v57 = vsub.f32 %v8792_v5, %v4691_v27 }
 0x4e9   :  { %7036 = vmatmul.mubr.msk.bf16.vlgmr.msra.gmra.mrb[52].mxu1 %vm3299_vm2, %v4202_v50 }
 0x4ea   :  { %v8109_v16 = vpop.eup %8108  ;;  %7046 = vmatpush3.bf16.msra.mxu1 %v8558_v6  ;;  %7047 = vmatprep.mubr.msk.bf16.mxu1 %vm8349_vm1, %v8348_v22  ;;  %v4457_v6 = vpop.permute.xlu0 %4456  ;;  %v4696_v58 = vmul.f32 1.442695, %v4693_v57 }
 0x4eb   :  { %7057 = vmatprep.subr.bf16.mxu1 %v8348_v22  ;;  %v4454_v21 = vpack.c.bf16 %v8109_v16, %v8105_v32  ;;  %v4449_v15 = vsel %vm3299_vm2, %v8109_v16, 0.0 }
 0x4ec   :  { %v4943_v55 = vpop.xlane.xlu1 %4942  ;;  %4325 = vadd.xlane.f32.xlu0 %v4324_v13 }
 0x4ed   :  { %v4945_v41 = vsub.f32 %v8810_v47, %v4943_v55 }
 0x4ee   :  { %v8111_v52 = vpop.eup %8110 }
 0x4ef   :  { %v4948_v59 = vmul.f32 1.442695, %v4945_v41  ;;  %v4573_v60 = vsel %vm3299_vm2, %v8111_v52, 0.0 }
 0x4f0   :  { %4450 = vadd.xlane.f32.xlu0 %v4449_v15  ;;  %4574 = vadd.xlane.f32.xlu1 %v4573_v60 }
 0x4f1   :  { %8114 = vpow2.f32 %v4948_v59  ;;  %7048 = vmatmul.mubr.msk.bf16.vlgmr.msra.gmra.mrb[56].mxu1 %vm3299_vm2, %v4329_v20 }
 0x4f2   :  { %v8113_v24 = vpop.eup %8112  ;;  %7058 = vmatpush3.bf16.msra.mxu1 %v4457_v6  ;;  %v5067_v1 = vpop.xlane.xlu1 %5066  ;;  %7059 = vmatprep.mubr.msk.bf16.mxu1 %vm8349_vm1, %v8348_v22 }
 0x4f3   :  { %v5071_v47 = vsub.f32 %v8814_v56, %v5067_v1  ;;  %v4576_v54 = vsel %vm3299_vm2, %v8113_v24, 0.0  ;;  %7069 = vmatprep.subr.bf16.mxu1 %v8348_v22  ;;  %v4581_v28 = vpack.c.bf16 %v8113_v24, %v8111_v52 }
 0x4f4   :  { %4577 = vadd.xlane.f32.xlu0 %v4576_v54 }
 0x4f5   :  { %v5073_v4 = vmul.f32 1.442695, %v5071_v47  ;;  %v7880_v47 = vld [vmem:[#allocation12 + $0x4] ss:$16 sps:$4 sm:$0xff]  }
 0x4f6   :  { %v5070_v12 = vpop.xlane.xlu1 %5069  ;;  %6065 = vmatprep.subr.bf16.mxu0 %v7880_v47  ;;  %v7941_v47 = vld [vmem:[#allocation12 + $0x148] ss:$16 sps:$4 sm:$0xff]  }
 0x4f7   :  { %v5072_v40 = vsub.f32 %v8818_v63, %v5070_v12  ;;  %8116 = vpow2.f32 %v5073_v4  ;;  %v7886_v12 = vld [vmem:[#allocation12 + $0x24] ss:$16 sps:$4 sm:$0xff]  }
 0x4f9   :  { %v5075_v51 = vmul.f32 1.442695, %v5072_v40  ;;  %7060 = vmatmul.mubr.msk.bf16.vlgmr.msra.gmra.mrb[60].mxu1 %vm3299_vm2, %v4454_v21  ;;  %v7889_v40 = vld [vmem:[#allocation12 + $0x2c] ss:$16 sps:$4 sm:$0xff]  }
 0x4fa   :  { %7070 = vmatpush3.bf16.msra.mxu1 %v8562_v8  ;;  %7071 = vmatprep.mubr.msk.bf16.mxu1 %vm8349_vm1, %v8348_v22  ;;  %v4709_v31 = vpop.permute.xlu1 %4708 }
 0x4fb   :  { %v8933_v56 = vpop.eup %8114  ;;  %8118 = vpow2.f32 %v5075_v51  ;;  %7081 = vmatprep.subr.bf16.mxu1 %v8348_v22  ;;  %v7884_v51 = vld [vmem:[#allocation12 + $0x20] ss:$16 sps:$4 sm:$0xff]  }
 0x4fc   :  { %v4953_v29 = vsel %vm3299_vm2, %v8933_v56, 0.0  ;;  %8120 = vpow2.f32 %v4696_v58  ;;  %v7892_v58 = vld [vmem:[#allocation12 + $0x44] ss:$16 sps:$4 sm:$0xff]  }
 0x4fd   :  { %4954 = vadd.xlane.f32.xlu0 %v4953_v29 }
 0x4fe   :  { %v8939_v63 = vpop.f32.mrb[24].mxu1 }
 0x4ff   :  { %v6953_v62 = vpop.f32.mrb[25].mxu1  ;;  %v4688_v26 = vpop.xlane.xlu0 %4687 }
 0x500   :  { %v4692_v8 = vsub.f32 %v8790_v30, %v4688_v26  ;;  %v8942_v17 = vpop.f32.mrb[26].mxu1  ;;  %v7895_v62 = vld [vmem:[#allocation12 + $0x4c] ss:$16 sps:$4 sm:$0xff]   ;;  %v7890_v26 = vld [vmem:[#allocation12 + $0x40] ss:$16 sps:$4 sm:$0xff]  }
 0x501   :  { %v6954_v61 = vpop.f32.mrb[27].mxu1  ;;  %7072 = vmatmul.mubr.msk.bf16.vlgmr.msra.gmra.mrb[64].mxu1 %vm3299_vm2, %v4581_v28  ;;  %v8948_v20 = vpop.eup %8116  ;;  %v7881_v28 = vld [vmem:[#allocation12 + $0x8] ss:$16 sps:$4 sm:$0xff]  }
 0x502   :  { %v4694_v5 = vmul.f32 1.442695, %v4692_v8  ;;  %7082 = vmatpush3.bf16.msra.mxu1 %v4709_v31  ;;  %7083 = vmatprep.mubr.msk.bf16.mxu1 %vm8349_vm1, %v8348_v22  ;;  %v7893_v8 = vld [vmem:[#allocation12 + $0x48] ss:$16 sps:$4 sm:$0xff]   ;;  %v7896_v61 = vld [vmem:[#allocation12 + $0x60] ss:$16 sps:$4 sm:$0xff]  }
 0x503   :  { %v4815_v33 = vpop.xlane.xlu0 %4814  ;;  %7093 = vmatprep.subr.bf16.mxu1 %v8348_v22 }
 0x504   :  { %8122 = vpow2.f32 %v4694_v5  ;;  %v4819_v30 = vsub.f32 %v8800_v34, %v4815_v33  ;;  %v7898_v5 = vld [vmem:[#allocation12 + $0x64] ss:$16 sps:$4 sm:$0xff]   ;;  %v7899_v33 = vld [vmem:[#allocation12 + $0x68] ss:$16 sps:$4 sm:$0xff]  }
 0x505   :  { %v8951_v18 = vpop.eup %8118 }
 0x506   :  { %v5085_v0 = vpack.c.bf16 %v8951_v18, %v8948_v20  ;;  %v4821_v32 = vmul.f32 1.442695, %v4819_v30  ;;  %v8121_v46 = vpop.eup %8120  ;;  %v7901_v30 = vld [vmem:[#allocation12 + $0x6c] ss:$16 sps:$4 sm:$0xff]  }
 0x507   :  { %v4818_v9 = vpop.xlane.xlu0 %4817 }
 0x508   :  { %v4820_v2 = vsub.f32 %v8802_v25, %v4818_v9  ;;  %8124 = vpow2.f32 %v4821_v32  ;;  %v7907_v32 = vld [vmem:[#allocation12 + $0x8c] ss:$16 sps:$4 sm:$0xff]   ;;  %v7902_v9 = vld [vmem:[#allocation12 + $0x80] ss:$16 sps:$4 sm:$0xff]  }
 0x50a   :  { %v4823_v48 = vmul.f32 1.442695, %v4820_v2  ;;  %v7905_v2 = vld [vmem:[#allocation12 + $0x88] ss:$16 sps:$4 sm:$0xff]  }
 0x50b   :  { %v4940_v3 = vpop.xlane.xlu0 %4939 }
 0x50c   :  { %8126 = vpow2.f32 %v4823_v48  ;;  %v4944_v35 = vsub.f32 %v8808_v14, %v4940_v3  ;;  %v4701_v14 = vsel %vm3299_vm2, %v8121_v46, 0.0  ;;  %v7910_v3 = vld [vmem:[#allocation12 + $0xa4] ss:$16 sps:$4 sm:$0xff]  }
 0x50e   :  { %v8123_v36 = vpop.eup %8122  ;;  %v4946_v37 = vmul.f32 1.442695, %v4944_v35  ;;  %v7913_v35 = vld [vmem:[#allocation12 + $0xac] ss:$16 sps:$4 sm:$0xff]  }
 0x50f   :  { %v5192_v38 = vpop.xlane.xlu0 %5191  ;;  %v4698_v34 = vsel %vm3299_vm2, %v8123_v36, 0.0  ;;  %v4706_v39 = vpack.c.bf16 %v8121_v46, %v8123_v36  ;;  %v7908_v46 = vld [vmem:[#allocation12 + $0xa0] ss:$16 sps:$4 sm:$0xff]   ;;  %v7911_v36 = vld [vmem:[#allocation12 + $0xa8] ss:$16 sps:$4 sm:$0xff]  }
 0x510   :  { %8128 = vpow2.f32 %v4946_v37  ;;  %v5196_v53 = vsub.f32 %v8822_v11, %v5192_v38  ;;  %4699 = vadd.xlane.f32.xlu1 %v4698_v34  ;;  %v7916_v38 = vld [vmem:[#allocation12 + $0xc4] ss:$16 sps:$4 sm:$0xff]  }
 0x511   :  { %7084 = vmatmul.mubr.msk.bf16.vlgmr.msra.gmra.mrb[68].mxu1 %vm3299_vm2, %v4706_v39 }
 0x512   :  { %v5198_v25 = vmul.f32 1.442695, %v5196_v53  ;;  %7094 = vmatpush3.bf16.msra.mxu1 %v8560_v7  ;;  %7095 = vmatprep.mubr.msk.bf16.mxu1 %vm8349_vm1, %v8348_v22  ;;  %v8965_v44 = vpop.eup %8124  ;;  %v7914_v53 = vld [vmem:[#allocation12 + $0xc0] ss:$16 sps:$4 sm:$0xff]  }
 0x513   :  { %7105 = vmatprep.subr.bf16.mxu1 %v8348_v22  ;;  %v4961_v23 = vpop.permute.xlu0 %4960 }
 0x514   :  { %8130 = vpow2.f32 %v5198_v25  ;;  %4702 = vadd.xlane.f32.xlu1 %v4701_v14  ;;  %v7919_v25 = vld [vmem:[#allocation12 + $0xcc] ss:$16 sps:$4 sm:$0xff]   ;;  %v7917_v14 = vld [vmem:[#allocation12 + $0xc8] ss:$16 sps:$4 sm:$0xff]  }
 0x516   :  { %v8967_v27 = vpop.eup %8126 }
 0x517   :  { %v4833_v11 = vpack.c.bf16 %v8967_v27, %v8965_v44  ;;  %v5213_v55 = vpop.permute.xlu0 %5212 }
 0x519   :  { %7096 = vmatmul.mubr.msk.bf16.vlgmr.msra.gmra.mrb[72].mxu1 %vm3299_vm2, %v4833_v11  ;;  %v7922_v11 = vld [vmem:[#allocation12 + $0xe4] ss:$16 sps:$4 sm:$0xff]  }
 0x51a   :  { %v8129_v7 = vpop.eup %8128  ;;  %7106 = vmatpush3.bf16.msra.mxu1 %v4961_v23  ;;  %7107 = vmatprep.mubr.msk.bf16.mxu1 %vm8349_vm1, %v8348_v22  ;;  %v7925_v23 = vld [vmem:[#allocation12 + $0xec] ss:$16 sps:$4 sm:$0xff]  }
 0x51b   :  { %v4950_v50 = vsel %vm3299_vm2, %v8129_v7, 0.0  ;;  %7117 = vmatprep.subr.bf16.mxu1 %v8348_v22  ;;  %v4958_v16 = vpack.c.bf16 %v8933_v56, %v8129_v7  ;;  %v7887_v56 = vld [vmem:[#allocation12 + $0x28] ss:$16 sps:$4 sm:$0xff]  }
 0x51c   :  { %4951 = vadd.xlane.f32.xlu1 %v4950_v50  ;;  %v7920_v50 = vld [vmem:[#allocation12 + $0xe0] ss:$16 sps:$4 sm:$0xff]  }
 0x51e   :  { %v8131_v13 = vpop.eup %8130 }
 0x51f   :  { %v5202_v21 = vsel %vm3299_vm2, %v8131_v13, 0.0 }
 0x520   :  { %5203 = vadd.xlane.f32.xlu1 %v5202_v21  ;;  %v7929_v21 = vld [vmem:[#allocation12 + $0x108] ss:$16 sps:$4 sm:$0xff]  }
 0x521   :  { %7108 = vmatmul.mubr.msk.bf16.vlgmr.msra.gmra.mrb[76].mxu1 %vm3299_vm2, %v4958_v16  ;;  %v7923_v16 = vld [vmem:[#allocation12 + $0xe8] ss:$16 sps:$4 sm:$0xff]  }
 0x522   :  { %7118 = vmatpush3.bf16.msra.mxu1 %v8564_v10  ;;  %7119 = vmatprep.mubr.msk.bf16.mxu1 %vm8349_vm1, %v8348_v22 }
 0x523   :  { %7129 = vmatprep.subr.bf16.mxu1 %v8348_v22 }
 0x529   :  { %7120 = vmatmul.mubr.msk.bf16.vlgmr.msra.gmra.mrb[80].mxu1 %vm3299_vm2, %v5085_v0  ;;  %v7904_v0 = vld [vmem:[#allocation12 + $0x84] ss:$16 sps:$4 sm:$0xff]  }
 0x52a   :  { %7130 = vmatpush3.bf16.msra.mxu1 %v5213_v55  ;;  %7131 = vmatprep.mubr.msk.bf16.mxu1 %vm8349_vm1, %v8348_v22  ;;  %v7883_v22 = vld [vmem:[#allocation12 + $0xc] ss:$16 sps:$4 sm:$0xff]   ;;  %v7932_v55 = vld [vmem:[#allocation12 + $0x120] ss:$16 sps:$4 sm:$0xff]  }
 0x52b   :  { %v5195_v41 = vpop.xlane.xlu1 %5194  ;;  %6171 = vmatprep.subr.bf16.mxu1 %v7883_v22  ;;  %v7946_v22 = vld [vmem:[#allocation12 + $0x164] ss:$16 sps:$4 sm:$0xff]  }
 0x52c   :  { %v5197_v52 = vsub.f32 %v8824_v19, %v5195_v41  ;;  %v7878_v19 = vld [vmem:[#allocation12] ss:$16 sps:$4 sm:$0xff]   ;;  %v7934_v41 = vld [vmem:[#allocation12 + $0x124] ss:$16 sps:$4 sm:$0xff]  }
 0x52d   :  { %6066 = vmatpush1.bf16.msra.mxu0 %v7878_v19  ;;  %v7944_v19 = vld [vmem:[#allocation12 + $0x160] ss:$16 sps:$4 sm:$0xff]  }
 0x52e   :  { %v5200_v59 = vmul.f32 1.442695, %v5197_v52  ;;  %6067 = vmatprep.subr.bf16.mxu0 %v7886_v12  ;;  %v7935_v52 = vld [vmem:[#allocation12 + $0x128] ss:$16 sps:$4 sm:$0xff]  }
 0x52f   :  { %v8987_v15 = vpop.xlane.xlu1 %3438 }
 0x530   :  { %8132 = vpow2.f32 %v5200_v59  ;;  %v7937_v59 = vld [vmem:[#allocation12 + $0x12c] ss:$16 sps:$4 sm:$0xff]  }
 0x531   :  { %6068 = vmatpush1.bf16.msra.mxu0 %v7884_v51 }
 0x532   :  { %6069 = vmatprep.subr.bf16.mxu0 %v7892_v58  ;;  %v7955_v58 = vld [vmem:[#allocation12 + $0x18c] ss:$16 sps:$4 sm:$0xff]  }
 0x533   :  { %v8990_v24 = vpop.xlane.xlu1 %3441 }
 0x535   :  { %6070 = vmatpush1.bf16.msra.mxu0 %v7890_v26 }
 0x536   :  { %6071 = vmatprep.subr.bf16.mxu0 %v7898_v5  ;;  %v7958_v5 = vld [vmem:[#allocation12 + $0x1a4] ss:$16 sps:$4 sm:$0xff]  }
 0x539   :  { %6072 = vmatpush1.bf16.msra.mxu0 %v7896_v61  ;;  %v7953_v61 = vld [vmem:[#allocation12 + $0x188] ss:$16 sps:$4 sm:$0xff]  }
 0x53a   :  { %v8133_v10 = vpop.eup %8132  ;;  %v8993_v1 = vpop.xlane.xlu1 %3694  ;;  %6073 = vmatprep.subr.bf16.mxu0 %v7904_v0 }
 0x53b   :  { %v5205_v60 = vsel %vm3299_vm2, %v8133_v10, 0.0  ;;  %v5210_v6 = vpack.c.bf16 %v8133_v10, %v8131_v13  ;;  %v7926_v13 = vld [vmem:[#allocation12 + $0x100] ss:$16 sps:$4 sm:$0xff]   ;;  %v7940_v10 = vld [vmem:[#allocation12 + $0x144] ss:$16 sps:$4 sm:$0xff]  }
 0x53c   :  { %5206 = vadd.xlane.f32.xlu0 %v5205_v60  ;;  %v7943_v60 = vld [vmem:[#allocation12 + $0x14c] ss:$16 sps:$4 sm:$0xff]  }
 0x53d   :  { %7132 = vmatmul.mubr.msk.bf16.vlgmr.msra.gmra.mrb[84].mxu1 %vm3299_vm2, %v5210_v6  ;;  %6074 = vmatpush1.bf16.msra.mxu0 %v7902_v9  ;;  %v7938_v6 = vld [vmem:[#allocation12 + $0x140] ss:$16 sps:$4 sm:$0xff]  }
 0x53e   :  { %v8995_v54 = vpop.xlane.xlu1 %3566  ;;  %6172 = vmatpush1.bf16.msra.mxu1 %v7881_v28  ;;  %6075 = vmatprep.subr.bf16.mxu0 %v7910_v3  ;;  %v7949_v28 = vld [vmem:[#allocation12 + $0x16c] ss:$16 sps:$4 sm:$0xff]   ;;  %v7964_v3 = vld [vmem:[#allocation12 + $0x1c4] ss:$16 sps:$4 sm:$0xff]  }
 0x53f   :  { %6173 = vmatprep.subr.bf16.mxu1 %v7889_v40 }
 0x541   :  { %6076 = vmatpush1.bf16.msra.mxu0 %v7908_v46 }
 0x542   :  { %v3314_v57 = vpop.xlane.xlu1 %3313  ;;  %6174 = vmatpush1.bf16.msra.mxu1 %v7887_v56  ;;  %6077 = vmatprep.subr.bf16.mxu0 %v7916_v38  ;;  %v7965_v38 = vld [vmem:[#allocation12 + $0x1c8] ss:$16 sps:$4 sm:$0xff]  }
 0x543   :  { %8134 = vrcp.f32 %v3314_v57  ;;  %6175 = vmatprep.subr.bf16.mxu1 %v7895_v62  ;;  %v7952_v57 = vld [vmem:[#allocation12 + $0x184] ss:$16 sps:$4 sm:$0xff]  }
 0x545   :  { %6078 = vmatpush1.bf16.msra.mxu0 %v7914_v53 }
 0x546   :  { %6176 = vmatpush1.bf16.msra.mxu1 %v7893_v8  ;;  %6079 = vmatprep.subr.bf16.mxu0 %v7922_v11  ;;  %v7971_v11 = vld [vmem:[#allocation12 + $0x1e8] ss:$16 sps:$4 sm:$0xff]  }
 0x547   :  { %6177 = vmatprep.subr.bf16.mxu1 %v7901_v30  ;;  %v7961_v30 = vld [vmem:[#allocation12 + $0x1ac] ss:$16 sps:$4 sm:$0xff]  }
 0x548   :  { %v8997_v4 = vpop.xlane.xlu0 %3691 }
 0x549   :  { %6080 = vmatpush1.bf16.msra.mxu0 %v7920_v50 }
 0x54a   :  { %6178 = vmatpush1.bf16.msra.mxu1 %v7899_v33  ;;  %v7959_v33 = vld [vmem:[#allocation12 + $0x1a8] ss:$16 sps:$4 sm:$0xff]  }
 0x54b   :  { %6179 = vmatprep.subr.bf16.mxu1 %v7907_v32 }
 0x54c   :  { %v8999_v29 = vpop.xlane.xlu0 %3569 }
 0x54d   :  { %v8135_v48 = vpop.eup %8134 }
 0x54e   :  { %6180 = vmatpush1.bf16.msra.mxu1 %v7905_v2  ;;  %v3365_v34 = vmul.f32 %v8135_v48, %v8939_v63  ;;  %v7928_v63 = vld [vmem:[#allocation12 + $0x104] ss:$16 sps:$4 sm:$0xff]  }
 0x54f   :  { %6181 = vmatprep.subr.bf16.mxu1 %v7913_v35  ;;  %6081 = vmatprep.subr.bf16.mxu0 %v7928_v63  ;;  %v7967_v35 = vld [vmem:[#allocation12 + $0x1cc] ss:$16 sps:$4 sm:$0xff]  }
 0x550   :  { %v3317_v31 = vpop.xlane.xlu0 %3316  ;;  %6082 = vmatpush1.bf16.msra.mxu0 %v7926_v13 }
 0x551   :  { %8136 = vrcp.f32 %v3317_v31  ;;  %6083 = vmatprep.subr.bf16.mxu0 %v7934_v41  ;;  %v7950_v31 = vld [vmem:[#allocation12 + $0x180] ss:$16 sps:$4 sm:$0xff]  }
 0x552   :  { %6182 = vmatpush1.bf16.msra.mxu1 %v7911_v36  ;;  %8138 = vrcp.f32 %v8987_v15  ;;  %v7947_v15 = vld [vmem:[#allocation12 + $0x168] ss:$16 sps:$4 sm:$0xff]  }
 0x553   :  { %6183 = vmatprep.subr.bf16.mxu1 %v7919_v25  ;;  %8140 = vrcp.f32 %v8990_v24  ;;  %v7968_v25 = vld [vmem:[#allocation12 + $0x1e0] ss:$16 sps:$4 sm:$0xff]  }
 0x554   :  { %6084 = vmatpush1.bf16.msra.mxu0 %v7932_v55  ;;  %8142 = vrcp.f32 %v8995_v54 }
 0x555   :  { %6085 = vmatprep.subr.bf16.mxu0 %v7940_v10  ;;  %8144 = vrcp.f32 %v8999_v29  ;;  %v7956_v29 = vld [vmem:[#allocation12 + $0x1a0] ss:$16 sps:$4 sm:$0xff]  }
 0x556   :  { %6184 = vmatpush1.bf16.msra.mxu1 %v7917_v14  ;;  %8146 = vrcp.f32 %v8993_v1  ;;  %v7962_v1 = vld [vmem:[#allocation12 + $0x1c0] ss:$16 sps:$4 sm:$0xff]   ;;  %v7973_v14 = vld [vmem:[#allocation12 + $0x1ec] ss:$16 sps:$4 sm:$0xff]  }
 0x557   :  { %6185 = vmatprep.subr.bf16.mxu1 %v7925_v23  ;;  %8148 = vrcp.f32 %v8997_v4  ;;  %v7970_v4 = vld [vmem:[#allocation12 + $0x1e4] ss:$16 sps:$4 sm:$0xff]  }
 0x558   :  { %6086 = vmatpush1.bf16.msra.mxu0 %v7938_v6 }
 0x559   :  { %6087 = vmatprep.subr.bf16.mxu0 %v7946_v22 }
 0x55a   :  { %6186 = vmatpush1.bf16.msra.mxu1 %v7923_v16 }
 0x55b   :  { %v8137_v37 = vpop.eup %8136 }
 0x55c   :  { %v3366_v39 = vmul.f32 %v8137_v37, %v8942_v17  ;;  %v7931_v17 = vld [vmem:[#allocation12 + $0x10c] ss:$16 sps:$4 sm:$0xff]   ;;  %v8139_v12 = vpop.eup %8138  ;;  %6088 = vmatpush1.bf16.msra.mxu0 %v7944_v19 }
 0x55d   :  { %6187 = vmatprep.subr.bf16.mxu1 %v7931_v17  ;;  %v8141_v51 = vpop.eup %8140  ;;  %6089 = vmatprep.subr.bf16.mxu0 %v7952_v57 }
 0x55e   :  { %v3367_v7 = vpack.c.bf16 %v3366_v39, %v3365_v34  ;;  %6188 = vmatpush1.bf16.msra.mxu1 %v7929_v21  ;;  %v8143_v32 = vpop.eup %8142  ;;  %v3819_v34 = vpop.xlane.xlu1 %3818 }
 0x55f   :  { %6189 = vmatprep.subr.bf16.mxu1 %v7937_v59  ;;  %v8145_v2 = vpop.eup %8144  ;;  %v3822_v39 = vpop.xlane.xlu0 %3821  ;;  %8150 = vrcp.f32 %v3819_v34 }
 0x560   :  { %3368 = vst.msk [vmem:[#allocation5] sm:$0xff] %vm3251_vm0, %v3367_v7  ;;  %6090 = vmatpush1.bf16.msra.mxu0 %v7950_v31  ;;  %8152 = vrcp.f32 %v3822_v39  ;;  %v8147_v7 = vpop.eup %8146 }
 0x561   :  { %6091 = vmatprep.subr.bf16.mxu0 %v7958_v5  ;;  %v8149_v16 = vpop.eup %8148 }
 0x562   :  { %6190 = vmatpush1.bf16.msra.mxu1 %v7935_v52  ;;  %v3944_v17 = vpop.xlane.xlu1 %3943 }
 0x563   :  { %6191 = vmatprep.subr.bf16.mxu1 %v7943_v60  ;;  %v3947_v41 = vpop.xlane.xlu0 %3946  ;;  %8154 = vrcp.f32 %v3944_v17 }
 0x564   :  { %6092 = vmatpush1.bf16.msra.mxu0 %v7956_v29  ;;  %8156 = vrcp.f32 %v3947_v41 }
 0x565   :  { %6093 = vmatprep.subr.bf16.mxu0 %v7964_v3  ;;  %v5077_v3 = vsel %vm3299_vm2, %v8948_v20, 0.0 }
 0x566   :  { %6192 = vmatpush1.bf16.msra.mxu1 %v7941_v47 }
 0x567   :  { %6193 = vmatprep.subr.bf16.mxu1 %v7949_v28 }
 0x568   :  { %6094 = vmatpush1.bf16.msra.mxu0 %v7962_v1 }
 0x569   :  { %6095 = vmatprep.subr.bf16.mxu0 %v7970_v4  ;;  %v8151_v10 = vpop.eup %8150 }
 0x56a   :  { %6194 = vmatpush1.bf16.msra.mxu1 %v7947_v15  ;;  %v8153_v6 = vpop.eup %8152  ;;  %v4071_v15 = vpop.xlane.xlu1 %4070 }
 0x56b   :  { %6195 = vmatprep.subr.bf16.mxu1 %v7955_v58  ;;  %8158 = vrcp.f32 %v4071_v15 }
 0x56c   :  { %6096 = vmatpush1.bf16.msra.mxu0 %v7968_v25 }
 0x56e   :  { %6196 = vmatpush1.bf16.msra.mxu1 %v7953_v61  ;;  %v5080_v61 = vsel %vm3299_vm2, %v8951_v18, 0.0  ;;  %v7976_v18 = vld [vmem:[#allocation12 + $0x204] ss:$16 sps:$4 sm:$0xff]  }
 0x56f   :  { %6197 = vmatprep.subr.bf16.mxu1 %v7961_v30  ;;  %6118 = vmatprep.subr.bf16.mxu0 %v7976_v18 }
 0x572   :  { %6198 = vmatpush1.bf16.msra.mxu1 %v7959_v33  ;;  %v4828_v33 = vsel %vm3299_vm2, %v8967_v27, 0.0  ;;  %v4825_v27 = vsel %vm3299_vm2, %v8965_v44, 0.0 }
 0x573   :  { %v3487_v24 = vpop.f32.mrb[28].mxu1  ;;  %6199 = vmatprep.subr.bf16.mxu1 %v7967_v35  ;;  %v7979_v35 = vld [vmem:[#allocation12 + $0x20c] ss:$16 sps:$4 sm:$0xff]  }
 0x574   :  { %v6965_v40 = vpop.f32.mrb[29].mxu1  ;;  %v3494_v62 = vmul.f32 %v8139_v12, %v3487_v24  ;;  %v4074_v24 = vpop.xlane.xlu0 %4073 }
 0x575   :  { %v3490_v56 = vpop.f32.mrb[30].mxu1  ;;  %v8155_v40 = vpop.eup %8154  ;;  %8160 = vrcp.f32 %v4074_v24 }
 0x576   :  { %v3495_v26 = vmul.f32 %v8141_v51, %v3490_v56  ;;  %v6966_v8 = vpop.f32.mrb[31].mxu1  ;;  %6200 = vmatpush1.bf16.msra.mxu1 %v7965_v38  ;;  %v8157_v58 = vpop.eup %8156 }
 0x577   :  { %6201 = vmatprep.subr.bf16.mxu1 %v7973_v14  ;;  %v8159_v29 = vpop.eup %8158 }
 0x578   :  { %v3496_v54 = vpack.c.bf16 %v3495_v26, %v3494_v62 }
 0x57a   :  { %3498 = vrot.lane.b32.xlu0 %v3496_v54, %s8347_s4  ;;  %6202 = vmatpush1.bf16.msra.mxu1 %v7971_v11 }
 0x57b   :  { %v3611_v0 = vpop.f32.mrb[32].mxu1  ;;  %6224 = vmatprep.subr.bf16.mxu1 %v7979_v35 }
 0x57c   :  { %v6977_v9 = vpop.f32.mrb[33].mxu1  ;;  %v3618_v46 = vmul.f32 %v8143_v32, %v3611_v0 }
 0x57d   :  { %v3614_v48 = vpop.f32.mrb[34].mxu1 }
 0x57e   :  { %v3619_v36 = vmul.f32 %v8145_v2, %v3614_v48  ;;  %v6978_v37 = vpop.f32.mrb[35].mxu1 }
 0x57f   :  { %v8161_v30 = vpop.eup %8160 }
 0x580   :  { %v3620_v53 = vpack.c.bf16 %v3619_v36, %v3618_v46  ;;  %v4196_v46 = vpop.xlane.xlu1 %4195  ;;  %v4199_v36 = vpop.xlane.xlu0 %4198 }
 0x581   :  { %8162 = vrcp.f32 %v4196_v46 }
 0x582   :  { %3621 = vst.msk [vmem:[#allocation5 + $0x8] sm:$0xff] %vm3251_vm0, %v3620_v53  ;;  %8164 = vrcp.f32 %v4199_v36 }
 0x583   :  { %v3740_v23 = vpop.f32.mrb[36].mxu1 }
 0x584   :  { %v6989_v50 = vpop.f32.mrb[37].mxu1  ;;  %v3747_v13 = vmul.f32 %v8149_v16, %v3740_v23  ;;  %v4323_v37 = vpop.xlane.xlu1 %4322 }
 0x585   :  { %v3743_v63 = vpop.f32.mrb[38].mxu1  ;;  %v4326_v1 = vpop.xlane.xlu0 %4325  ;;  %8166 = vrcp.f32 %v4323_v37 }
 0x586   :  { %v3748_v21 = vmul.f32 %v8147_v7, %v3743_v63  ;;  %v6990_v55 = vpop.f32.mrb[39].mxu1  ;;  %8168 = vrcp.f32 %v4326_v1 }
 0x588   :  { %v3749_v52 = vpack.c.bf16 %v3748_v21, %v3747_v13  ;;  %v4448_v11 = vpop.xlane.xlu1 %4447 }
 0x589   :  { %v4451_v23 = vpop.xlane.xlu0 %4450  ;;  %8170 = vrcp.f32 %v4448_v11 }
 0x58a   :  { %3751 = vrot.lane.b32.xlu1 %v3749_v52, %s8347_s4  ;;  %8172 = vrcp.f32 %v4451_v23 }
 0x58b   :  { %v3863_v59 = vpop.f32.mrb[40].mxu1  ;;  %v8163_v34 = vpop.eup %8162 }
 0x58c   :  { %v7001_v60 = vpop.f32.mrb[41].mxu1  ;;  %v3870_v22 = vmul.f32 %v8151_v10, %v3863_v59  ;;  %v8165_v4 = vpop.eup %8164 }
 0x58d   :  { %v3866_v47 = vpop.f32.mrb[42].mxu1  ;;  %v4575_v41 = vpop.xlane.xlu1 %4574 }
 0x58e   :  { %v3871_v19 = vmul.f32 %v8153_v6, %v3866_v47  ;;  %v7002_v28 = vpop.f32.mrb[43].mxu1  ;;  %v4578_v52 = vpop.xlane.xlu0 %4577  ;;  %8174 = vrcp.f32 %v4575_v41 }
 0x58f   :  { %v8167_v50 = vpop.eup %8166  ;;  %8176 = vrcp.f32 %v4578_v52  ;;  %v7980_v52 = vld [vmem:[#allocation12 + $0x220] ss:$16 sps:$4 sm:$0xff]  }
 0x590   :  { %v3872_v12 = vpack.c.bf16 %v3871_v19, %v3870_v22  ;;  %v8169_v63 = vpop.eup %8168 }
 0x592   :  { %3873 = vst.msk [vmem:[#allocation5 + $0x10] sm:$0xff] %vm3251_vm0, %v3872_v12 }
 0x593   :  { %v3992_v51 = vpop.f32.mrb[44].mxu1  ;;  %v8171_v60 = vpop.eup %8170 }
 0x594   :  { %v9014_v56 = vmul.f32 %v8155_v40, %v3992_v51  ;;  %v7013_v57 = vpop.f32.mrb[45].mxu1  ;;  %v8173_v47 = vpop.eup %8172 }
 0x595   :  { %v3995_v62 = vpop.f32.mrb[46].mxu1 }
 0x596   :  { %v9016_v26 = vmul.f32 %v8157_v58, %v3995_v62  ;;  %v7014_v8 = vpop.f32.mrb[47].mxu1 }
 0x598   :  { %v4001_v31 = vpack.c.bf16 %v9016_v26, %v9014_v56  ;;  %v8175_v51 = vpop.eup %8174 }
 0x599   :  { %5081 = vadd.xlane.f32.xlu0 %v5080_v61  ;;  %v8177_v58 = vpop.eup %8176 }
 0x59b   :  { %v4115_v54 = vpop.f32.mrb[48].mxu1 }
 0x59c   :  { %v7025_v5 = vpop.f32.mrb[49].mxu1  ;;  %v4122_v32 = vmul.f32 %v8159_v29, %v4115_v54 }
 0x59d   :  { %v4118_v0 = vpop.f32.mrb[50].mxu1  ;;  %4829 = vadd.xlane.f32.xlu0 %v4828_v33  ;;  %v4700_v12 = vpop.xlane.xlu1 %4699 }
 0x59e   :  { %v4123_v9 = vmul.f32 %v8161_v30, %v4118_v0  ;;  %v7026_v2 = vpop.f32.mrb[51].mxu1  ;;  %8178 = vrcp.f32 %v4700_v12  ;;  %v4955_v33 = vpop.xlane.xlu0 %4954  ;;  %v8000_v12 = vld [vmem:[#allocation12 + $0x284] ss:$16 sps:$4 sm:$0xff]  }
 0x5a0   :  { %v4124_v48 = vpack.c.bf16 %v4123_v9, %v4122_v32 }
 0x5a1   :  { %v4703_v29 = vpop.xlane.xlu1 %4702 }
 0x5a2   :  { %4125 = vst.msk [vmem:[#allocation5 + $0x18] sm:$0xff] %vm3251_vm0, %v4124_v48  ;;  %8180 = vrcp.f32 %v4703_v29  ;;  %v7998_v29 = vld [vmem:[#allocation12 + $0x280] ss:$16 sps:$4 sm:$0xff]  }
 0x5a3   :  { %8182 = vrcp.f32 %v4955_v33  ;;  %v8006_v33 = vld [vmem:[#allocation12 + $0x2a4] ss:$16 sps:$4 sm:$0xff]  }
 0x5a8   :  { %v8179_v0 = vpop.eup %8178 }
 0x5a9   :  { %v4952_v46 = vpop.xlane.xlu1 %4951 }
 0x5aa   :  { %8184 = vrcp.f32 %v4952_v46  ;;  %v8021_v46 = vld [vmem:[#allocation12 + $0x2ec] ss:$16 sps:$4 sm:$0xff]  }
 0x5ac   :  { %v8181_v9 = vpop.eup %8180 }
 0x5ae   :  { %5078 = vadd.xlane.f32.xlu1 %v5077_v3 }
 0x5b2   :  { %4826 = vadd.xlane.f32.xlu1 %v4825_v27 }
 0x5bc   :  { %v4244_v38 = vpop.f32.mrb[52].mxu1 }
 0x5bd   :  { %v7037_v20 = vpop.f32.mrb[53].mxu1  ;;  %v9029_v53 = vmul.f32 %v8163_v34, %v4244_v38 }
 0x5be   :  { %v4247_v39 = vpop.f32.mrb[54].mxu1 }
 0x5bf   :  { %v9031_v25 = vmul.f32 %v8165_v4, %v4247_v39  ;;  %v7038_v14 = vpop.f32.mrb[55].mxu1  ;;  %v8183_v4 = vpop.eup %8182 }
 0x5c1   :  { %v4253_v44 = vpack.c.bf16 %v9031_v25, %v9029_v53  ;;  %v8185_v53 = vpop.eup %8184 }
 0x5c4   :  { %v4367_v7 = vpop.f32.mrb[56].mxu1 }
 0x5c5   :  { %v7049_v16 = vpop.f32.mrb[57].mxu1  ;;  %v4374_v13 = vmul.f32 %v8167_v50, %v4367_v7  ;;  %v5204_v7 = vpop.xlane.xlu1 %5203 }
 0x5c6   :  { %v4370_v17 = vpop.f32.mrb[58].mxu1  ;;  %8186 = vrcp.f32 %v5204_v7  ;;  %v8034_v7 = vld [vmem:[#allocation12 + $0x340] ss:$16 sps:$4 sm:$0xff]  }
 0x5c7   :  { %v4375_v21 = vmul.f32 %v8169_v63, %v4370_v17  ;;  %v7050_v55 = vpop.f32.mrb[59].mxu1  ;;  %v7977_v17 = vld [vmem:[#allocation12 + $0x208] ss:$16 sps:$4 sm:$0xff]  }
 0x5c8   :  { %v7985_v55 = vld [vmem:[#allocation12 + $0x22c] ss:$16 sps:$4 sm:$0xff]  }
 0x5c9   :  { %v4376_v59 = vpack.c.bf16 %v4375_v21, %v4374_v13  ;;  %v5207_v35 = vpop.xlane.xlu0 %5206  ;;  %v7982_v21 = vld [vmem:[#allocation12 + $0x224] ss:$16 sps:$4 sm:$0xff]  }
 0x5ca   :  { %8188 = vrcp.f32 %v5207_v35  ;;  %v8018_v35 = vld [vmem:[#allocation12 + $0x2e4] ss:$16 sps:$4 sm:$0xff]  }
 0x5cb   :  { %4377 = vst.msk [vmem:[#allocation5 + $0x20] sm:$0xff] %vm3251_vm0, %v4376_v59  ;;  %v7983_v59 = vld [vmem:[#allocation12 + $0x228] ss:$16 sps:$4 sm:$0xff]  }
 0x5cc   :  { %v4496_v10 = vpop.f32.mrb[60].mxu1 }
 0x5cd   :  { %v7061_v6 = vpop.f32.mrb[61].mxu1  ;;  %v4503_v19 = vmul.f32 %v8171_v60, %v4496_v10  ;;  %v7988_v10 = vld [vmem:[#allocation12 + $0x244] ss:$16 sps:$4 sm:$0xff]   ;;  %v7991_v60 = vld [vmem:[#allocation12 + $0x24c] ss:$16 sps:$4 sm:$0xff]  }
 0x5ce   :  { %v4499_v22 = vpop.f32.mrb[62].mxu1  ;;  %v7986_v6 = vld [vmem:[#allocation12 + $0x240] ss:$16 sps:$4 sm:$0xff]  }
 0x5cf   :  { %v4504_v28 = vmul.f32 %v8173_v47, %v4499_v22  ;;  %v7062_v15 = vpop.f32.mrb[63].mxu1  ;;  %v7989_v47 = vld [vmem:[#allocation12 + $0x248] ss:$16 sps:$4 sm:$0xff]   ;;  %v7994_v22 = vld [vmem:[#allocation12 + $0x264] ss:$16 sps:$4 sm:$0xff]  }
 0x5d0   :  { %v7995_v15 = vld [vmem:[#allocation12 + $0x268] ss:$16 sps:$4 sm:$0xff]  }
 0x5d1   :  { %v4505_v24 = vpack.c.bf16 %v4504_v28, %v4503_v19  ;;  %v7997_v19 = vld [vmem:[#allocation12 + $0x26c] ss:$16 sps:$4 sm:$0xff]   ;;  %v7992_v28 = vld [vmem:[#allocation12 + $0x260] ss:$16 sps:$4 sm:$0xff]  }
 0x5d3   :  { %4507 = vrot.lane.b32.xlu0 %v4505_v24, %s8347_s4 }
 0x5d4   :  { %v4619_v40 = vpop.f32.mrb[64].mxu1 }
 0x5d5   :  { %v7073_v57 = vpop.f32.mrb[65].mxu1  ;;  %v4626_v8 = vmul.f32 %v8175_v51, %v4619_v40  ;;  %v8003_v40 = vld [vmem:[#allocation12 + $0x28c] ss:$16 sps:$4 sm:$0xff]   ;;  %v8187_v51 = vpop.eup %8186 }
 0x5d6   :  { %v4622_v62 = vpop.f32.mrb[66].mxu1 }
 0x5d7   :  { %v4627_v61 = vmul.f32 %v8177_v58, %v4622_v62  ;;  %v7074_v54 = vpop.f32.mrb[67].mxu1  ;;  %v8189_v58 = vpop.eup %8188 }
 0x5d9   :  { %v4628_v5 = vpack.c.bf16 %v4627_v61, %v4626_v8 }
 0x5db   :  { %4629 = vst.msk [vmem:[#allocation5 + $0x28] sm:$0xff] %vm3251_vm0, %v4628_v5  ;;  %v8001_v5 = vld [vmem:[#allocation12 + $0x288] ss:$16 sps:$4 sm:$0xff]  }
 0x5e4   :  { %v4748_v30 = vpop.f32.mrb[68].mxu1 }
 0x5e5   :  { %v7085_v32 = vpop.f32.mrb[69].mxu1  ;;  %v4755_v48 = vmul.f32 %v8179_v0, %v4748_v30  ;;  %v8009_v0 = vld [vmem:[#allocation12 + $0x2ac] ss:$16 sps:$4 sm:$0xff]  }
 0x5e6   :  { %v4751_v2 = vpop.f32.mrb[70].mxu1  ;;  %v8004_v32 = vld [vmem:[#allocation12 + $0x2a0] ss:$16 sps:$4 sm:$0xff]  }
 0x5e7   :  { %v4756_v3 = vmul.f32 %v8181_v9, %v4751_v2  ;;  %v7086_v18 = vpop.f32.mrb[71].mxu1  ;;  %v8007_v9 = vld [vmem:[#allocation12 + $0x2a8] ss:$16 sps:$4 sm:$0xff]   ;;  %v8012_v2 = vld [vmem:[#allocation12 + $0x2c4] ss:$16 sps:$4 sm:$0xff]  }
 0x5e8   :  { %v8013_v18 = vld [vmem:[#allocation12 + $0x2c8] ss:$16 sps:$4 sm:$0xff]  }
 0x5e9   :  { %v4757_v36 = vpack.c.bf16 %v4756_v3, %v4755_v48  ;;  %v8015_v48 = vld [vmem:[#allocation12 + $0x2cc] ss:$16 sps:$4 sm:$0xff]   ;;  %v8010_v3 = vld [vmem:[#allocation12 + $0x2c0] ss:$16 sps:$4 sm:$0xff]  }
 0x5eb   :  { %4759 = vrot.lane.b32.xlu1 %v4757_v36, %s8347_s4  ;;  %v8016_v36 = vld [vmem:[#allocation12 + $0x2e0] ss:$16 sps:$4 sm:$0xff]  }
 0x5ec   :  { %v9039_v27 = vpop.f32.mrb[72].mxu1  ;;  %v3499_v37 = vpop.permute.xlu0 %3498 }
 0x5ed   :  { %3502 = vst.msk [vmem:[#allocation5] sm:$0xff] %vm3501_vm3, %v3499_v37  ;;  %v7097_v1 = vpop.f32.mrb[73].mxu1  ;;  %v8019_v37 = vld [vmem:[#allocation12 + $0x2e8] ss:$16 sps:$4 sm:$0xff]  }
 0x5ee   :  { %v9042_v38 = vpop.f32.mrb[74].mxu1  ;;  %v8024_v1 = vld [vmem:[#allocation12 + $0x304] ss:$16 sps:$4 sm:$0xff]  }
 0x5ef   :  { %v7098_v34 = vpop.f32.mrb[75].mxu1  ;;  %4255 = vrot.lane.b32.xlu1 %v4253_v44, %s8347_s4 }
 0x5f0   :  { %v8027_v34 = vld [vmem:[#allocation12 + $0x30c] ss:$16 sps:$4 sm:$0xff]  }
 0x5f3   :  { %4003 = vrot.lane.b32.xlu1 %v4001_v31, %s8347_s4  ;;  %v7974_v31 = vld [vmem:[#allocation12 + $0x200] ss:$16 sps:$4 sm:$0xff]  }
 0x5f4   :  { %v5000_v20 = vpop.f32.mrb[76].mxu1  ;;  %v5267_v41 = vld [vmem:[#allocation5] sm:$0xff] }
 0x5f5   :  { %v7109_v39 = vpop.f32.mrb[77].mxu1  ;;  %v5007_v14 = vmul.f32 %v8185_v53, %v5000_v20  ;;  %v8022_v20 = vld [vmem:[#allocation12 + $0x300] ss:$16 sps:$4 sm:$0xff]   ;;  %v8033_v53 = vld [vmem:[#allocation12 + $0x32c] ss:$16 sps:$4 sm:$0xff]  }
 0x5f6   :  { %v5003_v25 = vpop.f32.mrb[78].mxu1  ;;  %v8030_v39 = vld [vmem:[#allocation12 + $0x324] ss:$16 sps:$4 sm:$0xff]  }
 0x5f7   :  { %v5008_v11 = vmul.f32 %v8183_v4, %v5003_v25  ;;  %v7110_v23 = vpop.f32.mrb[79].mxu1  ;;  %v8025_v4 = vld [vmem:[#allocation12 + $0x308] ss:$16 sps:$4 sm:$0xff]   ;;  %v8028_v25 = vld [vmem:[#allocation12 + $0x320] ss:$16 sps:$4 sm:$0xff]  }
 0x5f8   :  { %v8039_v23 = vld [vmem:[#allocation12 + $0x34c] ss:$16 sps:$4 sm:$0xff]  }
 0x5f9   :  { %v5009_v50 = vpack.c.bf16 %v5008_v11, %v5007_v14  ;;  %v8031_v14 = vld [vmem:[#allocation12 + $0x328] ss:$16 sps:$4 sm:$0xff]   ;;  %v8036_v11 = vld [vmem:[#allocation12 + $0x344] ss:$16 sps:$4 sm:$0xff]  }
 0x5fb   :  { %5011 = vrot.lane.b32.xlu1 %v5009_v50, %s8347_s4  ;;  %v8037_v50 = vld [vmem:[#allocation12 + $0x348] ss:$16 sps:$4 sm:$0xff]  }
 0x5fc   :  { %v9050_v16 = vpop.f32.mrb[80].mxu1  ;;  %v3752_v44 = vpop.permute.xlu1 %3751 }
 0x5fd   :  { %3754 = vst.msk [vmem:[#allocation5 + $0x8] sm:$0xff] %vm3501_vm3, %v3752_v44  ;;  %v7121_v63 = vpop.f32.mrb[81].mxu1  ;;  %v8042_v44 = vld [vmem:[#allocation12 + $0x364] ss:$16 sps:$4 sm:$0xff]  }
 0x5fe   :  { %v9053_v56 = vpop.f32.mrb[82].mxu1  ;;  %v8045_v63 = vld [vmem:[#allocation12 + $0x36c] ss:$16 sps:$4 sm:$0xff]  }
 0x5ff   :  { %v7122_v26 = vpop.f32.mrb[83].mxu1 }
 0x600   :  { %v8040_v26 = vld [vmem:[#allocation12 + $0x360] ss:$16 sps:$4 sm:$0xff]  }
 0x604   :  { %v5268_v13 = vld [vmem:[#allocation5 + $0x8] sm:$0xff] }
 0x605   :  { %6097 = vmatprep.mubr.bf16.mxu0 %v5268_v13  ;;  %6203 = vmatprep.mubr.bf16.mxu1 %v5268_v13  ;;  %v8051_v13 = vld [vmem:[#allocation12 + $0x38c] ss:$16 sps:$4 sm:$0xff]  }
 0x606   :  { %6098 = vmatmul.mubr.bf16.vlgmr.msra.gmra.mrb[88].mxu0 %v5267_v41  ;;  %6204 = vmatmul.mubr.bf16.vlgmr.msra.gmra.mrb[88].mxu1 %v5267_v41  ;;  %v8054_v41 = vld [vmem:[#allocation12 + $0x3a4] ss:$16 sps:$4 sm:$0xff]  }
 0x607   :  { %6119 = vmatpush1.bf16.msra.mxu0 %v7974_v31  ;;  %6225 = vmatpush1.bf16.msra.mxu1 %v7977_v17  ;;  %v8043_v31 = vld [vmem:[#allocation12 + $0x368] ss:$16 sps:$4 sm:$0xff]   ;;  %v8048_v17 = vld [vmem:[#allocation12 + $0x384] ss:$16 sps:$4 sm:$0xff]  }
 0x608   :  { %6120 = vmatprep.subr.bf16.mxu0 %v7982_v21  ;;  %6226 = vmatprep.subr.bf16.mxu1 %v7985_v55  ;;  %v8046_v21 = vld [vmem:[#allocation12 + $0x380] ss:$16 sps:$4 sm:$0xff]   ;;  %v8049_v55 = vld [vmem:[#allocation12 + $0x388] ss:$16 sps:$4 sm:$0xff]  }
 0x60b   :  { %6121 = vmatpush1.bf16.msra.mxu0 %v7980_v52  ;;  %6227 = vmatpush1.bf16.msra.mxu1 %v7983_v59  ;;  %v8057_v59 = vld [vmem:[#allocation12 + $0x3ac] ss:$16 sps:$4 sm:$0xff]  }
 0x60c   :  { %6122 = vmatprep.subr.bf16.mxu0 %v7988_v10  ;;  %6228 = vmatprep.subr.bf16.mxu1 %v7991_v60  ;;  %v8052_v10 = vld [vmem:[#allocation12 + $0x3a0] ss:$16 sps:$4 sm:$0xff]   ;;  %v8055_v60 = vld [vmem:[#allocation12 + $0x3a8] ss:$16 sps:$4 sm:$0xff]  }
 0x60f   :  { %6123 = vmatpush1.bf16.msra.mxu0 %v7986_v6  ;;  %6229 = vmatpush1.bf16.msra.mxu1 %v7989_v47  ;;  %v8060_v6 = vld [vmem:[#allocation12 + $0x3c4] ss:$16 sps:$4 sm:$0xff]   ;;  %v8063_v47 = vld [vmem:[#allocation12 + $0x3cc] ss:$16 sps:$4 sm:$0xff]  }
 0x610   :  { %v5252_v24 = vpop.f32.mrb[84].mxu1  ;;  %6124 = vmatprep.subr.bf16.mxu0 %v7994_v22  ;;  %6230 = vmatprep.subr.bf16.mxu1 %v7997_v19 }
 0x611   :  { %v7133_v57 = vpop.f32.mrb[85].mxu1  ;;  %v5259_v8 = vmul.f32 %v8187_v51, %v5252_v24  ;;  %v8066_v24 = vld [vmem:[#allocation12 + $0x3e4] ss:$16 sps:$4 sm:$0xff]   ;;  %v8064_v51 = vld [vmem:[#allocation12 + $0x3e0] ss:$16 sps:$4 sm:$0xff]  }
 0x612   :  { %v5255_v62 = vpop.f32.mrb[86].mxu1  ;;  %v8067_v57 = vld [vmem:[#allocation12 + $0x3e8] ss:$16 sps:$4 sm:$0xff]  }
 0x613   :  { %v5260_v61 = vmul.f32 %v8189_v58, %v5255_v62  ;;  %v7134_v54 = vpop.f32.mrb[87].mxu1  ;;  %6125 = vmatpush1.bf16.msra.mxu0 %v7992_v28  ;;  %6231 = vmatpush1.bf16.msra.mxu1 %v7995_v15  ;;  %v8058_v28 = vld [vmem:[#allocation12 + $0x3c0] ss:$16 sps:$4 sm:$0xff]   ;;  %v8061_v15 = vld [vmem:[#allocation12 + $0x3c8] ss:$16 sps:$4 sm:$0xff]  }
 0x614   :  { %6126 = vmatprep.subr.bf16.mxu0 %v8000_v12  ;;  %6232 = vmatprep.subr.bf16.mxu1 %v8003_v40  ;;  %v8069_v12 = vld [vmem:[#allocation12 + $0x3ec] ss:$16 sps:$4 sm:$0xff]  }
 0x615   :  { %v5261_v30 = vpack.c.bf16 %v5260_v61, %v5259_v8 }
 0x617   :  { %5263 = vrot.lane.b32.xlu0 %v5261_v30, %s8347_s4  ;;  %6127 = vmatpush1.bf16.msra.mxu0 %v7998_v29 }
 0x618   :  { %6233 = vmatpush1.bf16.msra.mxu1 %v8001_v5  ;;  %6128 = vmatprep.subr.bf16.mxu0 %v8006_v33 }
 0x619   :  { %6234 = vmatprep.subr.bf16.mxu1 %v8009_v0 }
 0x61b   :  { %6129 = vmatpush1.bf16.msra.mxu0 %v8004_v32 }
 0x61c   :  { %6235 = vmatpush1.bf16.msra.mxu1 %v8007_v9  ;;  %6130 = vmatprep.subr.bf16.mxu0 %v8012_v2 }
 0x61d   :  { %6236 = vmatprep.subr.bf16.mxu1 %v8015_v48 }
 0x61f   :  { %6131 = vmatpush1.bf16.msra.mxu0 %v8010_v3 }
 0x620   :  { %6237 = vmatpush1.bf16.msra.mxu1 %v8013_v18  ;;  %6132 = vmatprep.subr.bf16.mxu0 %v8018_v35 }
 0x621   :  { %6238 = vmatprep.subr.bf16.mxu1 %v8021_v46 }
 0x623   :  { %6133 = vmatpush1.bf16.msra.mxu0 %v8016_v36  ;;  %v5403_v36 = vld [vmem:[#allocation14] sm:$0xf] }
 0x624   :  { %6239 = vmatpush1.bf16.msra.mxu1 %v8019_v37  ;;  %6134 = vmatprep.subr.bf16.mxu0 %v8024_v1  ;;  %v5408_v37 = vrot.slane %v5403_v36, %v8495_v45  ;;  %v5416_v1 = vrot.slane %v5403_v36, %v8491_v42 }
 0x625   :  { %6240 = vmatprep.subr.bf16.mxu1 %v8027_v34  ;;  %v5412_v34 = vrot.slane %v5403_v36, %v8497_v49 }
 0x626   :  { %v5082_v52 = vpop.xlane.xlu0 %5081 }
 0x627   :  { %6135 = vmatpush1.bf16.msra.mxu0 %v8022_v20  ;;  %8190 = vrcp.f32 %v5082_v52  ;;  %v5420_v20 = vrot.slane %v5403_v36, %v8493_v43 }
 0x628   :  { %6241 = vmatpush1.bf16.msra.mxu1 %v8025_v4  ;;  %6136 = vmatprep.subr.bf16.mxu0 %v8030_v39 }
 0x629   :  { %6242 = vmatprep.subr.bf16.mxu1 %v8033_v53 }
 0x62a   :  { %v4830_v22 = vpop.xlane.xlu0 %4829 }
 0x62b   :  { %6137 = vmatpush1.bf16.msra.mxu0 %v8028_v25 }
 0x62c   :  { %6243 = vmatpush1.bf16.msra.mxu1 %v8031_v14  ;;  %6138 = vmatprep.subr.bf16.mxu0 %v8036_v11 }
 0x62d   :  { %6244 = vmatprep.subr.bf16.mxu1 %v8039_v23 }
 0x62f   :  { %6139 = vmatpush1.bf16.msra.mxu0 %v8034_v7 }
 0x630   :  { %6245 = vmatpush1.bf16.msra.mxu1 %v8037_v50  ;;  %6140 = vmatprep.subr.bf16.mxu0 %v8042_v44 }
 0x631   :  { %6246 = vmatprep.subr.bf16.mxu1 %v8045_v63  ;;  %v8191_v58 = vpop.eup %8190 }
 0x632   :  { %v5131_v61 = vmul.f32 %v8191_v58, %v9053_v56 }
 0x633   :  { %6141 = vmatpush1.bf16.msra.mxu0 %v8040_v26 }
 0x634   :  { %6247 = vmatpush1.bf16.msra.mxu1 %v8043_v31  ;;  %6142 = vmatprep.subr.bf16.mxu0 %v8048_v17 }
 0x635   :  { %6248 = vmatprep.subr.bf16.mxu1 %v8051_v13 }
 0x637   :  { %6143 = vmatpush1.bf16.msra.mxu0 %v8046_v21 }
 0x638   :  { %6249 = vmatpush1.bf16.msra.mxu1 %v8049_v55  ;;  %6144 = vmatprep.subr.bf16.mxu0 %v8054_v41 }
 0x639   :  { %6250 = vmatprep.subr.bf16.mxu1 %v8057_v59 }
 0x63b   :  { %v5079_v19 = vpop.xlane.xlu1 %5078  ;;  %6145 = vmatpush1.bf16.msra.mxu0 %v8052_v10 }
 0x63c   :  { %8192 = vrcp.f32 %v5079_v19  ;;  %6251 = vmatpush1.bf16.msra.mxu1 %v8055_v60  ;;  %6146 = vmatprep.subr.bf16.mxu0 %v8060_v6 }
 0x63d   :  { %6252 = vmatprep.subr.bf16.mxu1 %v8063_v47  ;;  %8194 = vrcp.f32 %v4830_v22 }
 0x63f   :  { %v4827_v40 = vpop.xlane.xlu1 %4826  ;;  %6147 = vmatpush1.bf16.msra.mxu0 %v8058_v28 }
 0x640   :  { %8196 = vrcp.f32 %v4827_v40  ;;  %6253 = vmatpush1.bf16.msra.mxu1 %v8061_v15  ;;  %6148 = vmatprep.subr.bf16.mxu0 %v8066_v24 }
 0x641   :  { %6254 = vmatprep.subr.bf16.mxu1 %v8069_v12 }
 0x643   :  { %6149 = vmatpush1.bf16.msra.mxu0 %v8064_v51 }
 0x644   :  { %6255 = vmatpush1.bf16.msra.mxu1 %v8067_v57 }
 0x645   :  { %v4508_v62 = vpop.permute.xlu0 %4507 }
 0x646   :  { %v8193_v8 = vpop.eup %8192  ;;  %4510 = vst.msk [vmem:[#allocation5 + $0x20] sm:$0xff] %vm3501_vm3, %v4508_v62 }
 0x647   :  { %v5130_v54 = vmul.f32 %v8193_v8, %v9050_v16  ;;  %v8195_v29 = vpop.eup %8194 }
 0x648   :  { %v4879_v30 = vmul.f32 %v8195_v29, %v9042_v38 }
 0x649   :  { %v5132_v5 = vpack.c.bf16 %v5131_v61, %v5130_v54 }
 0x64a   :  { %v8197_v33 = vpop.eup %8196 }
 0x64b   :  { %v4878_v0 = vmul.f32 %v8197_v33, %v9039_v27  ;;  %5133 = vst.msk [vmem:[#allocation5 + $0x38] sm:$0xff] %vm3251_vm0, %v5132_v5 }
 0x64d   :  { %v4880_v32 = vpack.c.bf16 %v4879_v30, %v4878_v0  ;;  %v5271_v38 = vld [vmem:[#allocation5 + $0x20] sm:$0xff] }
 0x64f   :  { %4881 = vst.msk [vmem:[#allocation5 + $0x30] sm:$0xff] %vm3251_vm0, %v4880_v32 }
 0x65d   :  { %v4760_v9 = vpop.permute.xlu1 %4759 }
 0x65e   :  { %4762 = vst.msk [vmem:[#allocation5 + $0x28] sm:$0xff] %vm3501_vm3, %v4760_v9 }
 0x661   :  { %v4256_v2 = vpop.permute.xlu1 %4255 }
 0x662   :  { %4258 = vst.msk [vmem:[#allocation5 + $0x18] sm:$0xff] %vm3501_vm3, %v4256_v2 }
 0x665   :  { %v4004_v56 = vpop.permute.xlu1 %4003  ;;  %v5272_v16 = vld [vmem:[#allocation5 + $0x28] sm:$0xff] }
 0x666   :  { %4006 = vst.msk [vmem:[#allocation5 + $0x10] sm:$0xff] %vm3501_vm3, %v4004_v56  ;;  %6107 = vmatprep.mubr.bf16.mxu0 %v5272_v16  ;;  %6213 = vmatprep.mubr.bf16.mxu1 %v5272_v16 }
 0x667   :  { %6108 = vmatmul.mubr.bf16.gmra.mrb[92].mxu0 %v5271_v38  ;;  %6214 = vmatmul.mubr.bf16.gmra.mrb[92].mxu1 %v5271_v38 }
 0x669   :  { %v5270_v27 = vld [vmem:[#allocation5 + $0x18] sm:$0xff] }
 0x66a   :  { %6150 = vmatprep.mubr.bf16.mxu0 %v5270_v27  ;;  %6256 = vmatprep.mubr.bf16.mxu1 %v5270_v27 }
 0x66d   :  { %v5012_v48 = vpop.permute.xlu1 %5011  ;;  %v5269_v3 = vld [vmem:[#allocation5 + $0x10] sm:$0xff] }
 0x66e   :  { %5014 = vst.msk [vmem:[#allocation5 + $0x30] sm:$0xff] %vm3501_vm3, %v5012_v48 }
 0x66f   :  { %6151 = vmatmul.mubr.bf16.vlgmr.msra.gmra.mrb[88].mxu0 %v5269_v3  ;;  %6257 = vmatmul.mubr.bf16.vlgmr.msra.gmra.mrb[88].mxu1 %v5269_v3 }
 0x675   :  { %v5273_v46 = vld [vmem:[#allocation5 + $0x30] sm:$0xff] }
 0x689   :  { %v5264_v18 = vpop.permute.xlu0 %5263 }
 0x68a   :  { %5266 = vst.msk [vmem:[#allocation5 + $0x38] sm:$0xff] %vm3501_vm3, %v5264_v18 }
 0x691   :  { %v5274_v35 = vld [vmem:[#allocation5 + $0x38] sm:$0xff] }
 0x692   :  { %6160 = vmatprep.mubr.bf16.mxu0 %v5274_v35  ;;  %6266 = vmatprep.mubr.bf16.mxu1 %v5274_v35 }
 0x693   :  { %6161 = vmatmul.mubr.bf16.gmra.mrb[92].mxu0 %v5273_v46  ;;  %6267 = vmatmul.mubr.bf16.gmra.mrb[92].mxu1 %v5273_v46 }
 0x742   :  { %v6152_v4 = vpop.f32.mrb[88].mxu0  ;;  %v6258_v39 = vpop.f32.mrb[88].mxu1 }
 0x743   :  { %v7183_v53 = vadd.f32 %v6152_v4, %v5408_v37  ;;  %v7191_v25 = vadd.f32 %v6258_v39, %v5416_v1  ;;  %v6154_v14 = vpop.f32.mrb[89].mxu0  ;;  %v6260_v11 = vpop.f32.mrb[89].mxu1 }
 0x744   :  { %v7184_v23 = vadd.f32 %v6154_v14, %v5412_v34  ;;  %v7192_v7 = vadd.f32 %v6260_v11, %v5420_v20  ;;  %v6156_v50 = vpop.f32.mrb[90].mxu0  ;;  %v6262_v44 = vpop.f32.mrb[90].mxu1 }
 0x745   :  { %6277 = vst [vmem:[#allocation15] sm:$0xff] %v7183_v53  ;;  %6279 = vst [vmem:[#allocation15 + $0x10] sm:$0xff] %v7191_v25  ;;  %v7185_v63 = vadd.f32 %v6156_v50, %v5408_v37  ;;  %v7193_v45 = vadd.f32 %v6262_v44, %v5416_v1  ;;  %v6158_v26 = vpop.f32.mrb[91].mxu0  ;;  %v6264_v42 = vpop.f32.mrb[91].mxu1 }
 0x746   :  { %6278 = vst [vmem:[#allocation15 + $0x8] sm:$0xff] %v7184_v23  ;;  %6280 = vst [vmem:[#allocation15 + $0x18] sm:$0xff] %v7192_v7  ;;  %v7186_v49 = vadd.f32 %v6158_v26, %v5412_v34  ;;  %v7194_v43 = vadd.f32 %v6264_v42, %v5420_v20 }
 0x747   :  { %6281 = vst [vmem:[#allocation15 + $0x20] sm:$0xff] %v7185_v63  ;;  %6283 = vst [vmem:[#allocation15 + $0x30] sm:$0xff] %v7193_v45 }
 0x748   :  { %6282 = vst [vmem:[#allocation15 + $0x28] sm:$0xff] %v7186_v49  ;;  %6284 = vst [vmem:[#allocation15 + $0x38] sm:$0xff] %v7194_v43 }
 0x766   :  { %v6162_v31 = vpop.f32.mrb[92].mxu0  ;;  %v6268_v17 = vpop.f32.mrb[92].mxu1 }
 0x767   :  { %v7187_v13 = vadd.f32 %v6162_v31, %v5408_v37  ;;  %v7195_v21 = vadd.f32 %v6268_v17, %v5416_v1  ;;  %v6164_v55 = vpop.f32.mrb[93].mxu0  ;;  %v6270_v41 = vpop.f32.mrb[93].mxu1 }
 0x768   :  { %v7188_v52 = vadd.f32 %v6164_v55, %v5412_v34  ;;  %v7196_v59 = vadd.f32 %v6270_v41, %v5420_v20  ;;  %v6166_v10 = vpop.f32.mrb[94].mxu0  ;;  %v6272_v60 = vpop.f32.mrb[94].mxu1 }
 0x769   :  { %6285 = vst [vmem:[#allocation15 + $0x40] sm:$0xff] %v7187_v13  ;;  %6287 = vst [vmem:[#allocation15 + $0x50] sm:$0xff] %v7195_v21  ;;  %v7189_v6 = vadd.f32 %v6166_v10, %v5408_v37  ;;  %v7197_v47 = vadd.f32 %v6272_v60, %v5416_v1  ;;  %v6168_v22 = vpop.f32.mrb[95].mxu0  ;;  %v6274_v19 = vpop.f32.mrb[95].mxu1 }
 0x76a   :  { %6286 = vst [vmem:[#allocation15 + $0x48] sm:$0xff] %v7188_v52  ;;  %6288 = vst [vmem:[#allocation15 + $0x58] sm:$0xff] %v7196_v59  ;;  %v7190_v28 = vadd.f32 %v6168_v22, %v5412_v34  ;;  %v7198_v15 = vadd.f32 %v6274_v19, %v5420_v20 }
 0x76b   :  { %6289 = vst [vmem:[#allocation15 + $0x60] sm:$0xff] %v7189_v6  ;;  %6291 = vst [vmem:[#allocation15 + $0x70] sm:$0xff] %v7197_v47 }
 0x76c   :  { %6290 = vst [vmem:[#allocation15 + $0x68] sm:$0xff] %v7190_v28  ;;  %6292 = vst [vmem:[#allocation15 + $0x78] sm:$0xff] %v7198_v15 }
 0x76d   :  { %8319 = shalt.err (!%p8316_p2)
}
 0x76e   :  { %s8320_s6 = scalar_lea.hbm %s9089_s5, 2048 }
 0x76f   :  { %p8321_p3 = scmp.ne.s32.totalorder %s9089_s5, %s8320_s6  ;;  %p8324_p4 = scmp.lt.u32.totalorder %s8320_s6, %s9089_s5 }
 0x771   :  { %p8326_p5 = pnand %p8324_p4, %p8321_p3 }
 0x773   :  { %8329 = shalt.err (!%p8326_p5)
}
 0x774   :  { %s8351_s12 = smov 512   ;;  %s8352_s13 = smov 32  }
 0x775   :  { %6309 = dma.vmem_to_hbm [thread:$0]  %s6304_s28, 2048, %s9089_s5, [#allocation8], %s8351_s12, %s8351_s12, %s8352_s13  }
 0x776   :  { %8336 = dma.done.wait [#allocation8], 2048  }
 0x777   :  { %8337 = vsyncadd [#allocation8], 4294965248 }
 0x778   :  { %6313 = vsyncpa [#allocation7], 1 }
 0x779   :  { %6314 = vsyncpa [#allocation10], 1 }
 0x77a   :  { %6315 = vsyncpa [#allocation13], 1 }
 0x77b   :  { %6316 = vsyncpa [#allocation8], 1 }

</bundles_post_ra>
